<compile_context>
chip_gen: v5e
topology: v5e:2x2
jax: 0.10.0
libtpu: 0.0.40
codegen_flags: <defaults>
</compile_context>

<pallas_src>
import jax
import jax.numpy as jnp
from jax.experimental import pallas as pl
from jax.experimental.pallas import tpu as pltpu

LANE = 128
K_PACK_TARGET = 256   # MXU contraction depth to fill when packing taps
                      # (fills v6e/v7x 256-deep MXU; v5e would prefer 128, the
                      # toy shape packs all 9 taps either way).
M_CHUNK_MAX = 128     # rows of the flattened image accumulated in registers


def _round_up(x, m):
    return ((x + m - 1) // m) * m


def _vmem_cap_bytes():
    try:
        return int(getattr(pltpu.get_tpu_info(), "vmem_capacity_bytes", 64 << 20))
    except Exception:
        return 64 << 20


_VMEM_CAP = _vmem_cap_bytes()


def _pack_geometry(c):
    """Channel storage width, taps packed per matmul, number of tap groups."""
    cs = _round_up(c, 8)
    g = max(1, min(9, K_PACK_TARGET // cs))
    n_groups = -(-9 // g)
    return cs, g, n_groups


def _fold_bn(gamma, beta, mean, var, width, eps=1e-5):
    scale = gamma / jnp.sqrt(var + eps)
    bias = beta - mean * scale
    pad = width - gamma.shape[0]
    scale = jnp.pad(scale, (0, pad)).reshape(1, width).astype(jnp.float32)
    bias = jnp.pad(bias, (0, pad)).reshape(1, width).astype(jnp.float32)
    return scale, bias


def _prep_weight(w_oihw, cs, g, n_groups):
    """OIHW conv weight -> (n_groups, g*cs, cs) bf16 with taps packed along K."""
    cout, cin, kh, kw = w_oihw.shape
    w = jnp.transpose(w_oihw, (2, 3, 1, 0)).reshape(kh * kw, cin, cout)  # (9,C,P)
    w = jnp.pad(w, ((0, n_groups * g - kh * kw), (0, cs - cin), (0, cs - cout)))
    return w.reshape(n_groups, g * cs, cs).astype(jnp.bfloat16)


def prepare_block_params(params, eps=1e-5):
    """One-time (model-load) prep: BN folding + tap-packed bf16 conv weights."""
    p_out, c_in, _, _ = params["w1"].shape
    assert c_in == p_out, "fused residual path requires inplanes == planes"
    cs, g, n_groups = _pack_geometry(c_in)
    w1 = _prep_weight(params["w1"], cs, g, n_groups)
    w2 = _prep_weight(params["w2"], cs, g, n_groups)
    s1, b1 = _fold_bn(params["g1"], params["b1"], params["m1"], params["v1"], cs, eps)
    s2, b2 = _fold_bn(params["g2"], params["b2"], params["m2"], params["v2"], cs, eps)
    return {"w1": w1, "w2": w2, "s1": s1, "b1": b1, "s2": s2, "b2": b2}


@jax.jit
def basic_block_forward(x_nchw, prep):
    """x_nchw: (N, C, H, W) float32 (PyTorch layout). Returns (N, C, H, W) f32."""
    N, C, H, W = x_nchw.shape
    Cs, G, n_groups = _pack_geometry(C)
    Kg = G * Cs
    assert prep["w1"].shape == (n_groups, Kg, Cs), "params prepared for other shape"

    Hp = H + 2                              # spatial zero-pad of 1 on each side
    Wrow = _round_up(W + 2, 8)              # aligned row stride (extra cols = 0)
    HpWp = Hp * Wrow
    M_CHUNK = min(M_CHUNK_MAX, _round_up(HpWp, 8))
    n_chunks = -(-HpWp // M_CHUNK)
    L_compute = n_chunks * M_CHUNK
    halo = _round_up(Wrow + 1, 8)           # covers the largest tap shift
    Ltot = L_compute + 2 * halo

    # Flattened-image offsets of the 9 conv taps; padded slots have zero weight.
    taps = [(dh - 1) * Wrow + (dw - 1) for dh in range(3) for dw in range(3)]
    taps += [0] * (n_groups * G - 9)

    # ---- glue: NCHW -> NHWC, spatial + channel zero-pad, flatten, halo pad.
    x_nhwc = jnp.transpose(x_nchw, (0, 2, 3, 1)).astype(jnp.float32)
    x_pad = jnp.pad(x_nhwc, ((0, 0), (1, 1), (1, Wrow - W - 1), (0, Cs - C)))
    x_flat = x_pad.reshape(N, HpWp, Cs)
    x_flat = jnp.pad(x_flat, ((0, 0), (halo, halo + L_compute - HpWp), (0, 0)))

    # Lane-dense interior mask (1 inside the HxW image, 0 on the pad border);
    # multiplied into conv1's output so conv2 sees true zero padding.
    pos = jnp.arange(L_compute)
    interior = ((pos // Wrow >= 1) & (pos // Wrow <= H) &
                (pos % Wrow >= 1) & (pos % Wrow <= W))
    mask = jnp.broadcast_to(interior[:, None], (L_compute, Cs)).astype(jnp.float32)

    def kernel(xf_ref, w1_ref, s1_ref, b1_ref, w2_ref, s2_ref, b2_ref,
               mask_ref, out_ref, mid_ref):
        # Zero the scratch halo unconditionally: with "parallel" batch sharding
        # (v7x megacore) a program_id==0 gate would leave one core's scratch
        # uninitialized.  Cost is 2*halo tiny rows of stores per step.
        zero_halo = jnp.zeros((halo, Cs), mid_ref.dtype)
        mid_ref[pl.ds(0, halo), :] = zero_halo
        mid_ref[pl.ds(halo + L_compute, halo), :] = zero_halo

        s1 = s1_ref[...]
        b1 = b1_ref[...]
        s2 = s2_ref[...]
        b2 = b2_ref[...]

        def conv_chunk(load, w_ref, m0):
            """3x3 conv on one M_CHUNK of flattened rows: taps packed along the
            MXU K dim, f32 accumulation kept in registers (no scratch RMW)."""
            acc = None
            for gi in range(n_groups):
                lhs = None
                for t in range(G):
                    part = load(halo + m0 + taps[gi * G + t])   # (M_CHUNK, Cs)
                    lhs = part if lhs is None else jnp.concatenate(
                        [lhs, part], axis=-1)
                z = jnp.dot(lhs.astype(jnp.bfloat16), w_ref[gi],
                            preferred_element_type=jnp.float32)
                acc = z if acc is None else acc + z
            return acc

        # ---- pass 1: conv1 -> BN1 -> ReLU -> mask pad border -> mid (f32).
        for c in range(n_chunks):
            m0 = c * M_CHUNK
            acc = conv_chunk(lambda s: xf_ref[0, pl.ds(s, M_CHUNK), :],
                             w1_ref, m0)
            mid = jnp.maximum(acc * s1 + b1, 0.0) * mask_ref[pl.ds(m0, M_CHUNK), :]
            mid_ref[pl.ds(halo + m0, M_CHUNK), :] = mid

        # ---- pass 2: conv2 -> BN2 -> + identity (f32) -> ReLU -> out (bf16).
        for c in range(n_chunks):
            m0 = c * M_CHUNK
            acc = conv_chunk(lambda s: mid_ref[pl.ds(s, M_CHUNK), :],
                             w2_ref, m0)
            identity = xf_ref[0, pl.ds(halo + m0, M_CHUNK), :]
            res = jnp.maximum(acc * s2 + b2 + identity, 0.0)
            out_ref[0, pl.ds(m0, M_CHUNK), :] = res.astype(out_ref.dtype)

    # Generation-aware VMEM budget (VMEM tiles pad the minor dim to 128 lanes).
    lanes = max(Cs, LANE)
    est = (2 * Ltot * lanes * 4                      # x (f32, double-buffered)
           + 2 * L_compute * lanes * 4               # mask (f32, double-buffered)
           + 2 * L_compute * lanes * 2               # out (bf16, double-buffered)
           + Ltot * lanes * 4                        # mid scratch (f32)
           + 4 * n_groups * _round_up(Kg, 8) * lanes * 2   # packed weights
           + (8 << 20))                              # headroom / temporaries
    vmem_limit = int(max(16 << 20, min(est, _VMEM_CAP - (8 << 20))))

    out_flat = pl.pallas_call(
        kernel,
        out_shape=jax.ShapeDtypeStruct((N, L_compute, Cs), jnp.bfloat16),
        grid_spec=pltpu.PrefetchScalarGridSpec(
            num_scalar_prefetch=0,
            grid=(N,),
            in_specs=[
                pl.BlockSpec((1, Ltot, Cs), lambda n: (n, 0, 0)),
                pl.BlockSpec((n_groups, Kg, Cs), lambda n: (0, 0, 0)),
                pl.BlockSpec((1, Cs), lambda n: (0, 0)),
                pl.BlockSpec((1, Cs), lambda n: (0, 0)),
                pl.BlockSpec((n_groups, Kg, Cs), lambda n: (0, 0, 0)),
                pl.BlockSpec((1, Cs), lambda n: (0, 0)),
                pl.BlockSpec((1, Cs), lambda n: (0, 0)),
                pl.BlockSpec((L_compute, Cs), lambda n: (0, 0)),
            ],
            out_specs=pl.BlockSpec((1, L_compute, Cs), lambda n: (n, 0, 0)),
            scratch_shapes=[pltpu.VMEM((Ltot, Cs), jnp.float32)],  # padded mid
        ),
        compiler_params=pltpu.CompilerParams(
            dimension_semantics=("parallel",),
            vmem_limit_bytes=vmem_limit,
        ),
    )(x_flat, prep["w1"], prep["s1"], prep["b1"],
      prep["w2"], prep["s2"], prep["b2"], mask)

    out = out_flat[:, :HpWp, :].reshape(N, Hp, Wrow, Cs)
    out = out[:, 1:H + 1, 1:W + 1, :C]
    return jnp.transpose(out, (0, 3, 1, 2)).astype(jnp.float32)


def basic_block_reference(x, p, eps=1e-5):
    """Pure-JAX f32 reference (matches PyTorch BasicBlock in eval mode)."""
    def conv(x, w):
        return jax.lax.conv_general_dilated(
            x, w, window_strides=(1, 1), padding="SAME",
            dimension_numbers=("NCHW", "OIHW", "NCHW"))

    def bn(x, g, b, m, v):
        g, b, m, v = (a[None, :, None, None] for a in (g, b, m, v))
        return (x - m) / jnp.sqrt(v + eps) * g + b

    out = jax.nn.relu(bn(conv(x, p["w1"]), p["g1"], p["b1"], p["m1"], p["v1"]))
    out = bn(conv(out, p["w2"]), p["g2"], p["b2"], p["m2"], p["v2"])
    return jax.nn.relu(out + x)


if __name__ == "__main__":
    N, C, H, W = 2, 4, 16, 16      # inplanes = planes = 4, stride = 1
    P = C

    key = jax.random.PRNGKey(0)
    keys = jax.random.split(key, 12)

    x = jax.random.normal(keys[0], (N, C, H, W), jnp.float32)

    params = {
        # conv weights in PyTorch OIHW layout (kernel 3x3, bias=False)
        "w1": 0.1 * jax.random.normal(keys[1], (P, C, 3, 3), jnp.float32),
        "w2": 0.1 * jax.random.normal(keys[2], (P, P, 3, 3), jnp.float32),
        # BatchNorm2d params + running stats (eval mode)
        "g1": 1.0 + 0.1 * jax.random.normal(keys[3], (P,), jnp.float32),
        "b1": 0.1 * jax.random.normal(keys[4], (P,), jnp.float32),
        "m1": 0.1 * jax.random.normal(keys[5], (P,), jnp.float32),
        "v1": 1.0 + 0.2 * jnp.abs(jax.random.normal(keys[6], (P,), jnp.float32)),
        "g2": 1.0 + 0.1 * jax.random.normal(keys[7], (P,), jnp.float32),
        "b2": 0.1 * jax.random.normal(keys[8], (P,), jnp.float32),
        "m2": 0.1 * jax.random.normal(keys[9], (P,), jnp.float32),
        "v2": 1.0 + 0.2 * jnp.abs(jax.random.normal(keys[10], (P,), jnp.float32)),
    }

    # One-time, model-load-time prep (BN folding + tap-packed bf16 weights),
    # hoisted out of the per-forward jit.
    prep = prepare_block_params(params)

    out = jax.block_until_ready(basic_block_forward(x, prep))
    ref = jax.block_until_ready(basic_block_reference(x, params))

    assert out.shape == (N, C, H, W)
    # bf16 matmul operands + bf16 output with f32 accumulation.
    assert jnp.allclose(out, ref, atol=5e-2, rtol=5e-2), "mismatch vs reference"

    print("KERNEL_OK")
</pallas_src>

<mosaic_0001>
module attributes {stable_mosaic.version = 11 : i64} {
  func.func @kernel(%arg0: i32, %arg1: memref<1x576x8xf32, #tpu.memory_space<vmem>>, %arg2: memref<1x72x8xbf16, #tpu.memory_space<vmem>>, %arg3: memref<1x8xf32, #tpu.memory_space<vmem>>, %arg4: memref<1x8xf32, #tpu.memory_space<vmem>>, %arg5: memref<1x72x8xbf16, #tpu.memory_space<vmem>>, %arg6: memref<1x8xf32, #tpu.memory_space<vmem>>, %arg7: memref<1x8xf32, #tpu.memory_space<vmem>>, %arg8: memref<512x8xf32, #tpu.memory_space<vmem>>, %arg9: memref<1x512x8xbf16, #tpu.memory_space<vmem>>, %arg10: memref<576x8xf32, #tpu.memory_space<vmem>>) attributes {dimension_semantics = [#tpu.dimension_semantics<parallel>], iteration_bounds = array<i64: 2>, scalar_prefetch = 0 : i64, scratch_operands = 1 : i64, tpu.core_type = #tpu.core_type<tc>, window_params = [{transform_indices = @transform_0, window_bounds = array<i64: 1, 576, 8>}, {pipeline_mode = #tpu.pipeline_mode<synchronous>, transform_indices = @transform_1, window_bounds = array<i64: 1, 72, 8>}, {pipeline_mode = #tpu.pipeline_mode<synchronous>, transform_indices = @transform_2, window_bounds = array<i64: 1, 8>}, {pipeline_mode = #tpu.pipeline_mode<synchronous>, transform_indices = @transform_3, window_bounds = array<i64: 1, 8>}, {pipeline_mode = #tpu.pipeline_mode<synchronous>, transform_indices = @transform_4, window_bounds = array<i64: 1, 72, 8>}, {pipeline_mode = #tpu.pipeline_mode<synchronous>, transform_indices = @transform_5, window_bounds = array<i64: 1, 8>}, {pipeline_mode = #tpu.pipeline_mode<synchronous>, transform_indices = @transform_6, window_bounds = array<i64: 1, 8>}, {pipeline_mode = #tpu.pipeline_mode<synchronous>, transform_indices = @transform_7, window_bounds = array<i64: 512, 8>}, {transform_indices = @transform_8, window_bounds = array<i64: 1, 512, 8>}]} {
    %cst = arith.constant 0.000000e+00 : f32
    %0 = vector.broadcast %cst : f32 to vector<32x8xf32>
    %c0 = arith.constant 0 : index
    %c0_0 = arith.constant 0 : index
    %1 = vector.load %arg10[%c0, %c0_0] : memref<576x8xf32, #tpu.memory_space<vmem>>, vector<32x8xf32>
    tpu.vector_store %arg10[%c0, %c0_0], %0 {strides = array<i32>} : memref<576x8xf32, #tpu.memory_space<vmem>>, vector<32x8xf32>,
    %c544 = arith.constant 544 : index
    %c0_1 = arith.constant 0 : index
    %2 = vector.load %arg10[%c544, %c0_1] : memref<576x8xf32, #tpu.memory_space<vmem>>, vector<32x8xf32>
    tpu.vector_store %arg10[%c544, %c0_1], %0 {strides = array<i32>} : memref<576x8xf32, #tpu.memory_space<vmem>>, vector<32x8xf32>,
    %c0_2 = arith.constant 0 : index
    %c0_3 = arith.constant 0 : index
    %3 = vector.load %arg3[%c0_2, %c0_3] : memref<1x8xf32, #tpu.memory_space<vmem>>, vector<1x8xf32>
    %c0_4 = arith.constant 0 : index
    %c0_5 = arith.constant 0 : index
    %4 = vector.load %arg4[%c0_4, %c0_5] : memref<1x8xf32, #tpu.memory_space<vmem>>, vector<1x8xf32>
    %c0_6 = arith.constant 0 : index
    %c0_7 = arith.constant 0 : index
    %5 = vector.load %arg6[%c0_6, %c0_7] : memref<1x8xf32, #tpu.memory_space<vmem>>, vector<1x8xf32>
    %c0_8 = arith.constant 0 : index
    %c0_9 = arith.constant 0 : index
    %6 = vector.load %arg7[%c0_8, %c0_9] : memref<1x8xf32, #tpu.memory_space<vmem>>, vector<1x8xf32>
    %c0_10 = arith.constant 0 : index
    %c7 = arith.constant 7 : index
    %c0_11 = arith.constant 0 : index
    %7 = vector.load %arg1[%c0_10, %c7, %c0_11] : memref<1x576x8xf32, #tpu.memory_space<vmem>>, vector<1x128x8xf32>
    %8 = vector.shape_cast %7 : vector<1x128x8xf32> to vector<128x8xf32>
    %c0_12 = arith.constant 0 : index
    %c8 = arith.constant 8 : index
    %c0_13 = arith.constant 0 : index
    %9 = vector.load %arg1[%c0_12, %c8, %c0_13] : memref<1x576x8xf32, #tpu.memory_space<vmem>>, vector<1x128x8xf32>
    %10 = vector.shape_cast %9 : vector<1x128x8xf32> to vector<128x8xf32>
    %11 = tpu.concatenate %8, %10 in 1 : vector<128x8xf32>, vector<128x8xf32> -> vector<128x16xf32>
    %c0_14 = arith.constant 0 : index
    %c9 = arith.constant 9 : index
    %c0_15 = arith.constant 0 : index
    %12 = vector.load %arg1[%c0_14, %c9, %c0_15] : memref<1x576x8xf32, #tpu.memory_space<vmem>>, vector<1x128x8xf32>
    %13 = vector.shape_cast %12 : vector<1x128x8xf32> to vector<128x8xf32>
    %14 = tpu.concatenate %11, %13 in 1 : vector<128x16xf32>, vector<128x8xf32> -> vector<128x24xf32>
    %c0_16 = arith.constant 0 : index
    %c31 = arith.constant 31 : index
    %c0_17 = arith.constant 0 : index
    %15 = vector.load %arg1[%c0_16, %c31, %c0_17] : memref<1x576x8xf32, #tpu.memory_space<vmem>>, vector<1x128x8xf32>
    %16 = vector.shape_cast %15 : vector<1x128x8xf32> to vector<128x8xf32>
    %17 = tpu.concatenate %14, %16 in 1 : vector<128x24xf32>, vector<128x8xf32> -> vector<128x32xf32>
    %c0_18 = arith.constant 0 : index
    %c32 = arith.constant 32 : index
    %c0_19 = arith.constant 0 : index
    %18 = vector.load %arg1[%c0_18, %c32, %c0_19] : memref<1x576x8xf32, #tpu.memory_space<vmem>>, vector<1x128x8xf32>
    %19 = vector.shape_cast %18 : vector<1x128x8xf32> to vector<128x8xf32>
    %20 = tpu.concatenate %17, %19 in 1 : vector<128x32xf32>, vector<128x8xf32> -> vector<128x40xf32>
    %c0_20 = arith.constant 0 : index
    %c33 = arith.constant 33 : index
    %c0_21 = arith.constant 0 : index
    %21 = vector.load %arg1[%c0_20, %c33, %c0_21] : memref<1x576x8xf32, #tpu.memory_space<vmem>>, vector<1x128x8xf32>
    %22 = vector.shape_cast %21 : vector<1x128x8xf32> to vector<128x8xf32>
    %23 = tpu.concatenate %20, %22 in 1 : vector<128x40xf32>, vector<128x8xf32> -> vector<128x48xf32>
    %c0_22 = arith.constant 0 : index
    %c55 = arith.constant 55 : index
    %c0_23 = arith.constant 0 : index
    %24 = vector.load %arg1[%c0_22, %c55, %c0_23] : memref<1x576x8xf32, #tpu.memory_space<vmem>>, vector<1x128x8xf32>
    %25 = vector.shape_cast %24 : vector<1x128x8xf32> to vector<128x8xf32>
    %26 = tpu.concatenate %23, %25 in 1 : vector<128x48xf32>, vector<128x8xf32> -> vector<128x56xf32>
    %c0_24 = arith.constant 0 : index
    %c56 = arith.constant 56 : index
    %c0_25 = arith.constant 0 : index
    %27 = vector.load %arg1[%c0_24, %c56, %c0_25] : memref<1x576x8xf32, #tpu.memory_space<vmem>>, vector<1x128x8xf32>
    %28 = vector.shape_cast %27 : vector<1x128x8xf32> to vector<128x8xf32>
    %29 = tpu.concatenate %26, %28 in 1 : vector<128x56xf32>, vector<128x8xf32> -> vector<128x64xf32>
    %c0_26 = arith.constant 0 : index
    %c57 = arith.constant 57 : index
    %c0_27 = arith.constant 0 : index
    %30 = vector.load %arg1[%c0_26, %c57, %c0_27] : memref<1x576x8xf32, #tpu.memory_space<vmem>>, vector<1x128x8xf32>
    %31 = vector.shape_cast %30 : vector<1x128x8xf32> to vector<128x8xf32>
    %32 = tpu.concatenate %29, %31 in 1 : vector<128x64xf32>, vector<128x8xf32> -> vector<128x72xf32>
    %33 = arith.truncf %32 : vector<128x72xf32> to vector<128x72xbf16>
    %c0_28 = arith.constant 0 : index
    %c0_29 = arith.constant 0 : index
    %c0_30 = arith.constant 0 : index
    %34 = vector.load %arg2[%c0_28, %c0_29, %c0_30] : memref<1x72x8xbf16, #tpu.memory_space<vmem>>, vector<1x72x8xbf16>
    %35 = vector.shape_cast %34 : vector<1x72x8xbf16> to vector<72x8xbf16>
    %cst_31 = arith.constant dense<0.000000e+00> : vector<128x8xf32>
    %36 = tpu.matmul %33, %35, %cst_31 {dimension_numbers = #tpu.dot_dimension_numbers<[1], [0], [0], [1], [0, 0, 1, 1], [], []>} : vector<128x72xbf16>, vector<72x8xbf16>, vector<128x8xf32> -> vector<128x8xf32>
    %37 = vector.broadcast %3 : vector<1x8xf32> to vector<128x8xf32>
    %38 = arith.mulf %36, %37 : vector<128x8xf32>
    %39 = vector.broadcast %4 : vector<1x8xf32> to vector<128x8xf32>
    %40 = arith.addf %38, %39 : vector<128x8xf32>
    %cst_32 = arith.constant 0.000000e+00 : f32
    %41 = vector.broadcast %cst_32 : f32 to vector<128x8xf32>
    %42 = arith.maximumf %40, %41 : vector<128x8xf32>
    %c0_33 = arith.constant 0 : index
    %c0_34 = arith.constant 0 : index
    %43 = vector.load %arg8[%c0_33, %c0_34] : memref<512x8xf32, #tpu.memory_space<vmem>>, vector<128x8xf32>
    %44 = arith.mulf %42, %43 : vector<128x8xf32>
    %c32_35 = arith.constant 32 : index
    %c0_36 = arith.constant 0 : index
    %45 = vector.load %arg10[%c32_35, %c0_36] : memref<576x8xf32, #tpu.memory_space<vmem>>, vector<128x8xf32>
    tpu.vector_store %arg10[%c32_35, %c0_36], %44 {strides = array<i32>} : memref<576x8xf32, #tpu.memory_space<vmem>>, vector<128x8xf32>,
    %c0_37 = arith.constant 0 : index
    %c135 = arith.constant 135 : index
    %c0_38 = arith.constant 0 : index
    %46 = vector.load %arg1[%c0_37, %c135, %c0_38] : memref<1x576x8xf32, #tpu.memory_space<vmem>>, vector<1x128x8xf32>
    %47 = vector.shape_cast %46 : vector<1x128x8xf32> to vector<128x8xf32>
    %c0_39 = arith.constant 0 : index
    %c136 = arith.constant 136 : index
    %c0_40 = arith.constant 0 : index
    %48 = vector.load %arg1[%c0_39, %c136, %c0_40] : memref<1x576x8xf32, #tpu.memory_space<vmem>>, vector<1x128x8xf32>
    %49 = vector.shape_cast %48 : vector<1x128x8xf32> to vector<128x8xf32>
    %50 = tpu.concatenate %47, %49 in 1 : vector<128x8xf32>, vector<128x8xf32> -> vector<128x16xf32>
    %c0_41 = arith.constant 0 : index
    %c137 = arith.constant 137 : index
    %c0_42 = arith.constant 0 : index
    %51 = vector.load %arg1[%c0_41, %c137, %c0_42] : memref<1x576x8xf32, #tpu.memory_space<vmem>>, vector<1x128x8xf32>
    %52 = vector.shape_cast %51 : vector<1x128x8xf32> to vector<128x8xf32>
    %53 = tpu.concatenate %50, %52 in 1 : vector<128x16xf32>, vector<128x8xf32> -> vector<128x24xf32>
    %c0_43 = arith.constant 0 : index
    %c159 = arith.constant 159 : index
    %c0_44 = arith.constant 0 : index
    %54 = vector.load %arg1[%c0_43, %c159, %c0_44] : memref<1x576x8xf32, #tpu.memory_space<vmem>>, vector<1x128x8xf32>
    %55 = vector.shape_cast %54 : vector<1x128x8xf32> to vector<128x8xf32>
    %56 = tpu.concatenate %53, %55 in 1 : vector<128x24xf32>, vector<128x8xf32> -> vector<128x32xf32>
    %c0_45 = arith.constant 0 : index
    %c160 = arith.constant 160 : index
    %c0_46 = arith.constant 0 : index
    %57 = vector.load %arg1[%c0_45, %c160, %c0_46] : memref<1x576x8xf32, #tpu.memory_space<vmem>>, vector<1x128x8xf32>
    %58 = vector.shape_cast %57 : vector<1x128x8xf32> to vector<128x8xf32>
    %59 = tpu.concatenate %56, %58 in 1 : vector<128x32xf32>, vector<128x8xf32> -> vector<128x40xf32>
    %c0_47 = arith.constant 0 : index
    %c161 = arith.constant 161 : index
    %c0_48 = arith.constant 0 : index
    %60 = vector.load %arg1[%c0_47, %c161, %c0_48] : memref<1x576x8xf32, #tpu.memory_space<vmem>>, vector<1x128x8xf32>
    %61 = vector.shape_cast %60 : vector<1x128x8xf32> to vector<128x8xf32>
    %62 = tpu.concatenate %59, %61 in 1 : vector<128x40xf32>, vector<128x8xf32> -> vector<128x48xf32>
    %c0_49 = arith.constant 0 : index
    %c183 = arith.constant 183 : index
    %c0_50 = arith.constant 0 : index
    %63 = vector.load %arg1[%c0_49, %c183, %c0_50] : memref<1x576x8xf32, #tpu.memory_space<vmem>>, vector<1x128x8xf32>
    %64 = vector.shape_cast %63 : vector<1x128x8xf32> to vector<128x8xf32>
    %65 = tpu.concatenate %62, %64 in 1 : vector<128x48xf32>, vector<128x8xf32> -> vector<128x56xf32>
    %c0_51 = arith.constant 0 : index
    %c184 = arith.constant 184 : index
    %c0_52 = arith.constant 0 : index
    %66 = vector.load %arg1[%c0_51, %c184, %c0_52] : memref<1x576x8xf32, #tpu.memory_space<vmem>>, vector<1x128x8xf32>
    %67 = vector.shape_cast %66 : vector<1x128x8xf32> to vector<128x8xf32>
    %68 = tpu.concatenate %65, %67 in 1 : vector<128x56xf32>, vector<128x8xf32> -> vector<128x64xf32>
    %c0_53 = arith.constant 0 : index
    %c185 = arith.constant 185 : index
    %c0_54 = arith.constant 0 : index
    %69 = vector.load %arg1[%c0_53, %c185, %c0_54] : memref<1x576x8xf32, #tpu.memory_space<vmem>>, vector<1x128x8xf32>
    %70 = vector.shape_cast %69 : vector<1x128x8xf32> to vector<128x8xf32>
    %71 = tpu.concatenate %68, %70 in 1 : vector<128x64xf32>, vector<128x8xf32> -> vector<128x72xf32>
    %72 = arith.truncf %71 : vector<128x72xf32> to vector<128x72xbf16>
    %c0_55 = arith.constant 0 : index
    %c0_56 = arith.constant 0 : index
    %c0_57 = arith.constant 0 : index
    %73 = vector.load %arg2[%c0_55, %c0_56, %c0_57] : memref<1x72x8xbf16, #tpu.memory_space<vmem>>, vector<1x72x8xbf16>
    %74 = vector.shape_cast %73 : vector<1x72x8xbf16> to vector<72x8xbf16>
    %cst_58 = arith.constant dense<0.000000e+00> : vector<128x8xf32>
    %75 = tpu.matmul %72, %74, %cst_58 {dimension_numbers = #tpu.dot_dimension_numbers<[1], [0], [0], [1], [0, 0, 1, 1], [], []>} : vector<128x72xbf16>, vector<72x8xbf16>, vector<128x8xf32> -> vector<128x8xf32>
    %76 = vector.broadcast %3 : vector<1x8xf32> to vector<128x8xf32>
    %77 = arith.mulf %75, %76 : vector<128x8xf32>
    %78 = vector.broadcast %4 : vector<1x8xf32> to vector<128x8xf32>
    %79 = arith.addf %77, %78 : vector<128x8xf32>
    %cst_59 = arith.constant 0.000000e+00 : f32
    %80 = vector.broadcast %cst_59 : f32 to vector<128x8xf32>
    %81 = arith.maximumf %79, %80 : vector<128x8xf32>
    %c128 = arith.constant 128 : index
    %c0_60 = arith.constant 0 : index
    %82 = vector.load %arg8[%c128, %c0_60] : memref<512x8xf32, #tpu.memory_space<vmem>>, vector<128x8xf32>
    %83 = arith.mulf %81, %82 : vector<128x8xf32>
    %c160_61 = arith.constant 160 : index
    %c0_62 = arith.constant 0 : index
    %84 = vector.load %arg10[%c160_61, %c0_62] : memref<576x8xf32, #tpu.memory_space<vmem>>, vector<128x8xf32>
    tpu.vector_store %arg10[%c160_61, %c0_62], %83 {strides = array<i32>} : memref<576x8xf32, #tpu.memory_space<vmem>>, vector<128x8xf32>,
    %c0_63 = arith.constant 0 : index
    %c263 = arith.constant 263 : index
    %c0_64 = arith.constant 0 : index
    %85 = vector.load %arg1[%c0_63, %c263, %c0_64] : memref<1x576x8xf32, #tpu.memory_space<vmem>>, vector<1x128x8xf32>
    %86 = vector.shape_cast %85 : vector<1x128x8xf32> to vector<128x8xf32>
    %c0_65 = arith.constant 0 : index
    %c264 = arith.constant 264 : index
    %c0_66 = arith.constant 0 : index
    %87 = vector.load %arg1[%c0_65, %c264, %c0_66] : memref<1x576x8xf32, #tpu.memory_space<vmem>>, vector<1x128x8xf32>
    %88 = vector.shape_cast %87 : vector<1x128x8xf32> to vector<128x8xf32>
    %89 = tpu.concatenate %86, %88 in 1 : vector<128x8xf32>, vector<128x8xf32> -> vector<128x16xf32>
    %c0_67 = arith.constant 0 : index
    %c265 = arith.constant 265 : index
    %c0_68 = arith.constant 0 : index
    %90 = vector.load %arg1[%c0_67, %c265, %c0_68] : memref<1x576x8xf32, #tpu.memory_space<vmem>>, vector<1x128x8xf32>
    %91 = vector.shape_cast %90 : vector<1x128x8xf32> to vector<128x8xf32>
    %92 = tpu.concatenate %89, %91 in 1 : vector<128x16xf32>, vector<128x8xf32> -> vector<128x24xf32>
    %c0_69 = arith.constant 0 : index
    %c287 = arith.constant 287 : index
    %c0_70 = arith.constant 0 : index
    %93 = vector.load %arg1[%c0_69, %c287, %c0_70] : memref<1x576x8xf32, #tpu.memory_space<vmem>>, vector<1x128x8xf32>
    %94 = vector.shape_cast %93 : vector<1x128x8xf32> to vector<128x8xf32>
    %95 = tpu.concatenate %92, %94 in 1 : vector<128x24xf32>, vector<128x8xf32> -> vector<128x32xf32>
    %c0_71 = arith.constant 0 : index
    %c288 = arith.constant 288 : index
    %c0_72 = arith.constant 0 : index
    %96 = vector.load %arg1[%c0_71, %c288, %c0_72] : memref<1x576x8xf32, #tpu.memory_space<vmem>>, vector<1x128x8xf32>
    %97 = vector.shape_cast %96 : vector<1x128x8xf32> to vector<128x8xf32>
    %98 = tpu.concatenate %95, %97 in 1 : vector<128x32xf32>, vector<128x8xf32> -> vector<128x40xf32>
    %c0_73 = arith.constant 0 : index
    %c289 = arith.constant 289 : index
    %c0_74 = arith.constant 0 : index
    %99 = vector.load %arg1[%c0_73, %c289, %c0_74] : memref<1x576x8xf32, #tpu.memory_space<vmem>>, vector<1x128x8xf32>
    %100 = vector.shape_cast %99 : vector<1x128x8xf32> to vector<128x8xf32>
    %101 = tpu.concatenate %98, %100 in 1 : vector<128x40xf32>, vector<128x8xf32> -> vector<128x48xf32>
    %c0_75 = arith.constant 0 : index
    %c311 = arith.constant 311 : index
    %c0_76 = arith.constant 0 : index
    %102 = vector.load %arg1[%c0_75, %c311, %c0_76] : memref<1x576x8xf32, #tpu.memory_space<vmem>>, vector<1x128x8xf32>
    %103 = vector.shape_cast %102 : vector<1x128x8xf32> to vector<128x8xf32>
    %104 = tpu.concatenate %101, %103 in 1 : vector<128x48xf32>, vector<128x8xf32> -> vector<128x56xf32>
    %c0_77 = arith.constant 0 : index
    %c312 = arith.constant 312 : index
    %c0_78 = arith.constant 0 : index
    %105 = vector.load %arg1[%c0_77, %c312, %c0_78] : memref<1x576x8xf32, #tpu.memory_space<vmem>>, vector<1x128x8xf32>
    %106 = vector.shape_cast %105 : vector<1x128x8xf32> to vector<128x8xf32>
    %107 = tpu.concatenate %104, %106 in 1 : vector<128x56xf32>, vector<128x8xf32> -> vector<128x64xf32>
    %c0_79 = arith.constant 0 : index
    %c313 = arith.constant 313 : index
    %c0_80 = arith.constant 0 : index
    %108 = vector.load %arg1[%c0_79, %c313, %c0_80] : memref<1x576x8xf32, #tpu.memory_space<vmem>>, vector<1x128x8xf32>
    %109 = vector.shape_cast %108 : vector<1x128x8xf32> to vector<128x8xf32>
    %110 = tpu.concatenate %107, %109 in 1 : vector<128x64xf32>, vector<128x8xf32> -> vector<128x72xf32>
    %111 = arith.truncf %110 : vector<128x72xf32> to vector<128x72xbf16>
    %c0_81 = arith.constant 0 : index
    %c0_82 = arith.constant 0 : index
    %c0_83 = arith.constant 0 : index
    %112 = vector.load %arg2[%c0_81, %c0_82, %c0_83] : memref<1x72x8xbf16, #tpu.memory_space<vmem>>, vector<1x72x8xbf16>
    %113 = vector.shape_cast %112 : vector<1x72x8xbf16> to vector<72x8xbf16>
    %cst_84 = arith.constant dense<0.000000e+00> : vector<128x8xf32>
    %114 = tpu.matmul %111, %113, %cst_84 {dimension_numbers = #tpu.dot_dimension_numbers<[1], [0], [0], [1], [0, 0, 1, 1], [], []>} : vector<128x72xbf16>, vector<72x8xbf16>, vector<128x8xf32> -> vector<128x8xf32>
    %115 = vector.broadcast %3 : vector<1x8xf32> to vector<128x8xf32>
    %116 = arith.mulf %114, %115 : vector<128x8xf32>
    %117 = vector.broadcast %4 : vector<1x8xf32> to vector<128x8xf32>
    %118 = arith.addf %116, %117 : vector<128x8xf32>
    %cst_85 = arith.constant 0.000000e+00 : f32
    %119 = vector.broadcast %cst_85 : f32 to vector<128x8xf32>
    %120 = arith.maximumf %118, %119 : vector<128x8xf32>
    %c256 = arith.constant 256 : index
    %c0_86 = arith.constant 0 : index
    %121 = vector.load %arg8[%c256, %c0_86] : memref<512x8xf32, #tpu.memory_space<vmem>>, vector<128x8xf32>
    %122 = arith.mulf %120, %121 : vector<128x8xf32>
    %c288_87 = arith.constant 288 : index
    %c0_88 = arith.constant 0 : index
    %123 = vector.load %arg10[%c288_87, %c0_88] : memref<576x8xf32, #tpu.memory_space<vmem>>, vector<128x8xf32>
    tpu.vector_store %arg10[%c288_87, %c0_88], %122 {strides = array<i32>} : memref<576x8xf32, #tpu.memory_space<vmem>>, vector<128x8xf32>,
    %c0_89 = arith.constant 0 : index
    %c391 = arith.constant 391 : index
    %c0_90 = arith.constant 0 : index
    %124 = vector.load %arg1[%c0_89, %c391, %c0_90] : memref<1x576x8xf32, #tpu.memory_space<vmem>>, vector<1x128x8xf32>
    %125 = vector.shape_cast %124 : vector<1x128x8xf32> to vector<128x8xf32>
    %c0_91 = arith.constant 0 : index
    %c392 = arith.constant 392 : index
    %c0_92 = arith.constant 0 : index
    %126 = vector.load %arg1[%c0_91, %c392, %c0_92] : memref<1x576x8xf32, #tpu.memory_space<vmem>>, vector<1x128x8xf32>
    %127 = vector.shape_cast %126 : vector<1x128x8xf32> to vector<128x8xf32>
    %128 = tpu.concatenate %125, %127 in 1 : vector<128x8xf32>, vector<128x8xf32> -> vector<128x16xf32>
    %c0_93 = arith.constant 0 : index
    %c393 = arith.constant 393 : index
    %c0_94 = arith.constant 0 : index
    %129 = vector.load %arg1[%c0_93, %c393, %c0_94] : memref<1x576x8xf32, #tpu.memory_space<vmem>>, vector<1x128x8xf32>
    %130 = vector.shape_cast %129 : vector<1x128x8xf32> to vector<128x8xf32>
    %131 = tpu.concatenate %128, %130 in 1 : vector<128x16xf32>, vector<128x8xf32> -> vector<128x24xf32>
    %c0_95 = arith.constant 0 : index
    %c415 = arith.constant 415 : index
    %c0_96 = arith.constant 0 : index
    %132 = vector.load %arg1[%c0_95, %c415, %c0_96] : memref<1x576x8xf32, #tpu.memory_space<vmem>>, vector<1x128x8xf32>
    %133 = vector.shape_cast %132 : vector<1x128x8xf32> to vector<128x8xf32>
    %134 = tpu.concatenate %131, %133 in 1 : vector<128x24xf32>, vector<128x8xf32> -> vector<128x32xf32>
    %c0_97 = arith.constant 0 : index
    %c416 = arith.constant 416 : index
    %c0_98 = arith.constant 0 : index
    %135 = vector.load %arg1[%c0_97, %c416, %c0_98] : memref<1x576x8xf32, #tpu.memory_space<vmem>>, vector<1x128x8xf32>
    %136 = vector.shape_cast %135 : vector<1x128x8xf32> to vector<128x8xf32>
    %137 = tpu.concatenate %134, %136 in 1 : vector<128x32xf32>, vector<128x8xf32> -> vector<128x40xf32>
    %c0_99 = arith.constant 0 : index
    %c417 = arith.constant 417 : index
    %c0_100 = arith.constant 0 : index
    %138 = vector.load %arg1[%c0_99, %c417, %c0_100] : memref<1x576x8xf32, #tpu.memory_space<vmem>>, vector<1x128x8xf32>
    %139 = vector.shape_cast %138 : vector<1x128x8xf32> to vector<128x8xf32>
    %140 = tpu.concatenate %137, %139 in 1 : vector<128x40xf32>, vector<128x8xf32> -> vector<128x48xf32>
    %c0_101 = arith.constant 0 : index
    %c439 = arith.constant 439 : index
    %c0_102 = arith.constant 0 : index
    %141 = vector.load %arg1[%c0_101, %c439, %c0_102] : memref<1x576x8xf32, #tpu.memory_space<vmem>>, vector<1x128x8xf32>
    %142 = vector.shape_cast %141 : vector<1x128x8xf32> to vector<128x8xf32>
    %143 = tpu.concatenate %140, %142 in 1 : vector<128x48xf32>, vector<128x8xf32> -> vector<128x56xf32>
    %c0_103 = arith.constant 0 : index
    %c440 = arith.constant 440 : index
    %c0_104 = arith.constant 0 : index
    %144 = vector.load %arg1[%c0_103, %c440, %c0_104] : memref<1x576x8xf32, #tpu.memory_space<vmem>>, vector<1x128x8xf32>
    %145 = vector.shape_cast %144 : vector<1x128x8xf32> to vector<128x8xf32>
    %146 = tpu.concatenate %143, %145 in 1 : vector<128x56xf32>, vector<128x8xf32> -> vector<128x64xf32>
    %c0_105 = arith.constant 0 : index
    %c441 = arith.constant 441 : index
    %c0_106 = arith.constant 0 : index
    %147 = vector.load %arg1[%c0_105, %c441, %c0_106] : memref<1x576x8xf32, #tpu.memory_space<vmem>>, vector<1x128x8xf32>
    %148 = vector.shape_cast %147 : vector<1x128x8xf32> to vector<128x8xf32>
    %149 = tpu.concatenate %146, %148 in 1 : vector<128x64xf32>, vector<128x8xf32> -> vector<128x72xf32>
    %150 = arith.truncf %149 : vector<128x72xf32> to vector<128x72xbf16>
    %c0_107 = arith.constant 0 : index
    %c0_108 = arith.constant 0 : index
    %c0_109 = arith.constant 0 : index
    %151 = vector.load %arg2[%c0_107, %c0_108, %c0_109] : memref<1x72x8xbf16, #tpu.memory_space<vmem>>, vector<1x72x8xbf16>
    %152 = vector.shape_cast %151 : vector<1x72x8xbf16> to vector<72x8xbf16>
    %cst_110 = arith.constant dense<0.000000e+00> : vector<128x8xf32>
    %153 = tpu.matmul %150, %152, %cst_110 {dimension_numbers = #tpu.dot_dimension_numbers<[1], [0], [0], [1], [0, 0, 1, 1], [], []>} : vector<128x72xbf16>, vector<72x8xbf16>, vector<128x8xf32> -> vector<128x8xf32>
    %154 = vector.broadcast %3 : vector<1x8xf32> to vector<128x8xf32>
    %155 = arith.mulf %153, %154 : vector<128x8xf32>
    %156 = vector.broadcast %4 : vector<1x8xf32> to vector<128x8xf32>
    %157 = arith.addf %155, %156 : vector<128x8xf32>
    %cst_111 = arith.constant 0.000000e+00 : f32
    %158 = vector.broadcast %cst_111 : f32 to vector<128x8xf32>
    %159 = arith.maximumf %157, %158 : vector<128x8xf32>
    %c384 = arith.constant 384 : index
    %c0_112 = arith.constant 0 : index
    %160 = vector.load %arg8[%c384, %c0_112] : memref<512x8xf32, #tpu.memory_space<vmem>>, vector<128x8xf32>
    %161 = arith.mulf %159, %160 : vector<128x8xf32>
    %c416_113 = arith.constant 416 : index
    %c0_114 = arith.constant 0 : index
    %162 = vector.load %arg10[%c416_113, %c0_114] : memref<576x8xf32, #tpu.memory_space<vmem>>, vector<128x8xf32>
    tpu.vector_store %arg10[%c416_113, %c0_114], %161 {strides = array<i32>} : memref<576x8xf32, #tpu.memory_space<vmem>>, vector<128x8xf32>,
    %c7_115 = arith.constant 7 : index
    %c0_116 = arith.constant 0 : index
    %163 = vector.load %arg10[%c7_115, %c0_116] : memref<576x8xf32, #tpu.memory_space<vmem>>, vector<128x8xf32>
    %c8_117 = arith.constant 8 : index
    %c0_118 = arith.constant 0 : index
    %164 = vector.load %arg10[%c8_117, %c0_118] : memref<576x8xf32, #tpu.memory_space<vmem>>, vector<128x8xf32>
    %165 = tpu.concatenate %163, %164 in 1 : vector<128x8xf32>, vector<128x8xf32> -> vector<128x16xf32>
    %c9_119 = arith.constant 9 : index
    %c0_120 = arith.constant 0 : index
    %166 = vector.load %arg10[%c9_119, %c0_120] : memref<576x8xf32, #tpu.memory_space<vmem>>, vector<128x8xf32>
    %167 = tpu.concatenate %165, %166 in 1 : vector<128x16xf32>, vector<128x8xf32> -> vector<128x24xf32>
    %c31_121 = arith.constant 31 : index
    %c0_122 = arith.constant 0 : index
    %168 = vector.load %arg10[%c31_121, %c0_122] : memref<576x8xf32, #tpu.memory_space<vmem>>, vector<128x8xf32>
    %169 = tpu.concatenate %167, %168 in 1 : vector<128x24xf32>, vector<128x8xf32> -> vector<128x32xf32>
    %c32_123 = arith.constant 32 : index
    %c0_124 = arith.constant 0 : index
    %170 = vector.load %arg10[%c32_123, %c0_124] : memref<576x8xf32, #tpu.memory_space<vmem>>, vector<128x8xf32>
    %171 = tpu.concatenate %169, %170 in 1 : vector<128x32xf32>, vector<128x8xf32> -> vector<128x40xf32>
    %c33_125 = arith.constant 33 : index
    %c0_126 = arith.constant 0 : index
    %172 = vector.load %arg10[%c33_125, %c0_126] : memref<576x8xf32, #tpu.memory_space<vmem>>, vector<128x8xf32>
    %173 = tpu.concatenate %171, %172 in 1 : vector<128x40xf32>, vector<128x8xf32> -> vector<128x48xf32>
    %c55_127 = arith.constant 55 : index
    %c0_128 = arith.constant 0 : index
    %174 = vector.load %arg10[%c55_127, %c0_128] : memref<576x8xf32, #tpu.memory_space<vmem>>, vector<128x8xf32>
    %175 = tpu.concatenate %173, %174 in 1 : vector<128x48xf32>, vector<128x8xf32> -> vector<128x56xf32>
    %c56_129 = arith.constant 56 : index
    %c0_130 = arith.constant 0 : index
    %176 = vector.load %arg10[%c56_129, %c0_130] : memref<576x8xf32, #tpu.memory_space<vmem>>, vector<128x8xf32>
    %177 = tpu.concatenate %175, %176 in 1 : vector<128x56xf32>, vector<128x8xf32> -> vector<128x64xf32>
    %c57_131 = arith.constant 57 : index
    %c0_132 = arith.constant 0 : index
    %178 = vector.load %arg10[%c57_131, %c0_132] : memref<576x8xf32, #tpu.memory_space<vmem>>, vector<128x8xf32>
    %179 = tpu.concatenate %177, %178 in 1 : vector<128x64xf32>, vector<128x8xf32> -> vector<128x72xf32>
    %180 = arith.truncf %179 : vector<128x72xf32> to vector<128x72xbf16>
    %c0_133 = arith.constant 0 : index
    %c0_134 = arith.constant 0 : index
    %c0_135 = arith.constant 0 : index
    %181 = vector.load %arg5[%c0_133, %c0_134, %c0_135] : memref<1x72x8xbf16, #tpu.memory_space<vmem>>, vector<1x72x8xbf16>
    %182 = vector.shape_cast %181 : vector<1x72x8xbf16> to vector<72x8xbf16>
    %cst_136 = arith.constant dense<0.000000e+00> : vector<128x8xf32>
    %183 = tpu.matmul %180, %182, %cst_136 {dimension_numbers = #tpu.dot_dimension_numbers<[1], [0], [0], [1], [0, 0, 1, 1], [], []>} : vector<128x72xbf16>, vector<72x8xbf16>, vector<128x8xf32> -> vector<128x8xf32>
    %c0_137 = arith.constant 0 : index
    %c32_138 = arith.constant 32 : index
    %c0_139 = arith.constant 0 : index
    %184 = vector.load %arg1[%c0_137, %c32_138, %c0_139] : memref<1x576x8xf32, #tpu.memory_space<vmem>>, vector<1x128x8xf32>
    %185 = vector.shape_cast %184 : vector<1x128x8xf32> to vector<128x8xf32>
    %186 = vector.broadcast %5 : vector<1x8xf32> to vector<128x8xf32>
    %187 = arith.mulf %183, %186 : vector<128x8xf32>
    %188 = vector.broadcast %6 : vector<1x8xf32> to vector<128x8xf32>
    %189 = arith.addf %187, %188 : vector<128x8xf32>
    %190 = arith.addf %189, %185 : vector<128x8xf32>
    %cst_140 = arith.constant 0.000000e+00 : f32
    %191 = vector.broadcast %cst_140 : f32 to vector<128x8xf32>
    %192 = arith.maximumf %190, %191 : vector<128x8xf32>
    %193 = arith.truncf %192 : vector<128x8xf32> to vector<128x8xbf16>
    %c0_141 = arith.constant 0 : index
    %c0_142 = arith.constant 0 : index
    %c0_143 = arith.constant 0 : index
    %194 = vector.load %arg9[%c0_141, %c0_142, %c0_143] : memref<1x512x8xbf16, #tpu.memory_space<vmem>>, vector<1x128x8xbf16>
    %195 = vector.shape_cast %194 : vector<1x128x8xbf16> to vector<128x8xbf16>
    %196 = vector.shape_cast %193 : vector<128x8xbf16> to vector<1x128x8xbf16>
    tpu.vector_store %arg9[%c0_141, %c0_142, %c0_143], %196 {strides = array<i32>} : memref<1x512x8xbf16, #tpu.memory_space<vmem>>, vector<1x128x8xbf16>,
    %c135_144 = arith.constant 135 : index
    %c0_145 = arith.constant 0 : index
    %197 = vector.load %arg10[%c135_144, %c0_145] : memref<576x8xf32, #tpu.memory_space<vmem>>, vector<128x8xf32>
    %c136_146 = arith.constant 136 : index
    %c0_147 = arith.constant 0 : index
    %198 = vector.load %arg10[%c136_146, %c0_147] : memref<576x8xf32, #tpu.memory_space<vmem>>, vector<128x8xf32>
    %199 = tpu.concatenate %197, %198 in 1 : vector<128x8xf32>, vector<128x8xf32> -> vector<128x16xf32>
    %c137_148 = arith.constant 137 : index
    %c0_149 = arith.constant 0 : index
    %200 = vector.load %arg10[%c137_148, %c0_149] : memref<576x8xf32, #tpu.memory_space<vmem>>, vector<128x8xf32>
    %201 = tpu.concatenate %199, %200 in 1 : vector<128x16xf32>, vector<128x8xf32> -> vector<128x24xf32>
    %c159_150 = arith.constant 159 : index
    %c0_151 = arith.constant 0 : index
    %202 = vector.load %arg10[%c159_150, %c0_151] : memref<576x8xf32, #tpu.memory_space<vmem>>, vector<128x8xf32>
    %203 = tpu.concatenate %201, %202 in 1 : vector<128x24xf32>, vector<128x8xf32> -> vector<128x32xf32>
    %c160_152 = arith.constant 160 : index
    %c0_153 = arith.constant 0 : index
    %204 = vector.load %arg10[%c160_152, %c0_153] : memref<576x8xf32, #tpu.memory_space<vmem>>, vector<128x8xf32>
    %205 = tpu.concatenate %203, %204 in 1 : vector<128x32xf32>, vector<128x8xf32> -> vector<128x40xf32>
    %c161_154 = arith.constant 161 : index
    %c0_155 = arith.constant 0 : index
    %206 = vector.load %arg10[%c161_154, %c0_155] : memref<576x8xf32, #tpu.memory_space<vmem>>, vector<128x8xf32>
    %207 = tpu.concatenate %205, %206 in 1 : vector<128x40xf32>, vector<128x8xf32> -> vector<128x48xf32>
    %c183_156 = arith.constant 183 : index
    %c0_157 = arith.constant 0 : index
    %208 = vector.load %arg10[%c183_156, %c0_157] : memref<576x8xf32, #tpu.memory_space<vmem>>, vector<128x8xf32>
    %209 = tpu.concatenate %207, %208 in 1 : vector<128x48xf32>, vector<128x8xf32> -> vector<128x56xf32>
    %c184_158 = arith.constant 184 : index
    %c0_159 = arith.constant 0 : index
    %210 = vector.load %arg10[%c184_158, %c0_159] : memref<576x8xf32, #tpu.memory_space<vmem>>, vector<128x8xf32>
    %211 = tpu.concatenate %209, %210 in 1 : vector<128x56xf32>, vector<128x8xf32> -> vector<128x64xf32>
    %c185_160 = arith.constant 185 : index
    %c0_161 = arith.constant 0 : index
    %212 = vector.load %arg10[%c185_160, %c0_161] : memref<576x8xf32, #tpu.memory_space<vmem>>, vector<128x8xf32>
    %213 = tpu.concatenate %211, %212 in 1 : vector<128x64xf32>, vector<128x8xf32> -> vector<128x72xf32>
    %214 = arith.truncf %213 : vector<128x72xf32> to vector<128x72xbf16>
    %c0_162 = arith.constant 0 : index
    %c0_163 = arith.constant 0 : index
    %c0_164 = arith.constant 0 : index
    %215 = vector.load %arg5[%c0_162, %c0_163, %c0_164] : memref<1x72x8xbf16, #tpu.memory_space<vmem>>, vector<1x72x8xbf16>
    %216 = vector.shape_cast %215 : vector<1x72x8xbf16> to vector<72x8xbf16>
    %cst_165 = arith.constant dense<0.000000e+00> : vector<128x8xf32>
    %217 = tpu.matmul %214, %216, %cst_165 {dimension_numbers = #tpu.dot_dimension_numbers<[1], [0], [0], [1], [0, 0, 1, 1], [], []>} : vector<128x72xbf16>, vector<72x8xbf16>, vector<128x8xf32> -> vector<128x8xf32>
    %c0_166 = arith.constant 0 : index
    %c160_167 = arith.constant 160 : index
    %c0_168 = arith.constant 0 : index
    %218 = vector.load %arg1[%c0_166, %c160_167, %c0_168] : memref<1x576x8xf32, #tpu.memory_space<vmem>>, vector<1x128x8xf32>
    %219 = vector.shape_cast %218 : vector<1x128x8xf32> to vector<128x8xf32>
    %220 = vector.broadcast %5 : vector<1x8xf32> to vector<128x8xf32>
    %221 = arith.mulf %217, %220 : vector<128x8xf32>
    %222 = vector.broadcast %6 : vector<1x8xf32> to vector<128x8xf32>
    %223 = arith.addf %221, %222 : vector<128x8xf32>
    %224 = arith.addf %223, %219 : vector<128x8xf32>
    %cst_169 = arith.constant 0.000000e+00 : f32
    %225 = vector.broadcast %cst_169 : f32 to vector<128x8xf32>
    %226 = arith.maximumf %224, %225 : vector<128x8xf32>
    %227 = arith.truncf %226 : vector<128x8xf32> to vector<128x8xbf16>
    %c0_170 = arith.constant 0 : index
    %c128_171 = arith.constant 128 : index
    %c0_172 = arith.constant 0 : index
    %228 = vector.load %arg9[%c0_170, %c128_171, %c0_172] : memref<1x512x8xbf16, #tpu.memory_space<vmem>>, vector<1x128x8xbf16>
    %229 = vector.shape_cast %228 : vector<1x128x8xbf16> to vector<128x8xbf16>
    %230 = vector.shape_cast %227 : vector<128x8xbf16> to vector<1x128x8xbf16>
    tpu.vector_store %arg9[%c0_170, %c128_171, %c0_172], %230 {strides = array<i32>} : memref<1x512x8xbf16, #tpu.memory_space<vmem>>, vector<1x128x8xbf16>,
    %c263_173 = arith.constant 263 : index
    %c0_174 = arith.constant 0 : index
    %231 = vector.load %arg10[%c263_173, %c0_174] : memref<576x8xf32, #tpu.memory_space<vmem>>, vector<128x8xf32>
    %c264_175 = arith.constant 264 : index
    %c0_176 = arith.constant 0 : index
    %232 = vector.load %arg10[%c264_175, %c0_176] : memref<576x8xf32, #tpu.memory_space<vmem>>, vector<128x8xf32>
    %233 = tpu.concatenate %231, %232 in 1 : vector<128x8xf32>, vector<128x8xf32> -> vector<128x16xf32>
    %c265_177 = arith.constant 265 : index
    %c0_178 = arith.constant 0 : index
    %234 = vector.load %arg10[%c265_177, %c0_178] : memref<576x8xf32, #tpu.memory_space<vmem>>, vector<128x8xf32>
    %235 = tpu.concatenate %233, %234 in 1 : vector<128x16xf32>, vector<128x8xf32> -> vector<128x24xf32>
    %c287_179 = arith.constant 287 : index
    %c0_180 = arith.constant 0 : index
    %236 = vector.load %arg10[%c287_179, %c0_180] : memref<576x8xf32, #tpu.memory_space<vmem>>, vector<128x8xf32>
    %237 = tpu.concatenate %235, %236 in 1 : vector<128x24xf32>, vector<128x8xf32> -> vector<128x32xf32>
    %c288_181 = arith.constant 288 : index
    %c0_182 = arith.constant 0 : index
    %238 = vector.load %arg10[%c288_181, %c0_182] : memref<576x8xf32, #tpu.memory_space<vmem>>, vector<128x8xf32>
    %239 = tpu.concatenate %237, %238 in 1 : vector<128x32xf32>, vector<128x8xf32> -> vector<128x40xf32>
    %c289_183 = arith.constant 289 : index
    %c0_184 = arith.constant 0 : index
    %240 = vector.load %arg10[%c289_183, %c0_184] : memref<576x8xf32, #tpu.memory_space<vmem>>, vector<128x8xf32>
    %241 = tpu.concatenate %239, %240 in 1 : vector<128x40xf32>, vector<128x8xf32> -> vector<128x48xf32>
    %c311_185 = arith.constant 311 : index
    %c0_186 = arith.constant 0 : index
    %242 = vector.load %arg10[%c311_185, %c0_186] : memref<576x8xf32, #tpu.memory_space<vmem>>, vector<128x8xf32>
    %243 = tpu.concatenate %241, %242 in 1 : vector<128x48xf32>, vector<128x8xf32> -> vector<128x56xf32>
    %c312_187 = arith.constant 312 : index
    %c0_188 = arith.constant 0 : index
    %244 = vector.load %arg10[%c312_187, %c0_188] : memref<576x8xf32, #tpu.memory_space<vmem>>, vector<128x8xf32>
    %245 = tpu.concatenate %243, %244 in 1 : vector<128x56xf32>, vector<128x8xf32> -> vector<128x64xf32>
    %c313_189 = arith.constant 313 : index
    %c0_190 = arith.constant 0 : index
    %246 = vector.load %arg10[%c313_189, %c0_190] : memref<576x8xf32, #tpu.memory_space<vmem>>, vector<128x8xf32>
    %247 = tpu.concatenate %245, %246 in 1 : vector<128x64xf32>, vector<128x8xf32> -> vector<128x72xf32>
    %248 = arith.truncf %247 : vector<128x72xf32> to vector<128x72xbf16>
    %c0_191 = arith.constant 0 : index
    %c0_192 = arith.constant 0 : index
    %c0_193 = arith.constant 0 : index
    %249 = vector.load %arg5[%c0_191, %c0_192, %c0_193] : memref<1x72x8xbf16, #tpu.memory_space<vmem>>, vector<1x72x8xbf16>
    %250 = vector.shape_cast %249 : vector<1x72x8xbf16> to vector<72x8xbf16>
    %cst_194 = arith.constant dense<0.000000e+00> : vector<128x8xf32>
    %251 = tpu.matmul %248, %250, %cst_194 {dimension_numbers = #tpu.dot_dimension_numbers<[1], [0], [0], [1], [0, 0, 1, 1], [], []>} : vector<128x72xbf16>, vector<72x8xbf16>, vector<128x8xf32> -> vector<128x8xf32>
    %c0_195 = arith.constant 0 : index
    %c288_196 = arith.constant 288 : index
    %c0_197 = arith.constant 0 : index
    %252 = vector.load %arg1[%c0_195, %c288_196, %c0_197] : memref<1x576x8xf32, #tpu.memory_space<vmem>>, vector<1x128x8xf32>
    %253 = vector.shape_cast %252 : vector<1x128x8xf32> to vector<128x8xf32>
    %254 = vector.broadcast %5 : vector<1x8xf32> to vector<128x8xf32>
    %255 = arith.mulf %251, %254 : vector<128x8xf32>
    %256 = vector.broadcast %6 : vector<1x8xf32> to vector<128x8xf32>
    %257 = arith.addf %255, %256 : vector<128x8xf32>
    %258 = arith.addf %257, %253 : vector<128x8xf32>
    %cst_198 = arith.constant 0.000000e+00 : f32
    %259 = vector.broadcast %cst_198 : f32 to vector<128x8xf32>
    %260 = arith.maximumf %258, %259 : vector<128x8xf32>
    %261 = arith.truncf %260 : vector<128x8xf32> to vector<128x8xbf16>
    %c0_199 = arith.constant 0 : index
    %c256_200 = arith.constant 256 : index
    %c0_201 = arith.constant 0 : index
    %262 = vector.load %arg9[%c0_199, %c256_200, %c0_201] : memref<1x512x8xbf16, #tpu.memory_space<vmem>>, vector<1x128x8xbf16>
    %263 = vector.shape_cast %262 : vector<1x128x8xbf16> to vector<128x8xbf16>
    %264 = vector.shape_cast %261 : vector<128x8xbf16> to vector<1x128x8xbf16>
    tpu.vector_store %arg9[%c0_199, %c256_200, %c0_201], %264 {strides = array<i32>} : memref<1x512x8xbf16, #tpu.memory_space<vmem>>, vector<1x128x8xbf16>,
    %c391_202 = arith.constant 391 : index
    %c0_203 = arith.constant 0 : index
    %265 = vector.load %arg10[%c391_202, %c0_203] : memref<576x8xf32, #tpu.memory_space<vmem>>, vector<128x8xf32>
    %c392_204 = arith.constant 392 : index
    %c0_205 = arith.constant 0 : index
    %266 = vector.load %arg10[%c392_204, %c0_205] : memref<576x8xf32, #tpu.memory_space<vmem>>, vector<128x8xf32>
    %267 = tpu.concatenate %265, %266 in 1 : vector<128x8xf32>, vector<128x8xf32> -> vector<128x16xf32>
    %c393_206 = arith.constant 393 : index
    %c0_207 = arith.constant 0 : index
    %268 = vector.load %arg10[%c393_206, %c0_207] : memref<576x8xf32, #tpu.memory_space<vmem>>, vector<128x8xf32>
    %269 = tpu.concatenate %267, %268 in 1 : vector<128x16xf32>, vector<128x8xf32> -> vector<128x24xf32>
    %c415_208 = arith.constant 415 : index
    %c0_209 = arith.constant 0 : index
    %270 = vector.load %arg10[%c415_208, %c0_209] : memref<576x8xf32, #tpu.memory_space<vmem>>, vector<128x8xf32>
    %271 = tpu.concatenate %269, %270 in 1 : vector<128x24xf32>, vector<128x8xf32> -> vector<128x32xf32>
    %c416_210 = arith.constant 416 : index
    %c0_211 = arith.constant 0 : index
    %272 = vector.load %arg10[%c416_210, %c0_211] : memref<576x8xf32, #tpu.memory_space<vmem>>, vector<128x8xf32>
    %273 = tpu.concatenate %271, %272 in 1 : vector<128x32xf32>, vector<128x8xf32> -> vector<128x40xf32>
    %c417_212 = arith.constant 417 : index
    %c0_213 = arith.constant 0 : index
    %274 = vector.load %arg10[%c417_212, %c0_213] : memref<576x8xf32, #tpu.memory_space<vmem>>, vector<128x8xf32>
    %275 = tpu.concatenate %273, %274 in 1 : vector<128x40xf32>, vector<128x8xf32> -> vector<128x48xf32>
    %c439_214 = arith.constant 439 : index
    %c0_215 = arith.constant 0 : index
    %276 = vector.load %arg10[%c439_214, %c0_215] : memref<576x8xf32, #tpu.memory_space<vmem>>, vector<128x8xf32>
    %277 = tpu.concatenate %275, %276 in 1 : vector<128x48xf32>, vector<128x8xf32> -> vector<128x56xf32>
    %c440_216 = arith.constant 440 : index
    %c0_217 = arith.constant 0 : index
    %278 = vector.load %arg10[%c440_216, %c0_217] : memref<576x8xf32, #tpu.memory_space<vmem>>, vector<128x8xf32>
    %279 = tpu.concatenate %277, %278 in 1 : vector<128x56xf32>, vector<128x8xf32> -> vector<128x64xf32>
    %c441_218 = arith.constant 441 : index
    %c0_219 = arith.constant 0 : index
    %280 = vector.load %arg10[%c441_218, %c0_219] : memref<576x8xf32, #tpu.memory_space<vmem>>, vector<128x8xf32>
    %281 = tpu.concatenate %279, %280 in 1 : vector<128x64xf32>, vector<128x8xf32> -> vector<128x72xf32>
    %282 = arith.truncf %281 : vector<128x72xf32> to vector<128x72xbf16>
    %c0_220 = arith.constant 0 : index
    %c0_221 = arith.constant 0 : index
    %c0_222 = arith.constant 0 : index
    %283 = vector.load %arg5[%c0_220, %c0_221, %c0_222] : memref<1x72x8xbf16, #tpu.memory_space<vmem>>, vector<1x72x8xbf16>
    %284 = vector.shape_cast %283 : vector<1x72x8xbf16> to vector<72x8xbf16>
    %cst_223 = arith.constant dense<0.000000e+00> : vector<128x8xf32>
    %285 = tpu.matmul %282, %284, %cst_223 {dimension_numbers = #tpu.dot_dimension_numbers<[1], [0], [0], [1], [0, 0, 1, 1], [], []>} : vector<128x72xbf16>, vector<72x8xbf16>, vector<128x8xf32> -> vector<128x8xf32>
    %c0_224 = arith.constant 0 : index
    %c416_225 = arith.constant 416 : index
    %c0_226 = arith.constant 0 : index
    %286 = vector.load %arg1[%c0_224, %c416_225, %c0_226] : memref<1x576x8xf32, #tpu.memory_space<vmem>>, vector<1x128x8xf32>
    %287 = vector.shape_cast %286 : vector<1x128x8xf32> to vector<128x8xf32>
    %288 = vector.broadcast %5 : vector<1x8xf32> to vector<128x8xf32>
    %289 = arith.mulf %285, %288 : vector<128x8xf32>
    %290 = vector.broadcast %6 : vector<1x8xf32> to vector<128x8xf32>
    %291 = arith.addf %289, %290 : vector<128x8xf32>
    %292 = arith.addf %291, %287 : vector<128x8xf32>
    %cst_227 = arith.constant 0.000000e+00 : f32
    %293 = vector.broadcast %cst_227 : f32 to vector<128x8xf32>
    %294 = arith.maximumf %292, %293 : vector<128x8xf32>
    %295 = arith.truncf %294 : vector<128x8xf32> to vector<128x8xbf16>
    %c0_228 = arith.constant 0 : index
    %c384_229 = arith.constant 384 : index
    %c0_230 = arith.constant 0 : index
    %296 = vector.load %arg9[%c0_228, %c384_229, %c0_230] : memref<1x512x8xbf16, #tpu.memory_space<vmem>>, vector<1x128x8xbf16>
    %297 = vector.shape_cast %296 : vector<1x128x8xbf16> to vector<128x8xbf16>
    %298 = vector.shape_cast %295 : vector<128x8xbf16> to vector<1x128x8xbf16>
    tpu.vector_store %arg9[%c0_228, %c384_229, %c0_230], %298 {strides = array<i32>} : memref<1x512x8xbf16, #tpu.memory_space<vmem>>, vector<1x128x8xbf16>,
    return
  }
  func.func @transform_0(%arg0: i32) -> (i32, i32, i32) {
    %c0_i32 = arith.constant 0 : i32
    %c0_i32_0 = arith.constant 0 : i32
    %c0_i32_1 = arith.constant 0 : i32
    return %arg0, %c0_i32, %c0_i32_0 : i32, i32, i32
  }
  func.func @transform_1(%arg0: i32) -> (i32, i32, i32) {
    %c0_i32 = arith.constant 0 : i32
    %c0_i32_0 = arith.constant 0 : i32
    %c0_i32_1 = arith.constant 0 : i32
    %c0_i32_2 = arith.constant 0 : i32
    return %c0_i32, %c0_i32_0, %c0_i32_1 : i32, i32, i32
  }
  func.func @transform_2(%arg0: i32) -> (i32, i32) {
    %c0_i32 = arith.constant 0 : i32
    %c0_i32_0 = arith.constant 0 : i32
    %c0_i32_1 = arith.constant 0 : i32
    return %c0_i32, %c0_i32_0 : i32, i32
  }
  func.func @transform_3(%arg0: i32) -> (i32, i32) {
    %c0_i32 = arith.constant 0 : i32
    %c0_i32_0 = arith.constant 0 : i32
    %c0_i32_1 = arith.constant 0 : i32
    return %c0_i32, %c0_i32_0 : i32, i32
  }
  func.func @transform_4(%arg0: i32) -> (i32, i32, i32) {
    %c0_i32 = arith.constant 0 : i32
    %c0_i32_0 = arith.constant 0 : i32
    %c0_i32_1 = arith.constant 0 : i32
    %c0_i32_2 = arith.constant 0 : i32
    return %c0_i32, %c0_i32_0, %c0_i32_1 : i32, i32, i32
  }
  func.func @transform_5(%arg0: i32) -> (i32, i32) {
    %c0_i32 = arith.constant 0 : i32
    %c0_i32_0 = arith.constant 0 : i32
    %c0_i32_1 = arith.constant 0 : i32
    return %c0_i32, %c0_i32_0 : i32, i32
  }
  func.func @transform_6(%arg0: i32) -> (i32, i32) {
    %c0_i32 = arith.constant 0 : i32
    %c0_i32_0 = arith.constant 0 : i32
    %c0_i32_1 = arith.constant 0 : i32
    return %c0_i32, %c0_i32_0 : i32, i32
  }
  func.func @transform_7(%arg0: i32) -> (i32, i32) {
    %c0_i32 = arith.constant 0 : i32
    %c0_i32_0 = arith.constant 0 : i32
    %c0_i32_1 = arith.constant 0 : i32
    return %c0_i32, %c0_i32_0 : i32, i32
  }
  func.func @transform_8(%arg0: i32) -> (i32, i32, i32) {
    %c0_i32 = arith.constant 0 : i32
    %c0_i32_0 = arith.constant 0 : i32
    %c0_i32_1 = arith.constant 0 : i32
    return %arg0, %c0_i32, %c0_i32_0 : i32, i32, i32
  }
}

</mosaic_0001>

<bundles_post_ra>
// kernel: basic_block_forward.1
= control target key start
LH: loop header
LB: loop body
LE: loop exit
PB: predicated region body
PF: predicated region fallthrough
CT: control target
= control target key end

     0   :  { %s10391_s27 = smov 0   ;;  %s17253_s0 = inlined_call_operand.vmem [shape: f32[2,576,8], index: 0, kind: input, shape index: {}]   ;;  %s17254_s1 = inlined_call_operand.vmem [shape: bf16[1,72,8], index: 1, kind: input, shape index: {}]   ;;  %s17255_s2 = inlined_call_operand.vmem [shape: f32[1,8], index: 2, kind: input, shape index: {}]   ;;  %s17256_s3 = inlined_call_operand.vmem [shape: f32[1,8], index: 3, kind: input, shape index: {}]   ;;  %s17257_s4 = inlined_call_operand.vmem [shape: bf16[1,72,8], index: 4, kind: input, shape index: {}]   ;;  %s17258_s5 = inlined_call_operand.vmem [shape: f32[1,8], index: 5, kind: input, shape index: {}]   ;;  %s17259_s6 = inlined_call_operand.vmem [shape: f32[1,8], index: 6, kind: input, shape index: {}]   ;;  %s17260_s7 = inlined_call_operand.vmem [shape: f32[512,8], index: 7, kind: input, shape index: {}]   ;;  %s17261_s8 = inlined_call_operand.vmem [shape: bf16[2,512,8], index: 8, kind: output, shape index: {}]  }
   0x1 LB: > { %s7317_s28 = sadd.s32 4294967295, %s10335_s27   ;;  %p7321_p0 = scmp.ge.s32.totalorder %s10335_s27, 1  ;;  %s10335_s27 = sphi %s10391_s27, %s18_s27  }
   0x2   : > { %p262_p1 = scmp.lt.s32.totalorder %s10335_s27, 3 }
   0x4   : > { %p263_p2 = pnand %p7321_p0, %p262_p1 }
   0x6   : > { %266 = sbr.rel (%p263_p2) target bundleno = 1659 (0x67b), region = 52 }
   0xb   : > { %p296_p3 = scmp.lt.s32.totalorder %s7317_s28, 1  ;;  %s10337_s11 = smov 8   ;;  %vm1037_vm0 = vcmask 1043456   ;;  %vm307_vm1 = vcmask 64512   ;;  %vm512_vm2 = vcmask 130048   ;;  %vm596_vm3 = vcmask 195584  }
   0xc   : > { %s10338_s12 = smov 16   ;;  %s10339_s13 = smov 24   ;;  %vm667_vm4 = vcmask 261120   ;;  %vm738_vm5 = vcmask 326656   ;;  %vm809_vm6 = vcmask 392192   ;;  %vm951_vm7 = vcmask 523264  }
   0xd   : > { %s18386_s28 = smov (!%p296_p3, %s7317_s28), 1  ;;  %s10340_s14 = smov 32   ;;  %vm880_vm8 = vcmask 457728   ;;  %vm1012_vm9 = vcmask 588800   ;;  %vm4626_vm10 = vcmask 60416  }
   0xe   : > { %s7552_s29 = smul.u32 576, %s18386_s28  ;;  %s10341_s15 = smov 40  }
   0xf   : > { %s10342_s16 = smov 48   ;;  %s10343_s17 = smov 56  }
  0x10   : > { %s10405_s10 = scalar_lea.vmem %s17253_s0, %s7552_s29  ;;  %s10344_s18 = smov 64  }
  0x11   : > { %v10408_v0 = vld [vmem:[%s10405_s10 + $0x48] sm:$0xff]  ;;  %v10411_v1 = vld [vmem:[%s10405_s10 + $0x50] sm:$0xff]  ;;  %v10431_v9 = vld [vmem:[%s10405_s10 + $0x58] sm:$0xff]  ;;  %s7519_s9 = sshll.u32 %s18386_s28, 8 }
  0x12   : > { %v10414_v2 = vld [vmem:[%s10405_s10 + $0x30] sm:$0xff]  ;;  %v10418_v3 = vpack.i.bf16 %v10411_v1, %v10408_v0  ;;  %v10421_v4 = vld [vmem:[%s10405_s10 + $0x28] sm:$0xff]  ;;  %v10434_v10 = vld [vmem:[%s10405_s10 + $0x60] sm:$0xff]  ;;  %s15526_s22 = scalar_lea.vmem %s17261_s8, %s7519_s9 }
  0x13   : > { %v7580_v5 = vpack.i.bf16 %v10414_v2, %v10421_v4  ;;  %v336_v6 = vld [vmem:[%s10405_s10 + $0x8] sm:$0xff]  ;;  %v337_v7 = vld [vmem:[%s10405_s10 + $0x10] sm:$0xff]  ;;  %v10437_v11 = vld [vmem:[%s10405_s10 + $0x38] sm:$0xff]  ;;  %v10449_v15 = vpack.i.bf16 %v10434_v10, %v10431_v9 }
  0x14   : > { %7591 = vrot.lane.b32.xlu2 %v10418_v3, %s10337_s11  ;;  %v7570_v8 = vpack.i.bf16 %v337_v7, %v336_v6  ;;  %v10441_v12 = vld [vmem:[%s10405_s10 + $0x40] sm:$0xff]  ;;  %v338_v14 = vld [vmem:[%s10405_s10 + $0x18] sm:$0xff]  ;;  %v432_v18 = vld [vmem:[%s10405_s10 + $0x9] sm:$0xff] }
  0x15   : > { %7581 = vrot.lane.b32.xlu1 %v7580_v5, %s10337_s11  ;;  %v10444_v13 = vld [vmem:[%s10405_s10 + $0x20] sm:$0xff]  ;;  %v10453_v16 = vpack.i.bf16 %v10441_v12, %v10437_v11  ;;  %v433_v19 = vld [vmem:[%s10405_s10 + $0x11] sm:$0xff]  ;;  %v10470_v22 = vld [vmem:[%s10405_s10 + $0x68] sm:$0xff] }
  0x16   : > { %7571 = vrot.lane.b32.xlu0 %v7570_v8, %s10337_s11  ;;  %v7575_v17 = vpack.i.bf16 %v10444_v13, %v338_v14  ;;  %v10464_v20 = vld [vmem:[%s10405_s10 + $0x78] sm:$0xff]  ;;  %v10467_v21 = vld [vmem:[%s10405_s10 + $0x80] sm:$0xff]  ;;  %v10473_v23 = vld [vmem:[%s10405_s10 + $0x70] sm:$0xff]  ;;  %v7610_v24 = vpack.i.bf16 %v433_v19, %v432_v18 }
  0x17   : > { %v10477_v25 = vpack.i.bf16 %v10467_v21, %v10464_v20  ;;  %v10481_v26 = vpack.i.bf16 %v10473_v23, %v10470_v22  ;;  %v10487_v27 = vld [vmem:[%s10405_s10 + $0x39] sm:$0xff]  ;;  %v10490_v28 = vld [vmem:[%s10405_s10 + $0x41] sm:$0xff]  ;;  %v10495_v29 = vld [vmem:[%s10405_s10 + $0x29] sm:$0xff] }
  0x18   : > { %v10498_v30 = vld [vmem:[%s10405_s10 + $0x31] sm:$0xff]  ;;  %v434_v31 = vld [vmem:[%s10405_s10 + $0x19] sm:$0xff]  ;;  %v10502_v32 = vld [vmem:[%s10405_s10 + $0x21] sm:$0xff]  ;;  %v10506_v33 = vpack.i.bf16 %v10490_v28, %v10487_v27 }
  0x19   : > { %v7620_v34 = vpack.i.bf16 %v10498_v30, %v10495_v29  ;;  %v7615_v35 = vpack.i.bf16 %v10502_v32, %v434_v31  ;;  %v10515_v36 = vld [vmem:[%s10405_s10 + $0x69] sm:$0xff]  ;;  %v10518_v37 = vld [vmem:[%s10405_s10 + $0x71] sm:$0xff]  ;;  %v10522_v38 = vld [vmem:[%s10405_s10 + $0x59] sm:$0xff]  ;;  %v7695_v31 = vpack.i.bf16 %v10437_v11, %v10414_v2 }
  0x1a   : > { %v10525_v39 = vld [vmem:[%s10405_s10 + $0x61] sm:$0xff]  ;;  %v10528_v40 = vld [vmem:[%s10405_s10 + $0x49] sm:$0xff]  ;;  %v10531_v41 = vld [vmem:[%s10405_s10 + $0x51] sm:$0xff]  ;;  %v10535_v42 = vpack.i.bf16 %v10518_v37, %v10515_v36 }
  0x1b   : > { %v10539_v43 = vpack.i.bf16 %v10525_v39, %v10522_v38  ;;  %v10543_v44 = vpack.i.bf16 %v10531_v41, %v10528_v40  ;;  %v10550_v45 = vld [vmem:[%s10405_s10 + $0x2f] sm:$0xff]  ;;  %v10553_v46 = vld [vmem:[%s10405_s10 + $0x37] sm:$0xff]  ;;  %v10558_v47 = vld [vmem:[%s10405_s10 + $0x1f] sm:$0xff] }
  0x1c   : > { %7596 = vrot.lane.b32.xlu2 %v10449_v15, %s10337_s11  ;;  %17627 = vst [vmem:[#allocation3_spill] sm:$0xff] %v10553_v46  ;;  %v10561_v48 = vld [vmem:[%s10405_s10 + $0x27] sm:$0xff]  ;;  %v10564_v49 = vld [vmem:[%s10405_s10 + $0x79] sm:$0xff]  ;;  %v7655_v51 = vpack.i.bf16 %v10553_v46, %v10550_v45  ;;  %v10588_v56 = vld [vmem:[%s10405_s10 + $0x4f] sm:$0xff] }
  0x1d   : > { %7586 = vrot.lane.b32.xlu1 %v10453_v16, %s10337_s11  ;;  %v10567_v50 = vld [vmem:[%s10405_s10 + $0x81] sm:$0xff]  ;;  %v7650_v52 = vpack.i.bf16 %v10561_v48, %v10558_v47  ;;  %17628 = vst [vmem:[#allocation4_spill] sm:$0xff] %v10588_v56  ;;  %v10591_v57 = vld [vmem:[%s10405_s10 + $0x57] sm:$0xff]  ;;  %v10608_v63 = vld [vmem:[%s10405_s10 + $0x8f] sm:$0xff] }
  0x1e   : > { %7576 = vrot.lane.b32.xlu0 %v7575_v17, %s10337_s11  ;;  %v10575_v53 = vpack.i.bf16 %v10567_v50, %v10564_v49  ;;  %v10580_v54 = vld [vmem:[%s10405_s10 + $0x5f] sm:$0xff]  ;;  %v10583_v55 = vld [vmem:[%s10405_s10 + $0x67] sm:$0xff]  ;;  %v7665_v61 = vpack.i.bf16 %v10591_v57, %v10588_v56  ;;  %v10611_v5 = vld [vmem:[%s10405_s10 + $0x97] sm:$0xff] }
  0x1f   : > { %v10594_v58 = vld [vmem:[%s10405_s10 + $0x3f] sm:$0xff]  ;;  %v10597_v59 = vld [vmem:[%s10405_s10 + $0x47] sm:$0xff]  ;;  %v7670_v60 = vpack.i.bf16 %v10583_v55, %v10580_v54  ;;  %v333_v8 = vld [vmem:[%s10405_s10 + $0x6f] sm:$0xff]  ;;  %v7685_v17 = vpack.i.bf16 %v10611_v5, %v10608_v63 }
  0x20   : > { %17629 = vst [vmem:[#allocation5_spill] sm:$0xff] %v10594_v58  ;;  %v7660_v62 = vpack.i.bf16 %v10597_v59, %v10594_v58  ;;  %v335_v6 = vld [vmem:[%s10405_s10 + $0x7f] sm:$0xff]  ;;  %v10616_v7 = vld [vmem:[%s10405_s10 + $0x87] sm:$0xff]  ;;  %v334_v14 = vld [vmem:[%s10405_s10 + $0x77] sm:$0xff] }
  0x21   : > { %17630 = vst [vmem:[#allocation6_spill] sm:$0xff] %v10597_v59  ;;  %v7680_v18 = vpack.i.bf16 %v10616_v7, %v335_v6  ;;  %v7675_v19 = vpack.i.bf16 %v334_v14, %v333_v8  ;;  %v10645_v2 = vld [vmem:[%s10405_s10 + $0x90] sm:$0xff]  ;;  %v613_v11 = vld [vmem:[%s10405_s10 + $0x88] sm:$0xff] }
  0x24   : > { %7611 = vrot.lane.b32.xlu2 %v7610_v24, %s10338_s12  ;;  %v7700_v24 = vpack.i.bf16 %v10408_v0, %v10441_v12  ;;  %v7705_v0 = vpack.i.bf16 %v10431_v9, %v10411_v1  ;;  %v7730_v12 = vpack.i.bf16 %v10495_v29, %v10502_v32  ;;  %v7720_v1 = vpack.i.bf16 %v613_v11, %v10467_v21  ;;  %v10687_v32 = vld [vmem:[%s10405_s10 + $0x91] sm:$0xff] }
  0x25   : > { %7606 = vrot.lane.b32.xlu1 %v10477_v25, %s10337_s11  ;;  %v7745_v9 = vpack.i.bf16 %v10522_v38, %v10531_v41  ;;  %v7795_v21 = vpack.i.bf16 %v10608_v63, %v10616_v7  ;;  %v7755_v29 = vpack.i.bf16 %v10564_v49, %v10518_v37  ;;  %v686_v38 = vld [vmem:[%s10405_s10 + $0x99] sm:$0xff]  ;;  %v7770_v37 = vpack.i.bf16 %v10594_v58, %v10553_v46 }
  0x26   : > { %7601 = vrot.lane.b32.xlu0 %v10481_v26, %s10337_s11  ;;  %v7790_v41 = vpack.i.bf16 %v335_v6, %v334_v14  ;;  %v7785_v49 = vpack.i.bf16 %v333_v8, %v10583_v55 }
  0x2c   : > { %7626 = vrot.lane.b32.xlu2 %v10506_v33, %s10338_s12 }
  0x2d   : > { %7621 = vrot.lane.b32.xlu1 %v7620_v34, %s10338_s12  ;;  %v7690_v34 = vpack.i.bf16 %v10421_v4, %v10444_v13  ;;  %v10648_v4 = vld [vmem:[%s10405_s10 + $0x98] sm:$0xff]  ;;  %v7740_v13 = vpack.i.bf16 %v10528_v40, %v10490_v28  ;;  %v7775_v40 = vpack.i.bf16 %v10588_v56, %v10597_v59  ;;  %v10954_v56 = vld [vmem:[%s10405_s10 + $0x101] sm:$0xff] }
  0x2e   : > { %7616 = vrot.lane.b32.xlu0 %v7615_v35, %s10338_s12  ;;  %v7715_v35 = vpack.i.bf16 %v10464_v20, %v10473_v23  ;;  %v7735_v20 = vpack.i.bf16 %v10487_v27, %v10498_v30  ;;  %v7750_v27 = vpack.i.bf16 %v10515_v36, %v10525_v39  ;;  %v7765_v36 = vpack.i.bf16 %v686_v38, %v10687_v32 }
  0x34   : > { %7641 = vrot.lane.b32.xlu2 %v10535_v42, %s10338_s12 }
  0x35   : > { %7636 = vrot.lane.b32.xlu1 %v10539_v43, %s10338_s12 }
  0x36   : > { %7631 = vrot.lane.b32.xlu0 %v10543_v44, %s10338_s12 }
  0x3c   : > { %7656 = vrot.lane.b32.xlu2 %v7655_v51, %s10339_s13  ;;  %v7710_v51 = vpack.i.bf16 %v10470_v22, %v10434_v10  ;;  %v7725_v10 = vpack.i.bf16 %v10648_v4, %v10645_v2  ;;  %v10670_v22 = vld [vmem:[%s10405_s10 + $0x89] sm:$0xff] }
  0x3d   : > { %7651 = vrot.lane.b32.xlu1 %v7650_v52, %s10339_s13  ;;  %v7760_v28 = vpack.i.bf16 %v10670_v22, %v10567_v50  ;;  %v7780_v50 = vpack.i.bf16 %v10580_v54, %v10591_v57  ;;  %v10706_v52 = vld [vmem:[%s10405_s10 + $0xa7] sm:$0xff] }
  0x3e   : > { %7646 = vrot.lane.b32.xlu0 %v10575_v53, %s10338_s12 }
  0x44   : > { %7671 = vrot.lane.b32.xlu2 %v7670_v60, %s10339_s13  ;;  %v10709_v60 = vld [vmem:[%s10405_s10 + $0xaf] sm:$0xff] }
  0x45   : > { %7666 = vrot.lane.b32.xlu1 %v7665_v61, %s10339_s13  ;;  %v7805_v54 = vpack.i.bf16 %v10709_v60, %v10706_v52 }
  0x46   : > { %7661 = vrot.lane.b32.xlu0 %v7660_v62, %s10339_s13  ;;  %v10715_v62 = vld [vmem:[%s10405_s10 + $0x9f] sm:$0xff] }
  0x47   : > { %v7800_v57 = vpack.i.bf16 %v10715_v62, %v10611_v5 }
  0x4c   : > { %7686 = vrot.lane.b32.xlu2 %v7685_v17, %s10339_s13 }
  0x4d   : > { %7681 = vrot.lane.b32.xlu1 %v7680_v18, %s10339_s13  ;;  %v7835_v18 = vpack.i.bf16 %v10645_v2, %v613_v11 }
  0x4e   : > { %7676 = vrot.lane.b32.xlu0 %v7675_v19, %s10339_s13 }
  0x54   : > { %7701 = vrot.lane.b32.xlu2 %v7700_v24, %s10340_s14  ;;  %v10763_v24 = vld [vmem:[%s10405_s10 + $0xa0] sm:$0xff] }
  0x55   : > { %7696 = vrot.lane.b32.xlu1 %v7695_v31, %s10340_s14 }
  0x56   : > { %7691 = vrot.lane.b32.xlu0 %v7690_v34, %s10340_s14 }
  0x5c   : > { %7716 = vrot.lane.b32.xlu2 %v7715_v35, %s10340_s14 }
  0x5d   : > { %7711 = vrot.lane.b32.xlu1 %v7710_v51, %s10340_s14 }
  0x5e   : > { %7706 = vrot.lane.b32.xlu0 %v7705_v0, %s10340_s14  ;;  %v10786_v0 = vld [vmem:[%s10405_s10 + $0xa1] sm:$0xff] }
  0x5f   : > { %v7880_v11 = vpack.i.bf16 %v10786_v0, %v686_v38  ;;  %v10851_v38 = vld [vmem:[%s10405_s10 + $0xf8] sm:$0xff] }
  0x64   : > { %7731 = vrot.lane.b32.xlu2 %v7730_v12, %s10341_s15  ;;  %v10808_v12 = vld [vmem:[%s10405_s10 + $0xa9] sm:$0xff] }
  0x65   : > { %7726 = vrot.lane.b32.xlu1 %v7725_v10, %s10340_s14  ;;  %v10811_v10 = vld [vmem:[%s10405_s10 + $0xb1] sm:$0xff] }
  0x66   : > { %7721 = vrot.lane.b32.xlu0 %v7720_v1, %s10340_s14 }
  0x6c   : > { %7746 = vrot.lane.b32.xlu2 %v7745_v9, %s10341_s15  ;;  %v7885_v9 = vpack.i.bf16 %v10811_v10, %v10808_v12 }
  0x6d   : > { %7741 = vrot.lane.b32.xlu1 %v7740_v13, %s10341_s15  ;;  %v10823_v13 = vld [vmem:[%s10405_s10 + $0xd0] sm:$0xff] }
  0x6e   : > { %7736 = vrot.lane.b32.xlu0 %v7735_v20, %s10341_s15  ;;  %v10673_v23 = vpop.permute.xlu2 %7591 }
  0x6f   : > { %17631 = vst [vmem:[#allocation7_spill] sm:$0xff] %v10673_v23  ;;  %v10999_v23 = vld [vmem:[%s10405_s10 + $0xc7] sm:$0xff] }
  0x74   : > { %7761 = vrot.lane.b32.xlu2 %v7760_v28, %s10341_s15 }
  0x75   : > { %7756 = vrot.lane.b32.xlu1 %v7755_v29, %s10341_s15 }
  0x76   : > { %7751 = vrot.lane.b32.xlu0 %v7750_v27, %s10341_s15  ;;  %v10684_v30 = vpop.permute.xlu2 %7596 }
  0x77   : > { %17632 = vst [vmem:[#allocation8_spill] sm:$0xff] %v10684_v30 }
  0x7c   : > { %7776 = vrot.lane.b32.xlu2 %v7775_v40, %s10342_s16  ;;  %v10854_v40 = vld [vmem:[%s10405_s10 + $0x100] sm:$0xff] }
  0x7d   : > { %7771 = vrot.lane.b32.xlu1 %v7770_v37, %s10342_s16 }
  0x7e   : > { %7766 = vrot.lane.b32.xlu0 %v7765_v36, %s10341_s15  ;;  %v10698_v39 = vpop.permute.xlu2 %7611  ;;  %v10860_v36 = vld [vmem:[%s10405_s10 + $0xe8] sm:$0xff] }
  0x84   : > { %7791 = vrot.lane.b32.xlu2 %v7790_v41, %s10342_s16  ;;  %v10863_v41 = vld [vmem:[%s10405_s10 + $0xf0] sm:$0xff] }
  0x85   : > { %7786 = vrot.lane.b32.xlu1 %v7785_v49, %s10342_s16 }
  0x86   : > { %7781 = vrot.lane.b32.xlu0 %v7780_v50, %s10342_s16  ;;  %v10712_v61 = vpop.permute.xlu2 %7626  ;;  %v10868_v50 = vld [vmem:[%s10405_s10 + $0xd8] sm:$0xff] }
  0x87   : > { %17633 = vst [vmem:[#allocation9_spill] sm:$0xff] %v10712_v61  ;;  %v10717_v63 = vpop.permute.xlu1 %7581 }
  0x88   : > { %v10719_v55 = vpop.permute.xlu0 %7571 }
  0x8c   : > { %7806 = vrot.lane.b32.xlu2 %v7805_v54, %s10342_s16  ;;  %v10871_v54 = vld [vmem:[%s10405_s10 + $0xe0] sm:$0xff] }
  0x8d   : > { %7801 = vrot.lane.b32.xlu1 %v7800_v57, %s10342_s16 }
  0x8e   : > { %7796 = vrot.lane.b32.xlu0 %v7795_v21, %s10342_s16  ;;  %v10728_v6 = vpop.permute.xlu2 %7641  ;;  %v10829_v21 = vld [vmem:[%s10405_s10 + $0xb8] sm:$0xff] }
  0x8f   : > { %17634 = vst [vmem:[#allocation10_spill] sm:$0xff] %v10728_v6  ;;  %v10730_v7 = vpop.permute.xlu1 %7586  ;;  %v10905_v6 = vld [vmem:[%s10405_s10 + $0xe1] sm:$0xff] }
  0x90   : > { %17635 = vst [vmem:[#allocation11_spill] sm:$0xff] %v10730_v7  ;;  %v10732_v8 = vpop.permute.xlu0 %7576  ;;  %v11061_v7 = vld [vmem:[%s10405_s10 + $0x10f] sm:$0xff] }
  0x91   : > { %17675 = vst [vmem:[#allocation51_spill] sm:$0xff] %v11061_v7 }
  0x94   : > { %7821 = vrot.lane.b32.xlu2 %v10449_v15, %s10343_s17  ;;  %v10755_v15 = vld [vmem:[%s10405_s10 + $0xa8] sm:$0xff] }
  0x95   : > { %7816 = vrot.lane.b32.xlu1 %v10418_v3, %s10343_s17 }
  0x96   : > { %7811 = vrot.lane.b32.xlu0 %v10453_v16, %s10343_s17  ;;  %v10740_v5 = vpop.permute.xlu2 %7656  ;;  %v10758_v16 = vld [vmem:[%s10405_s10 + $0xb0] sm:$0xff] }
  0x97   : > { %v10742_v14 = vpop.permute.xlu1 %7606  ;;  %v7845_v34 = vpack.i.bf16 %v10758_v16, %v10755_v15 }
  0x98   : > { %17636 = vst [vmem:[#allocation12_spill] sm:$0xff] %v10742_v14  ;;  %v10744_v17 = vpop.permute.xlu0 %7601 }
  0x99   : > { %17637 = vst [vmem:[#allocation13_spill] sm:$0xff] %v10744_v17 }
  0x9c   : > { %7836 = vrot.lane.b32.xlu2 %v7835_v18, %s10343_s17 }
  0x9d   : > { %7831 = vrot.lane.b32.xlu1 %v10477_v25, %s10343_s17  ;;  %v7840_v25 = vpack.i.bf16 %v10763_v24, %v10648_v4 }
  0x9e   : > { %7826 = vrot.lane.b32.xlu0 %v10481_v26, %s10343_s17  ;;  %v10752_v3 = vpop.permute.xlu2 %7671 }
  0x9f   : > { %17638 = vst [vmem:[#allocation14_spill] sm:$0xff] %v10752_v3  ;;  %v10760_v19 = vpop.permute.xlu1 %7621 }
  0xa0   : > { %v10765_v31 = vpop.permute.xlu0 %7616 }
  0xa4   : > { %7851 = vrot.lane.b32.xlu2 %v10506_v33, %s10344_s18 }
  0xa5   : > { %7846 = vrot.lane.b32.xlu1 %v7845_v34, %s10343_s17 }
  0xa6   : > { %7841 = vrot.lane.b32.xlu0 %v7840_v25, %s10343_s17  ;;  %v10775_v26 = vpop.permute.xlu2 %7686 }
  0xa7   : > { %17639 = vst [vmem:[#allocation15_spill] sm:$0xff] %v10775_v26  ;;  %v10777_v35 = vpop.permute.xlu1 %7636 }
  0xa8   : > { %17640 = vst [vmem:[#allocation16_spill] sm:$0xff] %v10777_v35  ;;  %v10779_v51 = vpop.permute.xlu0 %7631 }
  0xa9   : > { %17641 = vst [vmem:[#allocation17_spill] sm:$0xff] %v10779_v51  ;;  %v10996_v51 = vld [vmem:[%s10405_s10 + $0xbf] sm:$0xff] }
  0xac   : > { %7866 = vrot.lane.b32.xlu2 %v10535_v42, %s10344_s18  ;;  %v7875_v42 = vpack.i.bf16 %v10687_v32, %v10670_v22  ;;  %v10832_v22 = vld [vmem:[%s10405_s10 + $0xc0] sm:$0xff] }
  0xad   : > { %7861 = vrot.lane.b32.xlu1 %v10539_v43, %s10344_s18  ;;  %v10844_v32 = vpack.i.bf16 %v10832_v22, %v10829_v21 }
  0xae   : > { %7856 = vrot.lane.b32.xlu0 %v10543_v44, %s10344_s18  ;;  %v10790_v33 = vpop.permute.xlu2 %7701 }
  0xaf   : > { %v10792_v2 = vpop.permute.xlu1 %7651  ;;  %17648 = vst [vmem:[#allocation24_spill] sm:$0xff] %v10844_v32 }
  0xb0   : > { %v10794_v4 = vpop.permute.xlu0 %7646 }
  0xb1   : > { %17642 = vst [vmem:[#allocation18_spill] sm:$0xff] %v10794_v4 }
  0xb4   : > { %7881 = vrot.lane.b32.xlu2 %v7880_v11, %s10344_s18 }
  0xb5   : > { %7876 = vrot.lane.b32.xlu1 %v7875_v42, %s10344_s18 }
  0xb6   : > { %7871 = vrot.lane.b32.xlu0 %v10575_v53, %s10344_s18  ;;  %v10803_v43 = vpop.permute.xlu2 %7716  ;;  %v10820_v53 = vld [vmem:[%s10405_s10 + $0xc8] sm:$0xff] }
  0xb7   : > { %17643 = vst [vmem:[#allocation19_spill] sm:$0xff] %v10803_v43  ;;  %v10805_v44 = vpop.permute.xlu1 %7666  ;;  %v10840_v27 = vpack.i.bf16 %v10823_v13, %v10820_v53  ;;  %v10911_v43 = vld [vmem:[%s10405_s10 + $0xc9] sm:$0xff] }
  0xb8   : > { %17644 = vst [vmem:[#allocation20_spill] sm:$0xff] %v10805_v44  ;;  %v10813_v1 = vpop.permute.xlu0 %7661  ;;  %v11035_v44 = vld [vmem:[%s10405_s10 + $0xf7] sm:$0xff] }
  0xb9   : > { %17647 = vst [vmem:[#allocation23_spill] sm:$0xff] %v10840_v27 }
  0xba   : > { %17671 = vst [vmem:[#allocation47_spill] sm:$0xff] %v11035_v44 }
  0xbc   : > { %7896 = vrot.lane.b32.xlu2 %v7840_v25, %s10337_s11  ;;  %v10885_v25 = vpack.i.bf16 %v10871_v54, %v10868_v50 }
  0xbd   : > { %7891 = vrot.lane.b32.xlu1 %v7835_v18, %s10337_s11  ;;  %v10877_v18 = vpack.i.bf16 %v10854_v40, %v10851_v38 }
  0xbe   : > { %7886 = vrot.lane.b32.xlu0 %v7885_v9, %s10344_s18  ;;  %v10826_v20 = vpop.permute.xlu2 %7731  ;;  %17652 = vst [vmem:[#allocation28_spill] sm:$0xff] %v10885_v25 }
  0xbf   : > { %v10834_v28 = vpop.permute.xlu1 %7681  ;;  %17650 = vst [vmem:[#allocation26_spill] sm:$0xff] %v10877_v18 }
  0xc0   : > { %17645 = vst [vmem:[#allocation21_spill] sm:$0xff] %v10834_v28  ;;  %v10836_v29 = vpop.permute.xlu0 %7676  ;;  %v10902_v28 = vld [vmem:[%s10405_s10 + $0xd9] sm:$0xff] }
  0xc1   : > { %17646 = vst [vmem:[#allocation22_spill] sm:$0xff] %v10836_v29  ;;  %v10914_v29 = vld [vmem:[%s10405_s10 + $0xd1] sm:$0xff] }
  0xc4   : > { %7911 = vrot.lane.b32.xlu2 %v10840_v27, %s10337_s11  ;;  %v7520_v27 = vld [vmem:[%s17254_s1] sm:$0xff] }
  0xc5   : > { %7906 = vrot.lane.b32.xlu1 %v10844_v32, %s10337_s11 }
  0xc6   : > { %7901 = vrot.lane.b32.xlu0 %v7845_v34, %s10337_s11  ;;  %v10857_v37 = vpop.permute.xlu2 %7746  ;;  %v10881_v34 = vpack.i.bf16 %v10863_v41, %v10860_v36 }
  0xc7   : > { %17649 = vst [vmem:[#allocation25_spill] sm:$0xff] %v10857_v37  ;;  %v10865_v49 = vpop.permute.xlu1 %7696  ;;  %v11026_v37 = vld [vmem:[%s10405_s10 + $0x107] sm:$0xff] }
  0xc8   : > { %v10873_v57 = vpop.permute.xlu0 %7691  ;;  %17651 = vst [vmem:[#allocation27_spill] sm:$0xff] %v10881_v34 }
  0xc9   : > { %17669 = vst [vmem:[#allocation45_spill] sm:$0xff] %v11026_v37 }
  0xcc   : > { %7926 = vrot.lane.b32.xlu2 %v10877_v18, %s10337_s11  ;;  %v7522_v18 = vld [vmem:[%s17254_s1 + $0x10] sm:$0xff] }
  0xcd   : > { %7921 = vrot.lane.b32.xlu1 %v10881_v34, %s10337_s11 }
  0xce   : > { %7916 = vrot.lane.b32.xlu0 %v10885_v25, %s10337_s11  ;;  %v10893_v26 = vpop.permute.xlu2 %7761  ;;  %v10935_v25 = vpack.i.bf16 %v10914_v29, %v10911_v43 }
  0xcf   : > { %17653 = vst [vmem:[#allocation29_spill] sm:$0xff] %v10893_v26  ;;  %v10895_v4 = vpop.permute.xlu1 %7711  ;;  %v984_v26 = vld [vmem:[%s17254_s1 + $0x20] sm:$0xf] }
  0xd0   : > { %17654 = vst [vmem:[#allocation30_spill] sm:$0xff] %v10895_v4  ;;  %v10897_v14 = vpop.permute.xlu0 %7706  ;;  %v1002_v30 = vunpack.c.l.b16 %v984_v26  ;;  %v10931_v4 = vpack.i.bf16 %v10905_v6, %v10902_v28 }
  0xd1   : > { %17655 = vst [vmem:[#allocation31_spill] sm:$0xff] %v10897_v14  ;;  %v11032_v14 = vld [vmem:[%s10405_s10 + $0xef] sm:$0xff] }
  0xd2   : > { %17658 = vst [vmem:[#allocation34_spill] sm:$0xff] %v10931_v4 }
  0xd3   : > { %17659 = vst [vmem:[#allocation35_spill] sm:$0xff] %v10935_v25 }
  0xd4   : > { %7941 = vrot.lane.b32.xlu2 %v7885_v9, %s10338_s12  ;;  %v10925_v9 = vld [vmem:[%s10405_s10 + $0xc1] sm:$0xff] }
  0xd5   : > { %7936 = vrot.lane.b32.xlu1 %v7880_v11, %s10338_s12  ;;  %v10922_v11 = vld [vmem:[%s10405_s10 + $0xb9] sm:$0xff] }
  0xd6   : > { %7931 = vrot.lane.b32.xlu0 %v7875_v42, %s10338_s12  ;;  %v10908_v17 = vpop.permute.xlu2 %7776  ;;  %v10939_v3 = vpack.i.bf16 %v10925_v9, %v10922_v11 }
  0xd7   : > { %v10919_v35 = vpop.permute.xlu1 %7726 }
  0xd8   : > { %17656 = vst [vmem:[#allocation32_spill] sm:$0xff] %v10919_v35  ;;  %v10927_v42 = vpop.permute.xlu0 %7721  ;;  %v1007_v35 = vpack.c.b16 %v1002_v30, %v1002_v30  ;;  %v10951_v30 = vld [vmem:[%s10405_s10 + $0xf9] sm:$0xff] }
  0xd9   : > { %17657 = vst [vmem:[#allocation33_spill] sm:$0xff] %v10927_v42  ;;  %v10973_v59 = vpack.i.bf16 %v10954_v56, %v10951_v30 }
  0xda   : > { %17660 = vst [vmem:[#allocation36_spill] sm:$0xff] %v10939_v3  ;;  %v1039_v26 = vsel %vm1037_vm0, %v1007_v35, 0  ;;  %v7523_v35 = vld [vmem:[%s17254_s1 + $0x18] sm:$0xff] }
  0xdb   : > { %1044 = vmatpush.bf16.msra.mxu0 %v1039_v26  ;;  %v10962_v26 = vld [vmem:[%s10405_s10 + $0xe9] sm:$0xff]  ;;  %17662 = vst [vmem:[#allocation38_spill] sm:$0xff] %v10973_v59 }
  0xdc   : > { %7956 = vrot.lane.b32.xlu2 %v10931_v4, %s10338_s12 }
  0xdd   : > { %7951 = vrot.lane.b32.xlu1 %v10935_v25, %s10338_s12  ;;  %v10965_v25 = vld [vmem:[%s10405_s10 + $0xf1] sm:$0xff] }
  0xde   : > { %7946 = vrot.lane.b32.xlu0 %v10939_v3, %s10338_s12  ;;  %v10948_v42 = vpop.permute.xlu2 %7791  ;;  %v10977_v34 = vpack.i.bf16 %v10965_v25, %v10962_v26 }
  0xdf   : > { %17661 = vst [vmem:[#allocation37_spill] sm:$0xff] %v10948_v42  ;;  %v10959_v4 = vpop.permute.xlu1 %7741  ;;  %v7970_v42 = vpack.i.bf16 %v10706_v52, %v10715_v62  ;;  %1045 = vmatpush.bf16.msra.mxu0 %v7523_v35  ;;  %v10986_v52 = vld [vmem:[%s10405_s10 + $0xcf] sm:$0xff]  ;;  %v10989_v62 = vld [vmem:[%s10405_s10 + $0xd7] sm:$0xff] }
  0xe0   : > { %v10967_v3 = vpop.permute.xlu0 %7736  ;;  %17663 = vst [vmem:[#allocation39_spill] sm:$0xff] %v10977_v34 }
  0xe1   : > { %17664 = vst [vmem:[#allocation40_spill] sm:$0xff] %v10986_v52 }
  0xe3   : > { %1046 = vmatpush.bf16.msra.mxu0 %v7522_v18  ;;  %v11007_v18 = vld [vmem:[%s10405_s10 + $0xb7] sm:$0xff] }
  0xe4   : > { %7971 = vrot.lane.b32.xlu2 %v7970_v42, %s10339_s13  ;;  %v7521_v42 = vld [vmem:[%s17254_s1 + $0x8] sm:$0xff] }
  0xe5   : > { %7966 = vrot.lane.b32.xlu1 %v10973_v59, %s10338_s12 }
  0xe6   : > { %7961 = vrot.lane.b32.xlu0 %v10977_v34, %s10338_s12  ;;  %v10993_v35 = vpop.permute.xlu2 %7806  ;;  %v7980_v34 = vpack.i.bf16 %v10999_v23, %v10996_v51 }
  0xe7   : > { %17665 = vst [vmem:[#allocation41_spill] sm:$0xff] %v10993_v35  ;;  %v11004_v59 = vpop.permute.xlu1 %7756  ;;  %v7985_v35 = vpack.i.bf16 %v10989_v62, %v10986_v52  ;;  %1047 = vmatpush.bf16.msra.mxu0 %v7521_v42  ;;  %v7613_v52 = vunpack.i.l.bf16 %v10698_v39 }
  0xe8   : > { %17666 = vst [vmem:[#allocation42_spill] sm:$0xff] %v11004_v59  ;;  %v11009_v32 = vpop.permute.xlu0 %7751  ;;  %v7975_v59 = vpack.i.bf16 %v11007_v18, %v10709_v60 }
  0xe9   : > { %17667 = vst [vmem:[#allocation43_spill] sm:$0xff] %v11009_v32  ;;  %v11023_v32 = vld [vmem:[%s10405_s10 + $0xff] sm:$0xff] }
  0xea   : > { %17668 = vst [vmem:[#allocation44_spill] sm:$0xff] %v11023_v32 }
  0xeb   : > { %1048 = vmatpush.bf16.msra.mxu0 %v7520_v27  ;;  %v8000_v27 = vpack.i.bf16 %v11026_v37, %v11023_v32  ;;  %v11064_v32 = vld [vmem:[%s10405_s10 + $0x117] sm:$0xff]  ;;  %v8015_v37 = vpack.i.bf16 %v10829_v21, %v10758_v16  ;;  %v7653_v21 = vunpack.i.l.bf16 %v10792_v2 }
  0xec   : > { %7986 = vrot.lane.b32.xlu2 %v7985_v35, %s10339_s13  ;;  %v11040_v35 = vld [vmem:[%s10405_s10 + $0xdf] sm:$0xff]  ;;  %17676 = vst [vmem:[#allocation52_spill] sm:$0xff] %v11064_v32 }
  0xed   : > { %7981 = vrot.lane.b32.xlu1 %v7980_v34, %s10339_s13  ;;  %v11043_v34 = vld [vmem:[%s10405_s10 + $0xe7] sm:$0xff] }
  0xee   : > { %7976 = vrot.lane.b32.xlu0 %v7975_v59, %s10339_s13  ;;  %v11029_v42 = vpop.permute.xlu2 %7821  ;;  %v7995_v59 = vpack.i.bf16 %v11035_v44, %v11032_v14  ;;  %v7990_v46 = vpack.i.bf16 %v11043_v34, %v11040_v35 }
  0xef   : > { %17670 = vst [vmem:[#allocation46_spill] sm:$0xff] %v11029_v42  ;;  %v11037_v60 = vpop.permute.xlu1 %7771  ;;  %v321_v42 = vld [vmem:[%s10405_s10 + $0xf] sm:$0xff] }
  0xf0   : > { %v11045_v58 = vpop.permute.xlu0 %7766 }
  0xf1   : > { %17672 = vst [vmem:[#allocation48_spill] sm:$0xff] %v11045_v58 }
  0xf4   : > { %8001 = vrot.lane.b32.xlu2 %v8000_v27, %s10339_s13  ;;  %v8010_v27 = vpack.i.bf16 %v10755_v15, %v10763_v24  ;;  %v7614_v15 = vunpack.i.h.bf16 %v10698_v39  ;;  %v7694_v39 = vunpack.i.h.bf16 %v10873_v57 }
  0xf5   : > { %7996 = vrot.lane.b32.xlu1 %v7995_v59, %s10339_s13  ;;  %v8005_v59 = vpack.i.bf16 %v11064_v32, %v11061_v7 }
  0xf6   : > { %7991 = vrot.lane.b32.xlu0 %v7990_v46, %s10339_s13  ;;  %v11056_v61 = vpop.permute.xlu2 %7836  ;;  %v7573_v46 = vunpack.i.l.bf16 %v10719_v55 }
  0xf7   : > { %17673 = vst [vmem:[#allocation49_spill] sm:$0xff] %v11056_v61  ;;  %v11058_v58 = vpop.permute.xlu1 %7786  ;;  %v7574_v61 = vunpack.i.h.bf16 %v10719_v55 }
  0xf8   : > { %17674 = vst [vmem:[#allocation50_spill] sm:$0xff] %v11058_v58  ;;  %v11066_v44 = vpop.permute.xlu0 %7781  ;;  %v320_v58 = vld [vmem:[%s10405_s10 + $0x7] sm:$0xff] }
  0xf9   : > { %v416_v24 = vsel %vm307_vm1, %v320_v58, %v7573_v46  ;;  %v417_v55 = vsel %vm307_vm1, %v321_v42, %v7574_v61  ;;  %v8025_v58 = vpack.i.bf16 %v10868_v50, %v10823_v13  ;;  %v8020_v61 = vpack.i.bf16 %v10820_v53, %v10832_v22  ;;  %v11110_v53 = vld [vmem:[%s10405_s10 + $0x110] sm:$0xff]  ;;  %v11113_v22 = vld [vmem:[%s10405_s10 + $0x118] sm:$0xff] }
  0xfa   : > { %v513_v46 = vsel %vm512_vm2, %v416_v24, %v7613_v52  ;;  %v7774_v52 = vunpack.i.h.bf16 %v11037_v60  ;;  %v11121_v24 = vld [vmem:[%s10405_s10 + $0x108] sm:$0xff] }
  0xfb   : > { %v597_v42 = vsel %vm596_vm3, %v513_v46, %v7653_v21 }
  0xfc   : > { %8016 = vrot.lane.b32.xlu2 %v8015_v37, %s10340_s14  ;;  %v7654_v37 = vunpack.i.h.bf16 %v10792_v2  ;;  %v514_v2 = vsel %vm512_vm2, %v417_v55, %v7614_v15  ;;  %v7773_v15 = vunpack.i.l.bf16 %v11037_v60 }
  0xfd   : > { %8011 = vrot.lane.b32.xlu1 %v8010_v27, %s10340_s14  ;;  %v7693_v27 = vunpack.i.l.bf16 %v10873_v57  ;;  %v7734_v57 = vunpack.i.h.bf16 %v10826_v20 }
  0xfe   : > { %8006 = vrot.lane.b32.xlu0 %v8005_v59, %s10339_s13  ;;  %v7852_v16 = vpop.permute.xlu2 %7851  ;;  %v8030_v59 = vpack.i.bf16 %v10860_v36, %v10871_v54  ;;  %v7733_v36 = vunpack.i.l.bf16 %v10826_v20  ;;  %v598_v54 = vsel %vm596_vm3, %v514_v2, %v7654_v37 }
  0xff   : > { %v11085_v7 = vpop.permute.xlu1 %7801  ;;  %v668_v13 = vsel %vm667_vm4, %v597_v42, %v7693_v27  ;;  %v669_v50 = vsel %vm667_vm4, %v598_v54, %v7694_v39  ;;  %v7854_v27 = vunpack.i.h.bf16 %v7852_v16 }
 0x100   : > { %v11090_v32 = vpop.permute.xlu0 %7796  ;;  %v739_v21 = vsel %vm738_vm5, %v668_v13, %v7733_v36  ;;  %v740_v37 = vsel %vm738_vm5, %v669_v50, %v7734_v57  ;;  %v8035_v36 = vpack.i.bf16 %v10851_v38, %v10863_v41 }
 0x101   : > { %v810_v2 = vsel %vm809_vm6, %v739_v21, %v7773_v15  ;;  %v811_v42 = vsel %vm809_vm6, %v740_v37, %v7774_v52  ;;  %v8060_v52 = vpack.i.bf16 %v10911_v43, %v10925_v9  ;;  %v8055_v15 = vpack.i.bf16 %v10922_v11, %v10811_v10 }
 0x102   : > { %v8050_v21 = vpack.i.bf16 %v10808_v12, %v10786_v0  ;;  %v7579_v37 = vunpack.i.h.bf16 %v10732_v8  ;;  %v7659_v11 = vunpack.i.h.bf16 %v10740_v5 }
 0x104   : > { %8031 = vrot.lane.b32.xlu2 %v8030_v59, %s10340_s14  ;;  %v7853_v59 = vunpack.i.l.bf16 %v7852_v16  ;;  %v419_v0 = vsel %vm307_vm1, %v10558_v47, %v7579_v37  ;;  %v7738_v47 = vunpack.i.l.bf16 %v10967_v3 }
 0x105   : > { %8026 = vrot.lane.b32.xlu1 %v8025_v58, %s10340_s14  ;;  %v8045_v58 = vpack.i.bf16 %v11113_v22, %v11110_v53 }
 0x106   : > { %8021 = vrot.lane.b32.xlu0 %v8020_v61, %s10340_s14  ;;  %v11118_v20 = vpop.permute.xlu2 %7866  ;;  %v8040_v61 = vpack.i.bf16 %v11121_v24, %v10854_v40 }
 0x107   : > { %v11124_v55 = vpop.permute.xlu1 %7816 }
 0x108   : > { %v7812_v39 = vpop.permute.xlu0 %7811 }
 0x109   : > { %v7814_v60 = vunpack.i.h.bf16 %v7812_v39  ;;  %v7813_v46 = vunpack.i.l.bf16 %v7812_v39  ;;  %v7618_v39 = vunpack.i.l.bf16 %v10765_v31 }
 0x10b   : > { %v881_v16 = vsel %vm880_vm8, %v810_v2, %v7813_v46  ;;  %v882_v54 = vsel %vm880_vm8, %v811_v42, %v7814_v60  ;;  %v8075_v46 = vpack.i.bf16 %v10951_v30, %v10965_v25  ;;  %v7699_v2 = vunpack.i.h.bf16 %v10865_v49 }
 0x10c   : > { %8046 = vrot.lane.b32.xlu2 %v8045_v58, %s10340_s14  ;;  %v952_v57 = vsel %vm951_vm7, %v881_v16, %v7853_v59  ;;  %v953_v40 = vsel %vm951_vm7, %v882_v54, %v7854_v27  ;;  %v7578_v27 = vunpack.i.l.bf16 %v10732_v8  ;;  %v322_v59 = vld [vmem:[%s10405_s10 + $0x17] sm:$0xff]  ;;  %v7619_v58 = vunpack.i.h.bf16 %v10765_v31 }
 0x10d   : > { %8041 = vrot.lane.b32.xlu1 %v8040_v61, %s10340_s14  ;;  %v968_v13 = vpack.c.bf16 %v953_v40, %v952_v57  ;;  %v7658_v8 = vunpack.i.l.bf16 %v10740_v5  ;;  %v7698_v31 = vunpack.i.l.bf16 %v10865_v49  ;;  %v8070_v42 = vpack.i.bf16 %v10962_v26, %v10905_v6  ;;  %v11202_v40 = vld [vmem:[%s10405_s10 + $0x111] sm:$0xff] }
 0x10e   : > { %8036 = vrot.lane.b32.xlu0 %v8035_v36, %s10340_s14  ;;  %v11142_v50 = vpop.permute.xlu2 %7881  ;;  %v418_v10 = vsel %vm307_vm1, %v322_v59, %v7578_v27  ;;  %v516_v61 = vsel %vm512_vm2, %v419_v0, %v7619_v58  ;;  %v7739_v5 = vunpack.i.h.bf16 %v10967_v3  ;;  %v8065_v36 = vpack.i.bf16 %v10902_v28, %v10914_v29 }
 0x10f   : > { %7341 = vmatmul.msk.bf16.vlgmr.msra.gmra.mxu0 %vm1012_vm9, %v968_v13  ;;  %v11145_v38 = vpop.permute.xlu1 %7831  ;;  %v515_v9 = vsel %vm512_vm2, %v418_v10, %v7618_v39  ;;  %v600_v25 = vsel %vm596_vm3, %v516_v61, %v7659_v11  ;;  %v7778_v49 = vunpack.i.l.bf16 %v10908_v17  ;;  %v7779_v3 = vunpack.i.h.bf16 %v10908_v17  ;;  %v11205_v13 = vld [vmem:[%s10405_s10 + $0x119] sm:$0xff]  ;;  %v11210_v17 = vld [vmem:[%s10405_s10 + $0x109] sm:$0xff] }
 0x110   : > { %v11147_v41 = vpop.permute.xlu0 %7826  ;;  %v599_v16 = vsel %vm596_vm3, %v515_v9, %v7658_v8  ;;  %v671_v6 = vsel %vm667_vm4, %v600_v25, %v7699_v2  ;;  %v7819_v29 = vunpack.i.h.bf16 %v11124_v55  ;;  %v7818_v54 = vunpack.i.l.bf16 %v11124_v55 }
 0x111   : > { %v670_v30 = vsel %vm667_vm4, %v599_v16, %v7698_v31  ;;  %v742_v28 = vsel %vm738_vm5, %v671_v6, %v7739_v5  ;;  %v8090_v55 = vpack.i.bf16 %v10996_v51, %v11007_v18  ;;  %v8085_v58 = vpack.i.bf16 %v11205_v13, %v11202_v40 }
 0x112   : > { %v741_v26 = vsel %vm738_vm5, %v670_v30, %v7738_v47  ;;  %v813_v10 = vsel %vm809_vm6, %v742_v28, %v7779_v3  ;;  %v7623_v0 = vunpack.i.l.bf16 %v10760_v19  ;;  %v8080_v8 = vpack.i.bf16 %v11210_v17, %v10954_v56 }
 0x113   : > { %v812_v27 = vsel %vm809_vm6, %v741_v26, %v7778_v49  ;;  %v884_v11 = vsel %vm880_vm8, %v813_v10, %v7819_v29  ;;  %v7624_v51 = vunpack.i.h.bf16 %v10760_v19  ;;  %v7663_v18 = vunpack.i.l.bf16 %v10813_v1  ;;  %v17679_v26 = vld [vmem:[#allocation40_spill] sm:$0xff] }
 0x114   : > { %8061 = vrot.lane.b32.xlu2 %v8060_v52, %s10341_s15  ;;  %v7703_v5 = vunpack.i.l.bf16 %v10790_v33  ;;  %v7744_v16 = vunpack.i.h.bf16 %v10959_v4  ;;  %v7743_v25 = vunpack.i.l.bf16 %v10959_v4  ;;  %v8105_v49 = vpack.i.bf16 %v11032_v14, %v11043_v34  ;;  %v17682_v10 = vld [vmem:[#allocation52_spill] sm:$0xff] }
 0x115   : > { %8056 = vrot.lane.b32.xlu1 %v8055_v15, %s10341_s15  ;;  %v7584_v15 = vunpack.i.h.bf16 %v10717_v63  ;;  %v7784_v6 = vunpack.i.h.bf16 %v11066_v44  ;;  %v7783_v3 = vunpack.i.l.bf16 %v11066_v44  ;;  %v8095_v28 = vpack.i.bf16 %v17679_v26, %v10999_v23  ;;  %v17680_v44 = vld [vmem:[#allocation46_spill] sm:$0xff] }
 0x116   : > { %8051 = vrot.lane.b32.xlu0 %v8050_v21, %s10341_s15  ;;  %v11163_v43 = vpop.permute.xlu2 %7896  ;;  %v7583_v21 = vunpack.i.l.bf16 %v10717_v63  ;;  %v883_v63 = vsel %vm880_vm8, %v812_v27, %v7818_v54  ;;  %v11264_v54 = vpack.i.bf16 %v11110_v53, %v11121_v24  ;;  %v11277_v53 = vld [vmem:[%s10405_s10 + $0x11f] sm:$0xff] }
 0x117   : > { %v11169_v12 = vpop.permute.xlu1 %7846  ;;  %v421_v2 = vsel %vm307_vm1, %v10550_v45, %v7584_v15  ;;  %v7824_v15 = vunpack.i.h.bf16 %v17680_v44 }
 0x118   : > { %v11174_v60 = vpop.permute.xlu0 %7841  ;;  %v420_v56 = vsel %vm307_vm1, %v10561_v48, %v7583_v21  ;;  %v7823_v21 = vunpack.i.l.bf16 %v17680_v44  ;;  %v11321_v44 = vld [vmem:[%s10405_s10 + $0x127] sm:$0xff] }
 0x119   : > { %v517_v19 = vsel %vm512_vm2, %v420_v56, %v7623_v0  ;;  %v8120_v0 = vpack.i.bf16 %v11277_v53, %v17682_v10  ;;  %v17686_v56 = vld [vmem:[#allocation47_spill] sm:$0xff] }
 0x11a   : > { %v601_v48 = vsel %vm596_vm3, %v517_v19, %v7663_v18 }
 0x11b   : > { %v672_v29 = vsel %vm667_vm4, %v601_v48, %v7703_v5  ;;  %v17689_v5 = vld [vmem:[#allocation5_spill] sm:$0xff] }
 0x11c   : > { %8076 = vrot.lane.b32.xlu2 %v8075_v46, %s10341_s15  ;;  %v7664_v46 = vunpack.i.h.bf16 %v10813_v1  ;;  %v518_v1 = vsel %vm512_vm2, %v421_v2, %v7624_v51  ;;  %v743_v34 = vsel %vm738_vm5, %v672_v29, %v7743_v25  ;;  %v17687_v2 = vld [vmem:[#allocation44_spill] sm:$0xff] }
 0x11d   : > { %8071 = vrot.lane.b32.xlu1 %v8070_v42, %s10341_s15  ;;  %v7704_v42 = vunpack.i.h.bf16 %v10790_v33  ;;  %v8100_v33 = vpack.i.bf16 %v11040_v35, %v10989_v62  ;;  %v814_v23 = vsel %vm809_vm6, %v743_v34, %v7783_v3  ;;  %v8110_v19 = vpack.i.bf16 %v17687_v2, %v17686_v56 }
 0x11e   : > { %8066 = vrot.lane.b32.xlu0 %v8065_v36, %s10341_s15  ;;  %v11199_v57 = vpop.permute.xlu2 %7911  ;;  %v602_v45 = vsel %vm596_vm3, %v518_v1, %v7664_v46  ;;  %v17688_v1 = vld [vmem:[#allocation3_spill] sm:$0xff] }
 0x11f   : > { %17677 = vst [vmem:[#allocation53_spill] sm:$0xff] %v11199_v57  ;;  %v11207_v52 = vpop.permute.xlu1 %7861  ;;  %v673_v4 = vsel %vm667_vm4, %v602_v45, %v7704_v42  ;;  %v17690_v45 = vld [vmem:[#allocation20_spill] sm:$0xff] }
 0x120   : > { %v7857_v37 = vpop.permute.xlu0 %7856  ;;  %v744_v14 = vsel %vm738_vm5, %v673_v4, %v7744_v16  ;;  %v7864_v35 = vunpack.i.h.bf16 %v11207_v52  ;;  %v7669_v16 = vunpack.i.h.bf16 %v17690_v45  ;;  %v7668_v25 = vunpack.i.l.bf16 %v17690_v45  ;;  %v11777_v57 = vld [vmem:[%s10405_s10 + $0x147] sm:$0xff] }
 0x121   : > { %v7859_v59 = vunpack.i.h.bf16 %v7857_v37  ;;  %v7858_v39 = vunpack.i.l.bf16 %v7857_v37  ;;  %v815_v62 = vsel %vm809_vm6, %v744_v14, %v7784_v6  ;;  %v7863_v37 = vunpack.i.l.bf16 %v11207_v52 }
 0x122   : > { %v885_v52 = vsel %vm880_vm8, %v814_v23, %v7823_v21  ;;  %v17694_v21 = vld [vmem:[#allocation25_spill] sm:$0xff] }
 0x123   : > { %v954_v9 = vsel %vm951_vm7, %v883_v63, %v7858_v39  ;;  %v955_v31 = vsel %vm951_vm7, %v884_v11, %v7859_v59  ;;  %v17683_v63 = vld [vmem:[#allocation45_spill] sm:$0xff]  ;;  %v17684_v11 = vld [vmem:[#allocation51_spill] sm:$0xff]  ;;  %v956_v18 = vsel %vm951_vm7, %v885_v52, %v7863_v37  ;;  %v7749_v23 = vunpack.i.h.bf16 %v17694_v21 }
 0x124   : > { %8091 = vrot.lane.b32.xlu2 %v8090_v55, %s10342_s16  ;;  %v969_v61 = vpack.c.bf16 %v955_v31, %v954_v9  ;;  %v17681_v55 = vld [vmem:[#allocation11_spill] sm:$0xff]  ;;  %v8115_v51 = vpack.i.bf16 %v17684_v11, %v17683_v63  ;;  %v17685_v31 = vld [vmem:[#allocation9_spill] sm:$0xff]  ;;  %v7828_v52 = vunpack.i.l.bf16 %v11147_v41 }
 0x125   : > { %8086 = vrot.lane.b32.xlu1 %v8085_v58, %s10341_s15  ;;  %v7589_v27 = vunpack.i.h.bf16 %v17681_v55  ;;  %v7588_v59 = vunpack.i.l.bf16 %v17681_v55  ;;  %v7629_v46 = vunpack.i.h.bf16 %v17685_v31 }
 0x126   : > { %8081 = vrot.lane.b32.xlu0 %v8080_v8, %s10341_s15  ;;  %7342 = vmatmul.msk.bf16.gmra.mxu0 %vm1012_vm9, %v969_v61  ;;  %v11239_v47 = vpop.permute.xlu2 %7926  ;;  %v886_v8 = vsel %vm880_vm8, %v815_v62, %v7824_v15  ;;  %v7628_v61 = vunpack.i.l.bf16 %v17685_v31  ;;  %v11324_v15 = vld [vmem:[%s10405_s10 + $0x12f] sm:$0xff]  ;;  %v7748_v62 = vunpack.i.l.bf16 %v17694_v21  ;;  %v7869_v31 = vunpack.i.h.bf16 %v11118_v20 }
 0x127   : > { %17678 = vst [vmem:[#allocation54_spill] sm:$0xff] %v11239_v47  ;;  %v11245_v36 = vpop.permute.xlu1 %7876  ;;  %v957_v9 = vsel %vm951_vm7, %v886_v8, %v7864_v35  ;;  %v422_v42 = vsel %vm307_vm1, %v17688_v1, %v7588_v59  ;;  %v423_v48 = vsel %vm307_vm1, %v17689_v5, %v7589_v27  ;;  %v17695_v27 = vld [vmem:[#allocation50_spill] sm:$0xff]  ;;  %v8125_v8 = vpack.i.bf16 %v11324_v15, %v11321_v44  ;;  %v17700_v5 = vld [vmem:[#allocation7_spill] sm:$0xff]  ;;  %v17705_v21 = vld [vmem:[#allocation4_spill] sm:$0xff] }
 0x128   : > { %v11250_v30 = vpop.permute.xlu0 %7871  ;;  %v970_v3 = vpack.c.bf16 %v957_v9, %v956_v18  ;;  %v519_v26 = vsel %vm512_vm2, %v422_v42, %v7628_v61  ;;  %v7789_v59 = vunpack.i.h.bf16 %v17695_v27  ;;  %v7788_v10 = vunpack.i.l.bf16 %v17695_v27  ;;  %v17707_v27 = vld [vmem:[#allocation28_spill] sm:$0xff] }
 0x129   : > { %v603_v14 = vsel %vm596_vm3, %v519_v26, %v7668_v25  ;;  %v7593_v45 = vunpack.i.l.bf16 %v17700_v5  ;;  %v11368_v26 = vld [vmem:[%s10405_s10 + $0x128] sm:$0xff] }
 0x12c   : > { %8106 = vrot.lane.b32.xlu2 %v8105_v49, %s10342_s16  ;;  %v17691_v49 = vld [vmem:[#allocation31_spill] sm:$0xff] }
 0x12d   : > { %8101 = vrot.lane.b32.xlu1 %v8100_v33, %s10342_s16  ;;  %v7708_v6 = vunpack.i.l.bf16 %v17691_v49  ;;  %v7709_v33 = vunpack.i.h.bf16 %v17691_v49 }
 0x12e   : > { %8096 = vrot.lane.b32.xlu0 %v8095_v28, %s10342_s16  ;;  %v11280_v24 = vpop.permute.xlu2 %7941  ;;  %v520_v28 = vsel %vm512_vm2, %v423_v48, %v7629_v46  ;;  %v7868_v46 = vunpack.i.l.bf16 %v11118_v20  ;;  %v7594_v48 = vunpack.i.h.bf16 %v17700_v5 }
 0x12f   : > { %v11284_v39 = vpop.permute.xlu1 %7891  ;;  %v604_v4 = vsel %vm596_vm3, %v520_v28, %v7669_v16  ;;  %v674_v35 = vsel %vm667_vm4, %v603_v14, %v7708_v6  ;;  %v17701_v16 = vld [vmem:[#allocation17_spill] sm:$0xff]  ;;  %v17702_v6 = vld [vmem:[#allocation26_spill] sm:$0xff] }
 0x130   : > { %v11286_v58 = vpop.permute.xlu0 %7886  ;;  %v675_v55 = vsel %vm667_vm4, %v604_v4, %v7709_v33  ;;  %v745_v63 = vsel %vm738_vm5, %v674_v35, %v7748_v62  ;;  %v7634_v25 = vunpack.i.h.bf16 %v17701_v16  ;;  %v7633_v49 = vunpack.i.l.bf16 %v17701_v16  ;;  %v17703_v33 = vld [vmem:[#allocation27_spill] sm:$0xff]  ;;  %v11371_v28 = vld [vmem:[%s10405_s10 + $0x130] sm:$0xff]  ;;  %v17704_v4 = vld [vmem:[#allocation6_spill] sm:$0xff] }
 0x131   : > { %v746_v11 = vsel %vm738_vm5, %v675_v55, %v7749_v23  ;;  %v816_v18 = vsel %vm809_vm6, %v745_v63, %v7788_v10  ;;  %v424_v14 = vsel %vm307_vm1, %v17704_v4, %v7593_v45  ;;  %v425_v23 = vsel %vm307_vm1, %v17705_v21, %v7594_v48  ;;  %v17706_v62 = vld [vmem:[#allocation14_spill] sm:$0xff]  ;;  %v11385_v10 = vld [vmem:[%s10405_s10 + $0x120] sm:$0xff]  ;;  %v17711_v48 = vld [vmem:[#allocation37_spill] sm:$0xff] }
 0x132   : > { %v817_v9 = vsel %vm809_vm6, %v746_v11, %v7789_v59  ;;  %v887_v56 = vsel %vm880_vm8, %v816_v18, %v7828_v52  ;;  %v7674_v35 = vunpack.i.h.bf16 %v17706_v62  ;;  %v7673_v55 = vunpack.i.l.bf16 %v17706_v62  ;;  %v17710_v18 = vld [vmem:[#allocation43_spill] sm:$0xff] }
 0x133   : > { %v958_v42 = vsel %vm951_vm7, %v887_v56, %v7868_v46  ;;  %v522_v52 = vsel %vm512_vm2, %v425_v23, %v7634_v25  ;;  %v11403_v56 = vpack.i.bf16 %v11385_v10, %v11113_v22  ;;  %v7794_v45 = vunpack.i.h.bf16 %v17711_v48 }
 0x134   : > { %8121 = vrot.lane.b32.xlu2 %v8120_v0, %s10342_s16  ;;  %v7829_v0 = vunpack.i.h.bf16 %v11147_v41  ;;  %v17697_v41 = vld [vmem:[#allocation24_spill] sm:$0xff]  ;;  %v7793_v16 = vunpack.i.l.bf16 %v17711_v48  ;;  %v7833_v22 = vunpack.i.l.bf16 %v11145_v38 }
 0x135   : > { %8116 = vrot.lane.b32.xlu1 %v8115_v51, %s10342_s16  ;;  %v17696_v51 = vld [vmem:[#allocation23_spill] sm:$0xff] }
 0x136   : > { %8111 = vrot.lane.b32.xlu0 %v8110_v19, %s10342_s16  ;;  %7343 = vmatmul.msk.bf16.gmra.mxu0 %vm1012_vm9, %v970_v3  ;;  %v11314_v29 = vpop.permute.xlu2 %7956  ;;  %v888_v2 = vsel %vm880_vm8, %v817_v9, %v7829_v0  ;;  %v521_v0 = vsel %vm512_vm2, %v424_v14, %v7633_v49  ;;  %v7754_v9 = vunpack.i.h.bf16 %v17710_v18 }
 0x137   : > { %17692 = vst [vmem:[#allocation40_spill] sm:$0xff] %v11314_v29  ;;  %v11318_v34 = vpop.permute.xlu1 %7906  ;;  %v959_v20 = vsel %vm951_vm7, %v888_v2, %v7869_v31  ;;  %v7753_v31 = vunpack.i.l.bf16 %v17710_v18  ;;  %v605_v2 = vsel %vm596_vm3, %v521_v0, %v7673_v55  ;;  %v17715_v55 = vld [vmem:[#allocation8_spill] sm:$0xff] }
 0x138   : > { %17693 = vst [vmem:[#allocation46_spill] sm:$0xff] %v11318_v34  ;;  %v11329_v37 = vpop.permute.xlu0 %7901  ;;  %v971_v3 = vpack.c.bf16 %v959_v20, %v958_v42  ;;  %v606_v42 = vsel %vm596_vm3, %v522_v52, %v7674_v35 }
 0x13c   : > { %8136 = vrot.lane.b32.xlu2 %v17696_v51, %s10343_s17 }
 0x13d   : > { %8131 = vrot.lane.b32.xlu1 %v17697_v41, %s10343_s17  ;;  %v11399_v41 = vpack.i.bf16 %v11371_v28, %v11368_v26 }
 0x13e   : > { %8126 = vrot.lane.b32.xlu0 %v8125_v8, %s10342_s16  ;;  %v11349_v61 = vpop.permute.xlu2 %7971  ;;  %v17709_v8 = vld [vmem:[#allocation30_spill] sm:$0xff] }
 0x13f   : > { %v11353_v19 = vpop.permute.xlu1 %7921  ;;  %v7714_v63 = vunpack.i.h.bf16 %v17709_v8  ;;  %v7713_v11 = vunpack.i.l.bf16 %v17709_v8  ;;  %v7598_v8 = vunpack.i.l.bf16 %v17715_v55 }
 0x140   : > { %17698 = vst [vmem:[#allocation11_spill] sm:$0xff] %v11353_v19  ;;  %v11355_v1 = vpop.permute.xlu0 %7916 }
 0x141   : > { %17699 = vst [vmem:[#allocation52_spill] sm:$0xff] %v11355_v1  ;;  %v677_v20 = vsel %vm667_vm4, %v606_v42, %v7714_v63  ;;  %v676_v5 = vsel %vm667_vm4, %v605_v2, %v7713_v11  ;;  %v17716_v63 = vld [vmem:[#allocation16_spill] sm:$0xff]  ;;  %v17718_v42 = vld [vmem:[#allocation34_spill] sm:$0xff] }
 0x142   : > { %v747_v25 = vsel %vm738_vm5, %v676_v5, %v7753_v31  ;;  %v748_v49 = vsel %vm738_vm5, %v677_v20, %v7754_v9  ;;  %v7639_v11 = vunpack.i.h.bf16 %v17716_v63  ;;  %v7638_v18 = vunpack.i.l.bf16 %v17716_v63  ;;  %v17717_v9 = vld [vmem:[#allocation22_spill] sm:$0xff] }
 0x143   : > { %v819_v23 = vsel %vm809_vm6, %v748_v49, %v7794_v45  ;;  %v7679_v31 = vunpack.i.h.bf16 %v17717_v9  ;;  %v7678_v2 = vunpack.i.l.bf16 %v17717_v9  ;;  %v10134_v5 = vld [vmem:[%s10405_s10 + $0x5f] sm:$0xff]  ;;  %v11470_v63 = vpack.i.bf16 %v11202_v40, %v11210_v17 }
 0x144   : > { %8151 = vrot.lane.b32.xlu2 %v17702_v6, %s10343_s17  ;;  %v7834_v6 = vunpack.i.h.bf16 %v11145_v38  ;;  %v818_v38 = vsel %vm809_vm6, %v747_v25, %v7793_v16  ;;  %v17719_v45 = vld [vmem:[#allocation35_spill] sm:$0xff]  ;;  %v10135_v16 = vld [vmem:[%s10405_s10 + $0x57] sm:$0xff] }
 0x145   : > { %8146 = vrot.lane.b32.xlu1 %v17703_v33, %s10343_s17  ;;  %v7873_v33 = vunpack.i.l.bf16 %v11250_v30  ;;  %v426_v25 = vsel %vm307_vm1, %v10135_v16, %v7598_v8  ;;  %v17726_v16 = vld [vmem:[#allocation38_spill] sm:$0xff] }
 0x146   : > { %8141 = vrot.lane.b32.xlu0 %v17707_v27, %s10343_s17  ;;  %7344 = vmatmul.msk.bf16.gmra.mxu0 %vm1012_vm9, %v971_v3  ;;  %v11382_v59 = vpop.permute.xlu2 %7986  ;;  %v7874_v3 = vunpack.i.h.bf16 %v11250_v30  ;;  %v889_v30 = vsel %vm880_vm8, %v818_v38, %v7833_v22  ;;  %v890_v35 = vsel %vm880_vm8, %v819_v23, %v7834_v6  ;;  %v7599_v27 = vunpack.i.h.bf16 %v17715_v55  ;;  %v17720_v6 = vld [vmem:[#allocation36_spill] sm:$0xff] }
 0x147   : > { %17708 = vst [vmem:[#allocation45_spill] sm:$0xff] %v11382_v59  ;;  %v11391_v51 = vpop.permute.xlu1 %7936  ;;  %v960_v0 = vsel %vm951_vm7, %v889_v30, %v7873_v33  ;;  %v17721_v33 = vld [vmem:[#allocation19_spill] sm:$0xff]  ;;  %v11805_v59 = vld [vmem:[%s10405_s10 + $0x16f] sm:$0xff] }
 0x148   : > { %v11395_v46 = vpop.permute.xlu0 %7931  ;;  %v961_v52 = vsel %vm951_vm7, %v890_v35, %v7874_v3  ;;  %v427_v48 = vsel %vm307_vm1, %v10134_v5, %v7599_v27  ;;  %v523_v3 = vsel %vm512_vm2, %v426_v25, %v7638_v18  ;;  %v7719_v38 = vunpack.i.h.bf16 %v17721_v33  ;;  %v17723_v27 = vld [vmem:[#allocation42_spill] sm:$0xff]  ;;  %v17727_v25 = vld [vmem:[#allocation39_spill] sm:$0xff] }
 0x149   : > { %v972_v20 = vpack.c.bf16 %v961_v52, %v960_v0  ;;  %v524_v49 = vsel %vm512_vm2, %v427_v48, %v7639_v11  ;;  %v7718_v23 = vunpack.i.l.bf16 %v17721_v33  ;;  %v607_v55 = vsel %vm596_vm3, %v523_v3, %v7678_v2  ;;  %v11496_v3 = vld [vmem:[%s10405_s10 + $0x131] sm:$0xff] }
 0x14a   : > { %v608_v30 = vsel %vm596_vm3, %v524_v49, %v7679_v31  ;;  %v7759_v0 = vunpack.i.h.bf16 %v17723_v27  ;;  %v7758_v52 = vunpack.i.l.bf16 %v17723_v27  ;;  %v7799_v11 = vunpack.i.h.bf16 %v11090_v32  ;;  %v17729_v33 = vld [vmem:[#allocation13_spill] sm:$0xff] }
 0x14b   : > { %v7798_v18 = vunpack.i.l.bf16 %v11090_v32  ;;  %v678_v9 = vsel %vm667_vm4, %v607_v55, %v7718_v23  ;;  %v679_v31 = vsel %vm667_vm4, %v608_v30, %v7719_v38  ;;  %v7879_v48 = vunpack.i.h.bf16 %v11245_v36  ;;  %v11502_v30 = vld [vmem:[%s10405_s10 + $0x121] sm:$0xff] }
 0x14c   : > { %8166 = vrot.lane.b32.xlu2 %v11399_v41, %s10343_s17  ;;  %v750_v2 = vsel %vm738_vm5, %v679_v31, %v7759_v0  ;;  %v7604_v38 = vunpack.i.h.bf16 %v17729_v33 }
 0x14d   : > { %8161 = vrot.lane.b32.xlu1 %v11403_v56, %s10343_s17  ;;  %v821_v32 = vsel %vm809_vm6, %v750_v2, %v7799_v11  ;;  %v11518_v2 = vpack.i.bf16 %v11502_v30, %v11205_v13 }
 0x14e   : > { %8156 = vrot.lane.b32.xlu0 %v11264_v54, %s10343_s17  ;;  %v11423_v4 = vpop.permute.xlu2 %8001 }
 0x14f   : > { %17712 = vst [vmem:[#allocation51_spill] sm:$0xff] %v11423_v4  ;;  %v11427_v21 = vpop.permute.xlu1 %7951 }
 0x150   : > { %17713 = vst [vmem:[#allocation9_spill] sm:$0xff] %v11427_v21  ;;  %v11431_v62 = vpop.permute.xlu0 %7946  ;;  %v11774_v21 = vld [vmem:[%s10405_s10 + $0x13f] sm:$0xff] }
 0x151   : > { %17714 = vst [vmem:[#allocation47_spill] sm:$0xff] %v11431_v62 }
 0x154   : > { %8181 = vrot.lane.b32.xlu2 %v17718_v42, %s10344_s18  ;;  %v749_v42 = vsel %vm738_vm5, %v678_v9, %v7758_v52  ;;  %v17731_v9 = vld [vmem:[#allocation10_spill] sm:$0xff] }
 0x155   : > { %8176 = vrot.lane.b32.xlu1 %v17719_v45, %s10344_s18  ;;  %v820_v17 = vsel %vm809_vm6, %v749_v42, %v7798_v18  ;;  %v7878_v45 = vunpack.i.l.bf16 %v11245_v36  ;;  %v7603_v36 = vunpack.i.l.bf16 %v17729_v33  ;;  %v7644_v31 = vunpack.i.h.bf16 %v17731_v9 }
 0x156   : > { %8171 = vrot.lane.b32.xlu0 %v17720_v6, %s10344_s18  ;;  %7345 = vmatmul.msk.bf16.gmra.mxu0 %vm1012_vm9, %v972_v20  ;;  %v11455_v22 = vpop.permute.xlu2 %8016  ;;  %v17725_v20 = vld [vmem:[#allocation49_spill] sm:$0xff]  ;;  %v7643_v42 = vunpack.i.l.bf16 %v17731_v9 }
 0x157   : > { %v11461_v35 = vpop.permute.xlu1 %7966  ;;  %v7839_v5 = vunpack.i.h.bf16 %v17725_v20  ;;  %v7838_v40 = vunpack.i.l.bf16 %v17725_v20  ;;  %v11493_v6 = vld [vmem:[%s10405_s10 + $0x129] sm:$0xff]  ;;  %17765 = vst [vmem:[#allocation49_spill] sm:$0xff] %v11805_v59 }
 0x158   : > { %17722 = vst [vmem:[#allocation44_spill] sm:$0xff] %v11461_v35  ;;  %v11466_v8 = vpop.permute.xlu0 %7961  ;;  %v11511_v52 = vpack.i.bf16 %v11496_v3, %v11493_v6  ;;  %v10136_v20 = vld [vmem:[%s10405_s10 + $0x6f] sm:$0xff] }
 0x159   : > { %17724 = vst [vmem:[#allocation3_spill] sm:$0xff] %v11466_v8  ;;  %v891_v27 = vsel %vm880_vm8, %v820_v17, %v7838_v40  ;;  %v892_v0 = vsel %vm880_vm8, %v821_v32, %v7839_v5  ;;  %v429_v5 = vsel %vm307_vm1, %v10136_v20, %v7604_v38  ;;  %v17732_v40 = vld [vmem:[#allocation21_spill] sm:$0xff]  ;;  %v11536_v38 = vld [vmem:[%s10405_s10 + $0x138] sm:$0xff] }
 0x15a   : > { %v962_v11 = vsel %vm951_vm7, %v891_v27, %v7878_v45  ;;  %v963_v18 = vsel %vm951_vm7, %v892_v0, %v7879_v48  ;;  %v7684_v17 = vunpack.i.h.bf16 %v17732_v40  ;;  %v10137_v45 = vld [vmem:[%s10405_s10 + $0x67] sm:$0xff]  ;;  %v526_v9 = vsel %vm512_vm2, %v429_v5, %v7644_v31 }
 0x15b   : > { %v428_v48 = vsel %vm307_vm1, %v10137_v45, %v7603_v36  ;;  %v973_v13 = vpack.c.bf16 %v963_v18, %v962_v11  ;;  %v11539_v0 = vld [vmem:[%s10405_s10 + $0x140] sm:$0xff] }
 0x15c   : > { %8196 = vrot.lane.b32.xlu2 %v11470_v63, %s10344_s18  ;;  %v525_v36 = vsel %vm512_vm2, %v428_v48, %v7643_v42  ;;  %v610_v11 = vsel %vm596_vm3, %v526_v9, %v7684_v17  ;;  %v11558_v5 = vpack.i.bf16 %v11539_v0, %v11536_v38  ;;  %v7804_v48 = vunpack.i.h.bf16 %v11085_v7 }
 0x15d   : > { %8191 = vrot.lane.b32.xlu1 %v17726_v16, %s10344_s18  ;;  %v7683_v16 = vunpack.i.l.bf16 %v17732_v40  ;;  %v17736_v40 = vld [vmem:[#allocation29_spill] sm:$0xff]  ;;  %v7843_v9 = vunpack.i.l.bf16 %v11174_v60 }
 0x15e   : > { %8186 = vrot.lane.b32.xlu0 %v17727_v25, %s10344_s18  ;;  %v11490_v49 = vpop.permute.xlu2 %8031  ;;  %v17733_v25 = vld [vmem:[#allocation33_spill] sm:$0xff]  ;;  %v7764_v45 = vunpack.i.h.bf16 %v17736_v40  ;;  %17738 = vst [vmem:[#allocation23_spill] sm:$0xff] %v11558_v5 }
 0x15f   : > { %17728 = vst [vmem:[#allocation5_spill] sm:$0xff] %v11490_v49  ;;  %v11499_v23 = vpop.permute.xlu1 %7981  ;;  %v7724_v33 = vunpack.i.h.bf16 %v17733_v25  ;;  %v7723_v27 = vunpack.i.l.bf16 %v17733_v25  ;;  %v609_v20 = vsel %vm596_vm3, %v525_v36, %v7683_v16  ;;  %v7763_v25 = vunpack.i.l.bf16 %v17736_v40 }
 0x160   : > { %17730 = vst [vmem:[#allocation20_spill] sm:$0xff] %v11499_v23  ;;  %v11505_v55 = vpop.permute.xlu0 %7976  ;;  %v7803_v16 = vunpack.i.l.bf16 %v11085_v7  ;;  %v7884_v7 = vunpack.i.h.bf16 %v11142_v50  ;;  %v7525_v23 = vld [vmem:[%s17254_s1 + $0x8] sm:$0xff] }
 0x161   : > { %v680_v42 = vsel %vm667_vm4, %v609_v20, %v7723_v27  ;;  %v681_v17 = vsel %vm667_vm4, %v610_v11, %v7724_v33  ;;  %v7883_v11 = vunpack.i.l.bf16 %v11142_v50  ;;  %v11580_v20 = vld [vmem:[%s10405_s10 + $0x170] sm:$0xff] }
 0x162   : > { %v751_v36 = vsel %vm738_vm5, %v680_v42, %v7763_v25  ;;  %v752_v40 = vsel %vm738_vm5, %v681_v17, %v7764_v45  ;;  %v11587_v25 = vld [vmem:[%s10405_s10 + $0x158] sm:$0xff]  ;;  %v11590_v42 = vld [vmem:[%s10405_s10 + $0x160] sm:$0xff] }
 0x163   : > { %v822_v33 = vsel %vm809_vm6, %v751_v36, %v7803_v16  ;;  %v823_v27 = vsel %vm809_vm6, %v752_v40, %v7804_v48  ;;  %v11600_v16 = vld [vmem:[%s10405_s10 + $0x150] sm:$0xff]  ;;  %v11610_v40 = vpack.i.bf16 %v11590_v42, %v11587_v25 }
 0x164   : > { %8211 = vrot.lane.b32.xlu2 %v11264_v54, %s10337_s11  ;;  %v893_v17 = vsel %vm880_vm8, %v822_v33, %v7843_v9  ;;  %v17743_v33 = vld [vmem:[#allocation12_spill] sm:$0xff] }
 0x165   : > { %8206 = vrot.lane.b32.xlu1 %v11511_v52, %s10344_s18  ;;  %17742 = vst [vmem:[#allocation26_spill] sm:$0xff] %v11610_v40  ;;  %v7608_v32 = vunpack.i.l.bf16 %v17743_v33 }
 0x166   : > { %8201 = vrot.lane.b32.xlu0 %v11518_v2, %s10344_s18  ;;  %7346 = vmatmul.msk.bf16.gmra.mxu0 %vm1012_vm9, %v973_v13  ;;  %v11545_v54 = vpop.permute.xlu2 %8046  ;;  %v7844_v13 = vunpack.i.h.bf16 %v11174_v60  ;;  %v11577_v60 = vld [vmem:[%s10405_s10 + $0x168] sm:$0xff] }
 0x167   : > { %17734 = vst [vmem:[#allocation31_spill] sm:$0xff] %v11545_v54  ;;  %v11549_v18 = vpop.permute.xlu1 %7996  ;;  %v17745_v54 = vld [vmem:[#allocation18_spill] sm:$0xff] }
 0x168   : > { %17735 = vst [vmem:[#allocation25_spill] sm:$0xff] %v11549_v18  ;;  %v11554_v31 = vpop.permute.xlu0 %7991  ;;  %v894_v50 = vsel %vm880_vm8, %v823_v27, %v7844_v13  ;;  %v964_v13 = vsel %vm951_vm7, %v893_v17, %v7883_v11  ;;  %v7609_v27 = vunpack.i.h.bf16 %v17743_v33  ;;  %v7648_v35 = vunpack.i.l.bf16 %v17745_v54  ;;  %v10139_v17 = vld [vmem:[%s10405_s10 + $0x7f] sm:$0xff] }
 0x169   : > { %17737 = vst [vmem:[#allocation50_spill] sm:$0xff] %v11554_v31  ;;  %v965_v9 = vsel %vm951_vm7, %v894_v50, %v7884_v7  ;;  %v10138_v7 = vld [vmem:[%s10405_s10 + $0x77] sm:$0xff]  ;;  %v17746_v33 = vld [vmem:[#allocation15_spill] sm:$0xff] }
 0x16a   : > { %v974_v47 = vpack.c.bf16 %v965_v9, %v964_v13  ;;  %v430_v11 = vsel %vm307_vm1, %v10138_v7, %v7608_v32  ;;  %v431_v50 = vsel %vm307_vm1, %v10139_v17, %v7609_v27  ;;  %v7689_v4 = vunpack.i.h.bf16 %v17746_v33  ;;  %v17748_v7 = vld [vmem:[#allocation32_spill] sm:$0xff]  ;;  %v11648_v18 = vld [vmem:[%s10405_s10 + $0x180] sm:$0xff] }
 0x16b   : > { %v7688_v8 = vunpack.i.l.bf16 %v17746_v33  ;;  %v10345_v13 = vmov 0.0   ;;  %v527_v32 = vsel %vm512_vm2, %v430_v11, %v7648_v35  ;;  %v7729_v27 = vunpack.i.h.bf16 %v17748_v7  ;;  %v11645_v33 = vld [vmem:[%s10405_s10 + $0x178] sm:$0xff] }
 0x16c   : > { %8226 = vrot.lane.b32.xlu2 %v11558_v5, %s10337_s11  ;;  %309 = vst.msk [vmem:[#allocation2 + $0x8] sm:$0xff] %vm307_vm1, %v10345_v13  ;;  %v7728_v17 = vunpack.i.l.bf16 %v17748_v7  ;;  %v11661_v11 = vpack.i.bf16 %v11648_v18, %v11645_v33 }
 0x16d   : > { %8221 = vrot.lane.b32.xlu1 %v11399_v41, %s10337_s11  ;;  %v11597_v41 = vld [vmem:[%s10405_s10 + $0x148] sm:$0xff]  ;;  %310 = vst.msk [vmem:[#allocation2 + $0x10] sm:$0xff] %vm307_vm1, %v10345_v13  ;;  %v611_v35 = vsel %vm596_vm3, %v527_v32, %v7688_v8  ;;  %v7849_v32 = vunpack.i.h.bf16 %v11169_v12 }
 0x16e   : > { %8216 = vrot.lane.b32.xlu0 %v11403_v56, %s10337_s11  ;;  %v11584_v45 = vpop.permute.xlu2 %8061  ;;  %v11606_v56 = vpack.i.bf16 %v11580_v20, %v11577_v60  ;;  %v11618_v14 = vpack.i.bf16 %v11600_v16, %v11597_v41  ;;  %308 = vst.msk [vmem:[#allocation2] sm:$0xff] %vm307_vm1, %v10345_v13  ;;  %v682_v7 = vsel %vm667_vm4, %v611_v35, %v7728_v17  ;;  %v7888_v17 = vunpack.i.l.bf16 %v11286_v58  ;;  %v11681_v35 = vld [vmem:[%s10405_s10 + $0x149] sm:$0xff] }
 0x16f   : > { %17739 = vst [vmem:[#allocation24_spill] sm:$0xff] %v11584_v45  ;;  %v11594_v48 = vpop.permute.xlu1 %8011 }
 0x170   : > { %v11602_v36 = vpop.permute.xlu0 %8006  ;;  %17741 = vst [vmem:[#allocation17_spill] sm:$0xff] %v11606_v56 }
 0x171   : > { %17740 = vst [vmem:[#allocation7_spill] sm:$0xff] %v11602_v36  ;;  %v7649_v36 = vunpack.i.h.bf16 %v17745_v54 }
 0x172   : > { %17744 = vst [vmem:[#allocation27_spill] sm:$0xff] %v11618_v14 }
 0x173   : > { %v528_v9 = vsel %vm512_vm2, %v431_v50, %v7649_v36  ;;  %311 = vst.msk [vmem:[#allocation2 + $0x18] sm:$0xff] %vm307_vm1, %v10345_v13 }
 0x174   : > { %8241 = vrot.lane.b32.xlu2 %v11606_v56, %s10337_s11  ;;  %v612_v36 = vsel %vm596_vm3, %v528_v9, %v7689_v4  ;;  %17752 = vst [vmem:[#allocation28_spill] sm:$0xff] %v11661_v11  ;;  %v7848_v9 = vunpack.i.l.bf16 %v11169_v12 }
 0x175   : > { %8236 = vrot.lane.b32.xlu1 %v11610_v40, %s10337_s11  ;;  %312 = vst.msk [vmem:[#allocation2 + $0x220] sm:$0xff] %vm307_vm1, %v10345_v13  ;;  %v683_v50 = vsel %vm667_vm4, %v612_v36, %v7729_v27  ;;  %v7889_v27 = vunpack.i.h.bf16 %v11286_v58 }
 0x176   : > { %8231 = vrot.lane.b32.xlu0 %v11618_v14, %s10337_s11  ;;  %7347 = vmatmul.msk.bf16.gmra.mxu0 %vm1012_vm9, %v974_v47  ;;  %v11635_v54 = vpop.permute.xlu2 %8076  ;;  %v17750_v47 = vld [vmem:[#allocation48_spill] sm:$0xff]  ;;  %313 = vst.msk [vmem:[#allocation2 + $0x228] sm:$0xff] %vm307_vm1, %v10345_v13 }
 0x177   : > { %17747 = vst [vmem:[#allocation6_spill] sm:$0xff] %v11635_v54  ;;  %v11642_v19 = vpop.permute.xlu1 %8026  ;;  %v7769_v54 = vunpack.i.h.bf16 %v17750_v47  ;;  %v7768_v29 = vunpack.i.l.bf16 %v17750_v47  ;;  %v17753_v47 = vld [vmem:[#allocation41_spill] sm:$0xff] }
 0x178   : > { %17749 = vst [vmem:[#allocation4_spill] sm:$0xff] %v11642_v19  ;;  %v11653_v1 = vpop.permute.xlu0 %8021  ;;  %v7809_v49 = vunpack.i.h.bf16 %v17753_v47  ;;  %v7808_v31 = vunpack.i.l.bf16 %v17753_v47 }
 0x179   : > { %17751 = vst [vmem:[#allocation14_spill] sm:$0xff] %v11653_v1  ;;  %v753_v4 = vsel %vm738_vm5, %v682_v7, %v7768_v29  ;;  %v754_v8 = vsel %vm738_vm5, %v683_v50, %v7769_v54  ;;  %v11684_v29 = vld [vmem:[%s10405_s10 + $0x151] sm:$0xff]  ;;  %v11695_v54 = vld [vmem:[%s10405_s10 + $0x141] sm:$0xff]  ;;  %v17771_v1 = vpack.i.bf16 %v11368_v26, %v11385_v10 }
 0x17a   : > { %314 = vst.msk [vmem:[#allocation2 + $0x230] sm:$0xff] %vm307_vm1, %v10345_v13  ;;  %v825_v36 = vsel %vm809_vm6, %v754_v8, %v7809_v49  ;;  %v11720_v8 = vld [vmem:[%s10405_s10 + $0x179] sm:$0xff] }
 0x17b   : > { %315 = vst.msk [vmem:[#allocation2 + $0x238] sm:$0xff] %vm307_vm1, %v10345_v13  ;;  %v11705_v13 = vpack.i.bf16 %v11684_v29, %v11681_v35  ;;  %v896_v47 = vsel %vm880_vm8, %v825_v36, %v7849_v32  ;;  %v11739_v36 = vld [vmem:[%s10405_s10 + $0x159] sm:$0xff] }
 0x17c   : > { %8256 = vrot.lane.b32.xlu2 %v11518_v2, %s10338_s12  ;;  %v11692_v2 = vld [vmem:[%s10405_s10 + $0x139] sm:$0xff] }
 0x17d   : > { %8251 = vrot.lane.b32.xlu1 %v11470_v63, %s10338_s12  ;;  %v824_v63 = vsel %vm809_vm6, %v753_v4, %v7808_v31  ;;  %17756 = vst [vmem:[#allocation37_spill] sm:$0xff] %v11705_v13  ;;  %v967_v31 = vsel %vm951_vm7, %v896_v47, %v7889_v27  ;;  %v11731_v27 = vld [vmem:[%s10405_s10 + $0x169] sm:$0xff] }
 0x17e   : > { %8246 = vrot.lane.b32.xlu0 %v11661_v11, %s10337_s11  ;;  %v11689_v12 = vpop.permute.xlu2 %8091  ;;  %v895_v7 = vsel %vm880_vm8, %v824_v63, %v7848_v9  ;;  %v11723_v9 = vld [vmem:[%s10405_s10 + $0x181] sm:$0xff] }
 0x17f   : > { %v11697_v58 = vpop.permute.xlu1 %8041  ;;  %v966_v49 = vsel %vm951_vm7, %v895_v7, %v7888_v17  ;;  %v11734_v17 = vld [vmem:[%s10405_s10 + $0x171] sm:$0xff]  ;;  %v11742_v7 = vld [vmem:[%s10405_s10 + $0x161] sm:$0xff] }
 0x180   : > { %17754 = vst [vmem:[#allocation30_spill] sm:$0xff] %v11697_v58  ;;  %v11701_v50 = vpop.permute.xlu0 %8036  ;;  %v11711_v58 = vpack.i.bf16 %v11695_v54, %v11692_v2  ;;  %v975_v4 = vpack.c.bf16 %v967_v31, %v966_v49  ;;  %v11753_v49 = vld [vmem:[%s17255_s2] ss:$0 sm:$0xff]  ;;  %v11757_v31 = vpack.i.bf16 %v11734_v17, %v11731_v27 }
 0x181   : > { %17755 = vst [vmem:[#allocation43_spill] sm:$0xff] %v11701_v50  ;;  %v11766_v50 = vld [vmem:[%s17256_s3] ss:$0 sm:$0xff] }
 0x182   : > { %17757 = vst [vmem:[#allocation8_spill] sm:$0xff] %v11711_v58 }
 0x183   : > { %17760 = vst [vmem:[#allocation34_spill] sm:$0xff] %v11757_v31 }
 0x184   : > { %8271 = vrot.lane.b32.xlu2 %v11705_v13, %s10338_s12 }
 0x185   : > { %8266 = vrot.lane.b32.xlu1 %v11711_v58, %s10338_s12 }
 0x186   : > { %8261 = vrot.lane.b32.xlu0 %v11511_v52, %s10338_s12  ;;  %7348 = vmatmul.msk.bf16.gmra.mxu0 %vm1012_vm9, %v975_v4  ;;  %v11728_v32 = vpop.permute.xlu2 %8106  ;;  %v11748_v52 = vpack.i.bf16 %v11723_v9, %v11720_v8  ;;  %v11761_v4 = vpack.i.bf16 %v11742_v7, %v11739_v36 }
 0x187   : > { %17758 = vst [vmem:[#allocation16_spill] sm:$0xff] %v11728_v32  ;;  %v11736_v63 = vpop.permute.xlu1 %8056  ;;  %v11784_v32 = vld [vmem:[%s10405_s10 + $0x137] sm:$0xff] }
 0x188   : > { %v11744_v47 = vpop.permute.xlu0 %8051  ;;  %17759 = vst [vmem:[#allocation22_spill] sm:$0xff] %v11748_v52  ;;  %v8295_v19 = vpack.i.bf16 %v11784_v32, %v11324_v15 }
 0x189   : > { %17761 = vst [vmem:[#allocation35_spill] sm:$0xff] %v11761_v4 }
 0x18c   : > { %v1050_v58 = vpop.f32.mrf.mxu0  ;;  %8286 = vrot.lane.b32.xlu2 %v11748_v52, %s10338_s12 }
 0x18d   : > { %v1093_v13 = vmul.f32 %v11753_v49, %v1050_v58  ;;  %8281 = vrot.lane.b32.xlu1 %v11757_v31, %s10338_s12  ;;  %v1144_v58 = vld [vmem:[%s17260_s7] sm:$0xff] }
 0x18e   : > { %8276 = vrot.lane.b32.xlu0 %v11761_v4, %s10338_s12  ;;  %v11781_v11 = vpop.permute.xlu2 %8121  ;;  %v8300_v4 = vpack.i.bf16 %v11777_v57, %v11774_v21 }
 0x18f   : > { %17762 = vst [vmem:[#allocation36_spill] sm:$0xff] %v11781_v11  ;;  %v1112_v52 = vadd.f32 %v11766_v50, %v1093_v13  ;;  %v11787_v14 = vpop.permute.xlu1 %8071  ;;  %v8290_v13 = vpack.i.bf16 %v11321_v44, %v11277_v53  ;;  %v11814_v53 = vld [vmem:[%s10405_s10 + $0x15f] sm:$0xff]  ;;  %v11817_v44 = vld [vmem:[%s10405_s10 + $0x167] sm:$0xff] }
 0x190   : > { %17763 = vst [vmem:[#allocation19_spill] sm:$0xff] %v11787_v14  ;;  %v11792_v31 = vpop.permute.xlu0 %8066 }
 0x191   : > { %17764 = vst [vmem:[#allocation42_spill] sm:$0xff] %v11792_v31  ;;  %v1128_v11 = vmax.f32 %v1112_v52, 0.0  ;;  %v11808_v52 = vld [vmem:[%s10405_s10 + $0x177] sm:$0xff] }
 0x192   : > { %v8315_v62 = vpack.i.bf16 %v11808_v52, %v11805_v59 }
 0x193   : > { %v1160_v14 = vmul.f32 %v1144_v58, %v1128_v11 }
 0x194   : > { %v1052_v40 = vpop.f32.mrf.mxu0  ;;  %8301 = vrot.lane.b32.xlu2 %v8300_v4, %s10339_s13  ;;  %v11829_v4 = vld [vmem:[%s10405_s10 + $0x157] sm:$0xff] }
 0x195   : > { %1176 = vst.msk [vmem:[#allocation2 + $0x20] sm:$0xff] %vm307_vm1, %v1160_v14  ;;  %v1094_v31 = vmul.f32 %v11753_v49, %v1052_v40  ;;  %8296 = vrot.lane.b32.xlu1 %v8295_v19, %s10339_s13  ;;  %v1849_v14 = vld [vmem:[%s17254_s1 + $0x20] sm:$0xf]  ;;  %v11826_v19 = vld [vmem:[%s10405_s10 + $0x14f] sm:$0xff] }
 0x196   : > { %8291 = vrot.lane.b32.xlu0 %v8290_v13, %s10339_s13  ;;  %v11811_v15 = vpop.permute.xlu2 %8136  ;;  %v1867_v58 = vunpack.c.l.b16 %v1849_v14  ;;  %v1145_v13 = vld [vmem:[%s17260_s7 + $0x8] sm:$0xff]  ;;  %v8305_v14 = vpack.i.bf16 %v11829_v4, %v11826_v19 }
 0x197   : > { %v1113_v40 = vadd.f32 %v11766_v50, %v1094_v31  ;;  %v11823_v11 = vpop.permute.xlu1 %8086  ;;  %v8310_v31 = vpack.i.bf16 %v11817_v44, %v11814_v53 }
 0x198   : > { %17766 = vst [vmem:[#allocation38_spill] sm:$0xff] %v11823_v11  ;;  %v11834_v56 = vpop.permute.xlu0 %8081  ;;  %v1872_v11 = vpack.c.b16 %v1867_v58, %v1867_v58  ;;  %v11853_v58 = vld [vmem:[%s10405_s10 + $0x197] sm:$0xff] }
 0x199   : > { %17767 = vst [vmem:[#allocation39_spill] sm:$0xff] %v11834_v56  ;;  %v1129_v34 = vmax.f32 %v1113_v40, 0.0  ;;  %v11850_v56 = vld [vmem:[%s10405_s10 + $0x18f] sm:$0xff] }
 0x19a   : > { %v1902_v45 = vsel %vm1037_vm0, %v1872_v11, 0  ;;  %17769 = vst [vmem:[#allocation10_spill] sm:$0xff] %v11853_v58 }
 0x19b   : > { %v1161_v5 = vmul.f32 %v1145_v13, %v1129_v34  ;;  %1907 = vmatpush.bf16.msra.mxu1 %v1902_v45  ;;  %v7527_v34 = vld [vmem:[%s17254_s1 + $0x18] sm:$0xff]  ;;  %v11864_v45 = vld [vmem:[%s10405_s10 + $0x187] sm:$0xff]  ;;  %v8325_v13 = vpack.i.bf16 %v11853_v58, %v11850_v56 }
 0x19c   : > { %8316 = vrot.lane.b32.xlu2 %v8315_v62, %s10339_s13  ;;  %v11861_v62 = vld [vmem:[%s10405_s10 + $0x17f] sm:$0xff] }
 0x19d   : > { %1177 = vst.msk [vmem:[#allocation2 + $0x28] sm:$0xff] %vm307_vm1, %v1161_v5  ;;  %8311 = vrot.lane.b32.xlu1 %v8310_v31, %s10339_s13  ;;  %v8320_v31 = vpack.i.bf16 %v11864_v45, %v11861_v62 }
 0x19e   : > { %8306 = vrot.lane.b32.xlu0 %v8305_v14, %s10339_s13  ;;  %v11847_v40 = vpop.permute.xlu2 %8151  ;;  %v7526_v14 = vld [vmem:[%s17254_s1 + $0x10] sm:$0xff] }
 0x19f   : > { %17768 = vst [vmem:[#allocation13_spill] sm:$0xff] %v11847_v40  ;;  %v11858_v11 = vpop.permute.xlu1 %8101  ;;  %1908 = vmatpush.bf16.msra.mxu1 %v7527_v34 }
 0x1a0   : > { %17770 = vst [vmem:[#allocation21_spill] sm:$0xff] %v11858_v11  ;;  %v11866_v5 = vpop.permute.xlu0 %8096 }
 0x1a3   : > { %v1055_v40 = vpop.f32.mrf.mxu0  ;;  %1909 = vmatpush.bf16.msra.mxu1 %v7526_v14 }
 0x1a4   : > { %v1095_v11 = vmul.f32 %v11753_v49, %v1055_v40  ;;  %8331 = vrot.lane.b32.xlu2 %v17771_v1, %s10340_s14  ;;  %v1146_v40 = vld [vmem:[%s17260_s7 + $0x10] sm:$0xff] }
 0x1a5   : > { %8326 = vrot.lane.b32.xlu1 %v8325_v13, %s10339_s13  ;;  %v8340_v13 = vpack.i.bf16 %v11597_v41, %v11539_v0 }
 0x1a6   : > { %v1114_v34 = vadd.f32 %v11766_v50, %v1095_v11  ;;  %8321 = vrot.lane.b32.xlu0 %v8320_v31, %s10339_s13  ;;  %v11883_v58 = vpop.permute.xlu2 %8166  ;;  %v8345_v11 = vpack.i.bf16 %v11587_v25, %v11600_v16  ;;  %v8335_v31 = vpack.i.bf16 %v11536_v38, %v11371_v28  ;;  %v1147_v38 = vld [vmem:[%s17260_s7 + $0x18] sm:$0xff] }
 0x1a7   : > { %17772 = vst [vmem:[#allocation33_spill] sm:$0xff] %v11883_v58  ;;  %v11891_v26 = vpop.permute.xlu1 %8116  ;;  %1910 = vmatpush.bf16.msra.mxu1 %v7525_v23  ;;  %v7524_v58 = vld [vmem:[%s17254_s1] sm:$0xff]  ;;  %v11909_v23 = vld [vmem:[%s10405_s10 + $0x188] sm:$0xff] }
 0x1a8   : > { %v1130_v1 = vmax.f32 %v1114_v34, 0.0  ;;  %v11893_v10 = vpop.permute.xlu0 %8111  ;;  %v8360_v16 = vpack.i.bf16 %v11909_v23, %v11648_v18  ;;  %v11934_v18 = vld [vmem:[#allocation2 + $0x21] sm:$0xff] }
 0x1a9   : > { %17775 = vst [vmem:[#allocation18_spill] sm:$0xff] %v11934_v18  ;;  %v1193_v18 = vld [vmem:[%s10405_s10 + $0x8f] sm:$0xff] }
 0x1aa   : > { %v1162_v14 = vmul.f32 %v1146_v40, %v1130_v1  ;;  %v8350_v1 = vpack.i.bf16 %v11577_v60, %v11590_v42  ;;  %v1192_v42 = vld [vmem:[%s10405_s10 + $0x87] sm:$0xff] }
 0x1ab   : > { %v1057_v59 = vpop.f32.mrf.mxu0  ;;  %1911 = vmatpush.bf16.msra.mxu1 %v7524_v58  ;;  %v8355_v58 = vpack.i.bf16 %v11645_v33, %v11580_v20  ;;  %v1148_v33 = vld [vmem:[%s17260_s7 + $0x20] sm:$0xff] }
 0x1ac   : > { %1178 = vst.msk [vmem:[#allocation2 + $0x30] sm:$0xff] %vm307_vm1, %v1162_v14  ;;  %v1096_v34 = vmul.f32 %v11753_v49, %v1057_v59  ;;  %8346 = vrot.lane.b32.xlu2 %v8345_v11, %s10340_s14 }
 0x1ad   : > { %8341 = vrot.lane.b32.xlu1 %v8340_v13, %s10340_s14 }
 0x1ae   : > { %v1115_v0 = vadd.f32 %v11766_v50, %v1096_v34  ;;  %8336 = vrot.lane.b32.xlu0 %v8335_v31, %s10340_s14  ;;  %v11913_v28 = vpop.permute.xlu2 %8181  ;;  %v11948_v34 = vld [vmem:[%s10405_s10 + $0x190] sm:$0xff] }
 0x1af   : > { %v11918_v25 = vpop.permute.xlu1 %8131 }
 0x1b0   : > { %v1131_v59 = vmax.f32 %v1115_v0, 0.0  ;;  %v11920_v41 = vpop.permute.xlu0 %8126  ;;  %v11951_v0 = vld [vmem:[%s10405_s10 + $0x198] sm:$0xff] }
 0x1b1   : > { %17773 = vst [vmem:[#allocation29_spill] sm:$0xff] %v11920_v41  ;;  %v7939_v41 = vunpack.i.h.bf16 %v11391_v51 }
 0x1b2   : > { %v1163_v40 = vmul.f32 %v1147_v38, %v1131_v59  ;;  %v8375_v38 = vpack.i.bf16 %v11692_v2, %v11496_v3  ;;  %v7934_v2 = vunpack.i.h.bf16 %v11395_v46 }
 0x1b3   : > { %v1060_v11 = vpop.f32.mrf.mxu0  ;;  %v11928_v13 = vld [vmem:[#allocation2 + $0x29] sm:$0xff] }
 0x1b4   : > { %17774 = vst [vmem:[#allocation12_spill] sm:$0xff] %v11928_v13  ;;  %v1097_v31 = vmul.f32 %v11753_v49, %v1060_v11  ;;  %8361 = vrot.lane.b32.xlu2 %v8360_v16, %s10340_s14  ;;  %v7893_v11 = vunpack.i.l.bf16 %v11284_v39  ;;  %v7933_v13 = vunpack.i.l.bf16 %v11395_v46  ;;  %v1149_v46 = vld [vmem:[%s17260_s7 + $0x28] sm:$0xff] }
 0x1b5   : > { %1179 = vst.msk [vmem:[#allocation2 + $0x38] sm:$0xff] %vm307_vm1, %v1163_v40  ;;  %8356 = vrot.lane.b32.xlu1 %v8355_v58, %s10340_s14  ;;  %v8365_v40 = vpack.i.bf16 %v11951_v0, %v11948_v34 }
 0x1b6   : > { %v1116_v20 = vadd.f32 %v11766_v50, %v1097_v31  ;;  %8351 = vrot.lane.b32.xlu0 %v8350_v1, %s10340_s14  ;;  %v11938_v60 = vpop.permute.xlu2 %8196  ;;  %v7894_v1 = vunpack.i.h.bf16 %v11284_v39 }
 0x1b7   : > { %v11945_v14 = vpop.permute.xlu1 %8146 }
 0x1b8   : > { %v1132_v59 = vmax.f32 %v1116_v20, 0.0  ;;  %v11955_v16 = vpop.permute.xlu0 %8141  ;;  %v17776_v20 = vpack.i.bf16 %v11493_v6, %v11502_v30 }
 0x1ba   : > { %v1164_v58 = vmul.f32 %v1148_v33, %v1132_v59  ;;  %v1289_v59 = vsel %vm307_vm1, %v1193_v18, %v7894_v1  ;;  %v8390_v18 = vpack.i.bf16 %v11731_v27, %v11742_v7  ;;  %v8053_v1 = vunpack.i.l.bf16 %v11744_v47 }
 0x1bb   : > { %v1062_v31 = vpop.f32.mrf.mxu0 }
 0x1bc   : > { %1180 = vst.msk [vmem:[#allocation2 + $0x40] sm:$0xff] %vm307_vm1, %v1164_v58  ;;  %v1098_v3 = vmul.f32 %v11753_v49, %v1062_v31  ;;  %8376 = vrot.lane.b32.xlu2 %v8375_v38, %s10341_s15  ;;  %v1288_v58 = vsel %vm307_vm1, %v1192_v42, %v7893_v11  ;;  %v7974_v31 = vunpack.i.h.bf16 %v11349_v61  ;;  %v7973_v38 = vunpack.i.l.bf16 %v11349_v61 }
 0x1bd   : > { %8371 = vrot.lane.b32.xlu1 %v17776_v20, %s10341_s15  ;;  %v1384_v30 = vsel %vm512_vm2, %v1288_v58, %v7933_v13  ;;  %v1385_v42 = vsel %vm512_vm2, %v1289_v59, %v7934_v2  ;;  %v8014_v61 = vunpack.i.h.bf16 %v11594_v48  ;;  %v8385_v11 = vpack.i.bf16 %v11739_v36, %v11684_v29  ;;  %v12013_v59 = vld [vmem:[%s10405_s10 + $0x191] sm:$0xff] }
 0x1be   : > { %v1117_v39 = vadd.f32 %v11766_v50, %v1098_v3  ;;  %8366 = vrot.lane.b32.xlu0 %v8365_v40, %s10340_s14  ;;  %v11974_v33 = vpop.permute.xlu2 %8211  ;;  %v8013_v40 = vunpack.i.l.bf16 %v11594_v48  ;;  %v1467_v58 = vsel %vm596_vm3, %v1384_v30, %v7973_v38  ;;  %v1468_v7 = vsel %vm596_vm3, %v1385_v42, %v7974_v31  ;;  %v12016_v31 = vld [vmem:[%s10405_s10 + $0x199] sm:$0xff] }
 0x1bf   : > { %17777 = vst [vmem:[#allocation15_spill] sm:$0xff] %v11974_v33  ;;  %v11983_v6 = vpop.permute.xlu1 %8161  ;;  %v8054_v33 = vunpack.i.h.bf16 %v11744_v47  ;;  %v8093_v2 = vunpack.i.l.bf16 %v11689_v12  ;;  %v8133_v30 = vunpack.i.l.bf16 %v11918_v25  ;;  %v7899_v42 = vunpack.i.h.bf16 %v11163_v43 }
 0x1c0   : > { %17778 = vst [vmem:[#allocation32_spill] sm:$0xff] %v11983_v6  ;;  %v1133_v3 = vmax.f32 %v1117_v39, 0.0  ;;  %v11987_v20 = vpop.permute.xlu0 %8156  ;;  %v8380_v39 = vpack.i.bf16 %v11681_v35, %v11695_v54  ;;  %v1537_v48 = vsel %vm667_vm4, %v1467_v58, %v8013_v40  ;;  %v1538_v35 = vsel %vm667_vm4, %v1468_v7, %v8014_v61  ;;  %v1194_v7 = vld [vmem:[%s10405_s10 + $0x97] sm:$0xff] }
 0x1c1   : > { %v8094_v54 = vunpack.i.h.bf16 %v11689_v12  ;;  %v1607_v47 = vsel %vm738_vm5, %v1537_v48, %v8053_v1  ;;  %v1608_v38 = vsel %vm738_vm5, %v1538_v35, %v8054_v33  ;;  %v7898_v61 = vunpack.i.l.bf16 %v11163_v43  ;;  %v1150_v33 = vld [vmem:[%s17260_s7 + $0x30] sm:$0xff] }
 0x1c2   : > { %v1165_v13 = vmul.f32 %v1149_v46, %v1133_v3  ;;  %v8134_v46 = vunpack.i.h.bf16 %v11918_v25  ;;  %v12026_v3 = vld [vmem:[%s10405_s10 + $0x189] sm:$0xff]  ;;  %v8405_v58 = vpack.i.bf16 %v12016_v31, %v12013_v59  ;;  %v8395_v1 = vpack.i.bf16 %v11720_v8, %v11734_v17 }
 0x1c3   : > { %v1065_v27 = vpop.f32.mrf.mxu0  ;;  %v12006_v36 = vld [vmem:[#allocation2 + $0x40] sm:$0xff]  ;;  %v1678_v35 = vsel %vm809_vm6, %v1608_v38, %v8094_v54  ;;  %v1290_v8 = vsel %vm307_vm1, %v1194_v7, %v7898_v61  ;;  %v7979_v17 = vunpack.i.h.bf16 %v11505_v55  ;;  %v8018_v61 = vunpack.i.l.bf16 %v11455_v22 }
 0x1c4   : > { %1181 = vst.msk [vmem:[#allocation2 + $0x48] sm:$0xff] %vm307_vm1, %v1165_v13  ;;  %v1099_v29 = vmul.f32 %v11753_v49, %v1065_v27  ;;  %8391 = vrot.lane.b32.xlu2 %v8390_v18, %s10341_s15  ;;  %v12028_v18 = vld [vmem:[#allocation2 + $0x38] sm:$0xff]  ;;  %v1677_v27 = vsel %vm809_vm6, %v1607_v47, %v8093_v2  ;;  %v7978_v2 = vunpack.i.l.bf16 %v11505_v55  ;;  %v8058_v7 = vunpack.i.l.bf16 %v11736_v63 }
 0x1c5   : > { %17779 = vst [vmem:[#allocation48_spill] sm:$0xff] %v12006_v36  ;;  %8386 = vrot.lane.b32.xlu1 %v8385_v11, %s10341_s15  ;;  %v7938_v11 = vunpack.i.l.bf16 %v11391_v51 }
 0x1c6   : > { %v1118_v40 = vadd.f32 %v11766_v50, %v1099_v29  ;;  %8381 = vrot.lane.b32.xlu0 %v8380_v39, %s10341_s15  ;;  %v12023_v12 = vpop.permute.xlu2 %8226  ;;  %17781 = vst [vmem:[#allocation55_spill] sm:$0xff] %v12028_v18  ;;  %v8400_v29 = vpack.i.bf16 %v12026_v3, %v11723_v9  ;;  %v1748_v18 = vsel %vm880_vm8, %v1678_v35, %v8134_v46  ;;  %v10140_v46 = vld [vmem:[%s10405_s10 + $0x9f] sm:$0xff] }
 0x1c7   : > { %17780 = vst [vmem:[#allocation41_spill] sm:$0xff] %v12023_v12  ;;  %v12035_v25 = vpop.permute.xlu1 %8176 }
 0x1c8   : > { %v1134_v13 = vmax.f32 %v1118_v40, 0.0  ;;  %v8172_v39 = vpop.permute.xlu0 %8171  ;;  %v1747_v40 = vsel %vm880_vm8, %v1677_v27, %v8133_v30  ;;  %v1291_v30 = vsel %vm307_vm1, %v10140_v46, %v7899_v42  ;;  %v8178_v46 = vunpack.i.l.bf16 %v12035_v25 }
 0x1c9   : > { %v8174_v43 = vunpack.i.h.bf16 %v8172_v39  ;;  %v8173_v48 = vunpack.i.l.bf16 %v8172_v39 }
 0x1ca   : > { %v1166_v12 = vmul.f32 %v1150_v33, %v1134_v13  ;;  %v12068_v33 = vld [vmem:[#allocation2 + $0x39] sm:$0xff] }
 0x1cb   : > { %v1067_v47 = vpop.f32.mrf.mxu0  ;;  %v1817_v39 = vsel %vm951_vm7, %v1747_v40, %v8173_v48  ;;  %v1818_v9 = vsel %vm951_vm7, %v1748_v18, %v8174_v43  ;;  %v12055_v6 = vld [vmem:[#allocation2 + $0x48] sm:$0xff]  ;;  %v1386_v18 = vsel %vm512_vm2, %v1290_v8, %v7938_v11  ;;  %17784 = vst [vmem:[#allocation58_spill] sm:$0xff] %v12068_v33  ;;  %v1387_v11 = vsel %vm512_vm2, %v1291_v30, %v7939_v41 }
 0x1cc   : > { %17782 = vst [vmem:[#allocation56_spill] sm:$0xff] %v12055_v6  ;;  %v12057_v54 = vld [vmem:[#allocation2 + $0x41] sm:$0xff]  ;;  %v1100_v38 = vmul.f32 %v11753_v49, %v1067_v47  ;;  %8406 = vrot.lane.b32.xlu2 %v8405_v58, %s10341_s15  ;;  %v1833_v51 = vpack.c.bf16 %v1818_v9, %v1817_v39  ;;  %v8019_v58 = vunpack.i.h.bf16 %v11455_v22  ;;  %v1469_v27 = vsel %vm596_vm3, %v1386_v18, %v7978_v2  ;;  %v17840_v6 = vld [vmem:[#allocation25_spill] sm:$0xff] }
 0x1cd   : > { %17783 = vst [vmem:[#allocation57_spill] sm:$0xff] %v12057_v54  ;;  %8401 = vrot.lane.b32.xlu1 %v8400_v29, %s10341_s15  ;;  %v1470_v48 = vsel %vm596_vm3, %v1387_v11, %v7979_v17  ;;  %v8059_v29 = vunpack.i.h.bf16 %v11736_v63  ;;  %v8420_v22 = vpack.i.bf16 %v11814_v53, %v11829_v4  ;;  %v8099_v41 = vunpack.i.h.bf16 %v11866_v5 }
 0x1ce   : > { %1182 = vst.msk [vmem:[#allocation2 + $0x50] sm:$0xff] %vm307_vm1, %v1166_v12  ;;  %v1119_v55 = vadd.f32 %v11766_v50, %v1100_v38  ;;  %8396 = vrot.lane.b32.xlu0 %v8395_v1, %s10341_s15  ;;  %7365 = vmatmul.msk.bf16.vlgmr.msra.gmra.mxu1 %vm1012_vm9, %v1833_v51  ;;  %v12074_v12 = vpop.permute.xlu2 %8241  ;;  %v1151_v1 = vld [vmem:[%s17260_s7 + $0x38] sm:$0xff]  ;;  %v8098_v2 = vunpack.i.l.bf16 %v11866_v5  ;;  %v8415_v47 = vpack.i.bf16 %v11826_v19, %v11777_v57  ;;  %v8139_v4 = vunpack.i.h.bf16 %v11811_v15 }
 0x1cf   : > { %17785 = vst [vmem:[#allocation59_spill] sm:$0xff] %v12074_v12  ;;  %v12087_v43 = vpop.permute.xlu1 %8191  ;;  %v1539_v39 = vsel %vm667_vm4, %v1469_v27, %v8018_v61  ;;  %v8410_v8 = vpack.i.bf16 %v11774_v21, %v11784_v32  ;;  %v1540_v63 = vsel %vm667_vm4, %v1470_v48, %v8019_v58  ;;  %v8138_v5 = vunpack.i.l.bf16 %v11811_v15  ;;  %v17863_v12 = vld [vmem:[#allocation36_spill] sm:$0xff] }
 0x1d0   : > { %v1135_v35 = vmax.f32 %v1119_v55, 0.0  ;;  %v12091_v40 = vpop.permute.xlu0 %8186  ;;  %v1609_v17 = vsel %vm738_vm5, %v1539_v39, %v8058_v7  ;;  %v1610_v53 = vsel %vm738_vm5, %v1540_v63, %v8059_v29  ;;  %v8179_v19 = vunpack.i.h.bf16 %v12035_v25  ;;  %v1152_v25 = vld [vmem:[%s17260_s7 + $0x40] sm:$0xff]  ;;  %v17788_v63 = vld [vmem:[#allocation20_spill] sm:$0xff] }
 0x1d1   : > { %v1679_v21 = vsel %vm809_vm6, %v1609_v17, %v8098_v2  ;;  %v1680_v32 = vsel %vm809_vm6, %v1610_v53, %v8099_v41  ;;  %v7903_v30 = vunpack.i.l.bf16 %v11329_v37  ;;  %v7904_v55 = vunpack.i.h.bf16 %v11329_v37  ;;  %v10141_v2 = vld [vmem:[%s10405_s10 + $0xa7] sm:$0xff]  ;;  %v17790_v53 = vld [vmem:[#allocation14_spill] sm:$0xff] }
 0x1d2   : > { %v1167_v9 = vmul.f32 %v1151_v1, %v1135_v35  ;;  %v8435_v7 = vpack.i.bf16 %v11850_v56, %v11864_v45  ;;  %v1749_v1 = vsel %vm880_vm8, %v1679_v21, %v8138_v5  ;;  %v1750_v48 = vsel %vm880_vm8, %v1680_v32, %v8139_v4  ;;  %v17787_v56 = vld [vmem:[#allocation49_spill] sm:$0xff] }
 0x1d3   : > { %v1070_v38 = vpop.f32.mrf.mxu0  ;;  %v7943_v29 = vunpack.i.l.bf16 %v11280_v24  ;;  %v8430_v37 = vpack.i.bf16 %v11861_v62, %v11808_v52  ;;  %v1819_v35 = vsel %vm951_vm7, %v1749_v1, %v8178_v46  ;;  %v7944_v41 = vunpack.i.h.bf16 %v11280_v24 }
 0x1d4   : > { %1183 = vst.msk [vmem:[#allocation2 + $0x58] sm:$0xff] %vm307_vm1, %v1167_v9  ;;  %v1101_v57 = vmul.f32 %v11753_v49, %v1070_v38  ;;  %8421 = vrot.lane.b32.xlu2 %v8420_v22, %s10342_s16  ;;  %v1820_v22 = vsel %vm951_vm7, %v1750_v48, %v8179_v19  ;;  %v8425_v45 = vpack.i.bf16 %v17787_v56, %v11817_v44  ;;  %v10142_v9 = vld [vmem:[%s10405_s10 + $0xaf] sm:$0xff]  ;;  %v7984_v17 = vunpack.i.h.bf16 %v17788_v63 }
 0x1d5   : > { %v12104_v51 = vld [vmem:[#allocation2 + $0x50] sm:$0xff]  ;;  %8416 = vrot.lane.b32.xlu1 %v8415_v47, %s10342_s16  ;;  %v1292_v47 = vsel %vm307_vm1, %v10141_v2, %v7903_v30  ;;  %v7983_v52 = vunpack.i.l.bf16 %v17788_v63  ;;  %v8023_v24 = vunpack.i.l.bf16 %v17790_v53  ;;  %v1834_v44 = vpack.c.bf16 %v1820_v22, %v1819_v35  ;;  %v12168_v30 = vld [vmem:[%s10405_s10 + $0x1a7] sm:$0xff]  ;;  %v12185_v35 = vld [vmem:[%s10405_s10 + $0x19f] sm:$0xff] }
 0x1d6   : > { %17786 = vst [vmem:[#allocation60_spill] sm:$0xff] %v12104_v51  ;;  %v1120_v15 = vadd.f32 %v11766_v50, %v1101_v57  ;;  %8411 = vrot.lane.b32.xlu0 %v8410_v8, %s10342_s16  ;;  %v12120_v18 = vpop.permute.xlu2 %8256  ;;  %v1293_v8 = vsel %vm307_vm1, %v10142_v9, %v7904_v55  ;;  %v1388_v5 = vsel %vm512_vm2, %v1292_v47, %v7943_v29  ;;  %v8024_v57 = vunpack.i.h.bf16 %v17790_v53  ;;  %v12159_v21 = vld [vmem:[#allocation2 + $0x49] sm:$0xff] }
 0x1d7   : > { %v12128_v11 = vpop.permute.xlu1 %8206  ;;  %17791 = vst [vmem:[#allocation20_spill] sm:$0xff] %v12159_v21  ;;  %v1389_v32 = vsel %vm512_vm2, %v1293_v8, %v7944_v41  ;;  %v1153_v29 = vld [vmem:[%s17260_s7 + $0x48] sm:$0xff]  ;;  %v17794_v41 = vld [vmem:[#allocation21_spill] sm:$0xff]  ;;  %v8143_v9 = vunpack.i.l.bf16 %v11955_v16  ;;  %v8144_v63 = vunpack.i.h.bf16 %v11955_v16  ;;  %v17798_v16 = vld [vmem:[#allocation23_spill] sm:$0xff] }
 0x1d8   : > { %v1136_v58 = vmax.f32 %v1120_v15, 0.0  ;;  %v12130_v27 = vpop.permute.xlu0 %8201  ;;  %v12171_v15 = vld [vmem:[%s10405_s10 + $0x1af] sm:$0xff]  ;;  %v8103_v2 = vunpack.i.l.bf16 %v17794_v41 }
 0x1d9   : > { %v8445_v8 = vpack.i.bf16 %v12171_v15, %v12168_v30  ;;  %v17821_v21 = vld [vmem:[#allocation9_spill] sm:$0xff] }
 0x1da   : > { %v1168_v39 = vmul.f32 %v1152_v25, %v1136_v58  ;;  %v1472_v25 = vsel %vm596_vm3, %v1389_v32, %v7984_v17  ;;  %v1471_v58 = vsel %vm596_vm3, %v1388_v5, %v7983_v52  ;;  %v17795_v52 = vld [vmem:[#allocation10_spill] sm:$0xff] }
 0x1db   : > { %v1072_v62 = vpop.f32.mrf.mxu0  ;;  %v12150_v38 = vld [vmem:[#allocation2 + $0x51] sm:$0xff]  ;;  %v1541_v22 = vsel %vm667_vm4, %v1471_v58, %v8023_v24  ;;  %v1542_v56 = vsel %vm667_vm4, %v1472_v25, %v8024_v57  ;;  %v8184_v25 = vunpack.i.h.bf16 %v11913_v28  ;;  %v8183_v58 = vunpack.i.l.bf16 %v11913_v28 }
 0x1dc   : > { %17789 = vst [vmem:[#allocation49_spill] sm:$0xff] %v12150_v38  ;;  %v1102_v4 = vmul.f32 %v11753_v49, %v1072_v62  ;;  %8436 = vrot.lane.b32.xlu2 %v8435_v7, %s10342_s16  ;;  %v17793_v7 = vld [vmem:[#allocation24_spill] sm:$0xff]  ;;  %v8440_v62 = vpack.i.bf16 %v12185_v35, %v17795_v52 }
 0x1dd   : > { %1184 = vst.msk [vmem:[#allocation2 + $0x60] sm:$0xff] %vm307_vm1, %v1168_v39  ;;  %8431 = vrot.lane.b32.xlu1 %v8430_v37, %s10342_s16  ;;  %v8064_v1 = vunpack.i.h.bf16 %v17793_v7  ;;  %v8063_v48 = vunpack.i.l.bf16 %v17793_v7 }
 0x1de   : > { %v1121_v19 = vadd.f32 %v11766_v50, %v1102_v4  ;;  %8426 = vrot.lane.b32.xlu0 %v8425_v45, %s10342_s16  ;;  %7366 = vmatmul.msk.bf16.gmra.mxu1 %vm1012_vm9, %v1834_v44  ;;  %v12165_v46 = vpop.permute.xlu2 %8271  ;;  %v8104_v45 = vunpack.i.h.bf16 %v17794_v41 }
 0x1df   : > { %17792 = vst [vmem:[#allocation14_spill] sm:$0xff] %v12165_v46  ;;  %v12182_v37 = vpop.permute.xlu1 %8221  ;;  %v1611_v53 = vsel %vm738_vm5, %v1541_v22, %v8063_v48  ;;  %v1612_v5 = vsel %vm738_vm5, %v1542_v56, %v8064_v1  ;;  %v12215_v1 = vld [vmem:[#allocation2 + $0x58] sm:$0xff] }
 0x1e0   : > { %v1137_v47 = vmax.f32 %v1121_v19, 0.0  ;;  %v12189_v39 = vpop.permute.xlu0 %8216  ;;  %v1681_v57 = vsel %vm809_vm6, %v1611_v53, %v8103_v2  ;;  %v1682_v19 = vsel %vm809_vm6, %v1612_v5, %v8104_v45  ;;  %17799 = vst [vmem:[#allocation10_spill] sm:$0xff] %v12215_v1  ;;  %v1154_v2 = vld [vmem:[%s17260_s7 + $0x50] sm:$0xff]  ;;  %v17802_v56 = vld [vmem:[#allocation46_spill] sm:$0xff] }
 0x1e1   : > { %v1751_v7 = vsel %vm880_vm8, %v1681_v57, %v8143_v9  ;;  %v1752_v22 = vsel %vm880_vm8, %v1682_v19, %v8144_v63  ;;  %v7909_v45 = vunpack.i.h.bf16 %v17802_v56  ;;  %v7908_v63 = vunpack.i.l.bf16 %v17802_v56 }
 0x1e2   : > { %v1169_v17 = vmul.f32 %v1153_v29, %v1137_v47  ;;  %v1822_v52 = vsel %vm951_vm7, %v1752_v22, %v8184_v25 }
 0x1e3   : > { %v1075_v24 = vpop.f32.mrf.mxu0 }
 0x1e4   : > { %v12200_v4 = vld [vmem:[#allocation2 + $0x60] sm:$0xff]  ;;  %1185 = vst.msk [vmem:[#allocation2 + $0x68] sm:$0xff] %vm307_vm1, %v1169_v17  ;;  %v1103_v32 = vmul.f32 %v11753_v49, %v1075_v24  ;;  %8451 = vrot.lane.b32.xlu2 %v17798_v16, %s10343_s17  ;;  %v1821_v17 = vsel %vm951_vm7, %v1751_v7, %v8183_v58  ;;  %v17805_v16 = vld [vmem:[#allocation17_spill] sm:$0xff] }
 0x1e5   : > { %17796 = vst [vmem:[#allocation24_spill] sm:$0xff] %v12200_v4  ;;  %v12202_v44 = vld [vmem:[#allocation2 + $0x59] sm:$0xff]  ;;  %8446 = vrot.lane.b32.xlu1 %v8445_v8, %s10342_s16  ;;  %v1835_v19 = vpack.c.bf16 %v1822_v52, %v1821_v17 }
 0x1e6   : > { %17797 = vst [vmem:[#allocation21_spill] sm:$0xff] %v12202_v44  ;;  %v1122_v48 = vadd.f32 %v11766_v50, %v1103_v32  ;;  %8441 = vrot.lane.b32.xlu0 %v8440_v62, %s10342_s16  ;;  %v12219_v29 = vpop.permute.xlu2 %8286  ;;  %v17804_v62 = vld [vmem:[#allocation47_spill] sm:$0xff]  ;;  %v10144_v7 = vld [vmem:[%s10405_s10 + $0xb7] sm:$0xff] }
 0x1e7   : > { %17800 = vst [vmem:[#allocation23_spill] sm:$0xff] %v12219_v29  ;;  %v12229_v47 = vpop.permute.xlu1 %8236  ;;  %v7948_v53 = vunpack.i.l.bf16 %v17804_v62  ;;  %v7949_v5 = vunpack.i.h.bf16 %v17804_v62  ;;  %v10143_v58 = vld [vmem:[%s10405_s10 + $0xbf] sm:$0xff]  ;;  %v1294_v22 = vsel %vm307_vm1, %v10144_v7, %v7908_v63  ;;  %v12579_v29 = vld [vmem:[%s10405_s10 + $0x1e8] sm:$0xff] }
 0x1e8   : > { %17801 = vst [vmem:[#allocation61_spill] sm:$0xff] %v12229_v47  ;;  %v1138_v9 = vmax.f32 %v1122_v48, 0.0  ;;  %v12232_v8 = vpop.permute.xlu0 %8231  ;;  %v1295_v25 = vsel %vm307_vm1, %v10143_v58, %v7909_v45  ;;  %v12253_v62 = vld [vmem:[%s10405_s10 + $0x1a0] sm:$0xff] }
 0x1e9   : > { %17803 = vst [vmem:[#allocation46_spill] sm:$0xff] %v12232_v8  ;;  %v1390_v52 = vsel %vm512_vm2, %v1294_v22, %v7948_v53  ;;  %v17810_v63 = vld [vmem:[#allocation27_spill] sm:$0xff]  ;;  %v1391_v7 = vsel %vm512_vm2, %v1295_v25, %v7949_v5  ;;  %v1155_v53 = vld [vmem:[%s17260_s7 + $0x58] sm:$0xff]  ;;  %v12283_v5 = vpack.i.bf16 %v12253_v62, %v11951_v0 }
 0x1ea   : > { %v1170_v24 = vmul.f32 %v1154_v2, %v1138_v9  ;;  %v17807_v2 = vld [vmem:[#allocation45_spill] sm:$0xff]  ;;  %v17808_v9 = vld [vmem:[#allocation26_spill] sm:$0xff] }
 0x1eb   : > { %v1077_v57 = vpop.f32.mrf.mxu0  ;;  %v12243_v48 = vld [vmem:[#allocation2 + $0x61] sm:$0xff]  ;;  %v7988_v56 = vunpack.i.l.bf16 %v17807_v2  ;;  %v7989_v17 = vunpack.i.h.bf16 %v17807_v2 }
 0x1ec   : > { %1186 = vst.msk [vmem:[#allocation2 + $0x70] sm:$0xff] %vm307_vm1, %v1170_v24  ;;  %v1104_v32 = vmul.f32 %v11753_v49, %v1077_v57  ;;  %8466 = vrot.lane.b32.xlu2 %v17805_v16, %s10343_s17  ;;  %v12257_v24 = vpack.i.bf16 %v12013_v59, %v12026_v3  ;;  %v17809_v57 = vld [vmem:[#allocation4_spill] sm:$0xff]  ;;  %v17812_v3 = vld [vmem:[#allocation42_spill] sm:$0xff] }
 0x1ed   : > { %17806 = vst [vmem:[#allocation47_spill] sm:$0xff] %v12243_v48  ;;  %8461 = vrot.lane.b32.xlu1 %v17808_v9, %s10343_s17  ;;  %v8028_v45 = vunpack.i.l.bf16 %v17809_v57  ;;  %v8029_v59 = vunpack.i.h.bf16 %v17809_v57  ;;  %v8068_v9 = vunpack.i.l.bf16 %v17812_v3  ;;  %v8069_v2 = vunpack.i.h.bf16 %v17812_v3 }
 0x1ee   : > { %v1123_v16 = vadd.f32 %v11766_v50, %v1104_v32  ;;  %8456 = vrot.lane.b32.xlu0 %v17810_v63, %s10343_s17  ;;  %7367 = vmatmul.msk.bf16.gmra.mxu1 %vm1012_vm9, %v1835_v19  ;;  %v12266_v58 = vpop.permute.xlu2 %8301  ;;  %v1473_v25 = vsel %vm596_vm3, %v1390_v52, %v7988_v56  ;;  %v12288_v57 = vpack.i.bf16 %v11948_v34, %v11909_v23  ;;  %v8149_v23 = vunpack.i.h.bf16 %v11945_v14 }
 0x1ef   : > { %17811 = vst [vmem:[#allocation17_spill] sm:$0xff] %v12266_v58  ;;  %v12274_v22 = vpop.permute.xlu1 %8251  ;;  %v1474_v42 = vsel %vm596_vm3, %v1391_v7, %v7989_v17  ;;  %v1543_v55 = vsel %vm667_vm4, %v1473_v25, %v8028_v45  ;;  %v8148_v34 = vunpack.i.l.bf16 %v11945_v14  ;;  %v12305_v17 = vld [vmem:[#allocation2 + $0x68] sm:$0xff]  ;;  %v8188_v52 = vunpack.i.l.bf16 %v12091_v40 }
 0x1f0   : > { %v1139_v19 = vmax.f32 %v1123_v16, 0.0  ;;  %v12279_v63 = vpop.permute.xlu0 %8246  ;;  %v1544_v3 = vsel %vm667_vm4, %v1474_v42, %v8029_v59  ;;  %v17814_v16 = vld [vmem:[#allocation16_spill] sm:$0xff]  ;;  %v1613_v0 = vsel %vm738_vm5, %v1543_v55, %v8068_v9  ;;  %17816 = vst [vmem:[#allocation4_spill] sm:$0xff] %v12305_v17  ;;  %v8189_v55 = vunpack.i.h.bf16 %v12091_v40  ;;  %v17819_v59 = vld [vmem:[#allocation53_spill] sm:$0xff] }
 0x1f1   : > { %17813 = vst [vmem:[#allocation45_spill] sm:$0xff] %v12279_v63  ;;  %v8109_v28 = vunpack.i.h.bf16 %v17814_v16  ;;  %v8108_v61 = vunpack.i.l.bf16 %v17814_v16  ;;  %v1614_v56 = vsel %vm738_vm5, %v1544_v3, %v8069_v2  ;;  %v17817_v7 = vld [vmem:[#allocation28_spill] sm:$0xff]  ;;  %v7914_v9 = vunpack.i.h.bf16 %v17819_v59  ;;  %v12328_v2 = vld [vmem:[%s10405_s10 + $0x1b0] sm:$0xff] }
 0x1f2   : > { %v1171_v32 = vmul.f32 %v1155_v53, %v1139_v19  ;;  %v1156_v53 = vld [vmem:[%s17260_s7 + $0x60] sm:$0xff]  ;;  %v7913_v14 = vunpack.i.l.bf16 %v17819_v59  ;;  %v7954_v48 = vunpack.i.h.bf16 %v17821_v21  ;;  %v12582_v63 = vld [vmem:[%s10405_s10 + $0x1f0] sm:$0xff] }
 0x1f3   : > { %v1080_v41 = vpop.f32.mrf.mxu0  ;;  %v12296_v13 = vld [vmem:[#allocation2 + $0x70] sm:$0xff]  ;;  %v1683_v19 = vsel %vm809_vm6, %v1613_v0, %v8108_v61  ;;  %v1684_v25 = vsel %vm809_vm6, %v1614_v56, %v8109_v28  ;;  %v7953_v61 = vunpack.i.l.bf16 %v17821_v21  ;;  %v17822_v56 = vld [vmem:[#allocation50_spill] sm:$0xff] }
 0x1f4   : > { %17815 = vst [vmem:[#allocation26_spill] sm:$0xff] %v12296_v13  ;;  %v1105_v42 = vmul.f32 %v11753_v49, %v1080_v41  ;;  %8481 = vrot.lane.b32.xlu2 %v12283_v5, %s10343_s17  ;;  %v7994_v59 = vunpack.i.h.bf16 %v17822_v56 }
 0x1f5   : > { %1187 = vst.msk [vmem:[#allocation2 + $0x78] sm:$0xff] %vm307_vm1, %v1171_v32  ;;  %8476 = vrot.lane.b32.xlu1 %v12288_v57, %s10343_s17  ;;  %v12325_v32 = vld [vmem:[%s10405_s10 + $0x1a8] sm:$0xff] }
 0x1f6   : > { %v1124_v45 = vadd.f32 %v11766_v50, %v1105_v42  ;;  %8471 = vrot.lane.b32.xlu0 %v17817_v7, %s10343_s17  ;;  %v12316_v41 = vpop.permute.xlu2 %8316  ;;  %v1753_v42 = vsel %vm880_vm8, %v1683_v19, %v8148_v34  ;;  %v1754_v7 = vsel %vm880_vm8, %v1684_v25, %v8149_v23  ;;  %v12343_v0 = vpack.i.bf16 %v12328_v2, %v12325_v32  ;;  %v10146_v25 = vld [vmem:[%s10405_s10 + $0xc7] sm:$0xff] }
 0x1f7   : > { %17818 = vst [vmem:[#allocation27_spill] sm:$0xff] %v12316_v41  ;;  %v12322_v40 = vpop.permute.xlu1 %8266  ;;  %v1823_v33 = vsel %vm951_vm7, %v1753_v42, %v8188_v52  ;;  %v1824_v54 = vsel %vm951_vm7, %v1754_v7, %v8189_v55  ;;  %v7993_v34 = vunpack.i.l.bf16 %v17822_v56  ;;  %v17824_v52 = vld [vmem:[#allocation37_spill] sm:$0xff]  ;;  %v17825_v42 = vld [vmem:[#allocation8_spill] sm:$0xff]  ;;  %v8124_v41 = vunpack.i.h.bf16 %v17863_v12 }
 0x1f8   : > { %17820 = vst [vmem:[#allocation42_spill] sm:$0xff] %v12322_v40  ;;  %v1140_v3 = vmax.f32 %v1124_v45, 0.0  ;;  %v12332_v16 = vpop.permute.xlu0 %8261  ;;  %v1836_v21 = vpack.c.bf16 %v1824_v54, %v1823_v33  ;;  %v12823_v40 = vld [vmem:[%s17255_s2] ss:$0 sm:$0xff]  ;;  %v8650_v58 = vpack.i.bf16 %v12325_v32, %v12253_v62  ;;  %v2002_v62 = vld [vmem:[%s17260_s7 + $0x88] sm:$0xff] }
 0x1fa   : > { %v1172_v28 = vmul.f32 %v1156_v53, %v1140_v3  ;;  %v10145_v53 = vld [vmem:[%s10405_s10 + $0xcf] sm:$0xff]  ;;  %v1296_v3 = vsel %vm307_vm1, %v10146_v25, %v7913_v14 }
 0x1fb   : > { %v1082_v23 = vpop.f32.mrf.mxu0  ;;  %v1297_v19 = vsel %vm307_vm1, %v10145_v53, %v7914_v9  ;;  %v12372_v9 = vld [vmem:[#allocation2 + $0x69] sm:$0xff] }
 0x1fc   : > { %v12346_v45 = vld [vmem:[#allocation2 + $0x78] sm:$0xff]  ;;  %1188 = vst.msk [vmem:[#allocation2 + $0x80] sm:$0xff] %vm307_vm1, %v1172_v28  ;;  %v1106_v55 = vmul.f32 %v11753_v49, %v1082_v23  ;;  %8496 = vrot.lane.b32.xlu2 %v17824_v52, %s10344_s18  ;;  %v1393_v56 = vsel %vm512_vm2, %v1297_v19, %v7954_v48  ;;  %v1392_v23 = vsel %vm512_vm2, %v1296_v3, %v7953_v61  ;;  %v17827_v52 = vld [vmem:[#allocation5_spill] sm:$0xff]  ;;  %v17829_v48 = vld [vmem:[#allocation19_spill] sm:$0xff] }
 0x1fd   : > { %17823 = vst [vmem:[#allocation16_spill] sm:$0xff] %v12346_v45  ;;  %8491 = vrot.lane.b32.xlu1 %v17825_v42, %s10344_s18  ;;  %v12359_v7 = vld [vmem:[#allocation2 + $0x71] sm:$0xff]  ;;  %v8033_v54 = vunpack.i.l.bf16 %v17827_v52  ;;  %v8034_v53 = vunpack.i.h.bf16 %v17827_v52  ;;  %v1475_v25 = vsel %vm596_vm3, %v1392_v23, %v7993_v34  ;;  %v8073_v19 = vunpack.i.l.bf16 %v17829_v48  ;;  %v1157_v61 = vld [vmem:[%s17260_s7 + $0x68] sm:$0xff]  ;;  %v10147_v45 = vld [vmem:[%s10405_s10 + $0xdf] sm:$0xff] }
 0x1fe   : > { %17826 = vst [vmem:[#allocation28_spill] sm:$0xff] %v12359_v7  ;;  %v1125_v33 = vadd.f32 %v11766_v50, %v1106_v55  ;;  %8486 = vrot.lane.b32.xlu0 %v12343_v0, %s10343_s17  ;;  %7368 = vmatmul.msk.bf16.gmra.mxu1 %vm1012_vm9, %v1836_v21  ;;  %v12370_v14 = vpop.permute.xlu2 %8331  ;;  %v1476_v21 = vsel %vm596_vm3, %v1393_v56, %v7994_v59  ;;  %v8074_v42 = vunpack.i.h.bf16 %v17829_v48  ;;  %v8114_v34 = vunpack.i.h.bf16 %v11893_v10 }
 0x1ff   : > { %17828 = vst [vmem:[#allocation53_spill] sm:$0xff] %v12372_v9  ;;  %v12380_v55 = vpop.permute.xlu1 %8281  ;;  %v8113_v23 = vunpack.i.l.bf16 %v11893_v10  ;;  %v1545_v52 = vsel %vm667_vm4, %v1475_v25, %v8033_v54  ;;  %v1546_v17 = vsel %vm667_vm4, %v1476_v21, %v8034_v53  ;;  %v8194_v25 = vunpack.i.h.bf16 %v12087_v43  ;;  %v12412_v21 = vld [vmem:[%s10405_s10 + $0x1b1] sm:$0xff] }
 0x200   : > { %17830 = vst [vmem:[#allocation9_spill] sm:$0xff] %v12380_v55  ;;  %v1141_v28 = vmax.f32 %v1125_v33, 0.0  ;;  %v12386_v1 = vpop.permute.xlu0 %8276  ;;  %v1615_v3 = vsel %vm738_vm5, %v1545_v52, %v8073_v19  ;;  %v1616_v56 = vsel %vm738_vm5, %v1546_v17, %v8074_v42  ;;  %v17833_v33 = vld [vmem:[#allocation13_spill] sm:$0xff]  ;;  %v8193_v17 = vunpack.i.l.bf16 %v12087_v43  ;;  %v17835_v19 = vld [vmem:[#allocation34_spill] sm:$0xff]  ;;  %v17838_v43 = vld [vmem:[#allocation52_spill] sm:$0xff] }
 0x201   : > { %17831 = vst [vmem:[#allocation50_spill] sm:$0xff] %v12386_v1  ;;  %v8154_v48 = vunpack.i.h.bf16 %v17833_v33  ;;  %v8153_v7 = vunpack.i.l.bf16 %v17833_v33  ;;  %v1685_v54 = vsel %vm809_vm6, %v1615_v3, %v8113_v23  ;;  %v1686_v53 = vsel %vm809_vm6, %v1616_v56, %v8114_v34  ;;  %v12420_v3 = vld [vmem:[%s10405_s10 + $0x1a1] sm:$0xff]  ;;  %v1158_v56 = vld [vmem:[%s17260_s7 + $0x70] sm:$0xff] }
 0x202   : > { %v1173_v4 = vmul.f32 %v1157_v61, %v1141_v28  ;;  %v17834_v28 = vld [vmem:[#allocation22_spill] sm:$0xff]  ;;  %v12409_v61 = vld [vmem:[%s10405_s10 + $0x1a9] sm:$0xff]  ;;  %v7919_v23 = vunpack.i.h.bf16 %v17838_v43  ;;  %v7918_v52 = vunpack.i.l.bf16 %v17838_v43  ;;  %v12441_v43 = vpack.i.bf16 %v12420_v3, %v12016_v31 }
 0x203   : > { %v1085_v9 = vpop.f32.mrf.mxu0  ;;  %v12393_v59 = vld [vmem:[#allocation2 + $0x80] sm:$0xff]  ;;  %v1756_v34 = vsel %vm880_vm8, %v1686_v53, %v8154_v48  ;;  %v10148_v53 = vld [vmem:[%s10405_s10 + $0xd7] sm:$0xff]  ;;  %v8123_v1 = vunpack.i.l.bf16 %v17863_v12 }
 0x204   : > { %17832 = vst [vmem:[#allocation37_spill] sm:$0xff] %v12393_v59  ;;  %v1107_v10 = vmul.f32 %v11753_v49, %v1085_v9  ;;  %8511 = vrot.lane.b32.xlu2 %v17834_v28, %s10344_s18  ;;  %v17836_v9 = vld [vmem:[#allocation35_spill] sm:$0xff]  ;;  %v1826_v51 = vsel %vm951_vm7, %v1756_v34, %v8194_v25  ;;  %v1299_v36 = vsel %vm307_vm1, %v10147_v45, %v7919_v23 }
 0x205   : > { %1189 = vst.msk [vmem:[#allocation2 + $0x88] sm:$0xff] %vm307_vm1, %v1173_v4  ;;  %8506 = vrot.lane.b32.xlu1 %v17835_v19, %s10344_s18  ;;  %v12435_v19 = vpack.i.bf16 %v12412_v21, %v12409_v61  ;;  %v1298_v31 = vsel %vm307_vm1, %v10148_v53, %v7918_v52  ;;  %v12616_v12 = vld [vmem:[%s10405_s10 + $0x1c1] sm:$0xff] }
 0x206   : > { %v1126_v4 = vadd.f32 %v11766_v50, %v1107_v10  ;;  %8501 = vrot.lane.b32.xlu0 %v17836_v9, %s10344_s18  ;;  %v12417_v42 = vpop.permute.xlu2 %8346  ;;  %v1755_v9 = vsel %vm880_vm8, %v1685_v54, %v8153_v7  ;;  %v7999_v7 = vunpack.i.h.bf16 %v17840_v6 }
 0x207   : > { %17837 = vst [vmem:[#allocation8_spill] sm:$0xff] %v12417_v42  ;;  %v12429_v33 = vpop.permute.xlu1 %8296  ;;  %v1825_v59 = vsel %vm951_vm7, %v1755_v9, %v8193_v17  ;;  %v7998_v17 = vunpack.i.l.bf16 %v17840_v6  ;;  %v17846_v9 = vld [vmem:[#allocation6_spill] sm:$0xff] }
 0x208   : > { %v1142_v10 = vmax.f32 %v1126_v4, 0.0  ;;  %v12431_v28 = vpop.permute.xlu0 %8291  ;;  %v17839_v4 = vld [vmem:[#allocation40_spill] sm:$0xff]  ;;  %v1837_v34 = vpack.c.bf16 %v1826_v51, %v1825_v59 }
 0x209   : > { %v7959_v38 = vunpack.i.h.bf16 %v17839_v4  ;;  %v7958_v13 = vunpack.i.l.bf16 %v17839_v4  ;;  %v8079_v4 = vunpack.i.h.bf16 %v17846_v9 }
 0x20a   : > { %v1174_v44 = vmul.f32 %v1158_v56, %v1142_v10  ;;  %v17842_v56 = vld [vmem:[#allocation43_spill] sm:$0xff] }
 0x20b   : > { %v1087_v54 = vpop.f32.mrf.mxu0  ;;  %v8039_v45 = vunpack.i.h.bf16 %v17842_v56  ;;  %v8038_v23 = vunpack.i.l.bf16 %v17842_v56  ;;  %v12463_v10 = vld [vmem:[#allocation2 + $0x79] sm:$0xff]  ;;  %v1395_v52 = vsel %vm512_vm2, %v1299_v36, %v7959_v38  ;;  %v8159_v56 = vunpack.i.h.bf16 %v11987_v20 }
 0x20c   : > { %v12450_v48 = vld [vmem:[#allocation2 + $0x81] sm:$0xff]  ;;  %1190 = vst.msk [vmem:[#allocation2 + $0x90] sm:$0xff] %vm307_vm1, %v1174_v44  ;;  %v1108_v25 = vmul.f32 %v11753_v49, %v1087_v54  ;;  %8526 = vrot.lane.b32.xlu2 %v12435_v19, %s10344_s18  ;;  %v1394_v44 = vsel %vm512_vm2, %v1298_v31, %v7958_v13  ;;  %v1478_v59 = vsel %vm596_vm3, %v1395_v52, %v7999_v7  ;;  %v1159_v36 = vld [vmem:[%s17260_s7 + $0x78] sm:$0xff]  ;;  %v8078_v54 = vunpack.i.l.bf16 %v17846_v9 }
 0x20d   : > { %17841 = vst [vmem:[#allocation5_spill] sm:$0xff] %v12450_v48  ;;  %8521 = vrot.lane.b32.xlu1 %v12441_v43, %s10344_s18  ;;  %v1548_v7 = vsel %vm667_vm4, %v1478_v59, %v8039_v45  ;;  %v8119_v31 = vunpack.i.h.bf16 %v11891_v26  ;;  %v12498_v45 = vld [vmem:[%s10405_s10 + $0x1d8] sm:$0xff]  ;;  %v8198_v59 = vunpack.i.l.bf16 %v11938_v60 }
 0x20e   : > { %17843 = vst [vmem:[#allocation19_spill] sm:$0xff] %v12463_v10  ;;  %v1127_v6 = vadd.f32 %v11766_v50, %v1108_v25  ;;  %8516 = vrot.lane.b32.xlu0 %v12257_v24, %s10344_s18  ;;  %7369 = vmatmul.msk.bf16.gmra.mxu1 %vm1012_vm9, %v1837_v34  ;;  %v12470_v49 = vpop.permute.xlu2 %8361  ;;  %v1477_v50 = vsel %vm596_vm3, %v1394_v44, %v7998_v17  ;;  %v8118_v34 = vunpack.i.l.bf16 %v11891_v26  ;;  %v8158_v17 = vunpack.i.l.bf16 %v11987_v20  ;;  %v17856_v10 = vld [vmem:[#allocation51_spill] sm:$0xff] }
 0x20f   : > { %17844 = vst [vmem:[#allocation13_spill] sm:$0xff] %v12470_v49  ;;  %v12479_v38 = vpop.permute.xlu1 %8311  ;;  %v1547_v13 = vsel %vm667_vm4, %v1477_v50, %v8038_v23  ;;  %v8199_v20 = vunpack.i.h.bf16 %v11938_v60  ;;  %v4054_v50 = vld [vmem:[#allocation2 + $0x88] sm:$0xff]  ;;  %v8004_v48 = vunpack.i.h.bf16 %v17856_v10 }
 0x210   : > { %17845 = vst [vmem:[#allocation22_spill] sm:$0xff] %v12479_v38  ;;  %v1143_v53 = vmax.f32 %v1127_v6, 0.0  ;;  %v12484_v25 = vpop.permute.xlu0 %8306  ;;  %v1617_v44 = vsel %vm738_vm5, %v1547_v13, %v8078_v54  ;;  %v1618_v6 = vsel %vm738_vm5, %v1548_v7, %v8079_v4  ;;  %v12514_v4 = vld [vmem:[%s10405_s10 + $0x1c8] sm:$0xff]  ;;  %v12517_v54 = vld [vmem:[%s10405_s10 + $0x1d0] sm:$0xff]  ;;  %v12526_v7 = vld [vmem:[%s10405_s10 + $0x1b8] sm:$0xff] }
 0x211   : > { %17847 = vst [vmem:[#allocation34_spill] sm:$0xff] %v12484_v25  ;;  %v1687_v26 = vsel %vm809_vm6, %v1617_v44, %v8118_v34  ;;  %v1688_v23 = vsel %vm809_vm6, %v1618_v6, %v8119_v31  ;;  %v12529_v31 = vld [vmem:[%s10405_s10 + $0x1c0] sm:$0xff] }
 0x212   : > { %v1175_v52 = vmul.f32 %v1159_v36, %v1143_v53  ;;  %v12507_v36 = vld [vmem:[%s10405_s10 + $0x1e0] sm:$0xff]  ;;  %v1757_v53 = vsel %vm880_vm8, %v1687_v26, %v8158_v17  ;;  %v1758_v60 = vsel %vm880_vm8, %v1688_v23, %v8159_v56  ;;  %v12539_v17 = vpack.i.bf16 %v12517_v54, %v12514_v4 }
 0x213   : > { %v4055_v9 = vld [vmem:[#allocation2 + $0x90] sm:$0xff]  ;;  %v12535_v34 = vpack.i.bf16 %v12507_v36, %v12498_v45  ;;  %v1827_v56 = vsel %vm951_vm7, %v1757_v53, %v8198_v59  ;;  %v17853_v44 = vld [vmem:[#allocation11_spill] sm:$0xff]  ;;  %v12547_v23 = vpack.i.bf16 %v12529_v31, %v12526_v7 }
 0x214   : > { %1191 = vst.msk [vmem:[#allocation2 + $0x98] sm:$0xff] %vm307_vm1, %v1175_v52  ;;  %8541 = vrot.lane.b32.xlu2 %v12343_v0, %s10337_s11  ;;  %v12521_v13 = vpack.i.bf16 %v4055_v9, %v4054_v50  ;;  %v1828_v52 = vsel %vm951_vm7, %v1758_v60, %v8199_v20  ;;  %v7924_v6 = vunpack.i.h.bf16 %v17853_v44  ;;  %v7923_v26 = vunpack.i.l.bf16 %v17853_v44  ;;  %v17855_v50 = vld [vmem:[#allocation3_spill] sm:$0xff]  ;;  %v10149_v20 = vld [vmem:[%s10405_s10 + $0xef] sm:$0xff] }
 0x215   : > { %8536 = vrot.lane.b32.xlu1 %v12283_v5, %s10337_s11  ;;  %17851 = vst [vmem:[#allocation25_spill] sm:$0xff] %v12535_v34  ;;  %v7964_v9 = vunpack.i.h.bf16 %v17855_v50  ;;  %v7963_v51 = vunpack.i.l.bf16 %v17855_v50  ;;  %v1838_v59 = vpack.c.bf16 %v1828_v52, %v1827_v56  ;;  %v10150_v60 = vld [vmem:[%s10405_s10 + $0xe7] sm:$0xff]  ;;  %v12567_v52 = vld [vmem:[%s10405_s10 + $0x1f8] sm:$0xff] }
 0x216   : > { %8531 = vrot.lane.b32.xlu0 %v12288_v57, %s10337_s11  ;;  %v12511_v0 = vpop.permute.xlu2 %8376  ;;  %17848 = vst [vmem:[#allocation35_spill] sm:$0xff] %v12521_v13  ;;  %v1301_v53 = vsel %vm307_vm1, %v10149_v20, %v7924_v6  ;;  %v1300_v44 = vsel %vm307_vm1, %v10150_v60, %v7923_v26  ;;  %v8003_v13 = vunpack.i.l.bf16 %v17856_v10  ;;  %v12570_v50 = vld [vmem:[%s10405_s10 + $0x200] sm:$0xff]  ;;  %v17858_v26 = vld [vmem:[#allocation30_spill] sm:$0xff] }
 0x217   : > { %v12523_v5 = vpop.permute.xlu1 %8326  ;;  %17852 = vst [vmem:[#allocation43_spill] sm:$0xff] %v12539_v17  ;;  %v1396_v6 = vsel %vm512_vm2, %v1300_v44, %v7963_v51  ;;  %v1397_v20 = vsel %vm512_vm2, %v1301_v53, %v7964_v9  ;;  %v8044_v60 = vunpack.i.h.bf16 %v17858_v26  ;;  %v12590_v51 = vpack.i.bf16 %v12570_v50, %v12567_v52  ;;  %v17871_v38 = vld [vmem:[#allocation7_spill] sm:$0xff] }
 0x218   : > { %17849 = vst [vmem:[#allocation52_spill] sm:$0xff] %v12523_v5  ;;  %v12531_v57 = vpop.permute.xlu0 %8321  ;;  %v8043_v5 = vunpack.i.l.bf16 %v17858_v26  ;;  %v1479_v9 = vsel %vm596_vm3, %v1396_v6, %v8003_v13  ;;  %v1480_v53 = vsel %vm596_vm3, %v1397_v20, %v8004_v48  ;;  %v12596_v44 = vpack.i.bf16 %v12582_v63, %v12579_v29  ;;  %v17864_v13 = vld [vmem:[#allocation32_spill] sm:$0xff] }
 0x219   : > { %17850 = vst [vmem:[#allocation40_spill] sm:$0xff] %v12531_v57  ;;  %v8164_v6 = vunpack.i.h.bf16 %v17864_v13  ;;  %v8163_v48 = vunpack.i.l.bf16 %v17864_v13  ;;  %v8204_v20 = vunpack.i.h.bf16 %v12130_v27  ;;  %v17869_v13 = vld [vmem:[#allocation54_spill] sm:$0xff]  ;;  %v8008_v46 = vunpack.i.l.bf16 %v17871_v38 }
 0x21a   : > { %17854 = vst [vmem:[#allocation6_spill] sm:$0xff] %v12547_v23  ;;  %v1549_v26 = vsel %vm667_vm4, %v1479_v9, %v8043_v5  ;;  %v8203_v5 = vunpack.i.l.bf16 %v12130_v27 }
 0x21b   : > { %17861 = vst [vmem:[#allocation51_spill] sm:$0xff] %v12590_v51 }
 0x21c   : > { %8556 = vrot.lane.b32.xlu2 %v12535_v34, %s10337_s11  ;;  %17862 = vst [vmem:[#allocation30_spill] sm:$0xff] %v12596_v44 }
 0x21d   : > { %8551 = vrot.lane.b32.xlu1 %v12539_v17, %s10337_s11 }
 0x21e   : > { %8546 = vrot.lane.b32.xlu0 %v12547_v23, %s10337_s11  ;;  %7370 = vmatmul.msk.bf16.gmra.mxu1 %vm1012_vm9, %v1838_v59  ;;  %v12564_v56 = vpop.permute.xlu2 %8391  ;;  %v17860_v59 = vld [vmem:[#allocation39_spill] sm:$0xff]  ;;  %v17880_v23 = vld [vmem:[#allocation33_spill] sm:$0xff] }
 0x21f   : > { %17857 = vst [vmem:[#allocation11_spill] sm:$0xff] %v12564_v56  ;;  %v12576_v10 = vpop.permute.xlu1 %8341  ;;  %v8084_v49 = vunpack.i.h.bf16 %v17860_v59  ;;  %v8083_v57 = vunpack.i.l.bf16 %v17860_v59  ;;  %v1550_v59 = vsel %vm667_vm4, %v1480_v53, %v8044_v60  ;;  %v12613_v60 = vld [vmem:[%s10405_s10 + $0x1b9] sm:$0xff]  ;;  %v8168_v17 = vunpack.i.l.bf16 %v17880_v23 }
 0x220   : > { %17859 = vst [vmem:[#allocation3_spill] sm:$0xff] %v12576_v10  ;;  %v12586_v55 = vpop.permute.xlu0 %8336  ;;  %v12630_v53 = vpack.i.bf16 %v12616_v12, %v12613_v60 }
 0x221   : > { %v1619_v47 = vsel %vm738_vm5, %v1549_v26, %v8083_v57  ;;  %v1620_v56 = vsel %vm738_vm5, %v1550_v59, %v8084_v49 }
 0x222   : > { %v1690_v9 = vsel %vm809_vm6, %v1620_v56, %v8124_v41  ;;  %17868 = vst [vmem:[#allocation62_spill] sm:$0xff] %v12630_v53  ;;  %v7929_v41 = vunpack.i.h.bf16 %v17869_v13  ;;  %v17870_v56 = vld [vmem:[#allocation44_spill] sm:$0xff] }
 0x223   : > { %v1760_v59 = vsel %vm880_vm8, %v1690_v9, %v8164_v6  ;;  %v12652_v9 = vld [vmem:[%s10405_s10 + $0x1f1] sm:$0xff] }
 0x224   : > { %8571 = vrot.lane.b32.xlu2 %v12257_v24, %s10338_s12  ;;  %v1689_v24 = vsel %vm809_vm6, %v1619_v47, %v8123_v1  ;;  %v1830_v47 = vsel %vm951_vm7, %v1760_v59, %v8204_v20  ;;  %v12649_v20 = vld [vmem:[%s10405_s10 + $0x1e9] sm:$0xff] }
 0x225   : > { %8566 = vrot.lane.b32.xlu1 %v12590_v51, %s10337_s11  ;;  %v1759_v26 = vsel %vm880_vm8, %v1689_v24, %v8163_v48  ;;  %v8009_v48 = vunpack.i.h.bf16 %v17871_v38  ;;  %v10151_v24 = vld [vmem:[%s10405_s10 + $0xf7] sm:$0xff] }
 0x226   : > { %8561 = vrot.lane.b32.xlu0 %v12596_v44, %s10337_s11  ;;  %v12620_v49 = vpop.permute.xlu2 %8406  ;;  %v1829_v1 = vsel %vm951_vm7, %v1759_v26, %v8203_v5  ;;  %v10152_v26 = vld [vmem:[%s10405_s10 + $0xff] sm:$0xff] }
 0x227   : > { %17865 = vst [vmem:[#allocation39_spill] sm:$0xff] %v12620_v49  ;;  %v12622_v57 = vpop.permute.xlu1 %8356  ;;  %v7928_v49 = vunpack.i.l.bf16 %v17869_v13  ;;  %v1839_v6 = vpack.c.bf16 %v1830_v47, %v1829_v1  ;;  %v1303_v59 = vsel %vm307_vm1, %v10152_v26, %v7929_v41  ;;  %v12663_v13 = vld [vmem:[%s10405_s10 + $0x1d9] sm:$0xff] }
 0x228   : > { %17866 = vst [vmem:[#allocation36_spill] sm:$0xff] %v12622_v57  ;;  %v12626_v27 = vpop.permute.xlu0 %8351  ;;  %v7968_v57 = vunpack.i.l.bf16 %v17870_v56  ;;  %v17873_v47 = vld [vmem:[#allocation31_spill] sm:$0xff]  ;;  %v17874_v26 = vld [vmem:[#allocation38_spill] sm:$0xff] }
 0x229   : > { %17867 = vst [vmem:[#allocation32_spill] sm:$0xff] %v12626_v27  ;;  %v7969_v27 = vunpack.i.h.bf16 %v17870_v56  ;;  %v1302_v5 = vsel %vm307_vm1, %v10151_v24, %v7928_v49  ;;  %v8049_v56 = vunpack.i.h.bf16 %v17873_v47  ;;  %v8048_v24 = vunpack.i.l.bf16 %v17873_v47 }
 0x22a   : > { %v1398_v38 = vsel %vm512_vm2, %v1302_v5, %v7968_v57  ;;  %v12675_v5 = vld [vmem:[%s10405_s10 + $0x1c9] sm:$0xff]  ;;  %v8088_v44 = vunpack.i.l.bf16 %v17874_v26 }
 0x22b   : > { %v1399_v1 = vsel %vm512_vm2, %v1303_v59, %v7969_v27  ;;  %v1481_v41 = vsel %vm596_vm3, %v1398_v38, %v8008_v46  ;;  %v12687_v27 = vpack.i.bf16 %v12652_v9, %v12649_v20  ;;  %v17877_v59 = vld [vmem:[#allocation29_spill] sm:$0xff] }
 0x22c   : > { %8586 = vrot.lane.b32.xlu2 %v12630_v53, %s10338_s12  ;;  %v8089_v53 = vunpack.i.h.bf16 %v17874_v26  ;;  %v8129_v46 = vunpack.i.h.bf16 %v17877_v59  ;;  %v8128_v38 = vunpack.i.l.bf16 %v17877_v59  ;;  %v8169_v59 = vunpack.i.h.bf16 %v17880_v23 }
 0x22d   : > { %8581 = vrot.lane.b32.xlu1 %v12435_v19, %s10338_s12  ;;  %v12666_v19 = vld [vmem:[%s10405_s10 + $0x1e1] sm:$0xff]  ;;  %17876 = vst [vmem:[#allocation7_spill] sm:$0xff] %v12687_v27 }
 0x22e   : > { %8576 = vrot.lane.b32.xlu0 %v12441_v43, %s10338_s12  ;;  %7371 = vmatmul.msk.bf16.gmra.mxu1 %vm1012_vm9, %v1839_v6  ;;  %v12660_v49 = vpop.permute.xlu2 %8421  ;;  %v12678_v43 = vld [vmem:[%s10405_s10 + $0x1d1] sm:$0xff]  ;;  %v1482_v6 = vsel %vm596_vm3, %v1399_v1, %v8009_v48  ;;  %v12693_v47 = vpack.i.bf16 %v12666_v19, %v12663_v13  ;;  %v1551_v1 = vsel %vm667_vm4, %v1481_v41, %v8048_v24  ;;  %v8209_v24 = vunpack.i.h.bf16 %v12128_v11 }
 0x22f   : > { %17872 = vst [vmem:[#allocation54_spill] sm:$0xff] %v12660_v49  ;;  %v12672_v57 = vpop.permute.xlu1 %8371  ;;  %v12697_v48 = vpack.i.bf16 %v12678_v43, %v12675_v5  ;;  %v1552_v26 = vsel %vm667_vm4, %v1482_v6, %v8049_v56  ;;  %v8208_v56 = vunpack.i.l.bf16 %v12128_v11 }
 0x230   : > { %v12683_v51 = vpop.permute.xlu0 %8366  ;;  %17878 = vst [vmem:[#allocation31_spill] sm:$0xff] %v12693_v47  ;;  %v1622_v8 = vsel %vm738_vm5, %v1552_v26, %v8089_v53 }
 0x231   : > { %17875 = vst [vmem:[#allocation44_spill] sm:$0xff] %v12683_v51  ;;  %v1621_v51 = vsel %vm738_vm5, %v1551_v1, %v8088_v44  ;;  %v1692_v34 = vsel %vm809_vm6, %v1622_v8, %v8129_v46  ;;  %v12714_v44 = vld [vmem:[%s10405_s10 + $0x1b7] sm:$0xff]  ;;  %v12726_v8 = vld [vmem:[%s10405_s10 + $0x201] sm:$0xff] }
 0x232   : > { %17879 = vst [vmem:[#allocation38_spill] sm:$0xff] %v12697_v48  ;;  %v1691_v42 = vsel %vm809_vm6, %v1621_v51, %v8128_v38  ;;  %v12723_v51 = vld [vmem:[%s10405_s10 + $0x1f9] sm:$0xff]  ;;  %v8615_v11 = vpack.i.bf16 %v12714_v44, %v12171_v15  ;;  %v1762_v46 = vsel %vm880_vm8, %v1692_v34, %v8169_v59  ;;  %v8610_v38 = vpack.i.bf16 %v12168_v30, %v12185_v35  ;;  %v12748_v34 = vld [vmem:[%s10405_s10 + $0x1e7] sm:$0xff]  ;;  %v12756_v35 = vld [vmem:[%s10405_s10 + $0x1cf] sm:$0xff] }
 0x233   : > { %v1761_v6 = vsel %vm880_vm8, %v1691_v42, %v8168_v17  ;;  %v1832_v26 = vsel %vm951_vm7, %v1762_v46, %v8209_v24  ;;  %v12745_v42 = vld [vmem:[%s10405_s10 + $0x1df] sm:$0xff]  ;;  %v12759_v17 = vld [vmem:[%s10405_s10 + $0x1d7] sm:$0xff] }
 0x234   : > { %8601 = vrot.lane.b32.xlu2 %v12687_v27, %s10338_s12  ;;  %v1831_v1 = vsel %vm951_vm7, %v1761_v6, %v8208_v56  ;;  %17885 = vst [vmem:[#allocation65_spill] sm:$0xff] %v12745_v42  ;;  %v2706_v59 = vld [vmem:[%s17254_s1 + $0x20] sm:$0xf] }
 0x235   : > { %8596 = vrot.lane.b32.xlu1 %v12693_v47, %s10338_s12  ;;  %v1840_v15 = vpack.c.bf16 %v1832_v26, %v1831_v1  ;;  %17886 = vst [vmem:[#allocation66_spill] sm:$0xff] %v12759_v17  ;;  %v12767_v56 = vld [vmem:[%s10405_s10 + $0x1bf] sm:$0xff]  ;;  %v2724_v6 = vunpack.c.l.b16 %v2706_v59  ;;  %v8625_v1 = vpack.i.bf16 %v12759_v17, %v12756_v35  ;;  %v12784_v59 = vld [vmem:[%s10405_s10 + $0x20f] sm:$0xff] }
 0x236   : > { %8591 = vrot.lane.b32.xlu0 %v12697_v48, %s10338_s12  ;;  %v12718_v23 = vpop.permute.xlu2 %8436  ;;  %v12793_v48 = vld [vmem:[%s10405_s10 + $0x1ff] sm:$0xff] }
 0x237   : > { %17881 = vst [vmem:[#allocation29_spill] sm:$0xff] %v12718_v23  ;;  %v12720_v53 = vpop.permute.xlu1 %8386  ;;  %v12740_v23 = vpack.i.bf16 %v12726_v8, %v12723_v51  ;;  %v2729_v26 = vpack.c.b16 %v2724_v6, %v2724_v6  ;;  %v12796_v6 = vld [vmem:[%s10405_s10 + $0x207] sm:$0xff] }
 0x238   : > { %17882 = vst [vmem:[#allocation33_spill] sm:$0xff] %v12720_v53  ;;  %v12728_v41 = vpop.permute.xlu0 %8381  ;;  %v8640_v27 = vpack.i.bf16 %v12796_v6, %v12793_v48  ;;  %v7530_v53 = vld [vmem:[%s17254_s1 + $0x10] sm:$0xff] }
 0x239   : > { %17883 = vst [vmem:[#allocation63_spill] sm:$0xff] %v12728_v41 }
 0x23a   : > { %17884 = vst [vmem:[#allocation64_spill] sm:$0xff] %v12740_v23 }
 0x23c   : > { %8616 = vrot.lane.b32.xlu2 %v8615_v11, %s10339_s13  ;;  %v12770_v11 = vld [vmem:[%s10405_s10 + $0x1c7] sm:$0xff] }
 0x23d   : > { %8611 = vrot.lane.b32.xlu1 %v8610_v38, %s10339_s13  ;;  %v8630_v38 = vpack.i.bf16 %v12748_v34, %v12745_v42  ;;  %v7528_v42 = vld [vmem:[%s17254_s1] sm:$0xff] }
 0x23e   : > { %8606 = vrot.lane.b32.xlu0 %v12740_v23, %s10338_s12  ;;  %7372 = vmatmul.msk.bf16.gmra.mxu1 %vm1012_vm9, %v1840_v15  ;;  %v12753_v30 = vpop.permute.xlu2 %8451  ;;  %v8620_v15 = vpack.i.bf16 %v12770_v11, %v12767_v56 }
 0x23f   : > { %v12764_v24 = vpop.permute.xlu1 %8401 }
 0x240   : > { %17887 = vst [vmem:[#allocation67_spill] sm:$0xff] %v12764_v24  ;;  %v12772_v46 = vpop.permute.xlu0 %8396  ;;  %v2759_v24 = vsel %vm1037_vm0, %v2729_v26, 0  ;;  %v7531_v26 = vld [vmem:[%s17254_s1 + $0x18] sm:$0xff] }
 0x241   : > { %17888 = vst [vmem:[#allocation68_spill] sm:$0xff] %v12772_v46  ;;  %2764 = vmatpush.bf16.msra.mxu2 %v2759_v24  ;;  %v12787_v46 = vld [vmem:[%s10405_s10 + $0x217] sm:$0xff]  ;;  %v12804_v24 = vld [vmem:[%s10405_s10 + $0x1ef] sm:$0xff] }
 0x242   : > { %17889 = vst [vmem:[#allocation69_spill] sm:$0xff] %v12787_v46 }
 0x244   : > { %8631 = vrot.lane.b32.xlu2 %v8630_v38, %s10339_s13 }
 0x245   : > { %8626 = vrot.lane.b32.xlu1 %v8625_v1, %s10339_s13  ;;  %v12807_v1 = vld [vmem:[%s10405_s10 + $0x1f7] sm:$0xff]  ;;  %2765 = vmatpush.bf16.msra.mxu2 %v7531_v26  ;;  %v12831_v26 = vld [vmem:[%s17256_s3] ss:$0 sm:$0xff] }
 0x246   : > { %8621 = vrot.lane.b32.xlu0 %v8620_v15, %s10339_s13  ;;  %v12790_v23 = vpop.permute.xlu2 %8466  ;;  %v8645_v15 = vpack.i.bf16 %v12787_v46, %v12784_v59 }
 0x247   : > { %17890 = vst [vmem:[#allocation70_spill] sm:$0xff] %v12790_v23  ;;  %v12801_v38 = vpop.permute.xlu1 %8416  ;;  %v8635_v23 = vpack.i.bf16 %v12807_v1, %v12804_v24 }
 0x248   : > { %v12809_v47 = vpop.permute.xlu0 %8411 }
 0x249   : > { %2766 = vmatpush.bf16.msra.mxu2 %v7530_v53  ;;  %v2001_v53 = vld [vmem:[%s17260_s7 + $0x80] sm:$0xff] }
 0x24b   : > { %v1913_v25 = vpop.f32.mrf.mxu1 }
 0x24c   : > { %v1953_v49 = vmul.f32 %v12823_v40, %v1913_v25  ;;  %8646 = vrot.lane.b32.xlu2 %v8645_v15, %s10339_s13  ;;  %v7529_v25 = vld [vmem:[%s17254_s1 + $0x8] sm:$0xff] }
 0x24d   : > { %8641 = vrot.lane.b32.xlu1 %v8640_v27, %s10339_s13  ;;  %2767 = vmatpush.bf16.msra.mxu2 %v7529_v25 }
 0x24e   : > { %v1969_v46 = vadd.f32 %v12831_v26, %v1953_v49  ;;  %8636 = vrot.lane.b32.xlu0 %v8635_v23, %s10339_s13  ;;  %v12835_v41 = vpop.permute.xlu2 %8481  ;;  %v8660_v49 = vpack.i.bf16 %v12514_v4, %v12529_v31  ;;  %v8655_v23 = vpack.i.bf16 %v12526_v7, %v12328_v2 }
 0x24f   : > { %17891 = vst [vmem:[#allocation71_spill] sm:$0xff] %v12835_v41  ;;  %v12843_v27 = vpop.permute.xlu1 %8431 }
 0x250   : > { %v1985_v15 = vmax.f32 %v1969_v46, 0.0  ;;  %v12845_v10 = vpop.permute.xlu0 %8426 }
 0x251   : > { %2768 = vmatpush.bf16.msra.mxu2 %v7528_v42 }
 0x252   : > { %v2017_v41 = vmul.f32 %v2001_v53, %v1985_v15 }
 0x253   : > { %v1915_v17 = vpop.f32.mrf.mxu1 }
 0x254   : > { %2033 = vst.msk [vmem:[#allocation2 + $0xa0] sm:$0xff] %vm307_vm1, %v2017_v41  ;;  %v1954_v46 = vmul.f32 %v12823_v40, %v1915_v17  ;;  %8661 = vrot.lane.b32.xlu2 %v8660_v49, %s10340_s14  ;;  %v8675_v41 = vpack.i.bf16 %v12567_v52, %v12582_v63  ;;  %v8665_v17 = vpack.i.bf16 %v12498_v45, %v12517_v54  ;;  %v12886_v63 = vld [vmem:[%s10405_s10 + $0x210] sm:$0xff]  ;;  %v12889_v45 = vld [vmem:[%s10405_s10 + $0x218] sm:$0xff]  ;;  %v12897_v52 = vld [vmem:[%s10405_s10 + $0x208] sm:$0xff] }
 0x255   : > { %8656 = vrot.lane.b32.xlu1 %v8655_v23, %s10340_s14 }
 0x256   : > { %v1970_v2 = vadd.f32 %v12831_v26, %v1954_v46  ;;  %8651 = vrot.lane.b32.xlu0 %v8650_v58, %s10340_s14  ;;  %v12862_v4 = vpop.permute.xlu2 %8496  ;;  %v8670_v58 = vpack.i.bf16 %v12579_v29, %v12507_v36  ;;  %v2003_v36 = vld [vmem:[%s17260_s7 + $0x90] sm:$0xff]  ;;  %v8690_v46 = vpack.i.bf16 %v12409_v61, %v12420_v3  ;;  %v8293_v61 = vunpack.i.l.bf16 %v12431_v28 }
 0x257   : > { %v12867_v32 = vpop.permute.xlu1 %8446 }
 0x258   : > { %17892 = vst [vmem:[#allocation72_spill] sm:$0xff] %v12867_v32  ;;  %v1986_v7 = vmax.f32 %v1970_v2, 0.0  ;;  %v12869_v31 = vpop.permute.xlu0 %8441  ;;  %v8685_v2 = vpack.i.bf16 %v12889_v45, %v12886_v63 }
 0x259   : > { %17893 = vst [vmem:[#allocation73_spill] sm:$0xff] %v12869_v31 }
 0x25a   : > { %v2018_v42 = vmul.f32 %v2002_v62, %v1986_v7  ;;  %v17895_v62 = vld [vmem:[#allocation15_spill] sm:$0xff] }
 0x25b   : > { %v1918_v25 = vpop.f32.mrf.mxu1  ;;  %v8214_v7 = vunpack.i.h.bf16 %v17895_v62 }
 0x25c   : > { %2034 = vst.msk [vmem:[#allocation2 + $0xa8] sm:$0xff] %vm307_vm1, %v2018_v42  ;;  %v1955_v53 = vmul.f32 %v12823_v40, %v1918_v25  ;;  %8676 = vrot.lane.b32.xlu2 %v8675_v41, %s10340_s14  ;;  %v8213_v41 = vunpack.i.l.bf16 %v17895_v62  ;;  %v8680_v42 = vpack.i.bf16 %v12897_v52, %v12570_v50  ;;  %v2050_v25 = vld [vmem:[%s10405_s10 + $0x10f] sm:$0xff]  ;;  %v12921_v50 = vld [vmem:[#allocation2 + $0xa0] sm:$0xff] }
 0x25d   : > { %8671 = vrot.lane.b32.xlu1 %v8670_v58, %s10340_s14  ;;  %17897 = vst [vmem:[#allocation75_spill] sm:$0xff] %v12921_v50 }
 0x25e   : > { %v1971_v15 = vadd.f32 %v12831_v26, %v1955_v53  ;;  %8666 = vrot.lane.b32.xlu0 %v8665_v17, %s10340_s14  ;;  %v12883_v29 = vpop.permute.xlu2 %8511  ;;  %v2049_v17 = vld [vmem:[%s10405_s10 + $0x107] sm:$0xff]  ;;  %v8254_v53 = vunpack.i.h.bf16 %v12274_v22 }
 0x25f   : > { %17894 = vst [vmem:[#allocation74_spill] sm:$0xff] %v12883_v29  ;;  %v12894_v54 = vpop.permute.xlu1 %8461 }
 0x260   : > { %v1987_v49 = vmax.f32 %v1971_v15, 0.0  ;;  %v12899_v23 = vpop.permute.xlu0 %8456  ;;  %v8253_v15 = vunpack.i.l.bf16 %v12274_v22  ;;  %v2145_v22 = vsel %vm307_vm1, %v2049_v17, %v8213_v41  ;;  %v8373_v17 = vunpack.i.l.bf16 %v12672_v57 }
 0x262   : > { %v2019_v58 = vmul.f32 %v2003_v36, %v1987_v49  ;;  %v8294_v36 = vunpack.i.h.bf16 %v12431_v28  ;;  %v2146_v49 = vsel %vm307_vm1, %v2050_v25, %v8214_v7  ;;  %v2241_v28 = vsel %vm512_vm2, %v2145_v22, %v8253_v15  ;;  %v2004_v7 = vld [vmem:[%s17260_s7 + $0x98] sm:$0xff] }
 0x263   : > { %v1920_v32 = vpop.f32.mrf.mxu1  ;;  %v12913_v31 = vld [vmem:[#allocation2 + $0xa8] sm:$0xff]  ;;  %v8414_v22 = vunpack.i.h.bf16 %v12809_v47 }
 0x264   : > { %17896 = vst [vmem:[#allocation15_spill] sm:$0xff] %v12913_v31  ;;  %v1956_v3 = vmul.f32 %v12823_v40, %v1920_v32  ;;  %8691 = vrot.lane.b32.xlu2 %v8690_v46, %s10341_s15  ;;  %v2242_v46 = vsel %vm512_vm2, %v2146_v49, %v8254_v53  ;;  %v8705_v53 = vpack.i.bf16 %v12663_v13, %v12678_v43  ;;  %v8219_v32 = vunpack.i.h.bf16 %v12189_v39 }
 0x265   : > { %2035 = vst.msk [vmem:[#allocation2 + $0xb0] sm:$0xff] %vm307_vm1, %v2019_v58  ;;  %8686 = vrot.lane.b32.xlu1 %v8685_v2, %s10340_s14  ;;  %v8334_v2 = vunpack.i.h.bf16 %v12370_v14  ;;  %v8333_v58 = vunpack.i.l.bf16 %v12370_v14  ;;  %v2325_v15 = vsel %vm596_vm3, %v2242_v46, %v8294_v36  ;;  %v8374_v14 = vunpack.i.h.bf16 %v12672_v57  ;;  %v2051_v46 = vld [vmem:[%s10405_s10 + $0x117] sm:$0xff] }
 0x266   : > { %v1972_v62 = vadd.f32 %v12831_v26, %v1956_v3  ;;  %8681 = vrot.lane.b32.xlu0 %v8680_v42, %s10340_s14  ;;  %v12927_v29 = vpop.permute.xlu2 %8526  ;;  %v2324_v42 = vsel %vm596_vm3, %v2241_v28, %v8293_v61  ;;  %v8700_v49 = vpack.i.bf16 %v12675_v5, %v12616_v12  ;;  %v8413_v61 = vunpack.i.l.bf16 %v12809_v47 }
 0x267   : > { %v12938_v41 = vpop.permute.xlu1 %8476  ;;  %v8218_v13 = vunpack.i.l.bf16 %v12189_v39  ;;  %v2394_v43 = vsel %vm667_vm4, %v2324_v42, %v8333_v58  ;;  %v8259_v57 = vunpack.i.h.bf16 %v12120_v18  ;;  %v2395_v12 = vsel %vm667_vm4, %v2325_v15, %v8334_v2  ;;  %v12969_v58 = vld [vmem:[%s10405_s10 + $0x209] sm:$0xff]  ;;  %v12975_v42 = vld [vmem:[#allocation2 + $0xa1] sm:$0xff] }
 0x268   : > { %v1988_v25 = vmax.f32 %v1972_v62, 0.0  ;;  %v12942_v3 = vpop.permute.xlu0 %8471  ;;  %v8695_v62 = vpack.i.bf16 %v12613_v60, %v12412_v21  ;;  %v2464_v5 = vsel %vm738_vm5, %v2394_v43, %v8373_v17  ;;  %v2465_v21 = vsel %vm738_vm5, %v2395_v12, %v8374_v14  ;;  %17899 = vst [vmem:[#allocation77_spill] sm:$0xff] %v12975_v42 }
 0x269   : > { %v8454_v39 = vunpack.i.h.bf16 %v12753_v30  ;;  %v8453_v60 = vunpack.i.l.bf16 %v12753_v30  ;;  %v2534_v17 = vsel %vm809_vm6, %v2464_v5, %v8413_v61  ;;  %v8258_v14 = vunpack.i.l.bf16 %v12120_v18 }
 0x26a   : > { %v2020_v28 = vmul.f32 %v2004_v7, %v1988_v25  ;;  %v2535_v25 = vsel %vm809_vm6, %v2465_v21, %v8414_v22  ;;  %v2147_v43 = vsel %vm307_vm1, %v2051_v46, %v8218_v13  ;;  %v8299_v61 = vunpack.i.h.bf16 %v12429_v33  ;;  %v2005_v22 = vld [vmem:[%s17260_s7 + $0xa0] sm:$0xff] }
 0x26b   : > { %v1923_v36 = vpop.f32.mrf.mxu1  ;;  %v8720_v18 = vpack.i.bf16 %v12969_v58, %v12726_v8  ;;  %v8298_v21 = vunpack.i.l.bf16 %v12429_v33  ;;  %v2604_v13 = vsel %vm880_vm8, %v2534_v17, %v8453_v60  ;;  %v2605_v46 = vsel %vm880_vm8, %v2535_v25, %v8454_v39 }
 0x26c   : > { %2036 = vst.msk [vmem:[#allocation2 + $0xb8] sm:$0xff] %vm307_vm1, %v2020_v28  ;;  %v1957_v47 = vmul.f32 %v12823_v40, %v1923_v36  ;;  %8706 = vrot.lane.b32.xlu2 %v8705_v53, %s10341_s15  ;;  %v12973_v7 = vld [vmem:[#allocation2 + $0xa9] sm:$0xff]  ;;  %v8338_v2 = vunpack.i.l.bf16 %v12586_v55  ;;  %v8339_v33 = vunpack.i.h.bf16 %v12586_v55  ;;  %v8378_v60 = vunpack.i.l.bf16 %v12511_v0 }
 0x26d   : > { %8701 = vrot.lane.b32.xlu1 %v8700_v49, %s10341_s15  ;;  %17898 = vst [vmem:[#allocation76_spill] sm:$0xff] %v12973_v7  ;;  %v10155_v49 = vld [vmem:[%s10405_s10 + $0x11f] sm:$0xff] }
 0x26e   : > { %v1973_v53 = vadd.f32 %v12831_v26, %v1957_v47  ;;  %8696 = vrot.lane.b32.xlu0 %v8695_v62, %s10341_s15  ;;  %v12981_v30 = vpop.permute.xlu2 %8541  ;;  %v2148_v28 = vsel %vm307_vm1, %v10155_v49, %v8219_v32  ;;  %v8715_v32 = vpack.i.bf16 %v12723_v51, %v12652_v9 }
 0x26f   : > { %v8492_v36 = vpop.permute.xlu1 %8491 }
 0x270   : > { %v1989_v62 = vmax.f32 %v1973_v53, 0.0  ;;  %v12993_v12 = vpop.permute.xlu0 %8486  ;;  %v8494_v5 = vunpack.i.h.bf16 %v8492_v36  ;;  %v8493_v47 = vunpack.i.l.bf16 %v8492_v36  ;;  %v8710_v53 = vpack.i.bf16 %v12649_v20, %v12666_v19 }
 0x271   : > { %v2243_v20 = vsel %vm512_vm2, %v2147_v43, %v8258_v14  ;;  %v2244_v19 = vsel %vm512_vm2, %v2148_v28, %v8259_v57  ;;  %v8379_v57 = vunpack.i.h.bf16 %v12511_v0  ;;  %v2006_v28 = vld [vmem:[%s17260_s7 + $0xa8] sm:$0xff]  ;;  %v8419_v0 = vunpack.i.h.bf16 %v12801_v38 }
 0x272   : > { %v2021_v49 = vmul.f32 %v2005_v22, %v1989_v62  ;;  %v2674_v15 = vsel %vm951_vm7, %v2604_v13, %v8493_v47  ;;  %v2675_v36 = vsel %vm951_vm7, %v2605_v46, %v8494_v5  ;;  %v2327_v55 = vsel %vm596_vm3, %v2244_v19, %v8299_v61  ;;  %v13035_v61 = vld [vmem:[%s10405_s10 + $0x211] sm:$0xff]  ;;  %v13038_v22 = vld [vmem:[%s10405_s10 + $0x219] sm:$0xff] }
 0x273   : > { %v1925_v8 = vpop.f32.mrf.mxu1  ;;  %v2690_v42 = vpack.c.bf16 %v2675_v36, %v2674_v15  ;;  %v13011_v51 = vld [vmem:[#allocation2 + $0xb8] sm:$0xff]  ;;  %v2326_v39 = vsel %vm596_vm3, %v2243_v20, %v8298_v21  ;;  %v13024_v15 = vld [vmem:[#allocation2 + $0xb0] sm:$0xff]  ;;  %v2397_v5 = vsel %vm667_vm4, %v2327_v55, %v8339_v33  ;;  %v8459_v21 = vunpack.i.h.bf16 %v12899_v23 }
 0x274   : > { %2037 = vst.msk [vmem:[#allocation2 + $0xc0] sm:$0xff] %vm307_vm1, %v2021_v49  ;;  %v1958_v9 = vmul.f32 %v12823_v40, %v1925_v8  ;;  %8721 = vrot.lane.b32.xlu2 %v8720_v18, %s10341_s15  ;;  %v2396_v14 = vsel %vm667_vm4, %v2326_v39, %v8338_v2  ;;  %v8735_v18 = vpack.i.bf16 %v12756_v35, %v12770_v11  ;;  %v8499_v11 = vunpack.i.h.bf16 %v12862_v4  ;;  %v10160_v62 = vld [vmem:[%s10405_s10 + $0x14f] sm:$0xff] }
 0x275   : > { %17900 = vst [vmem:[#allocation78_spill] sm:$0xff] %v13011_v51  ;;  %8716 = vrot.lane.b32.xlu1 %v8715_v32, %s10341_s15  ;;  %7389 = vmatmul.msk.bf16.vlgmr.msra.gmra.mxu2 %vm1012_vm9, %v2690_v42  ;;  %v8418_v42 = vunpack.i.l.bf16 %v12801_v38  ;;  %v8458_v32 = vunpack.i.l.bf16 %v12899_v23  ;;  %v8730_v13 = vpack.i.bf16 %v12767_v56, %v12714_v44  ;;  %v2466_v46 = vsel %vm738_vm5, %v2396_v14, %v8378_v60  ;;  %v2007_v60 = vld [vmem:[%s17260_s7 + $0xb0] sm:$0xff] }
 0x276   : > { %v1974_v17 = vadd.f32 %v12831_v26, %v1958_v9  ;;  %8711 = vrot.lane.b32.xlu0 %v8710_v53, %s10341_s15  ;;  %v13022_v25 = vpop.permute.xlu2 %8556  ;;  %17902 = vst [vmem:[#allocation80_spill] sm:$0xff] %v13024_v15  ;;  %v8725_v53 = vpack.i.bf16 %v13038_v22, %v13035_v61  ;;  %v2467_v38 = vsel %vm738_vm5, %v2397_v5, %v8379_v57  ;;  %v8498_v23 = vunpack.i.l.bf16 %v12862_v4  ;;  %v13510_v15 = vld [vmem:[#allocation2 + $0x80] sm:$0xff] }
 0x277   : > { %17901 = vst [vmem:[#allocation79_spill] sm:$0xff] %v13022_v25  ;;  %v13032_v43 = vpop.permute.xlu1 %8506  ;;  %v2536_v36 = vsel %vm809_vm6, %v2466_v46, %v8418_v42  ;;  %v2537_v35 = vsel %vm809_vm6, %v2467_v38, %v8419_v0  ;;  %v8224_v55 = vunpack.i.h.bf16 %v12182_v37  ;;  %v8223_v39 = vunpack.i.l.bf16 %v12182_v37  ;;  %v10157_v38 = vld [vmem:[%s10405_s10 + $0x127] sm:$0xff] }
 0x278   : > { %v1990_v2 = vmax.f32 %v1974_v17, 0.0  ;;  %v13044_v47 = vpop.permute.xlu0 %8501  ;;  %v2606_v56 = vsel %vm880_vm8, %v2536_v36, %v8458_v32  ;;  %v2607_v9 = vsel %vm880_vm8, %v2537_v35, %v8459_v21  ;;  %v8750_v42 = vpack.i.bf16 %v12793_v48, %v12807_v1  ;;  %v17904_v21 = vld [vmem:[#allocation66_spill] sm:$0xff]  ;;  %v17905_v32 = vld [vmem:[#allocation65_spill] sm:$0xff] }
 0x279   : > { %v2677_v5 = vsel %vm951_vm7, %v2607_v9, %v8499_v11  ;;  %v8264_v37 = vunpack.i.h.bf16 %v12332_v16  ;;  %v8263_v0 = vunpack.i.l.bf16 %v12332_v16  ;;  %v10156_v48 = vld [vmem:[%s10405_s10 + $0x12f] sm:$0xff]  ;;  %v2149_v36 = vsel %vm307_vm1, %v10157_v38, %v8223_v39  ;;  %v17910_v39 = vld [vmem:[#allocation63_spill] sm:$0xff] }
 0x27a   : > { %v2022_v49 = vmul.f32 %v2006_v28, %v1990_v2  ;;  %v2676_v28 = vsel %vm951_vm7, %v2606_v56, %v8498_v23  ;;  %v8745_v2 = vpack.i.bf16 %v12804_v24, %v12748_v34  ;;  %v2150_v1 = vsel %vm307_vm1, %v10156_v48, %v8224_v55  ;;  %v17907_v16 = vld [vmem:[#allocation17_spill] sm:$0xff]  ;;  %v17908_v23 = vld [vmem:[#allocation3_spill] sm:$0xff]  ;;  %v17911_v48 = vld [vmem:[#allocation54_spill] sm:$0xff] }
 0x27b   : > { %v1928_v8 = vpop.f32.mrf.mxu1  ;;  %v13057_v33 = vld [vmem:[#allocation2 + $0xc0] sm:$0xff]  ;;  %v8304_v24 = vunpack.i.h.bf16 %v17907_v16  ;;  %v2245_v35 = vsel %vm512_vm2, %v2149_v36, %v8263_v0  ;;  %v2246_v11 = vsel %vm512_vm2, %v2150_v1, %v8264_v37  ;;  %v3339_v9 = vld [vmem:[%s10405_s10 + $0x22f] sm:$0xff]  ;;  %v8344_v55 = vunpack.i.h.bf16 %v17908_v23  ;;  %v2008_v0 = vld [vmem:[%s17260_s7 + $0xb8] sm:$0xff] }
 0x27c   : > { %17903 = vst [vmem:[#allocation81_spill] sm:$0xff] %v13057_v33  ;;  %v1959_v44 = vmul.f32 %v12823_v40, %v1928_v8  ;;  %8736 = vrot.lane.b32.xlu2 %v8735_v18, %s10342_s16  ;;  %v8303_v8 = vunpack.i.l.bf16 %v17907_v16  ;;  %v3338_v56 = vld [vmem:[%s10405_s10 + $0x227] sm:$0xff]  ;;  %v8384_v37 = vunpack.i.h.bf16 %v17910_v39  ;;  %v8423_v1 = vunpack.i.l.bf16 %v17911_v48  ;;  %v17912_v38 = vld [vmem:[#allocation69_spill] sm:$0xff] }
 0x27d   : > { %2038 = vst.msk [vmem:[#allocation2 + $0xc8] sm:$0xff] %vm307_vm1, %v2022_v49  ;;  %8731 = vrot.lane.b32.xlu1 %v8730_v13, %s10342_s16  ;;  %v8740_v13 = vpack.i.bf16 %v17905_v32, %v17904_v21  ;;  %v2691_v49 = vpack.c.bf16 %v2677_v5, %v2676_v28  ;;  %v3337_v28 = vld [vmem:[%s10405_s10 + $0x21f] sm:$0xff] }
 0x27e   : > { %v1975_v20 = vadd.f32 %v12831_v26, %v1959_v44  ;;  %8726 = vrot.lane.b32.xlu0 %v8725_v53, %s10341_s15  ;;  %v13070_v19 = vpop.permute.xlu2 %8571  ;;  %v8343_v44 = vunpack.i.l.bf16 %v17908_v23  ;;  %v8760_v36 = vpack.i.bf16 %v3337_v28, %v17912_v38 }
 0x27f   : > { %v13079_v17 = vpop.permute.xlu1 %8521 }
 0x280   : > { %v1991_v57 = vmax.f32 %v1975_v20, 0.0  ;;  %v13081_v14 = vpop.permute.xlu0 %8516  ;;  %v13111_v20 = vld [vmem:[#allocation2 + $0xb9] sm:$0xff] }
 0x281   : > { %17909 = vst [vmem:[#allocation65_spill] sm:$0xff] %v13111_v20 }
 0x282   : > { %v2023_v18 = vmul.f32 %v2007_v60, %v1991_v57  ;;  %v8383_v60 = vunpack.i.l.bf16 %v17910_v39 }
 0x283   : > { %v1930_v46 = vpop.f32.mrf.mxu1 }
 0x284   : > { %v13093_v53 = vld [vmem:[#allocation2 + $0xc1] sm:$0xff]  ;;  %2039 = vst.msk [vmem:[#allocation2 + $0xd0] sm:$0xff] %vm307_vm1, %v2023_v18  ;;  %v1960_v34 = vmul.f32 %v12823_v40, %v1930_v46  ;;  %8751 = vrot.lane.b32.xlu2 %v8750_v42, %s10342_s16  ;;  %v2328_v18 = vsel %vm596_vm3, %v2245_v35, %v8303_v8  ;;  %v2329_v46 = vsel %vm596_vm3, %v2246_v11, %v8304_v24  ;;  %v8464_v35 = vunpack.i.h.bf16 %v12894_v54 }
 0x285   : > { %17906 = vst [vmem:[#allocation66_spill] sm:$0xff] %v13093_v53  ;;  %8746 = vrot.lane.b32.xlu1 %v8745_v2, %s10342_s16  ;;  %7390 = vmatmul.msk.bf16.gmra.mxu2 %vm1012_vm9, %v2691_v49  ;;  %v2398_v49 = vsel %vm667_vm4, %v2328_v18, %v8343_v44  ;;  %v2399_v16 = vsel %vm667_vm4, %v2329_v46, %v8344_v55  ;;  %v8503_v55 = vunpack.i.l.bf16 %v13044_v47  ;;  %v17964_v53 = vld [vmem:[#allocation29_spill] sm:$0xff] }
 0x286   : > { %v1976_v57 = vadd.f32 %v12831_v26, %v1960_v34  ;;  %8741 = vrot.lane.b32.xlu0 %v8740_v13, %s10342_s16  ;;  %v13117_v42 = vpop.permute.xlu2 %8586  ;;  %v8765_v13 = vpack.i.bf16 %v3339_v9, %v3338_v56  ;;  %v8424_v34 = vunpack.i.h.bf16 %v17911_v48  ;;  %v2468_v23 = vsel %vm738_vm5, %v2398_v49, %v8383_v60 }
 0x287   : > { %v13126_v2 = vpop.permute.xlu1 %8536  ;;  %v2469_v8 = vsel %vm738_vm5, %v2399_v16, %v8384_v37  ;;  %v8463_v56 = vunpack.i.l.bf16 %v12894_v54  ;;  %v8504_v9 = vunpack.i.h.bf16 %v13044_v47  ;;  %v13152_v54 = vld [vmem:[#allocation2 + $0xc8] sm:$0xff]  ;;  %v17916_v37 = vpack.i.bf16 %v12784_v59, %v12796_v6  ;;  %v2009_v59 = vld [vmem:[%s17260_s7 + $0xc0] sm:$0xff] }
 0x288   : > { %v1992_v21 = vmax.f32 %v1976_v57, 0.0  ;;  %v13129_v32 = vpop.permute.xlu0 %8531  ;;  %v2538_v57 = vsel %vm809_vm6, %v2468_v23, %v8423_v1  ;;  %17915 = vst [vmem:[#allocation63_spill] sm:$0xff] %v13152_v54  ;;  %v17920_v23 = vld [vmem:[#allocation42_spill] sm:$0xff]  ;;  %v10161_v54 = vld [vmem:[%s10405_s10 + $0x147] sm:$0xff]  ;;  %v8438_v7 = vunpack.i.l.bf16 %v17964_v53 }
 0x289   : > { %v2608_v48 = vsel %vm880_vm8, %v2538_v57, %v8463_v56  ;;  %v10158_v57 = vld [vmem:[%s10405_s10 + $0x13f] sm:$0xff] }
 0x28a   : > { %v2024_v39 = vmul.f32 %v2008_v0, %v1992_v21  ;;  %v2539_v0 = vsel %vm809_vm6, %v2469_v8, %v8424_v34  ;;  %v2678_v16 = vsel %vm951_vm7, %v2608_v48, %v8503_v55  ;;  %v8268_v8 = vunpack.i.l.bf16 %v17920_v23  ;;  %v17922_v55 = vld [vmem:[#allocation25_spill] sm:$0xff] }
 0x28b   : > { %v1933_v24 = vpop.f32.mrf.mxu1  ;;  %v13141_v11 = vld [vmem:[#allocation2 + $0xd0] sm:$0xff]  ;;  %v2609_v1 = vsel %vm880_vm8, %v2539_v0, %v8464_v35 }
 0x28c   : > { %17913 = vst [vmem:[#allocation17_spill] sm:$0xff] %v13141_v11  ;;  %v13143_v44 = vld [vmem:[#allocation2 + $0xc9] sm:$0xff]  ;;  %v1961_v60 = vmul.f32 %v12823_v40, %v1933_v24  ;;  %8766 = vrot.lane.b32.xlu2 %v8765_v13, %s10342_s16  ;;  %v2679_v34 = vsel %vm951_vm7, %v2609_v1, %v8504_v9  ;;  %v17921_v24 = vld [vmem:[#allocation34_spill] sm:$0xff] }
 0x28d   : > { %17914 = vst [vmem:[#allocation3_spill] sm:$0xff] %v13143_v44  ;;  %8761 = vrot.lane.b32.xlu1 %v8760_v36, %s10342_s16  ;;  %v17918_v13 = vld [vmem:[#allocation41_spill] sm:$0xff]  ;;  %v2692_v56 = vpack.c.bf16 %v2679_v34, %v2678_v16  ;;  %v8439_v44 = vunpack.i.h.bf16 %v17964_v53 }
 0x28e   : > { %2040 = vst.msk [vmem:[#allocation2 + $0xd8] sm:$0xff] %vm307_vm1, %v2024_v39  ;;  %v1977_v28 = vadd.f32 %v12831_v26, %v1961_v60  ;;  %8756 = vrot.lane.b32.xlu0 %v17916_v37, %s10342_s16  ;;  %v13159_v47 = vpop.permute.xlu2 %8601  ;;  %v8229_v46 = vunpack.i.h.bf16 %v17918_v13  ;;  %v8228_v49 = vunpack.i.l.bf16 %v17918_v13  ;;  %v8269_v39 = vunpack.i.h.bf16 %v17920_v23  ;;  %v17926_v34 = vld [vmem:[#allocation33_spill] sm:$0xff] }
 0x28f   : > { %17917 = vst [vmem:[#allocation54_spill] sm:$0xff] %v13159_v47  ;;  %v13171_v6 = vpop.permute.xlu1 %8551  ;;  %v8308_v60 = vunpack.i.l.bf16 %v17921_v24  ;;  %v8309_v13 = vunpack.i.h.bf16 %v17921_v24  ;;  %v8388_v23 = vunpack.i.l.bf16 %v17926_v34 }
 0x290   : > { %17919 = vst [vmem:[#allocation69_spill] sm:$0xff] %v13171_v6  ;;  %v1993_v38 = vmax.f32 %v1977_v28, 0.0  ;;  %v13175_v36 = vpop.permute.xlu0 %8546  ;;  %v2152_v35 = vsel %vm307_vm1, %v10158_v57, %v8229_v46  ;;  %v10159_v28 = vld [vmem:[%s10405_s10 + $0x137] sm:$0xff]  ;;  %v17925_v46 = vld [vmem:[#allocation43_spill] sm:$0xff]  ;;  %v8389_v57 = vunpack.i.h.bf16 %v17926_v34  ;;  %v13702_v6 = vld [vmem:[#allocation2 + $0x8f] sm:$0xff] }
 0x291   : > { %v2151_v0 = vsel %vm307_vm1, %v10159_v28, %v8228_v49 }
 0x292   : > { %v2025_v37 = vmul.f32 %v2009_v59, %v1993_v38  ;;  %v2248_v59 = vsel %vm512_vm2, %v2152_v35, %v8269_v39  ;;  %v2247_v1 = vsel %vm512_vm2, %v2151_v0, %v8268_v8  ;;  %v17924_v38 = vld [vmem:[#allocation8_spill] sm:$0xff]  ;;  %v8428_v35 = vunpack.i.l.bf16 %v12845_v10 }
 0x293   : > { %v1935_v5 = vpop.f32.mrf.mxu1  ;;  %v8348_v16 = vunpack.i.l.bf16 %v17924_v38  ;;  %v8349_v49 = vunpack.i.h.bf16 %v17924_v38  ;;  %v2331_v8 = vsel %vm596_vm3, %v2248_v59, %v8309_v13  ;;  %v8429_v0 = vunpack.i.h.bf16 %v12845_v10 }
 0x294   : > { %2041 = vst.msk [vmem:[#allocation2 + $0xe0] sm:$0xff] %vm307_vm1, %v2025_v37  ;;  %v1962_v9 = vmul.f32 %v12823_v40, %v1935_v5  ;;  %8781 = vrot.lane.b32.xlu2 %v17922_v55, %s10343_s17  ;;  %v2330_v5 = vsel %vm596_vm3, %v2247_v1, %v8308_v60  ;;  %v17927_v37 = vld [vmem:[#allocation6_spill] sm:$0xff]  ;;  %v8795_v13 = vpack.i.bf16 %v12886_v63, %v12897_v52  ;;  %v8509_v52 = vunpack.i.h.bf16 %v13032_v43 }
 0x295   : > { %v13191_v48 = vld [vmem:[#allocation2 + $0xd1] sm:$0xff]  ;;  %8776 = vrot.lane.b32.xlu1 %v17925_v46, %s10343_s17  ;;  %7391 = vmatmul.msk.bf16.gmra.mxu2 %vm1012_vm9, %v2692_v56  ;;  %v2010_v56 = vld [vmem:[%s17260_s7 + $0xc8] sm:$0xff]  ;;  %v2400_v59 = vsel %vm667_vm4, %v2330_v5, %v8348_v16  ;;  %v2401_v1 = vsel %vm667_vm4, %v2331_v8, %v8349_v49  ;;  %v8508_v16 = vunpack.i.l.bf16 %v13032_v43  ;;  %v17933_v8 = vld [vmem:[#allocation51_spill] sm:$0xff] }
 0x296   : > { %17923 = vst [vmem:[#allocation41_spill] sm:$0xff] %v13191_v48  ;;  %v1978_v24 = vadd.f32 %v12831_v26, %v1962_v9  ;;  %8771 = vrot.lane.b32.xlu0 %v17927_v37, %s10343_s17  ;;  %v13205_v39 = vpop.permute.xlu2 %8616  ;;  %v2470_v38 = vsel %vm738_vm5, %v2400_v59, %v8388_v23  ;;  %v2471_v34 = vsel %vm738_vm5, %v2401_v1, %v8389_v57  ;;  %v17930_v37 = vld [vmem:[#allocation70_spill] sm:$0xff]  ;;  %v3409_v59 = vld [vmem:[%s10405_s10 + $0x230] sm:$0xff] }
 0x297   : > { %v13213_v60 = vpop.permute.xlu1 %8566  ;;  %v8469_v21 = vunpack.i.h.bf16 %v17930_v37  ;;  %v8468_v28 = vunpack.i.l.bf16 %v17930_v37  ;;  %v2540_v10 = vsel %vm809_vm6, %v2470_v38, %v8428_v35  ;;  %v2541_v63 = vsel %vm809_vm6, %v2471_v34, %v8429_v0  ;;  %v17932_v5 = vld [vmem:[#allocation46_spill] sm:$0xff]  ;;  %v2011_v1 = vld [vmem:[%s17260_s7 + $0xd0] sm:$0xff] }
 0x298   : > { %17928 = vst [vmem:[#allocation42_spill] sm:$0xff] %v13213_v60  ;;  %v1994_v9 = vmax.f32 %v1978_v24, 0.0  ;;  %v13218_v55 = vpop.permute.xlu0 %8561  ;;  %v8234_v23 = vunpack.i.h.bf16 %v17932_v5  ;;  %v13240_v57 = vld [vmem:[#allocation2 + $0xd8] sm:$0xff]  ;;  %v8233_v35 = vunpack.i.l.bf16 %v17932_v5 }
 0x299   : > { %17929 = vst [vmem:[#allocation34_spill] sm:$0xff] %v13218_v55  ;;  %v17935_v43 = vld [vmem:[#allocation30_spill] sm:$0xff]  ;;  %v2610_v34 = vsel %vm880_vm8, %v2540_v10, %v8468_v28  ;;  %v2611_v37 = vsel %vm880_vm8, %v2541_v63, %v8469_v21 }
 0x29a   : > { %v2026_v46 = vmul.f32 %v2010_v56, %v1994_v9  ;;  %17934 = vst [vmem:[#allocation8_spill] sm:$0xff] %v13240_v57  ;;  %v3408_v9 = vld [vmem:[%s10405_s10 + $0x228] sm:$0xff]  ;;  %v2680_v5 = vsel %vm951_vm7, %v2610_v34, %v8508_v16  ;;  %v2154_v20 = vsel %vm307_vm1, %v10160_v62, %v8234_v23  ;;  %v2153_v28 = vsel %vm307_vm1, %v10161_v54, %v8233_v35  ;;  %v17938_v10 = vld [vmem:[#allocation22_spill] sm:$0xff] }
 0x29b   : > { %v1938_v24 = vpop.f32.mrf.mxu1  ;;  %v13229_v4 = vld [vmem:[#allocation2 + $0xe0] sm:$0xff]  ;;  %v8805_v48 = vpack.i.bf16 %v3409_v59, %v3408_v9  ;;  %v8313_v21 = vunpack.i.l.bf16 %v17938_v10  ;;  %v8314_v16 = vunpack.i.h.bf16 %v17938_v10  ;;  %v17939_v34 = vld [vmem:[#allocation32_spill] sm:$0xff]  ;;  %v17942_v23 = vld [vmem:[#allocation62_spill] sm:$0xff] }
 0x29c   : > { %17931 = vst [vmem:[#allocation25_spill] sm:$0xff] %v13229_v4  ;;  %v1963_v49 = vmul.f32 %v12823_v40, %v1938_v24  ;;  %8796 = vrot.lane.b32.xlu2 %v8795_v13, %s10343_s17  ;;  %v8354_v62 = vunpack.i.h.bf16 %v17939_v34  ;;  %v13287_v9 = vld [vmem:[#allocation2 + $0xd9] sm:$0xff] }
 0x29d   : > { %2042 = vst.msk [vmem:[#allocation2 + $0xe8] sm:$0xff] %vm307_vm1, %v2026_v46  ;;  %8791 = vrot.lane.b32.xlu1 %v17933_v8, %s10343_s17  ;;  %v3407_v46 = vld [vmem:[%s10405_s10 + $0x220] sm:$0xff]  ;;  %v2681_v8 = vsel %vm951_vm7, %v2611_v37, %v8509_v52  ;;  %v8353_v52 = vunpack.i.l.bf16 %v17939_v34 }
 0x29e   : > { %v1979_v56 = vadd.f32 %v12831_v26, %v1963_v49  ;;  %8786 = vrot.lane.b32.xlu0 %v17935_v43, %s10343_s17  ;;  %v13246_v0 = vpop.permute.xlu2 %8631  ;;  %v17937_v43 = vld [vmem:[#allocation14_spill] sm:$0xff]  ;;  %v2693_v11 = vpack.c.bf16 %v2681_v8, %v2680_v5  ;;  %17943 = vst [vmem:[#allocation70_spill] sm:$0xff] %v13287_v9  ;;  %v8433_v8 = vunpack.i.l.bf16 %v12843_v27 }
 0x29f   : > { %17936 = vst [vmem:[#allocation43_spill] sm:$0xff] %v13246_v0  ;;  %v13255_v38 = vpop.permute.xlu1 %8581  ;;  %v8274_v13 = vunpack.i.h.bf16 %v17937_v43  ;;  %v8273_v18 = vunpack.i.l.bf16 %v17937_v43  ;;  %v10181_v55 = vld [vmem:[%s10405_s10 + $0x17f] sm:$0xff] }
 0x2a0   : > { %v1995_v24 = vmax.f32 %v1979_v56, 0.0  ;;  %v13260_v49 = vpop.permute.xlu0 %8576  ;;  %v8800_v56 = vpack.i.bf16 %v3407_v46, %v12889_v45  ;;  %v17944_v46 = vld [vmem:[#allocation11_spill] sm:$0xff] }
 0x2a1   : > { %v2249_v45 = vsel %vm512_vm2, %v2153_v28, %v8273_v18  ;;  %v2250_v35 = vsel %vm512_vm2, %v2154_v20, %v8274_v13  ;;  %v2012_v28 = vld [vmem:[%s17260_s7 + $0xd8] sm:$0xff] }
 0x2a2   : > { %v2027_v63 = vmul.f32 %v2011_v1, %v1995_v24  ;;  %v2332_v1 = vsel %vm596_vm3, %v2249_v45, %v8313_v21  ;;  %v8393_v24 = vunpack.i.l.bf16 %v17944_v46 }
 0x2a3   : > { %v1940_v37 = vpop.f32.mrf.mxu1  ;;  %v2402_v13 = vsel %vm667_vm4, %v2332_v1, %v8353_v52  ;;  %v8473_v52 = vunpack.i.l.bf16 %v12942_v3 }
 0x2a4   : > { %v13274_v57 = vld [vmem:[#allocation2 + $0xe8] sm:$0xff]  ;;  %2043 = vst.msk [vmem:[#allocation2 + $0xf0] sm:$0xff] %vm307_vm1, %v2027_v63  ;;  %v1964_v54 = vmul.f32 %v12823_v40, %v1940_v37  ;;  %8811 = vrot.lane.b32.xlu2 %v17942_v23, %s10344_s18  ;;  %v8434_v63 = vunpack.i.h.bf16 %v12843_v27  ;;  %v2472_v37 = vsel %vm738_vm5, %v2402_v13, %v8393_v24  ;;  %v17950_v24 = vld [vmem:[#allocation7_spill] sm:$0xff] }
 0x2a5   : > { %17940 = vst [vmem:[#allocation33_spill] sm:$0xff] %v13274_v57  ;;  %v13276_v43 = vld [vmem:[#allocation2 + $0xe1] sm:$0xff]  ;;  %8806 = vrot.lane.b32.xlu1 %v8805_v48, %s10343_s17  ;;  %7392 = vmatmul.msk.bf16.gmra.mxu2 %vm1012_vm9, %v2693_v11  ;;  %v2333_v11 = vsel %vm596_vm3, %v2250_v35, %v8314_v16  ;;  %v8394_v48 = vunpack.i.h.bf16 %v17944_v46  ;;  %v8474_v16 = vunpack.i.h.bf16 %v12942_v3  ;;  %v2542_v45 = vsel %vm809_vm6, %v2472_v37, %v8433_v8  ;;  %v17953_v37 = vld [vmem:[#allocation61_spill] sm:$0xff] }
 0x2a6   : > { %17941 = vst [vmem:[#allocation6_spill] sm:$0xff] %v13276_v43  ;;  %v1980_v5 = vadd.f32 %v12831_v26, %v1964_v54  ;;  %8801 = vrot.lane.b32.xlu0 %v8800_v56, %s10343_s17  ;;  %v13295_v18 = vpop.permute.xlu2 %8646  ;;  %v2403_v21 = vsel %vm667_vm4, %v2333_v11, %v8354_v62  ;;  %v17949_v62 = vld [vmem:[#allocation74_spill] sm:$0xff]  ;;  %v17951_v11 = vld [vmem:[#allocation31_spill] sm:$0xff]  ;;  %v2612_v13 = vsel %vm880_vm8, %v2542_v45, %v8473_v52 }
 0x2a7   : > { %17945 = vst [vmem:[#allocation46_spill] sm:$0xff] %v13295_v18  ;;  %v13306_v10 = vpop.permute.xlu1 %8596  ;;  %v2473_v23 = vsel %vm738_vm5, %v2403_v21, %v8394_v48  ;;  %v8514_v46 = vunpack.i.h.bf16 %v17949_v62  ;;  %v3477_v48 = vld [vmem:[%s10405_s10 + $0x221] sm:$0xff] }
 0x2a8   : > { %17946 = vst [vmem:[#allocation51_spill] sm:$0xff] %v13306_v10  ;;  %v1996_v56 = vmax.f32 %v1980_v5, 0.0  ;;  %v13310_v34 = vpop.permute.xlu0 %8591  ;;  %v2543_v27 = vsel %vm809_vm6, %v2473_v23, %v8434_v63  ;;  %v8513_v5 = vunpack.i.l.bf16 %v17949_v62  ;;  %v17952_v63 = vld [vmem:[#allocation38_spill] sm:$0xff]  ;;  %v8238_v23 = vunpack.i.l.bf16 %v17953_v37  ;;  %v2013_v52 = vld [vmem:[%s17260_s7 + $0xe0] sm:$0xff]  ;;  %v13677_v10 = vld [vmem:[#allocation2 + $0x6f] sm:$0xff] }
 0x2a9   : > { %17947 = vst [vmem:[#allocation30_spill] sm:$0xff] %v13310_v34  ;;  %v2613_v8 = vsel %vm880_vm8, %v2543_v27, %v8474_v16  ;;  %v8840_v27 = vpack.i.bf16 %v3477_v48, %v13038_v22  ;;  %v10163_v22 = vld [vmem:[%s10405_s10 + $0x157] sm:$0xff]  ;;  %v17957_v48 = vld [vmem:[#allocation27_spill] sm:$0xff] }
 0x2aa   : > { %v2028_v54 = vmul.f32 %v2012_v28, %v1996_v56  ;;  %v2682_v62 = vsel %vm951_vm7, %v2612_v13, %v8513_v5  ;;  %v10162_v28 = vld [vmem:[%s10405_s10 + $0x15f] sm:$0xff]  ;;  %v2155_v5 = vsel %vm307_vm1, %v10163_v22, %v8238_v23  ;;  %v8318_v13 = vunpack.i.l.bf16 %v17957_v48  ;;  %v13695_v34 = vld [vmem:[#allocation2 + $0x97] sm:$0xff] }
 0x2ab   : > { %v1943_v35 = vpop.f32.mrf.mxu1  ;;  %v13317_v1 = vld [vmem:[#allocation2 + $0xf0] sm:$0xff]  ;;  %v3781_v23 = vld [vmem:[#allocation2 + $0x18] sm:$0xff]  ;;  %v17978_v18 = vld [vmem:[#allocation71_spill] sm:$0xff] }
 0x2ac   : > { %17948 = vst [vmem:[#allocation14_spill] sm:$0xff] %v13317_v1  ;;  %v1965_v3 = vmul.f32 %v12823_v40, %v1943_v35  ;;  %8826 = vrot.lane.b32.xlu2 %v17950_v24, %s10344_s18  ;;  %v17955_v24 = vld [vmem:[#allocation50_spill] sm:$0xff]  ;;  %v8483_v60 = vunpack.i.l.bf16 %v17978_v18 }
 0x2ad   : > { %2044 = vst.msk [vmem:[#allocation2 + $0xf8] sm:$0xff] %vm307_vm1, %v2028_v54  ;;  %8821 = vrot.lane.b32.xlu1 %v17951_v11, %s10344_s18  ;;  %v8239_v54 = vunpack.i.h.bf16 %v17953_v37  ;;  %v8279_v11 = vunpack.i.h.bf16 %v17955_v24  ;;  %v8835_v37 = vpack.i.bf16 %v13035_v61, %v12969_v58 }
 0x2ae   : > { %v1981_v21 = vadd.f32 %v12831_v26, %v1965_v3  ;;  %8816 = vrot.lane.b32.xlu0 %v17952_v63, %s10344_s18  ;;  %v13336_v56 = vpop.permute.xlu2 %8661  ;;  %v2683_v3 = vsel %vm951_vm7, %v2613_v8, %v8514_v46  ;;  %v8278_v63 = vunpack.i.l.bf16 %v17955_v24  ;;  %v8319_v46 = vunpack.i.h.bf16 %v17957_v48  ;;  %v13378_v24 = vld [vmem:[#allocation2 + $0x20] sm:$0xff]  ;;  %v3479_v48 = vld [vmem:[%s10405_s10 + $0x231] sm:$0xff] }
 0x2af   : > { %v13343_v16 = vpop.permute.xlu1 %8611  ;;  %v2156_v59 = vsel %vm307_vm1, %v10162_v28, %v8239_v54  ;;  %v2694_v9 = vpack.c.bf16 %v2683_v3, %v2682_v62  ;;  %v17958_v28 = vld [vmem:[#allocation36_spill] sm:$0xff]  ;;  %v3780_v3 = vld [vmem:[#allocation2 + $0x10] sm:$0xff]  ;;  %v8855_v33 = vpack.i.bf16 %v13378_v24, %v3781_v23  ;;  %v8519_v23 = vunpack.i.h.bf16 %v13081_v14 }
 0x2b0   : > { %v1997_v45 = vmax.f32 %v1981_v21, 0.0  ;;  %v13345_v35 = vpop.permute.xlu0 %8606  ;;  %v2251_v58 = vsel %vm512_vm2, %v2155_v5, %v8278_v63  ;;  %v2252_v61 = vsel %vm512_vm2, %v2156_v59, %v8279_v11  ;;  %v8359_v54 = vunpack.i.h.bf16 %v17958_v28  ;;  %v3779_v59 = vld [vmem:[#allocation2 + $0x8] sm:$0xff] }
 0x2b1   : > { %17954 = vst [vmem:[#allocation22_spill] sm:$0xff] %v13345_v35  ;;  %v17962_v63 = vld [vmem:[#allocation68_spill] sm:$0xff]  ;;  %v8484_v35 = vunpack.i.h.bf16 %v17978_v18  ;;  %v13528_v18 = vld [vmem:[#allocation2 + $0x31] sm:$0xff] }
 0x2b2   : > { %v2029_v20 = vmul.f32 %v2013_v52, %v1997_v45  ;;  %v8358_v52 = vunpack.i.l.bf16 %v17958_v28  ;;  %v3478_v5 = vld [vmem:[%s10405_s10 + $0x229] sm:$0xff]  ;;  %v2335_v28 = vsel %vm596_vm3, %v2252_v61, %v8319_v46  ;;  %v8478_v61 = vunpack.i.l.bf16 %v12938_v41 }
 0x2b3   : > { %v1945_v21 = vpop.f32.mrf.mxu1  ;;  %v8845_v57 = vpack.i.bf16 %v3479_v48, %v3478_v5  ;;  %v13434_v48 = vld [vmem:[#allocation2 + $0x30] sm:$0xff] }
 0x2b4   : > { %v13356_v43 = vld [vmem:[#allocation2 + $0xf1] sm:$0xff]  ;;  %2045 = vst.msk [vmem:[#allocation2 + $0x100] sm:$0xff] %vm307_vm1, %v2029_v20  ;;  %v1966_v8 = vmul.f32 %v12823_v40, %v1945_v21  ;;  %8841 = vrot.lane.b32.xlu2 %v8840_v27, %s10344_s18  ;;  %v13371_v20 = vld [vmem:[#allocation2 + $0xe9] sm:$0xff] }
 0x2b5   : > { %17956 = vst [vmem:[#allocation32_spill] sm:$0xff] %v13356_v43  ;;  %8836 = vrot.lane.b32.xlu1 %v8835_v37, %s10344_s18  ;;  %7393 = vmatmul.msk.bf16.gmra.mxu2 %vm1012_vm9, %v2694_v9  ;;  %v17960_v27 = vld [vmem:[#allocation64_spill] sm:$0xff]  ;;  %v8399_v37 = vunpack.i.h.bf16 %v17962_v63  ;;  %v8398_v9 = vunpack.i.l.bf16 %v17962_v63  ;;  %v8850_v63 = vpack.i.bf16 %v3780_v3, %v3779_v59  ;;  %v8518_v59 = vunpack.i.l.bf16 %v13081_v14 }
 0x2b6   : > { %17959 = vst [vmem:[#allocation62_spill] sm:$0xff] %v13371_v20  ;;  %v1982_v45 = vadd.f32 %v12831_v26, %v1966_v8  ;;  %8831 = vrot.lane.b32.xlu0 %v17960_v27, %s10344_s18  ;;  %v13376_v62 = vpop.permute.xlu2 %8676  ;;  %v2014_v21 = vld [vmem:[%s17260_s7 + $0xe8] sm:$0xff]  ;;  %v2334_v8 = vsel %vm596_vm3, %v2251_v58, %v8318_v13  ;;  %v2405_v20 = vsel %vm667_vm4, %v2335_v28, %v8359_v54  ;;  %v8479_v58 = vunpack.i.h.bf16 %v12938_v41 }
 0x2b7   : > { %17961 = vst [vmem:[#allocation11_spill] sm:$0xff] %v13376_v62  ;;  %v13387_v22 = vpop.permute.xlu1 %8626  ;;  %v2404_v11 = vsel %vm667_vm4, %v2334_v8, %v8358_v52  ;;  %v2475_v46 = vsel %vm738_vm5, %v2405_v20, %v8399_v37  ;;  %v13413_v20 = vld [vmem:[#allocation2 + $0xf8] sm:$0xff]  ;;  %v10169_v41 = vld [vmem:[%s10405_s10 + $0x167] sm:$0xff] }
 0x2b8   : > { %17963 = vst [vmem:[#allocation74_spill] sm:$0xff] %v13387_v22  ;;  %v1998_v27 = vmax.f32 %v1982_v45, 0.0  ;;  %v13393_v1 = vpop.permute.xlu0 %8621  ;;  %v2474_v13 = vsel %vm738_vm5, %v2404_v11, %v8398_v9  ;;  %v2015_v9 = vld [vmem:[%s17260_s7 + $0xf0] sm:$0xff] }
 0x2b9   : > { %17967 = vst [vmem:[#allocation38_spill] sm:$0xff] %v13413_v20 }
 0x2ba   : > { %v2030_v4 = vmul.f32 %v2014_v21, %v1998_v27  ;;  %v17971_v27 = vld [vmem:[#allocation9_spill] sm:$0xff] }
 0x2bb   : > { %v1948_v52 = vpop.f32.mrf.mxu1  ;;  %v13404_v45 = vld [vmem:[#allocation2 + $0x100] sm:$0xff] }
 0x2bc   : > { %17965 = vst [vmem:[#allocation7_spill] sm:$0xff] %v13404_v45  ;;  %v13406_v54 = vld [vmem:[#allocation2 + $0xf9] sm:$0xff]  ;;  %v1967_v53 = vmul.f32 %v12823_v40, %v1948_v52  ;;  %8856 = vrot.lane.b32.xlu2 %v8855_v33, %s10337_s11  ;;  %v2544_v40 = vsel %vm809_vm6, %v2474_v13, %v8438_v7  ;;  %v2545_v33 = vsel %vm809_vm6, %v2475_v46, %v8439_v44  ;;  %v8283_v13 = vunpack.i.l.bf16 %v17971_v27  ;;  %v13443_v46 = vld [vmem:[#allocation2 + $0x28] sm:$0xff] }
 0x2bd   : > { %17966 = vst [vmem:[#allocation31_spill] sm:$0xff] %v13406_v54  ;;  %8851 = vrot.lane.b32.xlu1 %v8850_v63, %s10337_s11  ;;  %v2614_v5 = vsel %vm880_vm8, %v2544_v40, %v8478_v61  ;;  %v8284_v63 = vunpack.i.h.bf16 %v17971_v27  ;;  %v8860_v61 = vpack.i.bf16 %v13434_v48, %v13443_v46  ;;  %v10164_v52 = vld [vmem:[#allocation2 + $0x48] sm:$0xff] }
 0x2be   : > { %2046 = vst.msk [vmem:[#allocation2 + $0x108] sm:$0xff] %vm307_vm1, %v2030_v4  ;;  %v1983_v11 = vadd.f32 %v12831_v26, %v1967_v53  ;;  %8846 = vrot.lane.b32.xlu0 %v8845_v57, %s10344_s18  ;;  %v13422_v14 = vpop.permute.xlu2 %8691  ;;  %v17968_v4 = vld [vmem:[#allocation59_spill] sm:$0xff]  ;;  %v2615_v26 = vsel %vm880_vm8, %v2545_v33, %v8479_v58  ;;  %v2684_v44 = vsel %vm951_vm7, %v2614_v5, %v8518_v59  ;;  %v13447_v53 = vld [vmem:[#allocation2 + $0x50] sm:$0xff]  ;;  %v17972_v59 = vld [vmem:[#allocation40_spill] sm:$0xff] }
 0x2bf   : > { %v8244_v37 = vunpack.i.h.bf16 %v17968_v4  ;;  %v13430_v21 = vpop.permute.xlu1 %8641  ;;  %v8243_v57 = vunpack.i.l.bf16 %v17968_v4  ;;  %v2685_v28 = vsel %vm951_vm7, %v2615_v26, %v8519_v23  ;;  %v8324_v40 = vunpack.i.h.bf16 %v17972_v59  ;;  %v10166_v5 = vld [vmem:[#allocation2 + $0x40] sm:$0xff]  ;;  %v13452_v26 = vld [vmem:[#allocation2 + $0x38] sm:$0xff] }
 0x2c0   : > { %17969 = vst [vmem:[#allocation61_spill] sm:$0xff] %v13430_v21  ;;  %v1999_v8 = vmax.f32 %v1983_v11, 0.0  ;;  %v13437_v7 = vpop.permute.xlu0 %8636  ;;  %v8870_v11 = vpack.i.bf16 %v13447_v53, %v10164_v52  ;;  %v8323_v23 = vunpack.i.l.bf16 %v17972_v59  ;;  %v2695_v4 = vpack.c.bf16 %v2685_v28, %v2684_v44  ;;  %v13465_v52 = vld [vmem:[%s17255_s2] ss:$0 sm:$0xff] }
 0x2c1   : > { %17970 = vst [vmem:[#allocation50_spill] sm:$0xff] %v13437_v7  ;;  %v8865_v27 = vpack.i.bf16 %v10166_v5, %v13452_v26  ;;  %v2157_v20 = vsel %vm307_vm1, %v10169_v41, %v8243_v57  ;;  %v17974_v41 = vld [vmem:[#allocation13_spill] sm:$0xff] }
 0x2c2   : > { %v2031_v58 = vmul.f32 %v2015_v9, %v1999_v8  ;;  %v10168_v8 = vld [vmem:[%s10405_s10 + $0x16f] sm:$0xff]  ;;  %v2253_v59 = vsel %vm512_vm2, %v2157_v20, %v8283_v13  ;;  %v8363_v57 = vunpack.i.l.bf16 %v17974_v41 }
 0x2c3   : > { %v1950_v33 = vpop.f32.mrf.mxu1  ;;  %v2158_v3 = vsel %vm307_vm1, %v10168_v8, %v8244_v37  ;;  %v8364_v37 = vunpack.i.h.bf16 %v17974_v41 }
 0x2c4   : > { %2047 = vst.msk [vmem:[#allocation2 + $0x110] sm:$0xff] %vm307_vm1, %v2031_v58  ;;  %v1968_v44 = vmul.f32 %v13465_v52, %v1950_v33  ;;  %8871 = vrot.lane.b32.xlu2 %v8870_v11, %s10337_s11  ;;  %v2254_v28 = vsel %vm512_vm2, %v2158_v3, %v8284_v63  ;;  %v13478_v58 = vld [vmem:[%s17256_s3] ss:$0 sm:$0xff]  ;;  %v2336_v63 = vsel %vm596_vm3, %v2253_v59, %v8323_v23  ;;  %v10174_v59 = vld [vmem:[#allocation2 + $0x70] sm:$0xff] }
 0x2c5   : > { %v13455_v9 = vld [vmem:[#allocation2 + $0x101] sm:$0xff]  ;;  %7394 = vmatmul.msk.bf16.gmra.mxu2 %vm1012_vm9, %v2695_v4  ;;  %8866 = vrot.lane.b32.xlu1 %v8865_v27, %s10337_s11  ;;  %v2337_v13 = vsel %vm596_vm3, %v2254_v28, %v8324_v40  ;;  %v2016_v27 = vld [vmem:[%s17260_s7 + $0xf8] sm:$0xff]  ;;  %v2406_v43 = vsel %vm667_vm4, %v2336_v63, %v8363_v57 }
 0x2c6   : > { %17973 = vst [vmem:[#allocation27_spill] sm:$0xff] %v13455_v9  ;;  %v1984_v33 = vadd.f32 %v13478_v58, %v1968_v44  ;;  %8861 = vrot.lane.b32.xlu0 %v8860_v61, %s10337_s11  ;;  %v13482_v3 = vpop.permute.xlu2 %8706  ;;  %v17976_v11 = vld [vmem:[#allocation67_spill] sm:$0xff]  ;;  %v17977_v61 = vld [vmem:[#allocation73_spill] sm:$0xff]  ;;  %v13501_v40 = vld [vmem:[#allocation2 + $0x58] sm:$0xff]  ;;  %v2407_v54 = vsel %vm667_vm4, %v2337_v13, %v8364_v37  ;;  %v8524_v37 = vunpack.i.h.bf16 %v13079_v17 }
 0x2c7   : > { %17975 = vst [vmem:[#allocation36_spill] sm:$0xff] %v13482_v3  ;;  %v8404_v4 = vunpack.i.h.bf16 %v17976_v11  ;;  %v8403_v5 = vunpack.i.l.bf16 %v17976_v11  ;;  %v13493_v8 = vpop.permute.xlu1 %8656  ;;  %v8444_v44 = vunpack.i.h.bf16 %v17977_v61  ;;  %v8443_v41 = vunpack.i.l.bf16 %v17977_v61  ;;  %v13499_v23 = vld [vmem:[#allocation2 + $0x60] sm:$0xff]  ;;  %v13505_v11 = vld [vmem:[#allocation2 + $0x68] sm:$0xff] }
 0x2c8   : > { %v2000_v45 = vmax.f32 %v1984_v33, 0.0  ;;  %v13497_v20 = vpop.permute.xlu0 %8651  ;;  %v8875_v28 = vpack.i.bf16 %v13499_v23, %v13501_v40  ;;  %v8880_v9 = vpack.i.bf16 %v10174_v59, %v13505_v11  ;;  %v10176_v33 = vld [vmem:[#allocation2 + $0x78] sm:$0xff]  ;;  %v2906_v3 = vld [vmem:[%s10405_s10 + $0x187] sm:$0xff] }
 0x2c9   : > { %v8885_v51 = vpack.i.bf16 %v13510_v15, %v10176_v33  ;;  %v2476_v50 = vsel %vm738_vm5, %v2406_v43, %v8403_v5  ;;  %v2477_v31 = vsel %vm738_vm5, %v2407_v54, %v8404_v4  ;;  %v17979_v43 = vld [vmem:[#allocation45_spill] sm:$0xff] }
 0x2ca   : > { %v2032_v61 = vmul.f32 %v2016_v27, %v2000_v45  ;;  %v2546_v59 = vsel %vm809_vm6, %v2476_v50, %v8443_v41  ;;  %v2547_v57 = vsel %vm809_vm6, %v2477_v31, %v8444_v44  ;;  %v8523_v45 = vunpack.i.l.bf16 %v13079_v17  ;;  %v3877_v44 = vld [vmem:[#allocation2 + $0x19] sm:$0xff] }
 0x2cb   : > { %v8248_v54 = vunpack.i.l.bf16 %v17979_v43  ;;  %v8249_v31 = vunpack.i.h.bf16 %v17979_v43  ;;  %v2616_v17 = vsel %vm880_vm8, %v2546_v59, %v8483_v60  ;;  %v2617_v13 = vsel %vm880_vm8, %v2547_v57, %v8484_v35  ;;  %v17983_v41 = vld [vmem:[#allocation23_spill] sm:$0xff]  ;;  %v10179_v43 = vld [vmem:[#allocation2 + $0x29] sm:$0xff]  ;;  %v10180_v35 = vld [vmem:[%s10405_s10 + $0x177] sm:$0xff] }
 0x2cc   : > { %2048 = vst.msk [vmem:[#allocation2 + $0x118] sm:$0xff] %vm307_vm1, %v2032_v61  ;;  %8886 = vrot.lane.b32.xlu2 %v8885_v51, %s10337_s11  ;;  %v3875_v51 = vld [vmem:[#allocation2 + $0x9] sm:$0xff]  ;;  %v2686_v5 = vsel %vm951_vm7, %v2616_v17, %v8523_v45  ;;  %v2687_v27 = vsel %vm951_vm7, %v2617_v13, %v8524_v37  ;;  %v10178_v61 = vld [vmem:[#allocation2 + $0x21] sm:$0xff]  ;;  %v8289_v60 = vunpack.i.h.bf16 %v17983_v41 }
 0x2cd   : > { %8881 = vrot.lane.b32.xlu1 %v8880_v9, %s10337_s11  ;;  %v3876_v9 = vld [vmem:[#allocation2 + $0x11] sm:$0xff]  ;;  %v8895_v33 = vpack.i.bf16 %v10178_v61, %v3877_v44  ;;  %v2159_v59 = vsel %vm307_vm1, %v10180_v35, %v8248_v54  ;;  %v17984_v57 = vld [vmem:[#allocation52_spill] sm:$0xff]  ;;  %v2160_v45 = vsel %vm307_vm1, %v10181_v55, %v8249_v31  ;;  %v2696_v62 = vpack.c.bf16 %v2687_v27, %v2686_v5 }
 0x2ce   : > { %8876 = vrot.lane.b32.xlu0 %v8875_v28, %s10337_s11  ;;  %v13526_v63 = vpop.permute.xlu2 %8721  ;;  %v8288_v28 = vunpack.i.l.bf16 %v17983_v41  ;;  %v8328_v21 = vunpack.i.l.bf16 %v17984_v57  ;;  %v8890_v47 = vpack.i.bf16 %v3876_v9, %v3875_v51  ;;  %v8329_v37 = vunpack.i.h.bf16 %v17984_v57  ;;  %v17985_v17 = vld [vmem:[#allocation44_spill] sm:$0xff]  ;;  %v17987_v51 = vld [vmem:[#allocation39_spill] sm:$0xff] }
 0x2cf   : > { %17980 = vst [vmem:[#allocation64_spill] sm:$0xff] %v13526_v63  ;;  %v13531_v50 = vpop.permute.xlu1 %8671  ;;  %v8900_v63 = vpack.i.bf16 %v13528_v18, %v10179_v43  ;;  %v8368_v13 = vunpack.i.l.bf16 %v17985_v17  ;;  %v8369_v61 = vunpack.i.h.bf16 %v17985_v17  ;;  %v5004_v41 = vld [vmem:[#allocation2 + $0x109] sm:$0xff]  ;;  %v2256_v55 = vsel %vm512_vm2, %v2160_v45, %v8289_v60  ;;  %v3563_v45 = vld [vmem:[%s17254_s1 + $0x20] sm:$0xf] }
 0x2d0   : > { %17981 = vst [vmem:[#allocation68_spill] sm:$0xff] %v13531_v50  ;;  %v13535_v4 = vpop.permute.xlu0 %8666  ;;  %v2255_v43 = vsel %vm512_vm2, %v2159_v59, %v8288_v28  ;;  %v8408_v9 = vunpack.i.l.bf16 %v17987_v51  ;;  %v8409_v27 = vunpack.i.h.bf16 %v17987_v51  ;;  %v17988_v28 = vld [vmem:[#allocation72_spill] sm:$0xff]  ;;  %v8488_v57 = vunpack.i.l.bf16 %v12993_v12  ;;  %v10182_v17 = vld [vmem:[#allocation2 + $0x59] sm:$0xff]  ;;  %v10186_v51 = vld [vmem:[#allocation2 + $0x51] sm:$0xff] }
 0x2d1   : > { %17982 = vst [vmem:[#allocation29_spill] sm:$0xff] %v13535_v4  ;;  %v2338_v31 = vsel %vm596_vm3, %v2255_v43, %v8328_v21  ;;  %v8449_v21 = vunpack.i.h.bf16 %v17988_v28 }
 0x2d2   : > { %17999 = vst [vmem:[#allocation39_spill] sm:$0xff] %v13695_v34 }
 0x2d3   : > { %v5005_v44 = vld [vmem:[#allocation2 + $0x111] sm:$0xff]  ;;  %18000 = vst [vmem:[#allocation72_spill] sm:$0xff] %v13702_v6 }
 0x2d4   : > { %8901 = vrot.lane.b32.xlu2 %v8900_v63, %s10338_s12  ;;  %v13554_v54 = vpack.i.bf16 %v5005_v44, %v5004_v41  ;;  %v2339_v63 = vsel %vm596_vm3, %v2256_v55, %v8329_v37  ;;  %v13583_v55 = vld [vmem:[#allocation2 + $0x41] sm:$0xff] }
 0x2d5   : > { %7395 = vmatmul.msk.bf16.gmra.mxu2 %vm1012_vm9, %v2696_v62  ;;  %8896 = vrot.lane.b32.xlu1 %v8895_v33, %s10338_s12  ;;  %v2408_v62 = vsel %vm667_vm4, %v2338_v31, %v8368_v13  ;;  %v8448_v33 = vunpack.i.l.bf16 %v17988_v28  ;;  %v2409_v60 = vsel %vm667_vm4, %v2339_v63, %v8369_v61  ;;  %v13578_v13 = vld [vmem:[#allocation2 + $0x61] sm:$0xff]  ;;  %v3581_v61 = vunpack.c.l.b16 %v3563_v45  ;;  %v13585_v31 = vld [vmem:[#allocation2 + $0x39] sm:$0xff]  ;;  %v13589_v63 = vld [vmem:[#allocation2 + $0x49] sm:$0xff] }
 0x2d6   : > { %17986 = vst [vmem:[#allocation59_spill] sm:$0xff] %v13554_v54  ;;  %8891 = vrot.lane.b32.xlu0 %v8890_v47, %s10338_s12  ;;  %v13560_v5 = vpop.permute.xlu2 %8736  ;;  %v8489_v47 = vunpack.i.h.bf16 %v12993_v12  ;;  %v2478_v37 = vsel %vm738_vm5, %v2408_v62, %v8408_v9  ;;  %v8915_v44 = vpack.i.bf16 %v13578_v13, %v10182_v17  ;;  %v2479_v41 = vsel %vm738_vm5, %v2409_v60, %v8409_v27 }
 0x2d7   : > { %v13566_v35 = vpop.permute.xlu1 %8686  ;;  %v2548_v43 = vsel %vm809_vm6, %v2478_v37, %v8448_v33  ;;  %v8905_v12 = vpack.i.bf16 %v13583_v55, %v13585_v31  ;;  %v8910_v9 = vpack.i.bf16 %v10186_v51, %v13589_v63  ;;  %v2549_v62 = vsel %vm809_vm6, %v2479_v41, %v8449_v21  ;;  %v3767_v41 = vld [vmem:[#allocation2 + $0x27] sm:$0xff]  ;;  %v3766_v51 = vld [vmem:[#allocation2 + $0x1f] sm:$0xff] }
 0x2d8   : > { %17989 = vst [vmem:[#allocation9_spill] sm:$0xff] %v13566_v35  ;;  %v13570_v59 = vpop.permute.xlu0 %8681  ;;  %v8529_v28 = vunpack.i.h.bf16 %v12927_v29  ;;  %v8528_v27 = vunpack.i.l.bf16 %v12927_v29  ;;  %v3586_v33 = vpack.c.b16 %v3581_v61, %v3581_v61  ;;  %v2618_v60 = vsel %vm880_vm8, %v2548_v43, %v8488_v57 }
 0x2d9   : > { %17990 = vst [vmem:[#allocation40_spill] sm:$0xff] %v13570_v59  ;;  %v2619_v45 = vsel %vm880_vm8, %v2549_v62, %v8489_v47  ;;  %v7535_v47 = vld [vmem:[%s17254_s1 + $0x18] sm:$0xff]  ;;  %v8930_v57 = vpack.i.bf16 %v3767_v41, %v3766_v51 }
 0x2da   : > { %v3616_v17 = vsel %vm1037_vm0, %v3586_v33, 0  ;;  %v2689_v61 = vsel %vm951_vm7, %v2619_v45, %v8529_v28  ;;  %v13618_v33 = vld [vmem:[#allocation2 + $0x71] sm:$0xff] }
 0x2db   : > { %3621 = vmatpush.bf16.msra.mxu3 %v3616_v17  ;;  %v13635_v41 = vld [vmem:[#allocation2 + $0x57] sm:$0xff] }
 0x2dc   : > { %8916 = vrot.lane.b32.xlu2 %v8915_v44, %s10338_s12  ;;  %v2688_v44 = vsel %vm951_vm7, %v2618_v60, %v8528_v27  ;;  %v13620_v27 = vld [vmem:[#allocation2 + $0x69] sm:$0xff]  ;;  %v13641_v51 = vld [vmem:[#allocation2 + $0x37] sm:$0xff] }
 0x2dd   : > { %8911 = vrot.lane.b32.xlu1 %v8910_v9, %s10338_s12  ;;  %v2697_v43 = vpack.c.bf16 %v2689_v61, %v2688_v44  ;;  %v13614_v9 = vld [vmem:[#allocation2 + $0x79] sm:$0xff]  ;;  %v8920_v28 = vpack.i.bf16 %v13618_v33, %v13620_v27  ;;  %v7534_v60 = vld [vmem:[%s17254_s1 + $0x10] sm:$0xff]  ;;  %v13639_v61 = vld [vmem:[#allocation2 + $0x47] sm:$0xff] }
 0x2de   : > { %8906 = vrot.lane.b32.xlu0 %v8905_v12, %s10338_s12  ;;  %v13600_v37 = vpop.permute.xlu2 %8751  ;;  %v13612_v12 = vld [vmem:[#allocation2 + $0x81] sm:$0xff] }
 0x2df   : > { %17991 = vst [vmem:[#allocation13_spill] sm:$0xff] %v13600_v37  ;;  %v13603_v21 = vpop.permute.xlu1 %8701  ;;  %v8925_v62 = vpack.i.bf16 %v13612_v12, %v13614_v9  ;;  %3622 = vmatpush.bf16.msra.mxu3 %v7535_v47  ;;  %v13643_v47 = vld [vmem:[#allocation2 + $0x4f] sm:$0xff] }
 0x2e0   : > { %v13605_v29 = vpop.permute.xlu0 %8696 }
 0x2e3   : > { %3623 = vmatpush.bf16.msra.mxu3 %v7534_v60 }
 0x2e4   : > { %8931 = vrot.lane.b32.xlu2 %v8930_v57, %s10339_s13  ;;  %v7533_v57 = vld [vmem:[%s17254_s1 + $0x8] sm:$0xff] }
 0x2e5   : > { %7396 = vmatmul.msk.bf16.gmra.mxu2 %vm1012_vm9, %v2697_v43  ;;  %8926 = vrot.lane.b32.xlu1 %v8925_v62, %s10338_s12  ;;  %v8945_v43 = vpack.i.bf16 %v13635_v41, %v13643_v47  ;;  %v13650_v62 = vld [vmem:[#allocation2 + $0x3f] sm:$0xff] }
 0x2e6   : > { %8921 = vrot.lane.b32.xlu0 %v8920_v28, %s10338_s12  ;;  %v13631_v45 = vpop.permute.xlu2 %8766  ;;  %v3768_v28 = vld [vmem:[#allocation2 + $0x2f] sm:$0xff]  ;;  %v8940_v60 = vpack.i.bf16 %v13639_v61, %v13650_v62 }
 0x2e7   : > { %17992 = vst [vmem:[#allocation67_spill] sm:$0xff] %v13631_v45  ;;  %v13633_v17 = vpop.permute.xlu1 %8716  ;;  %3624 = vmatpush.bf16.msra.mxu3 %v7533_v57  ;;  %v8935_v54 = vpack.i.bf16 %v13641_v51, %v3768_v28  ;;  %v7532_v45 = vld [vmem:[%s17254_s1] sm:$0xff]  ;;  %v13669_v28 = vld [vmem:[#allocation2 + $0x77] sm:$0xff] }
 0x2e8   : > { %17993 = vst [vmem:[#allocation73_spill] sm:$0xff] %v13633_v17  ;;  %v13637_v44 = vpop.permute.xlu0 %8711  ;;  %v13665_v17 = vld [vmem:[#allocation2 + $0x87] sm:$0xff]  ;;  %v8955_v25 = vpack.i.bf16 %v13669_v28, %v13677_v10 }
 0x2e9   : > { %17994 = vst [vmem:[#allocation71_spill] sm:$0xff] %v13637_v44 }
 0x2ea   : > { %17995 = vst [vmem:[#allocation45_spill] sm:$0xff] %v13665_v17 }
 0x2eb   : > { %3625 = vmatpush.bf16.msra.mxu3 %v7532_v45 }
 0x2ec   : > { %8946 = vrot.lane.b32.xlu2 %v8945_v43, %s10339_s13  ;;  %v13671_v43 = vld [vmem:[#allocation2 + $0x67] sm:$0xff] }
 0x2ed   : > { %8941 = vrot.lane.b32.xlu1 %v8940_v60, %s10339_s13  ;;  %v13673_v60 = vld [vmem:[#allocation2 + $0x7f] sm:$0xff] }
 0x2ee   : > { %8936 = vrot.lane.b32.xlu0 %v8935_v54, %s10339_s13  ;;  %v13661_v35 = vpop.permute.xlu2 %8781  ;;  %v8960_v7 = vpack.i.bf16 %v13665_v17, %v13673_v60  ;;  %v13679_v54 = vld [vmem:[#allocation2 + $0x5f] sm:$0xff] }
 0x2ef   : > { %v13663_v59 = vpop.permute.xlu1 %8731  ;;  %v8950_v45 = vpack.i.bf16 %v13671_v43, %v13679_v54 }
 0x2f0   : > { %v13667_v57 = vpop.permute.xlu0 %8726 }
 0x2f1   : > { %17996 = vst [vmem:[#allocation23_spill] sm:$0xff] %v13667_v57 }
 0x2f4   : > { %8961 = vrot.lane.b32.xlu2 %v8960_v7, %s10339_s13  ;;  %v8975_v7 = vpack.i.bf16 %v13452_v26, %v13434_v48  ;;  %v8534_v48 = vunpack.i.h.bf16 %v13129_v32  ;;  %v8573_v26 = vunpack.i.l.bf16 %v13070_v19 }
 0x2f5   : > { %8956 = vrot.lane.b32.xlu1 %v8955_v25, %s10339_s13 }
 0x2f6   : > { %8951 = vrot.lane.b32.xlu0 %v8950_v45, %s10339_s13  ;;  %v13688_v57 = vpop.permute.xlu2 %8796  ;;  %v8970_v45 = vpack.i.bf16 %v13443_v46, %v13378_v24  ;;  %v2907_v24 = vld [vmem:[%s10405_s10 + $0x18f] sm:$0xff] }
 0x2f7   : > { %17997 = vst [vmem:[#allocation52_spill] sm:$0xff] %v13688_v57  ;;  %v13690_v37 = vpop.permute.xlu1 %8746  ;;  %v8533_v57 = vunpack.i.l.bf16 %v13129_v32 }
 0x2f8   : > { %17998 = vst [vmem:[#allocation44_spill] sm:$0xff] %v13690_v37  ;;  %v13692_v44 = vpop.permute.xlu0 %8741  ;;  %v2770_v50 = vpop.f32.mrf.mxu2  ;;  %v2858_v37 = vld [vmem:[%s17260_s7 + $0x100] sm:$0xff] }
 0x2f9   : > { %v2810_v0 = vmul.f32 %v13465_v52, %v2770_v50  ;;  %v8965_v50 = vpack.i.bf16 %v13695_v34, %v13702_v6  ;;  %v3002_v17 = vsel %vm307_vm1, %v2906_v3, %v8533_v57  ;;  %v8613_v34 = vunpack.i.l.bf16 %v13343_v16 }
 0x2fa   : > { %v3098_v3 = vsel %vm512_vm2, %v3002_v17, %v8573_v26 }
 0x2fb   : > { %v2826_v25 = vadd.f32 %v13478_v58, %v2810_v0 }
 0x2fc   : > { %8976 = vrot.lane.b32.xlu2 %v8975_v7, %s10340_s14  ;;  %v8574_v7 = vunpack.i.h.bf16 %v13070_v19  ;;  %v8990_v19 = vpack.i.bf16 %v13505_v11, %v13499_v23  ;;  %v8694_v11 = vunpack.i.h.bf16 %v13422_v14 }
 0x2fd   : > { %v2842_v0 = vmax.f32 %v2826_v25, 0.0  ;;  %8971 = vrot.lane.b32.xlu1 %v8970_v45, %s10340_s14  ;;  %v3003_v25 = vsel %vm307_vm1, %v2907_v24, %v8534_v48  ;;  %v8614_v45 = vunpack.i.h.bf16 %v13343_v16  ;;  %v8985_v48 = vpack.i.bf16 %v13501_v40, %v13447_v53 }
 0x2fe   : > { %8966 = vrot.lane.b32.xlu0 %v8965_v50, %s10339_s13  ;;  %v8812_v46 = vpop.permute.xlu2 %8811  ;;  %v8653_v50 = vunpack.i.l.bf16 %v13497_v20  ;;  %v3099_v16 = vsel %vm512_vm2, %v3003_v25, %v8574_v7  ;;  %v3181_v24 = vsel %vm596_vm3, %v3098_v3, %v8613_v34  ;;  %v8734_v34 = vunpack.i.h.bf16 %v13663_v59  ;;  %v18002_v7 = vld [vmem:[#allocation56_spill] sm:$0xff] }
 0x2ff   : > { %v2874_v4 = vmul.f32 %v2858_v37, %v2842_v0  ;;  %v13717_v22 = vpop.permute.xlu1 %8761  ;;  %v8654_v0 = vunpack.i.h.bf16 %v13497_v20  ;;  %v2859_v20 = vld [vmem:[%s17260_s7 + $0x108] sm:$0xff]  ;;  %v3182_v23 = vsel %vm596_vm3, %v3099_v16, %v8614_v45  ;;  %v8733_v40 = vunpack.i.l.bf16 %v13663_v59 }
 0x300   : > { %18001 = vst [vmem:[#allocation82_spill] sm:$0xff] %v13717_v22  ;;  %v13722_v6 = vpop.permute.xlu0 %8756  ;;  %v2772_v32 = vpop.f32.mrf.mxu2  ;;  %v3251_v17 = vsel %vm667_vm4, %v3181_v24, %v8653_v50  ;;  %v13758_v50 = vld [vmem:[#allocation2 + $0x98] sm:$0xff]  ;;  %v8814_v3 = vunpack.i.h.bf16 %v8812_v46 }
 0x301   : > { %2890 = vst.msk [vmem:[#allocation2 + $0x120] sm:$0xff] %vm307_vm1, %v2874_v4  ;;  %v2811_v37 = vmul.f32 %v13465_v52, %v2772_v32  ;;  %v8693_v4 = vunpack.i.l.bf16 %v13422_v14  ;;  %v3252_v53 = vsel %vm667_vm4, %v3182_v23, %v8654_v0  ;;  %v18003_v32 = vld [vmem:[#allocation48_spill] sm:$0xff]  ;;  %v8813_v0 = vunpack.i.l.bf16 %v8812_v46 }
 0x302   : > { %v18004_v25 = vpack.i.bf16 %v18002_v7, %v18003_v32  ;;  %v3322_v59 = vsel %vm738_vm5, %v3252_v53, %v8694_v11  ;;  %v10193_v46 = vld [vmem:[#allocation2 + $0x88] sm:$0xff] }
 0x303   : > { %v2827_v57 = vadd.f32 %v13478_v58, %v2811_v37 }
 0x304   : > { %8991 = vrot.lane.b32.xlu2 %v8990_v19, %s10340_s14  ;;  %v3321_v19 = vsel %vm738_vm5, %v3251_v17, %v8693_v4  ;;  %v9000_v17 = vpack.i.bf16 %v10193_v46, %v13510_v15  ;;  %v18005_v15 = vld [vmem:[#allocation16_spill] sm:$0xff]  ;;  %v8538_v46 = vunpack.i.l.bf16 %v13126_v2 }
 0x305   : > { %v2843_v26 = vmax.f32 %v2827_v57, 0.0  ;;  %8986 = vrot.lane.b32.xlu1 %v8985_v48, %s10340_s14 }
 0x306   : > { %8981 = vrot.lane.b32.xlu0 %v18004_v25, %s10340_s14  ;;  %v13754_v37 = vpop.permute.xlu2 %8826  ;;  %v10192_v25 = vld [vmem:[#allocation2 + $0x90] sm:$0xff] }
 0x307   : > { %v2875_v45 = vmul.f32 %v2859_v20, %v2843_v26  ;;  %v13756_v14 = vpop.permute.xlu1 %8776  ;;  %v3391_v20 = vsel %vm809_vm6, %v3321_v19, %v8733_v40  ;;  %v3392_v26 = vsel %vm809_vm6, %v3322_v59, %v8734_v34  ;;  %v9005_v22 = vpack.i.bf16 %v13758_v50, %v10192_v25 }
 0x308   : > { %v8772_v57 = vpop.permute.xlu0 %8771  ;;  %v2775_v48 = vpop.f32.mrf.mxu2  ;;  %v9020_v25 = vpack.i.bf16 %v13589_v63, %v13583_v55  ;;  %v2861_v55 = vld [vmem:[%s17260_s7 + $0x118] sm:$0xff]  ;;  %v8579_v63 = vunpack.i.h.bf16 %v13260_v49 }
 0x309   : > { %2891 = vst.msk [vmem:[#allocation2 + $0x128] sm:$0xff] %vm307_vm1, %v2875_v45  ;;  %v8774_v16 = vunpack.i.h.bf16 %v8772_v57  ;;  %v8773_v24 = vunpack.i.l.bf16 %v8772_v57  ;;  %v2812_v23 = vmul.f32 %v13465_v52, %v2775_v48  ;;  %v2860_v45 = vld [vmem:[%s17260_s7 + $0x110] sm:$0xff]  ;;  %v18006_v48 = vld [vmem:[#allocation26_spill] sm:$0xff] }
 0x30a   : > { %v18007_v59 = vpack.i.bf16 %v18005_v15, %v18006_v48 }
 0x30b   : > { %v2828_v4 = vadd.f32 %v13478_v58, %v2812_v23  ;;  %v3461_v11 = vsel %vm880_vm8, %v3391_v20, %v8773_v24  ;;  %v3462_v53 = vsel %vm880_vm8, %v3392_v26, %v8774_v16  ;;  %v13793_v26 = vld [vmem:[#allocation2 + $0x120] sm:$0xff] }
 0x30c   : > { %9006 = vrot.lane.b32.xlu2 %v9005_v22, %s10340_s14  ;;  %v3531_v34 = vsel %vm951_vm7, %v3461_v11, %v8813_v0  ;;  %v3532_v40 = vsel %vm951_vm7, %v3462_v53, %v8814_v3  ;;  %18009 = vst [vmem:[#allocation48_spill] sm:$0xff] %v13793_v26  ;;  %v9015_v11 = vpack.i.bf16 %v13585_v31, %v13528_v18  ;;  %v2908_v53 = vld [vmem:[%s10405_s10 + $0x197] sm:$0xff] }
 0x30d   : > { %v2844_v19 = vmax.f32 %v2828_v4, 0.0  ;;  %9001 = vrot.lane.b32.xlu1 %v9000_v17, %s10340_s14  ;;  %v3547_v57 = vpack.c.bf16 %v3532_v40, %v3531_v34  ;;  %v8578_v34 = vunpack.i.l.bf16 %v13260_v49 }
 0x30e   : > { %8996 = vrot.lane.b32.xlu0 %v18007_v59, %s10340_s14  ;;  %v13782_v16 = vpop.permute.xlu2 %8841  ;;  %v8618_v59 = vunpack.i.l.bf16 %v13205_v39 }
 0x30f   : > { %v2876_v24 = vmul.f32 %v2860_v45, %v2844_v19  ;;  %7413 = vmatmul.msk.bf16.vlgmr.msra.gmra.mxu3 %vm1012_vm9, %v3547_v57  ;;  %v13785_v22 = vpop.permute.xlu1 %8791  ;;  %v8539_v45 = vunpack.i.h.bf16 %v13126_v2  ;;  %v18010_v19 = vld [vmem:[#allocation12_spill] sm:$0xff]  ;;  %v18011_v57 = vld [vmem:[#allocation18_spill] sm:$0xff]  ;;  %v3004_v2 = vsel %vm307_vm1, %v2908_v53, %v8538_v46  ;;  %v8659_v53 = vunpack.i.h.bf16 %v13493_v8 }
 0x310   : > { %v13787_v0 = vpop.permute.xlu0 %8786  ;;  %v2777_v3 = vpop.f32.mrf.mxu2  ;;  %v13789_v23 = vld [vmem:[#allocation2 + $0x128] sm:$0xff]  ;;  %v18012_v18 = vpack.i.bf16 %v18010_v19, %v18011_v57 }
 0x311   : > { %18008 = vst [vmem:[#allocation56_spill] sm:$0xff] %v13789_v23  ;;  %v2813_v20 = vmul.f32 %v13465_v52, %v2777_v3 }
 0x312   : > { %2892 = vst.msk [vmem:[#allocation2 + $0x130] sm:$0xff] %vm307_vm1, %v2876_v24 }
 0x313   : > { %v2829_v17 = vadd.f32 %v13478_v58, %v2813_v20  ;;  %v10194_v20 = vld [vmem:[%s10405_s10 + $0x19f] sm:$0xff] }
 0x314   : > { %9021 = vrot.lane.b32.xlu2 %v9020_v25, %s10341_s15  ;;  %v3005_v49 = vsel %vm307_vm1, %v10194_v20, %v8539_v45  ;;  %v8619_v25 = vunpack.i.h.bf16 %v13205_v39  ;;  %v8699_v45 = vunpack.i.h.bf16 %v13605_v29 }
 0x315   : > { %v2845_v40 = vmax.f32 %v2829_v17, 0.0  ;;  %9016 = vrot.lane.b32.xlu1 %v9015_v11, %s10341_s15  ;;  %v3100_v17 = vsel %vm512_vm2, %v3004_v2, %v8578_v34  ;;  %v8658_v11 = vunpack.i.l.bf16 %v13493_v8  ;;  %v3101_v46 = vsel %vm512_vm2, %v3005_v49, %v8579_v63  ;;  %v13850_v49 = vld [vmem:[#allocation2 + $0x99] sm:$0xff] }
 0x316   : > { %9011 = vrot.lane.b32.xlu0 %v18012_v18, %s10341_s15  ;;  %v13816_v31 = vpop.permute.xlu2 %8856  ;;  %v9035_v34 = vpack.i.bf16 %v13614_v9, %v13618_v33  ;;  %v3183_v2 = vsel %vm596_vm3, %v3100_v17, %v8618_v59  ;;  %v9030_v63 = vpack.i.bf16 %v13620_v27, %v13578_v13  ;;  %v3184_v20 = vsel %vm596_vm3, %v3101_v46, %v8619_v25  ;;  %v2862_v27 = vld [vmem:[%s17260_s7 + $0x120] sm:$0xff]  ;;  %v18015_v46 = vld [vmem:[#allocation21_spill] sm:$0xff] }
 0x317   : > { %v2877_v24 = vmul.f32 %v2861_v55, %v2845_v40  ;;  %v13820_v3 = vpop.permute.xlu1 %8806  ;;  %v8698_v55 = vunpack.i.l.bf16 %v13605_v29  ;;  %v13839_v40 = vld [vmem:[#allocation2 + $0x121] sm:$0xff]  ;;  %v3254_v9 = vsel %vm667_vm4, %v3184_v20, %v8659_v53  ;;  %v8739_v33 = vunpack.i.h.bf16 %v13560_v5  ;;  %v18016_v53 = vld [vmem:[#allocation49_spill] sm:$0xff] }
 0x318   : > { %v13827_v19 = vpop.permute.xlu0 %8801  ;;  %v2780_v57 = vpop.f32.mrf.mxu2  ;;  %18014 = vst [vmem:[#allocation26_spill] sm:$0xff] %v13839_v40  ;;  %v8738_v59 = vunpack.i.l.bf16 %v13560_v5  ;;  %v3324_v25 = vsel %vm738_vm5, %v3254_v9, %v8699_v45  ;;  %v8779_v17 = vunpack.i.h.bf16 %v13756_v14  ;;  %v9050_v45 = vpack.i.bf16 %v13650_v62, %v13641_v51 }
 0x319   : > { %v13829_v18 = vld [vmem:[#allocation2 + $0x129] sm:$0xff]  ;;  %2893 = vst.msk [vmem:[#allocation2 + $0x138] sm:$0xff] %vm307_vm1, %v2877_v24  ;;  %v2814_v39 = vmul.f32 %v13465_v52, %v2780_v57  ;;  %v3253_v24 = vsel %vm667_vm4, %v3183_v2, %v8658_v11  ;;  %v8778_v11 = vunpack.i.l.bf16 %v13756_v14  ;;  %v8544_v14 = vunpack.i.h.bf16 %v12981_v30 }
 0x31a   : > { %18013 = vst [vmem:[#allocation16_spill] sm:$0xff] %v13829_v18  ;;  %v3323_v13 = vsel %vm738_vm5, %v3253_v24, %v8698_v55  ;;  %v13869_v55 = vld [vmem:[#allocation2 + $0x91] sm:$0xff]  ;;  %v8584_v20 = vunpack.i.h.bf16 %v13255_v38  ;;  %v3394_v40 = vsel %vm809_vm6, %v3324_v25, %v8739_v33  ;;  %v13882_v18 = vld [vmem:[#allocation2 + $0x89] sm:$0xff]  ;;  %v8583_v51 = vunpack.i.l.bf16 %v13255_v38 }
 0x31b   : > { %v2830_v29 = vadd.f32 %v13478_v58, %v2814_v39  ;;  %v18017_v39 = vpack.i.bf16 %v18015_v46, %v18016_v53  ;;  %v9045_v2 = vpack.i.bf16 %v13850_v49, %v13869_v55  ;;  %v3393_v4 = vsel %vm809_vm6, %v3323_v13, %v8738_v59  ;;  %v10195_v13 = vld [vmem:[%s10405_s10 + $0x1af] sm:$0xff] }
 0x31c   : > { %9036 = vrot.lane.b32.xlu2 %v9035_v34, %s10341_s15  ;;  %v3463_v62 = vsel %vm880_vm8, %v3393_v4, %v8778_v11  ;;  %v3007_v25 = vsel %vm307_vm1, %v10195_v13, %v8544_v14  ;;  %v9040_v4 = vpack.i.bf16 %v13882_v18, %v13612_v12  ;;  %v8664_v14 = vunpack.i.h.bf16 %v13336_v56 }
 0x31d   : > { %9031 = vrot.lane.b32.xlu1 %v9030_v63, %s10341_s15  ;;  %v2846_v57 = vmax.f32 %v2830_v29, 0.0  ;;  %v8543_v63 = vunpack.i.l.bf16 %v12981_v30 }
 0x31e   : > { %9026 = vrot.lane.b32.xlu0 %v18017_v39, %s10341_s15  ;;  %v13867_v5 = vpop.permute.xlu2 %8871 }
 0x31f   : > { %18018 = vst [vmem:[#allocation12_spill] sm:$0xff] %v13867_v5  ;;  %v13871_v34 = vpop.permute.xlu1 %8821  ;;  %v2878_v24 = vmul.f32 %v2862_v27, %v2846_v57  ;;  %v3464_v27 = vsel %vm880_vm8, %v3394_v40, %v8779_v17  ;;  %v8624_v57 = vunpack.i.h.bf16 %v13393_v1  ;;  %v10196_v40 = vld [vmem:[%s10405_s10 + $0x1a7] sm:$0xff] }
 0x320   : > { %v8817_v29 = vpop.permute.xlu0 %8816  ;;  %v2782_v9 = vpop.f32.mrf.mxu2  ;;  %v3006_v17 = vsel %vm307_vm1, %v10196_v40, %v8543_v63 }
 0x321   : > { %v8819_v39 = vunpack.i.h.bf16 %v8817_v29  ;;  %v8818_v8 = vunpack.i.l.bf16 %v8817_v29  ;;  %2894 = vst.msk [vmem:[#allocation2 + $0x140] sm:$0xff] %vm307_vm1, %v2878_v24  ;;  %v2815_v30 = vmul.f32 %v13465_v52, %v2782_v9  ;;  %v8623_v29 = vunpack.i.l.bf16 %v13393_v1 }
 0x322   : > { %v3103_v1 = vsel %vm512_vm2, %v3007_v25, %v8584_v20  ;;  %v3102_v11 = vsel %vm512_vm2, %v3006_v17, %v8583_v51  ;;  %v8784_v17 = vunpack.i.h.bf16 %v13661_v35 }
 0x323   : > { %v3533_v59 = vsel %vm951_vm7, %v3463_v62, %v8818_v8  ;;  %v3534_v33 = vsel %vm951_vm7, %v3464_v27, %v8819_v39  ;;  %v2831_v38 = vadd.f32 %v13478_v58, %v2815_v30  ;;  %v2863_v8 = vld [vmem:[%s17260_s7 + $0x128] sm:$0xff]  ;;  %v3185_v63 = vsel %vm596_vm3, %v3102_v11, %v8623_v29 }
 0x324   : > { %v3548_v24 = vpack.c.bf16 %v3534_v33, %v3533_v59  ;;  %9051 = vrot.lane.b32.xlu2 %v9050_v45, %s10342_s16  ;;  %v8663_v45 = vunpack.i.l.bf16 %v13336_v56  ;;  %v3186_v20 = vsel %vm596_vm3, %v3103_v1, %v8624_v57  ;;  %v8704_v39 = vunpack.i.h.bf16 %v13603_v21 }
 0x325   : > { %9046 = vrot.lane.b32.xlu1 %v9045_v2, %s10341_s15  ;;  %v2847_v9 = vmax.f32 %v2831_v38, 0.0  ;;  %v8703_v2 = vunpack.i.l.bf16 %v13603_v21  ;;  %v8744_v27 = vunpack.i.h.bf16 %v13692_v44  ;;  %v8743_v59 = vunpack.i.l.bf16 %v13692_v44 }
 0x326   : > { %7414 = vmatmul.msk.bf16.gmra.mxu3 %vm1012_vm9, %v3548_v24  ;;  %9041 = vrot.lane.b32.xlu0 %v9040_v4, %s10341_s15  ;;  %v13911_v12 = vpop.permute.xlu2 %8886  ;;  %v9055_v33 = vpack.i.bf16 %v13643_v47, %v13639_v61  ;;  %v3255_v13 = vsel %vm667_vm4, %v3185_v63, %v8663_v45  ;;  %v3256_v21 = vsel %vm667_vm4, %v3186_v20, %v8664_v14  ;;  %v13935_v24 = vld [vmem:[#allocation2 + $0x131] sm:$0xff]  ;;  %v8783_v1 = vunpack.i.l.bf16 %v13661_v35 }
 0x327   : > { %18019 = vst [vmem:[#allocation18_spill] sm:$0xff] %v13911_v12  ;;  %v13917_v51 = vpop.permute.xlu1 %8836  ;;  %v2879_v30 = vmul.f32 %v2863_v8, %v2847_v9  ;;  %v9065_v38 = vpack.i.bf16 %v13677_v10, %v13671_v43  ;;  %v3325_v44 = vsel %vm738_vm5, %v3255_v13, %v8703_v2  ;;  %v3326_v61 = vsel %vm738_vm5, %v3256_v21, %v8704_v39  ;;  %v13941_v4 = vld [vmem:[#allocation2 + $0x138] sm:$0xff]  ;;  %v2864_v14 = vld [vmem:[%s17260_s7 + $0x130] sm:$0xff]  ;;  %v18113_v12 = vld [vmem:[#allocation67_spill] sm:$0xff] }
 0x328   : > { %v13919_v62 = vpop.permute.xlu0 %8831  ;;  %v2785_v56 = vpop.f32.mrf.mxu2  ;;  %v13925_v29 = vld [vmem:[#allocation2 + $0x140] sm:$0xff]  ;;  %18022 = vst [vmem:[#allocation83_spill] sm:$0xff] %v13935_v24  ;;  %v9060_v47 = vpack.i.bf16 %v13679_v54, %v13635_v41  ;;  %v3395_v8 = vsel %vm809_vm6, %v3325_v44, %v8743_v59  ;;  %v3396_v41 = vsel %vm809_vm6, %v3326_v61, %v8744_v27  ;;  %v8824_v54 = vunpack.i.h.bf16 %v13871_v34  ;;  %v18025_v44 = vld [vmem:[#allocation45_spill] sm:$0xff]  ;;  %v18026_v61 = vld [vmem:[#allocation72_spill] sm:$0xff] }
 0x329   : > { %18020 = vst [vmem:[#allocation21_spill] sm:$0xff] %v13925_v29  ;;  %v13927_v57 = vld [vmem:[#allocation2 + $0x139] sm:$0xff]  ;;  %v2816_v25 = vmul.f32 %v13465_v52, %v2785_v56  ;;  %v8823_v11 = vunpack.i.l.bf16 %v13871_v34  ;;  %v8549_v9 = vunpack.i.h.bf16 %v13175_v36  ;;  %v8548_v63 = vunpack.i.l.bf16 %v13175_v36 }
 0x32a   : > { %18021 = vst [vmem:[#allocation49_spill] sm:$0xff] %v13927_v57  ;;  %v13966_v39 = vld [vmem:[#allocation2 + $0x9f] sm:$0xff]  ;;  %v3465_v56 = vsel %vm880_vm8, %v3395_v8, %v8783_v1  ;;  %v3466_v27 = vsel %vm880_vm8, %v3396_v41, %v8784_v17  ;;  %v9070_v13 = vpack.i.bf16 %v13673_v60, %v13669_v28  ;;  %v10198_v41 = vld [vmem:[%s10405_s10 + $0x1b7] sm:$0xff] }
 0x32b   : > { %2895 = vst.msk [vmem:[#allocation2 + $0x148] sm:$0xff] %vm307_vm1, %v2879_v30  ;;  %v2832_v10 = vadd.f32 %v13478_v58, %v2816_v25  ;;  %v3536_v36 = vsel %vm951_vm7, %v3466_v27, %v8824_v54  ;;  %v8589_v25 = vunpack.i.h.bf16 %v13117_v42  ;;  %v18027_v17 = vld [vmem:[#allocation39_spill] sm:$0xff]  ;;  %v3008_v28 = vsel %vm307_vm1, %v10198_v41, %v8548_v63  ;;  %v18028_v60 = vld [vmem:[#allocation74_spill] sm:$0xff]  ;;  %v18032_v41 = vld [vmem:[#allocation44_spill] sm:$0xff] }
 0x32c   : > { %18023 = vst [vmem:[#allocation84_spill] sm:$0xff] %v13941_v4  ;;  %9066 = vrot.lane.b32.xlu2 %v9065_v38, %s10342_s16  ;;  %v8588_v38 = vunpack.i.l.bf16 %v13117_v42  ;;  %v9080_v1 = vpack.i.bf16 %v13966_v39, %v18027_v17  ;;  %v8628_v54 = vunpack.i.l.bf16 %v18028_v60  ;;  %v8629_v42 = vunpack.i.h.bf16 %v18028_v60  ;;  %v10206_v4 = vld [vmem:[%s10405_s10 + $0x1df] sm:$0xff] }
 0x32d   : > { %9061 = vrot.lane.b32.xlu1 %v9060_v47, %s10342_s16  ;;  %v2848_v35 = vmax.f32 %v2832_v10, 0.0  ;;  %v9075_v47 = vpack.i.bf16 %v18026_v61, %v18025_v44  ;;  %v10197_v10 = vld [vmem:[%s10405_s10 + $0x1bf] sm:$0xff]  ;;  %v18031_v44 = vld [vmem:[#allocation36_spill] sm:$0xff] }
 0x32e   : > { %9056 = vrot.lane.b32.xlu0 %v9055_v33, %s10342_s16  ;;  %v13960_v45 = vpop.permute.xlu2 %8901  ;;  %v3535_v33 = vsel %vm951_vm7, %v3465_v56, %v8823_v11  ;;  %v3009_v8 = vsel %vm307_vm1, %v10197_v10, %v8549_v9  ;;  %v3104_v27 = vsel %vm512_vm2, %v3008_v28, %v8588_v38  ;;  %v8708_v61 = vunpack.i.l.bf16 %v18031_v44  ;;  %v10199_v9 = vld [vmem:[%s10405_s10 + $0x1cf] sm:$0xff] }
 0x32f   : > { %v13964_v20 = vpop.permute.xlu1 %8851  ;;  %v2880_v34 = vmul.f32 %v2864_v14, %v2848_v35  ;;  %v18029_v14 = vld [vmem:[#allocation29_spill] sm:$0xff]  ;;  %v8748_v28 = vunpack.i.l.bf16 %v18032_v41 }
 0x330   : > { %v13968_v2 = vpop.permute.xlu0 %8846  ;;  %v2787_v30 = vpop.f32.mrf.mxu2  ;;  %v8668_v35 = vunpack.i.l.bf16 %v18029_v14  ;;  %v8669_v63 = vunpack.i.h.bf16 %v18029_v14  ;;  %v8789_v14 = vunpack.i.h.bf16 %v13787_v0 }
 0x331   : > { %v2817_v59 = vmul.f32 %v13465_v52, %v2787_v30  ;;  %2896 = vst.msk [vmem:[#allocation2 + $0x150] sm:$0xff] %vm307_vm1, %v2880_v34  ;;  %v2865_v34 = vld [vmem:[%s17260_s7 + $0x138] sm:$0xff]  ;;  %v3549_v30 = vpack.c.bf16 %v3536_v36, %v3535_v33  ;;  %v3105_v33 = vsel %vm512_vm2, %v3009_v8, %v8589_v25  ;;  %v3187_v36 = vsel %vm596_vm3, %v3104_v27, %v8628_v54 }
 0x332   : > { %v13977_v21 = vld [vmem:[#allocation2 + $0x141] sm:$0xff]  ;;  %v3188_v10 = vsel %vm596_vm3, %v3105_v33, %v8629_v42  ;;  %v3257_v38 = vsel %vm667_vm4, %v3187_v36, %v8668_v35  ;;  %v8749_v8 = vunpack.i.h.bf16 %v18032_v41  ;;  %v8788_v35 = vunpack.i.l.bf16 %v13787_v0 }
 0x333   : > { %18024 = vst [vmem:[#allocation85_spill] sm:$0xff] %v13977_v21  ;;  %v2833_v11 = vadd.f32 %v13478_v58, %v2817_v59  ;;  %v3258_v25 = vsel %vm667_vm4, %v3188_v10, %v8669_v63  ;;  %v14032_v63 = vld [vmem:[#allocation2 + $0x148] sm:$0xff]  ;;  %v2866_v36 = vld [vmem:[%s17260_s7 + $0x140] sm:$0xff]  ;;  %v18058_v21 = vld [vmem:[#allocation13_spill] sm:$0xff] }
 0x334   : > { %9081 = vrot.lane.b32.xlu2 %v9080_v1, %s10342_s16  ;;  %18034 = vst [vmem:[#allocation39_spill] sm:$0xff] %v14032_v63  ;;  %v10207_v63 = vld [vmem:[%s10405_s10 + $0x1d7] sm:$0xff] }
 0x335   : > { %v2849_v56 = vmax.f32 %v2833_v11, 0.0  ;;  %9076 = vrot.lane.b32.xlu1 %v9075_v47, %s10342_s16  ;;  %v8709_v47 = vunpack.i.h.bf16 %v18031_v44  ;;  %v14022_v11 = vld [vmem:[#allocation2 + $0xaf] sm:$0xff] }
 0x336   : > { %7415 = vmatmul.msk.bf16.gmra.mxu3 %vm1012_vm9, %v3549_v30  ;;  %9071 = vrot.lane.b32.xlu0 %v9070_v13, %s10342_s16  ;;  %v14005_v59 = vpop.permute.xlu2 %8916  ;;  %v18035_v44 = vld [vmem:[#allocation60_spill] sm:$0xff] }
 0x337   : > { %18030 = vst [vmem:[#allocation45_spill] sm:$0xff] %v14005_v59  ;;  %v2881_v17 = vmul.f32 %v2865_v34, %v2849_v56  ;;  %v14010_v1 = vpop.permute.xlu1 %8866  ;;  %v3327_v34 = vsel %vm738_vm5, %v3257_v38, %v8708_v61  ;;  %v14030_v56 = vld [vmem:[#allocation2 + $0xa7] sm:$0xff]  ;;  %v3328_v27 = vsel %vm738_vm5, %v3258_v25, %v8709_v47  ;;  %v18036_v0 = vpack.i.bf16 %v18035_v44, %v18002_v7  ;;  %v14538_v59 = vld [vmem:[#allocation2 + $0xcf] sm:$0xff] }
 0x338   : > { %v14016_v13 = vpop.permute.xlu0 %8861  ;;  %v2790_v60 = vpop.f32.mrf.mxu2  ;;  %v14024_v42 = vld [vmem:[#allocation2 + $0x150] sm:$0xff]  ;;  %v3397_v33 = vsel %vm809_vm6, %v3327_v34, %v8748_v28  ;;  %v9085_v61 = vpack.i.bf16 %v14022_v11, %v14030_v56  ;;  %v3398_v10 = vsel %vm809_vm6, %v3328_v27, %v8749_v8  ;;  %v8829_v47 = vunpack.i.h.bf16 %v13754_v37  ;;  %v18037_v28 = vld [vmem:[#allocation55_spill] sm:$0xff] }
 0x339   : > { %2897 = vst.msk [vmem:[#allocation2 + $0x158] sm:$0xff] %vm307_vm1, %v2881_v17  ;;  %v2818_v54 = vmul.f32 %v13465_v52, %v2790_v60  ;;  %v8828_v38 = vunpack.i.l.bf16 %v13754_v37  ;;  %v18038_v60 = vpack.i.bf16 %v18003_v32, %v18037_v28  ;;  %v3467_v25 = vsel %vm880_vm8, %v3397_v33, %v8788_v35  ;;  %v18040_v27 = vld [vmem:[#allocation69_spill] sm:$0xff] }
 0x33a   : > { %18033 = vst [vmem:[#allocation72_spill] sm:$0xff] %v14024_v42  ;;  %v8554_v44 = vunpack.i.h.bf16 %v18040_v27  ;;  %v14075_v28 = vld [vmem:[#allocation2 + $0x149] sm:$0xff] }
 0x33b   : > { %v2834_v30 = vadd.f32 %v13478_v58, %v2818_v54  ;;  %v3468_v54 = vsel %vm880_vm8, %v3398_v10, %v8789_v14  ;;  %v3537_v35 = vsel %vm951_vm7, %v3467_v25, %v8828_v38  ;;  %18045 = vst [vmem:[#allocation60_spill] sm:$0xff] %v14075_v28  ;;  %v18046_v25 = vld [vmem:[#allocation37_spill] sm:$0xff] }
 0x33c   : > { %9096 = vrot.lane.b32.xlu2 %v18036_v0, %s10343_s17  ;;  %v3538_v33 = vsel %vm951_vm7, %v3468_v54, %v8829_v47  ;;  %v2867_v47 = vld [vmem:[%s17260_s7 + $0x148] sm:$0xff]  ;;  %v18047_v54 = vpack.i.bf16 %v18046_v25, %v18005_v15  ;;  %v10203_v28 = vld [vmem:[#allocation2 + $0xb0] sm:$0xff] }
 0x33d   : > { %v2850_v41 = vmax.f32 %v2834_v30, 0.0  ;;  %9091 = vrot.lane.b32.xlu1 %v18038_v60, %s10343_s17  ;;  %v3550_v38 = vpack.c.bf16 %v3538_v33, %v3537_v35  ;;  %v18051_v60 = vld [vmem:[#allocation68_spill] sm:$0xff] }
 0x33e   : > { %9086 = vrot.lane.b32.xlu0 %v9085_v61, %s10342_s16  ;;  %v14055_v7 = vpop.permute.xlu2 %8931  ;;  %v8553_v61 = vunpack.i.l.bf16 %v18040_v27  ;;  %v8674_v15 = vunpack.i.h.bf16 %v18051_v60  ;;  %v8673_v25 = vunpack.i.l.bf16 %v18051_v60 }
 0x33f   : > { %v2882_v34 = vmul.f32 %v2866_v36, %v2850_v41  ;;  %v14059_v8 = vpop.permute.xlu1 %8881  ;;  %v18044_v36 = vld [vmem:[#allocation30_spill] sm:$0xff] }
 0x340   : > { %18039 = vst [vmem:[#allocation74_spill] sm:$0xff] %v14059_v8  ;;  %v14062_v37 = vpop.permute.xlu0 %8876  ;;  %v2792_v30 = vpop.f32.mrf.mxu2  ;;  %v14064_v0 = vld [vmem:[#allocation2 + $0x158] sm:$0xff]  ;;  %v8594_v10 = vunpack.i.h.bf16 %v18044_v36  ;;  %v8593_v41 = vunpack.i.l.bf16 %v18044_v36  ;;  %v10200_v36 = vld [vmem:[%s10405_s10 + $0x1c7] sm:$0xff] }
 0x341   : > { %18041 = vst [vmem:[#allocation29_spill] sm:$0xff] %v14062_v37  ;;  %v14066_v32 = vld [vmem:[#allocation2 + $0x151] sm:$0xff]  ;;  %v2819_v14 = vmul.f32 %v13465_v52, %v2792_v30  ;;  %v3011_v30 = vsel %vm307_vm1, %v10199_v9, %v8554_v44  ;;  %v3010_v43 = vsel %vm307_vm1, %v10200_v36, %v8553_v61  ;;  %v18049_v9 = vld [vmem:[#allocation4_spill] sm:$0xff] }
 0x342   : > { %18042 = vst [vmem:[#allocation36_spill] sm:$0xff] %v14064_v0  ;;  %v18050_v44 = vpack.i.bf16 %v18006_v48, %v18049_v9  ;;  %v3106_v35 = vsel %vm512_vm2, %v3010_v43, %v8593_v41  ;;  %v3107_v33 = vsel %vm512_vm2, %v3011_v30, %v8594_v10  ;;  %v18052_v61 = vld [vmem:[#allocation24_spill] sm:$0xff]  ;;  %v18056_v9 = vld [vmem:[#allocation71_spill] sm:$0xff]  ;;  %v14528_v8 = vld [vmem:[#allocation2 + $0xd7] sm:$0xff] }
 0x343   : > { %18043 = vst [vmem:[#allocation44_spill] sm:$0xff] %v14066_v32  ;;  %v2835_v27 = vadd.f32 %v13478_v58, %v2819_v14  ;;  %v18048_v14 = vld [vmem:[#allocation43_spill] sm:$0xff]  ;;  %v8714_v43 = vunpack.i.h.bf16 %v18056_v9  ;;  %v8713_v10 = vunpack.i.l.bf16 %v18056_v9  ;;  %v10202_v9 = vld [vmem:[#allocation2 + $0xa8] sm:$0xff] }
 0x344   : > { %2898 = vst.msk [vmem:[#allocation2 + $0x160] sm:$0xff] %vm307_vm1, %v2882_v34  ;;  %9111 = vrot.lane.b32.xlu2 %v18047_v54, %s10343_s17  ;;  %v8634_v17 = vunpack.i.h.bf16 %v18048_v14  ;;  %v8633_v34 = vunpack.i.l.bf16 %v18048_v14  ;;  %v18053_v54 = vld [vmem:[#allocation10_spill] sm:$0xff]  ;;  %v14127_v32 = vpack.i.bf16 %v10203_v28, %v10202_v9  ;;  %v2868_v28 = vld [vmem:[%s17260_s7 + $0x150] sm:$0xff] }
 0x345   : > { %v2851_v40 = vmax.f32 %v2835_v27, 0.0  ;;  %9106 = vrot.lane.b32.xlu1 %v18050_v44, %s10343_s17  ;;  %v18054_v36 = vpack.i.bf16 %v18052_v61, %v18053_v54  ;;  %v10201_v54 = vld [vmem:[#allocation2 + $0xa0] sm:$0xff] }
 0x346   : > { %7416 = vmatmul.msk.bf16.gmra.mxu3 %vm1012_vm9, %v3550_v38  ;;  %v14108_v27 = vpop.permute.xlu2 %8946  ;;  %v3189_v38 = vsel %vm596_vm3, %v3106_v35, %v8633_v34  ;;  %v3190_v44 = vsel %vm596_vm3, %v3107_v33, %v8634_v17  ;;  %v8754_v34 = vunpack.i.h.bf16 %v18058_v21  ;;  %v8753_v17 = vunpack.i.l.bf16 %v18058_v21 }
 0x347   : > { %9101 = vrot.lane.b32.xlu0 %v18054_v36, %s10343_s17  ;;  %18055 = vst [vmem:[#allocation55_spill] sm:$0xff] %v14108_v27  ;;  %v2883_v14 = vmul.f32 %v2867_v47, %v2851_v40  ;;  %v14110_v48 = vpop.permute.xlu1 %8896  ;;  %v3259_v40 = vsel %vm667_vm4, %v3189_v38, %v8673_v25  ;;  %v3260_v47 = vsel %vm667_vm4, %v3190_v44, %v8674_v15  ;;  %v8793_v25 = vunpack.i.l.bf16 %v13785_v22 }
 0x348   : > { %v14114_v41 = vpop.permute.xlu0 %8891  ;;  %v2795_v30 = vpop.f32.mrf.mxu2  ;;  %v14125_v36 = vpack.i.bf16 %v10201_v54, %v13758_v50  ;;  %v3329_v33 = vsel %vm738_vm5, %v3259_v40, %v8713_v10  ;;  %v3330_v15 = vsel %vm738_vm5, %v3260_v47, %v8714_v43  ;;  %v8794_v50 = vunpack.i.h.bf16 %v13785_v22  ;;  %v18059_v43 = vld [vmem:[#allocation35_spill] sm:$0xff] }
 0x349   : > { %2899 = vst.msk [vmem:[#allocation2 + $0x168] sm:$0xff] %vm307_vm1, %v2883_v14  ;;  %v2820_v61 = vmul.f32 %v13465_v52, %v2795_v30  ;;  %v8833_v21 = vunpack.i.l.bf16 %v13919_v62  ;;  %v3399_v38 = vsel %vm809_vm6, %v3329_v33, %v8753_v17  ;;  %v3400_v44 = vsel %vm809_vm6, %v3330_v15, %v8754_v34  ;;  %v14167_v34 = vld [vmem:[%s17255_s2] ss:$0 sm:$0xff] }
 0x34a   : > { %v3469_v54 = vsel %vm880_vm8, %v3399_v38, %v8793_v25  ;;  %v3470_v9 = vsel %vm880_vm8, %v3400_v44, %v8794_v50  ;;  %v18064_v50 = vld [vmem:[#allocation51_spill] sm:$0xff] }
 0x34b   : > { %v14116_v60 = vld [vmem:[#allocation2 + $0x160] sm:$0xff]  ;;  %v2836_v35 = vadd.f32 %v13478_v58, %v2820_v61  ;;  %v8834_v58 = vunpack.i.h.bf16 %v13919_v62  ;;  %v3539_v33 = vsel %vm951_vm7, %v3469_v54, %v8833_v21  ;;  %v8599_v25 = vunpack.i.h.bf16 %v18064_v50 }
 0x34c   : > { %18057 = vst [vmem:[#allocation69_spill] sm:$0xff] %v14116_v60  ;;  %9126 = vrot.lane.b32.xlu2 %v14127_v32, %s10343_s17  ;;  %v18062_v61 = vld [vmem:[#allocation79_spill] sm:$0xff] }
 0x34d   : > { %v2852_v14 = vmax.f32 %v2836_v35, 0.0  ;;  %9121 = vrot.lane.b32.xlu1 %v14125_v36, %s10343_s17  ;;  %v8559_v40 = vunpack.i.h.bf16 %v18062_v61  ;;  %v8558_v52 = vunpack.i.l.bf16 %v18062_v61  ;;  %v3540_v15 = vsel %vm951_vm7, %v3470_v9, %v8834_v58  ;;  %v14180_v44 = vld [vmem:[%s17256_s3] ss:$0 sm:$0xff] }
 0x34e   : > { %v14149_v10 = vpop.permute.xlu2 %8961  ;;  %v3551_v54 = vpack.c.bf16 %v3540_v15, %v3539_v33  ;;  %v18067_v9 = vld [vmem:[#allocation47_spill] sm:$0xff] }
 0x34f   : > { %9116 = vrot.lane.b32.xlu0 %v18059_v43, %s10343_s17  ;;  %18060 = vst [vmem:[#allocation30_spill] sm:$0xff] %v14149_v10  ;;  %v2884_v22 = vmul.f32 %v2868_v28, %v2852_v14  ;;  %v14151_v30 = vpop.permute.xlu1 %8911  ;;  %v8598_v28 = vunpack.i.l.bf16 %v18064_v50  ;;  %v14174_v14 = vld [vmem:[#allocation2 + $0x159] sm:$0xff]  ;;  %v18068_v50 = vpack.i.bf16 %v18067_v9, %v18015_v46  ;;  %v3013_v29 = vsel %vm307_vm1, %v10206_v4, %v8559_v40  ;;  %v18072_v46 = vld [vmem:[#allocation57_spill] sm:$0xff] }
 0x350   : > { %18061 = vst [vmem:[#allocation37_spill] sm:$0xff] %v14151_v30  ;;  %v14156_v47 = vpop.permute.xlu0 %8906  ;;  %v2797_v62 = vpop.f32.mrf.mxu2  ;;  %v14160_v35 = vld [vmem:[#allocation2 + $0x161] sm:$0xff]  ;;  %v18073_v4 = vld [vmem:[#allocation58_spill] sm:$0xff]  ;;  %v8758_v9 = vunpack.i.l.bf16 %v13722_v6  ;;  %v8768_v10 = vunpack.i.l.bf16 %v18113_v12 }
 0x351   : > { %18063 = vst [vmem:[#allocation43_spill] sm:$0xff] %v14160_v35  ;;  %v2821_v17 = vmul.f32 %v14167_v34, %v2797_v62  ;;  %v2869_v62 = vld [vmem:[%s17260_s7 + $0x158] sm:$0xff]  ;;  %v18071_v15 = vld [vmem:[#allocation11_spill] sm:$0xff]  ;;  %v18074_v40 = vpack.i.bf16 %v18072_v46, %v18073_v4  ;;  %v10208_v35 = vld [vmem:[#allocation2 + $0xa9] sm:$0xff] }
 0x352   : > { %2900 = vst.msk [vmem:[#allocation2 + $0x170] sm:$0xff] %vm307_vm1, %v2884_v22  ;;  %v18066_v22 = vld [vmem:[#allocation50_spill] sm:$0xff]  ;;  %v8678_v24 = vunpack.i.l.bf16 %v18071_v15 }
 0x353   : > { %18065 = vst [vmem:[#allocation4_spill] sm:$0xff] %v14174_v14  ;;  %v8638_v38 = vunpack.i.l.bf16 %v18066_v22  ;;  %v2837_v61 = vadd.f32 %v14180_v44, %v2821_v17  ;;  %v8639_v58 = vunpack.i.h.bf16 %v18066_v22  ;;  %v3012_v17 = vsel %vm307_vm1, %v10207_v63, %v8558_v52  ;;  %v18069_v22 = vld [vmem:[#allocation20_spill] sm:$0xff] }
 0x354   : > { %9141 = vrot.lane.b32.xlu2 %v18068_v50, %s10344_s18  ;;  %v18070_v21 = vpack.i.bf16 %v18016_v53, %v18069_v22  ;;  %v3109_v14 = vsel %vm512_vm2, %v3013_v29, %v8599_v25  ;;  %v3108_v33 = vsel %vm512_vm2, %v3012_v17, %v8598_v28  ;;  %v8679_v52 = vunpack.i.h.bf16 %v18071_v15 }
 0x355   : > { %v2853_v60 = vmax.f32 %v2837_v61, 0.0  ;;  %v3191_v53 = vsel %vm596_vm3, %v3108_v33, %v8638_v38  ;;  %v18075_v61 = vld [vmem:[#allocation73_spill] sm:$0xff]  ;;  %v3192_v28 = vsel %vm596_vm3, %v3109_v14, %v8639_v58  ;;  %v8759_v38 = vunpack.i.h.bf16 %v13722_v6  ;;  %v14233_v58 = vld [vmem:[#allocation2 + $0x168] sm:$0xff] }
 0x356   : > { %9136 = vrot.lane.b32.xlu1 %v18070_v21, %s10344_s18  ;;  %7417 = vmatmul.msk.bf16.gmra.mxu3 %vm1012_vm9, %v3551_v54  ;;  %v14209_v63 = vpop.permute.xlu2 %8976  ;;  %v8718_v21 = vunpack.i.l.bf16 %v18075_v61  ;;  %v8719_v54 = vunpack.i.h.bf16 %v18075_v61  ;;  %v14231_v14 = vpack.i.bf16 %v13869_v55, %v13882_v18  ;;  %18080 = vst [vmem:[#allocation13_spill] sm:$0xff] %v14233_v58  ;;  %v3262_v15 = vsel %vm667_vm4, %v3192_v28, %v8679_v52  ;;  %v14267_v58 = vld [vmem:[#allocation2 + $0xb1] sm:$0xff] }
 0x357   : > { %9131 = vrot.lane.b32.xlu0 %v18074_v40, %s10344_s18  ;;  %v2885_v29 = vmul.f32 %v2869_v62, %v2853_v60  ;;  %v14214_v25 = vpop.permute.xlu1 %8926  ;;  %v3261_v62 = vsel %vm667_vm4, %v3191_v53, %v8678_v24  ;;  %v18081_v53 = vld [vmem:[#allocation52_spill] sm:$0xff]  ;;  %v8838_v28 = vunpack.i.l.bf16 %v13917_v51  ;;  %v18089_v40 = vld [vmem:[#allocation34_spill] sm:$0xff] }
 0x358   : > { %18076 = vst [vmem:[#allocation68_spill] sm:$0xff] %v14214_v25  ;;  %v14219_v50 = vpop.permute.xlu0 %8921  ;;  %v2800_v17 = vpop.f32.mrf.mxu2  ;;  %v3331_v4 = vsel %vm738_vm5, %v3261_v62, %v8718_v21  ;;  %v3332_v24 = vsel %vm738_vm5, %v3262_v15, %v8719_v54  ;;  %v8799_v61 = vunpack.i.h.bf16 %v18081_v53  ;;  %v8798_v18 = vunpack.i.l.bf16 %v18081_v53  ;;  %v18086_v15 = vld [vmem:[#allocation53_spill] sm:$0xff] }
 0x359   : > { %18077 = vst [vmem:[#allocation24_spill] sm:$0xff] %v14219_v50  ;;  %v14221_v22 = vld [vmem:[#allocation2 + $0x170] sm:$0xff]  ;;  %v2822_v60 = vmul.f32 %v14167_v34, %v2800_v17  ;;  %v3401_v55 = vsel %vm809_vm6, %v3331_v4, %v8758_v9  ;;  %v3402_v52 = vsel %vm809_vm6, %v3332_v24, %v8759_v38  ;;  %v8839_v21 = vunpack.i.h.bf16 %v13917_v51  ;;  %v18085_v9 = vld [vmem:[#allocation28_spill] sm:$0xff] }
 0x35a   : > { %18078 = vst [vmem:[#allocation10_spill] sm:$0xff] %v14221_v22  ;;  %v14223_v46 = vld [vmem:[#allocation2 + $0x169] sm:$0xff]  ;;  %v18087_v4 = vpack.i.bf16 %v18085_v9, %v18086_v15  ;;  %v8563_v33 = vunpack.i.l.bf16 %v18089_v40  ;;  %v8564_v51 = vunpack.i.h.bf16 %v18089_v40  ;;  %v18091_v40 = vld [vmem:[#allocation54_spill] sm:$0xff] }
 0x35b   : > { %18079 = vst [vmem:[#allocation71_spill] sm:$0xff] %v14223_v46  ;;  %v2838_v6 = vadd.f32 %v14180_v44, %v2822_v60  ;;  %v18082_v17 = vld [vmem:[#allocation5_spill] sm:$0xff]  ;;  %v18083_v60 = vld [vmem:[#allocation19_spill] sm:$0xff]  ;;  %v8603_v22 = vunpack.i.l.bf16 %v18091_v40 }
 0x35c   : > { %2901 = vst.msk [vmem:[#allocation2 + $0x178] sm:$0xff] %vm307_vm1, %v2885_v29  ;;  %v2870_v29 = vld [vmem:[%s17260_s7 + $0x160] sm:$0xff]  ;;  %9156 = vrot.lane.b32.xlu2 %v14231_v14, %s10344_s18  ;;  %v18084_v62 = vpack.i.bf16 %v18082_v17, %v18083_v60  ;;  %v3471_v60 = vsel %vm880_vm8, %v3401_v55, %v8798_v18  ;;  %v14283_v18 = vpack.i.bf16 %v14267_v58, %v10208_v35 }
 0x35d   : > { %v2854_v54 = vmax.f32 %v2838_v6, 0.0 }
 0x35e   : > { %9151 = vrot.lane.b32.xlu1 %v18084_v62, %s10344_s18  ;;  %v14262_v53 = vpop.permute.xlu2 %8991  ;;  %v3472_v62 = vsel %vm880_vm8, %v3402_v52, %v8799_v61  ;;  %v10209_v61 = vld [vmem:[#allocation2 + $0xa1] sm:$0xff] }
 0x35f   : > { %9146 = vrot.lane.b32.xlu0 %v18087_v4, %s10344_s18  ;;  %18088 = vst [vmem:[#allocation35_spill] sm:$0xff] %v14262_v53  ;;  %v2886_v38 = vmul.f32 %v2870_v29, %v2854_v54  ;;  %v14265_v24 = vpop.permute.xlu1 %8941  ;;  %v3541_v54 = vsel %vm951_vm7, %v3471_v60, %v8838_v28  ;;  %v3542_v15 = vsel %vm951_vm7, %v3472_v62, %v8839_v21  ;;  %v8604_v4 = vunpack.i.h.bf16 %v18091_v40  ;;  %v10210_v52 = vld [vmem:[%s10405_s10 + $0x1e7] sm:$0xff]  ;;  %v10211_v60 = vld [vmem:[%s10405_s10 + $0x1ef] sm:$0xff]  ;;  %v14556_v53 = vld [vmem:[#allocation2 + $0x117] sm:$0xff] }
 0x360   : > { %v14270_v6 = vpop.permute.xlu0 %8936  ;;  %v2802_v17 = vpop.f32.mrf.mxu2  ;;  %v14286_v55 = vpack.i.bf16 %v10209_v61, %v13850_v49  ;;  %v3015_v62 = vsel %vm307_vm1, %v10211_v60, %v8564_v51  ;;  %v18093_v40 = vld [vmem:[#allocation40_spill] sm:$0xff]  ;;  %v3552_v61 = vpack.c.bf16 %v3542_v15, %v3541_v54 }
 0x361   : > { %2902 = vst.msk [vmem:[#allocation2 + $0x180] sm:$0xff] %vm307_vm1, %v2886_v38  ;;  %v2823_v29 = vmul.f32 %v14167_v34, %v2802_v17  ;;  %v3014_v38 = vsel %vm307_vm1, %v10210_v52, %v8563_v33  ;;  %v18092_v17 = vld [vmem:[#allocation61_spill] sm:$0xff]  ;;  %v8683_v42 = vunpack.i.l.bf16 %v18093_v40  ;;  %v2871_v49 = vld [vmem:[%s17260_s7 + $0x168] sm:$0xff]  ;;  %v8684_v33 = vunpack.i.h.bf16 %v18093_v40 }
 0x362   : > { %v8643_v57 = vunpack.i.l.bf16 %v18092_v17  ;;  %v8644_v35 = vunpack.i.h.bf16 %v18092_v17  ;;  %v3110_v51 = vsel %vm512_vm2, %v3014_v38, %v8603_v22  ;;  %v3111_v54 = vsel %vm512_vm2, %v3015_v62, %v8604_v4 }
 0x363   : > { %v14274_v9 = vld [vmem:[#allocation2 + $0x171] sm:$0xff]  ;;  %v2839_v28 = vadd.f32 %v14180_v44, %v2823_v29 }
 0x364   : > { %18090 = vst [vmem:[#allocation79_spill] sm:$0xff] %v14274_v9  ;;  %9171 = vrot.lane.b32.xlu2 %v18059_v43, %s10337_s11  ;;  %v3193_v15 = vsel %vm596_vm3, %v3110_v51, %v8643_v57  ;;  %v18095_v43 = vld [vmem:[#allocation64_spill] sm:$0xff]  ;;  %v3194_v40 = vsel %vm596_vm3, %v3111_v54, %v8644_v35  ;;  %v8804_v35 = vunpack.i.h.bf16 %v13827_v19  ;;  %v14334_v54 = vld [vmem:[#allocation2 + $0x178] sm:$0xff] }
 0x365   : > { %v2855_v29 = vmax.f32 %v2839_v28, 0.0  ;;  %v8723_v17 = vunpack.i.l.bf16 %v18095_v43  ;;  %v8724_v22 = vunpack.i.h.bf16 %v18095_v43  ;;  %v3263_v38 = vsel %vm667_vm4, %v3193_v15, %v8683_v42  ;;  %v10212_v42 = vld [vmem:[#allocation2 + $0xb8] sm:$0xff]  ;;  %18100 = vst [vmem:[#allocation11_spill] sm:$0xff] %v14334_v54  ;;  %v14386_v54 = vld [vmem:[#allocation2 + $0xd0] sm:$0xff] }
 0x366   : > { %9166 = vrot.lane.b32.xlu1 %v14283_v18, %s10344_s18  ;;  %7418 = vmatmul.msk.bf16.gmra.mxu3 %vm1012_vm9, %v3552_v61  ;;  %v14310_v52 = vpop.permute.xlu2 %9006  ;;  %v18097_v61 = vld [vmem:[#allocation82_spill] sm:$0xff]  ;;  %v3264_v57 = vsel %vm667_vm4, %v3194_v40, %v8684_v33 }
 0x367   : > { %9161 = vrot.lane.b32.xlu0 %v14286_v55, %s10344_s18  ;;  %18094 = vst [vmem:[#allocation51_spill] sm:$0xff] %v14310_v52  ;;  %v2887_v60 = vmul.f32 %v2871_v49, %v2855_v29  ;;  %v14315_v28 = vpop.permute.xlu1 %8956  ;;  %v8763_v21 = vunpack.i.l.bf16 %v18097_v61  ;;  %v8764_v4 = vunpack.i.h.bf16 %v18097_v61  ;;  %v8803_v49 = vunpack.i.l.bf16 %v13827_v19  ;;  %v14331_v29 = vld [vmem:[#allocation2 + $0xc0] sm:$0xff]  ;;  %v2872_v19 = vld [vmem:[%s17260_s7 + $0x170] sm:$0xff] }
 0x368   : > { %18096 = vst [vmem:[#allocation50_spill] sm:$0xff] %v14315_v28  ;;  %v14321_v9 = vpop.permute.xlu0 %8951  ;;  %v2805_v46 = vpop.f32.mrf.mxu2  ;;  %v14323_v0 = vld [vmem:[#allocation2 + $0x180] sm:$0xff]  ;;  %v9185_v51 = vpack.i.bf16 %v14331_v29, %v10212_v42  ;;  %v3333_v15 = vsel %vm738_vm5, %v3263_v38, %v8723_v17  ;;  %v8844_v61 = vunpack.i.h.bf16 %v13782_v16  ;;  %v8843_v17 = vunpack.i.l.bf16 %v13782_v16 }
 0x369   : > { %18098 = vst [vmem:[#allocation47_spill] sm:$0xff] %v14321_v9  ;;  %v2824_v62 = vmul.f32 %v14167_v34, %v2805_v46  ;;  %v3334_v46 = vsel %vm738_vm5, %v3264_v57, %v8724_v22  ;;  %v14373_v43 = vld [vmem:[#allocation2 + $0x179] sm:$0xff] }
 0x36a   : > { %18099 = vst [vmem:[#allocation20_spill] sm:$0xff] %v14323_v0  ;;  %v3404_v40 = vsel %vm809_vm6, %v3334_v46, %v8764_v4  ;;  %v18104_v46 = vld [vmem:[#allocation22_spill] sm:$0xff] }
 0x36b   : > { %2903 = vst.msk [vmem:[#allocation2 + $0x188] sm:$0xff] %vm307_vm1, %v2887_v60  ;;  %v2840_v33 = vadd.f32 %v14180_v44, %v2824_v62  ;;  %v3403_v60 = vsel %vm809_vm6, %v3333_v15, %v8763_v21  ;;  %v3474_v57 = vsel %vm880_vm8, %v3404_v40, %v8804_v35  ;;  %v18103_v15 = vld [vmem:[#allocation42_spill] sm:$0xff]  ;;  %v14370_v40 = vld [vmem:[#allocation2 + $0xf0] sm:$0xff] }
 0x36c   : > { %9186 = vrot.lane.b32.xlu2 %v9185_v51, %s10337_s11  ;;  %v3473_v22 = vsel %vm880_vm8, %v3403_v60, %v8803_v49  ;;  %v3544_v49 = vsel %vm951_vm7, %v3474_v57, %v8844_v61  ;;  %v8569_v35 = vunpack.i.h.bf16 %v18103_v15  ;;  %v8608_v60 = vunpack.i.l.bf16 %v18104_v46  ;;  %18105 = vst [vmem:[#allocation73_spill] sm:$0xff] %v14373_v43  ;;  %v10220_v0 = vld [vmem:[%s10405_s10 + $0x1f7] sm:$0xff]  ;;  %v10221_v57 = vld [vmem:[%s10405_s10 + $0x1ff] sm:$0xff] }
 0x36d   : > { %v2856_v38 = vmax.f32 %v2840_v33, 0.0  ;;  %v8568_v33 = vunpack.i.l.bf16 %v18103_v15  ;;  %v2873_v15 = vld [vmem:[%s17260_s7 + $0x178] sm:$0xff] }
 0x36e   : > { %9181 = vrot.lane.b32.xlu1 %v14127_v32, %s10337_s11  ;;  %v14353_v21 = vpop.permute.xlu2 %9021  ;;  %v3017_v43 = vsel %vm307_vm1, %v10221_v57, %v8569_v35  ;;  %v18110_v57 = vld [vmem:[#allocation23_spill] sm:$0xff] }
 0x36f   : > { %9176 = vrot.lane.b32.xlu0 %v14125_v36, %s10337_s11  ;;  %v2888_v62 = vmul.f32 %v2872_v19, %v2856_v38  ;;  %v14357_v42 = vpop.permute.xlu1 %8971  ;;  %v3543_v36 = vsel %vm951_vm7, %v3473_v22, %v8843_v17  ;;  %v10214_v19 = vld [vmem:[#allocation2 + $0xe8] sm:$0xff]  ;;  %v10216_v17 = vld [vmem:[#allocation2 + $0xe0] sm:$0xff]  ;;  %v14377_v22 = vld [vmem:[#allocation2 + $0xd8] sm:$0xff] }
 0x370   : > { %v14359_v4 = vpop.permute.xlu0 %8966  ;;  %v2807_v51 = vpop.f32.mrf.mxu2  ;;  %v9200_v38 = vpack.i.bf16 %v14370_v40, %v10214_v19  ;;  %v9195_v61 = vpack.i.bf16 %v10216_v17, %v14377_v22  ;;  %v3553_v19 = vpack.c.bf16 %v3544_v49, %v3543_v36  ;;  %v3016_v17 = vsel %vm307_vm1, %v10220_v0, %v8568_v33  ;;  %v18108_v33 = vld [vmem:[#allocation9_spill] sm:$0xff] }
 0x371   : > { %18101 = vst [vmem:[#allocation57_spill] sm:$0xff] %v14359_v4  ;;  %v2825_v32 = vmul.f32 %v14167_v34, %v2807_v51  ;;  %v8729_v4 = vunpack.i.h.bf16 %v18110_v57  ;;  %v9305_v5 = vpack.i.bf16 %v14377_v22, %v14386_v54  ;;  %v18131_v22 = vld [vmem:[#allocation78_spill] sm:$0xff] }
 0x372   : > { %v14361_v16 = vld [vmem:[#allocation2 + $0x181] sm:$0xff]  ;;  %2904 = vst.msk [vmem:[#allocation2 + $0x190] sm:$0xff] %vm307_vm1, %v2888_v62  ;;  %v8609_v62 = vunpack.i.h.bf16 %v18104_v46 }
 0x373   : > { %18102 = vst [vmem:[#allocation58_spill] sm:$0xff] %v14361_v16  ;;  %v2841_v51 = vadd.f32 %v14180_v44, %v2825_v32  ;;  %v14388_v46 = vld [vmem:[#allocation2 + $0xc8] sm:$0xff]  ;;  %v18106_v16 = vld [vmem:[#allocation46_spill] sm:$0xff] }
 0x374   : > { %9201 = vrot.lane.b32.xlu2 %v9200_v38, %s10337_s11  ;;  %v9190_v32 = vpack.i.bf16 %v14386_v54, %v14388_v46  ;;  %v8649_v36 = vunpack.i.h.bf16 %v18106_v16  ;;  %v8648_v49 = vunpack.i.l.bf16 %v18106_v16  ;;  %v3112_v38 = vsel %vm512_vm2, %v3016_v17, %v8608_v60  ;;  %v14424_v17 = vld [vmem:[#allocation2 + $0xf8] sm:$0xff]  ;;  %v3717_v54 = vld [vmem:[%s17260_s7 + $0x190] sm:$0xff] }
 0x375   : > { %v2857_v26 = vmax.f32 %v2841_v51, 0.0  ;;  %v3113_v0 = vsel %vm512_vm2, %v3017_v43, %v8609_v62  ;;  %v8689_v51 = vunpack.i.h.bf16 %v18108_v33  ;;  %v8728_v16 = vunpack.i.l.bf16 %v18110_v57 }
 0x376   : > { %9196 = vrot.lane.b32.xlu1 %v9195_v61, %s10337_s11  ;;  %7419 = vmatmul.msk.bf16.gmra.mxu3 %vm1012_vm9, %v3553_v19  ;;  %v14402_v23 = vpop.permute.xlu2 %9036  ;;  %v8688_v61 = vunpack.i.l.bf16 %v18108_v33  ;;  %v14413_v19 = vld [vmem:[#allocation2 + $0x187] sm:$0xff]  ;;  %v3195_v62 = vsel %vm596_vm3, %v3112_v38, %v8648_v49  ;;  %v8808_v38 = vunpack.i.l.bf16 %v13820_v3 }
 0x377   : > { %9191 = vrot.lane.b32.xlu0 %v9190_v32, %s10337_s11  ;;  %18107 = vst [vmem:[#allocation52_spill] sm:$0xff] %v14402_v23  ;;  %v2889_v52 = vmul.f32 %v2873_v15, %v2857_v26  ;;  %v14407_v35 = vpop.permute.xlu1 %8986  ;;  %v3196_v26 = vsel %vm596_vm3, %v3113_v0, %v8649_v36  ;;  %v14422_v15 = vld [vmem:[#allocation2 + $0x100] sm:$0xff]  ;;  %v8809_v36 = vunpack.i.h.bf16 %v13820_v3  ;;  %v8849_v0 = vunpack.i.h.bf16 %v13968_v2 }
 0x378   : > { %18109 = vst [vmem:[#allocation5_spill] sm:$0xff] %v14407_v35  ;;  %v14411_v60 = vpop.permute.xlu0 %8981  ;;  %v9205_v33 = vpack.i.bf16 %v14422_v15, %v14424_v17  ;;  %v3265_v57 = vsel %vm667_vm4, %v3195_v62, %v8688_v61  ;;  %v3266_v25 = vsel %vm667_vm4, %v3196_v26, %v8689_v51  ;;  %v8848_v61 = vunpack.i.l.bf16 %v13968_v2  ;;  %v10224_v62 = vld [vmem:[#allocation2 + $0xc9] sm:$0xff]  ;;  %v14455_v26 = vld [vmem:[#allocation2 + $0xd1] sm:$0xff] }
 0x379   : > { %18111 = vst [vmem:[#allocation19_spill] sm:$0xff] %v14413_v19  ;;  %v14415_v32 = vld [vmem:[#allocation2 + $0x18f] sm:$0xff]  ;;  %v3335_v43 = vsel %vm738_vm5, %v3265_v57, %v8728_v16  ;;  %v3336_v49 = vsel %vm738_vm5, %v3266_v25, %v8729_v4  ;;  %v10226_v57 = vld [vmem:[#allocation2 + $0xc1] sm:$0xff]  ;;  %v14458_v19 = vld [vmem:[#allocation2 + $0xb9] sm:$0xff]  ;;  %v8974_v35 = vunpack.i.h.bf16 %v14357_v42 }
 0x37a   : > { %18112 = vst [vmem:[#allocation28_spill] sm:$0xff] %v14415_v32  ;;  %v3405_v25 = vsel %vm809_vm6, %v3335_v43, %v8768_v10  ;;  %v9225_v10 = vpack.i.bf16 %v10226_v57, %v14458_v19 }
 0x37b   : > { %2905 = vst.msk [vmem:[#allocation2 + $0x198] sm:$0xff] %vm307_vm1, %v2889_v52  ;;  %v8769_v52 = vunpack.i.h.bf16 %v18113_v12 }
 0x37c   : > { %9216 = vrot.lane.b32.xlu2 %v14286_v55, %s10338_s12  ;;  %v3475_v55 = vsel %vm880_vm8, %v3405_v25, %v8808_v38  ;;  %v10228_v38 = vld [vmem:[#allocation2 + $0xf9] sm:$0xff]  ;;  %v10230_v25 = vld [vmem:[#allocation2 + $0xf1] sm:$0xff] }
 0x37d   : > { %v3406_v3 = vsel %vm809_vm6, %v3336_v49, %v8769_v52  ;;  %v3545_v2 = vsel %vm951_vm7, %v3475_v55, %v8848_v61 }
 0x37e   : > { %9211 = vrot.lane.b32.xlu1 %v14231_v14, %s10338_s12  ;;  %v14443_v12 = vpop.permute.xlu2 %9051  ;;  %v3476_v16 = vsel %vm880_vm8, %v3406_v3, %v8809_v36  ;;  %v14475_v3 = vld [vmem:[#allocation2 + $0xe9] sm:$0xff] }
 0x37f   : > { %9206 = vrot.lane.b32.xlu0 %v9205_v33, %s10337_s11  ;;  %v14445_v51 = vpop.permute.xlu1 %9001  ;;  %v3546_v14 = vsel %vm951_vm7, %v3476_v16, %v8849_v0  ;;  %v9230_v33 = vpack.i.bf16 %v14455_v26, %v10224_v62  ;;  %v14472_v0 = vld [vmem:[#allocation2 + $0x101] sm:$0xff]  ;;  %v9240_v55 = vpack.i.bf16 %v10230_v25, %v14475_v3 }
 0x380   : > { %18114 = vst [vmem:[#allocation53_spill] sm:$0xff] %v14445_v51  ;;  %v14449_v4 = vpop.permute.xlu0 %8996  ;;  %v3554_v43 = vpack.c.bf16 %v3546_v14, %v3545_v2  ;;  %v9245_v61 = vpack.i.bf16 %v14472_v0, %v10228_v38  ;;  %v14479_v16 = vld [vmem:[#allocation2 + $0xe1] sm:$0xff] }
 0x381   : > { %18115 = vst [vmem:[#allocation34_spill] sm:$0xff] %v14449_v4 }
 0x384   : > { %9231 = vrot.lane.b32.xlu2 %v9230_v33, %s10338_s12  ;;  %v14491_v33 = vld [vmem:[#allocation2 + $0xc7] sm:$0xff] }
 0x386   : > { %9226 = vrot.lane.b32.xlu1 %v9225_v10, %s10338_s12  ;;  %7420 = vmatmul.msk.bf16.gmra.mxu3 %vm1012_vm9, %v3554_v43  ;;  %v14466_v52 = vpop.permute.xlu2 %9066  ;;  %v14495_v10 = vld [vmem:[#allocation2 + $0xb7] sm:$0xff]  ;;  %v14497_v43 = vld [vmem:[#allocation2 + $0xbf] sm:$0xff] }
 0x387   : > { %9221 = vrot.lane.b32.xlu0 %v14283_v18, %s10338_s12  ;;  %18116 = vst [vmem:[#allocation54_spill] sm:$0xff] %v14466_v52  ;;  %v14468_v49 = vpop.permute.xlu1 %9016  ;;  %v14481_v18 = vld [vmem:[#allocation2 + $0xd9] sm:$0xff]  ;;  %v8854_v52 = vunpack.i.h.bf16 %v13964_v20 }
 0x388   : > { %v14470_v36 = vpop.permute.xlu0 %9011  ;;  %v9235_v2 = vpack.i.bf16 %v14479_v16, %v14481_v18 }
 0x38c   : > { %9246 = vrot.lane.b32.xlu2 %v9245_v61, %s10338_s12  ;;  %v9260_v61 = vpack.i.bf16 %v14491_v33, %v14497_v43 }
 0x38e   : > { %9241 = vrot.lane.b32.xlu1 %v9240_v55, %s10338_s12  ;;  %v14487_v14 = vpop.permute.xlu2 %9081  ;;  %v9255_v55 = vpack.i.bf16 %v14495_v10, %v14022_v11  ;;  %v14517_v11 = vld [vmem:[#allocation2 + $0xf7] sm:$0xff] }
 0x38f   : > { %9236 = vrot.lane.b32.xlu0 %v9235_v2, %s10338_s12  ;;  %18117 = vst [vmem:[#allocation61_spill] sm:$0xff] %v14487_v14  ;;  %v14489_v62 = vpop.permute.xlu1 %9031  ;;  %v9250_v2 = vpack.i.bf16 %v14030_v56, %v13966_v39  ;;  %v3715_v14 = vld [vmem:[%s17260_s7 + $0x180] sm:$0xff] }
 0x390   : > { %18118 = vst [vmem:[#allocation40_spill] sm:$0xff] %v14489_v62  ;;  %v14493_v57 = vpop.permute.xlu0 %9026  ;;  %v14521_v39 = vld [vmem:[#allocation2 + $0xe7] sm:$0xff]  ;;  %v4420_v56 = vld [vmem:[%s17257_s4 + $0x20] sm:$0xf]  ;;  %v14563_v62 = vld [vmem:[#allocation2 + $0x10f] sm:$0xff] }
 0x391   : > { %18119 = vst [vmem:[#allocation64_spill] sm:$0xff] %v14493_v57  ;;  %v18144_v57 = vld [vmem:[#allocation77_spill] sm:$0xff] }
 0x392   : > { %v3627_v38 = vpop.f32.mrf.mxu3 }
 0x393   : > { %v3667_v25 = vmul.f32 %v14167_v34, %v3627_v38 }
 0x394   : > { %9261 = vrot.lane.b32.xlu2 %v9260_v61, %s10339_s13 }
 0x395   : > { %v3683_v32 = vadd.f32 %v14180_v44, %v3667_v25 }
 0x396   : > { %9256 = vrot.lane.b32.xlu1 %v9255_v55, %s10339_s13  ;;  %v14513_v51 = vpop.permute.xlu2 %9096  ;;  %v14526_v55 = vld [vmem:[#allocation2 + $0xef] sm:$0xff] }
 0x397   : > { %9251 = vrot.lane.b32.xlu0 %v9250_v2, %s10339_s13  ;;  %v3699_v38 = vmax.f32 %v3683_v32, 0.0  ;;  %v14515_v50 = vpop.permute.xlu1 %9046  ;;  %v4438_v2 = vunpack.c.l.b16 %v4420_v56  ;;  %v14530_v32 = vld [vmem:[#allocation2 + $0xdf] sm:$0xff] }
 0x398   : > { %18120 = vst [vmem:[#allocation82_spill] sm:$0xff] %v14515_v50  ;;  %v14519_v61 = vpop.permute.xlu0 %9041  ;;  %v9275_v50 = vpack.i.bf16 %v14517_v11, %v14526_v55  ;;  %v9270_v4 = vpack.i.bf16 %v14521_v39, %v14530_v32 }
 0x399   : > { %18121 = vst [vmem:[#allocation42_spill] sm:$0xff] %v14519_v61  ;;  %v3731_v25 = vmul.f32 %v3715_v14, %v3699_v38  ;;  %v4443_v14 = vpack.c.b16 %v4438_v2, %v4438_v2  ;;  %v9265_v38 = vpack.i.bf16 %v14528_v8, %v14538_v59 }
 0x39a   : > { %v3629_v23 = vpop.f32.mrf.mxu3 }
 0x39b   : > { %3747 = vst.msk [vmem:[#allocation2 + $0x1a0] sm:$0xff] %vm307_vm1, %v3731_v25  ;;  %v3668_v61 = vmul.f32 %v14167_v34, %v3629_v23  ;;  %v4473_v28 = vsel %vm1037_vm0, %v4443_v14, 0  ;;  %v3716_v23 = vld [vmem:[%s17260_s7 + $0x188] sm:$0xff] }
 0x39c   : > { %9276 = vrot.lane.b32.xlu2 %v9275_v50, %s10339_s13  ;;  %4478 = vmatpush.bf16.msrb.mxu0 %v4473_v28  ;;  %v14561_v14 = vld [vmem:[#allocation2 + $0x107] sm:$0xff]  ;;  %v9285_v28 = vpack.i.bf16 %v14556_v53, %v14563_v62 }
 0x39d   : > { %v3684_v56 = vadd.f32 %v14180_v44, %v3668_v61 }
 0x39e   : > { %9271 = vrot.lane.b32.xlu1 %v9270_v4, %s10339_s13  ;;  %v14550_v25 = vpop.permute.xlu2 %9111  ;;  %v7539_v4 = vld [vmem:[%s17257_s4 + $0x18] sm:$0xff] }
 0x39f   : > { %9266 = vrot.lane.b32.xlu0 %v9265_v38, %s10339_s13  ;;  %18122 = vst [vmem:[#allocation22_spill] sm:$0xff] %v14550_v25  ;;  %v3700_v2 = vmax.f32 %v3684_v56, 0.0  ;;  %v14552_v50 = vpop.permute.xlu1 %9061  ;;  %v14568_v38 = vld [vmem:[#allocation2 + $0xff] sm:$0xff] }
 0x3a0   : > { %v14554_v37 = vpop.permute.xlu0 %9056  ;;  %4479 = vmatpush.bf16.msrb.mxu0 %v7539_v4  ;;  %v18123_v56 = vld [vmem:[#allocation15_spill] sm:$0xff] }
 0x3a1   : > { %v3732_v61 = vmul.f32 %v3716_v23, %v3700_v2  ;;  %v18124_v25 = vld [vmem:[#allocation75_spill] sm:$0xff]  ;;  %v9280_v23 = vpack.i.bf16 %v14561_v14, %v14568_v38  ;;  %v7538_v2 = vld [vmem:[%s17257_s4 + $0x10] sm:$0xff] }
 0x3a2   : > { %v18125_v9 = vpack.i.bf16 %v18123_v56, %v18124_v25 }
 0x3a3   : > { %3748 = vst.msk [vmem:[#allocation2 + $0x1a8] sm:$0xff] %vm307_vm1, %v3732_v61 }
 0x3a4   : > { %9291 = vrot.lane.b32.xlu2 %v18125_v9, %s10340_s14  ;;  %4480 = vmatpush.bf16.msrb.mxu0 %v7538_v2  ;;  %v7537_v9 = vld [vmem:[%s17257_s4 + $0x8] sm:$0xff]  ;;  %v14597_v2 = vld [vmem:[#allocation2 + $0x1a0] sm:$0xff] }
 0x3a5   : > { %18130 = vst [vmem:[#allocation15_spill] sm:$0xff] %v14597_v2 }
 0x3a6   : > { %9286 = vrot.lane.b32.xlu1 %v9285_v28, %s10339_s13  ;;  %v14581_v4 = vpop.permute.xlu2 %9126 }
 0x3a7   : > { %9281 = vrot.lane.b32.xlu0 %v9280_v23, %s10339_s13  ;;  %18126 = vst [vmem:[#allocation46_spill] sm:$0xff] %v14581_v4  ;;  %v14583_v61 = vpop.permute.xlu1 %9076  ;;  %v9300_v23 = vpack.i.bf16 %v14388_v46, %v14331_v29  ;;  %v18132_v46 = vld [vmem:[#allocation80_spill] sm:$0xff] }
 0x3a8   : > { %18127 = vst [vmem:[#allocation9_spill] sm:$0xff] %v14583_v61  ;;  %v14585_v30 = vpop.permute.xlu0 %9071  ;;  %4481 = vmatpush.bf16.msrb.mxu0 %v7537_v9  ;;  %v7536_v61 = vld [vmem:[%s17257_s4] sm:$0xff]  ;;  %v18133_v9 = vpack.i.bf16 %v18131_v22, %v18132_v46  ;;  %v9315_v46 = vpack.i.bf16 %v14424_v17, %v14370_v40 }
 0x3a9   : > { %18128 = vst [vmem:[#allocation23_spill] sm:$0xff] %v14585_v30  ;;  %v3632_v25 = vpop.f32.mrf.mxu3  ;;  %v14618_v30 = vld [vmem:[#allocation2 + $0x108] sm:$0xff] }
 0x3aa   : > { %v3669_v56 = vmul.f32 %v14167_v34, %v3632_v25  ;;  %v14593_v28 = vld [vmem:[#allocation2 + $0x1a8] sm:$0xff]  ;;  %18134 = vst [vmem:[#allocation75_spill] sm:$0xff] %v14618_v30 }
 0x3ab   : > { %18129 = vst [vmem:[#allocation67_spill] sm:$0xff] %v14593_v28 }
 0x3ac   : > { %v3685_v4 = vadd.f32 %v14180_v44, %v3669_v56  ;;  %9306 = vrot.lane.b32.xlu2 %v9305_v5, %s10340_s14  ;;  %4482 = vmatpush.bf16.msrb.mxu0 %v7536_v61 }
 0x3ae   : > { %9301 = vrot.lane.b32.xlu1 %v9300_v23, %s10340_s14  ;;  %v3701_v29 = vmax.f32 %v3685_v4, 0.0  ;;  %v14614_v5 = vpop.permute.xlu2 %9141  ;;  %v9320_v23 = vpack.i.bf16 %v14618_v30, %v14422_v15  ;;  %v8893_v30 = vunpack.i.l.bf16 %v14114_v41 }
 0x3af   : > { %9296 = vrot.lane.b32.xlu0 %v18133_v9, %s10340_s14  ;;  %v14616_v56 = vpop.permute.xlu1 %9091 }
 0x3b0   : > { %v3733_v25 = vmul.f32 %v3717_v54, %v3701_v29  ;;  %v14620_v2 = vpop.permute.xlu0 %9086  ;;  %v3718_v54 = vld [vmem:[%s17260_s7 + $0x198] sm:$0xff] }
 0x3b1   : > { %18135 = vst [vmem:[#allocation78_spill] sm:$0xff] %v14620_v2  ;;  %v3634_v28 = vpop.f32.mrf.mxu3 }
 0x3b2   : > { %3749 = vst.msk [vmem:[#allocation2 + $0x1b0] sm:$0xff] %vm307_vm1, %v3733_v25  ;;  %v3670_v4 = vmul.f32 %v14167_v34, %v3634_v28  ;;  %v18136_v25 = vld [vmem:[#allocation33_spill] sm:$0xff] }
 0x3b3   : > { %v18137_v28 = vld [vmem:[#allocation25_spill] sm:$0xff] }
 0x3b4   : > { %v3686_v61 = vadd.f32 %v14180_v44, %v3670_v4  ;;  %9321 = vrot.lane.b32.xlu2 %v9320_v23, %s10340_s14  ;;  %v18138_v9 = vpack.i.bf16 %v18136_v25, %v18137_v28  ;;  %v14644_v23 = vld [vmem:[#allocation2 + $0x118] sm:$0xff] }
 0x3b5   : > { %18141 = vst [vmem:[#allocation87_spill] sm:$0xff] %v14644_v23 }
 0x3b6   : > { %9316 = vrot.lane.b32.xlu1 %v9315_v46, %s10340_s14  ;;  %v3702_v29 = vmax.f32 %v3686_v61, 0.0  ;;  %v14638_v15 = vpop.permute.xlu2 %9156  ;;  %v9335_v61 = vpack.i.bf16 %v14458_v19, %v14267_v58  ;;  %v3719_v58 = vld [vmem:[%s17260_s7 + $0x1a0] sm:$0xff]  ;;  %v18143_v19 = vld [vmem:[#allocation76_spill] sm:$0xff] }
 0x3b7   : > { %9311 = vrot.lane.b32.xlu0 %v18138_v9, %s10340_s14  ;;  %18139 = vst [vmem:[#allocation80_spill] sm:$0xff] %v14638_v15  ;;  %v14640_v2 = vpop.permute.xlu1 %9106  ;;  %v14651_v9 = vld [vmem:[#allocation2 + $0x110] sm:$0xff] }
 0x3b8   : > { %18140 = vst [vmem:[#allocation86_spill] sm:$0xff] %v14640_v2  ;;  %v3734_v40 = vmul.f32 %v3718_v54, %v3702_v29  ;;  %v3764_v15 = vld [vmem:[#allocation2 + $0xf] sm:$0xff]  ;;  %v8853_v2 = vunpack.i.l.bf16 %v13964_v20  ;;  %v8894_v54 = vunpack.i.h.bf16 %v14114_v41  ;;  %v18145_v20 = vpack.i.bf16 %v18143_v19, %v18144_v57 }
 0x3b9   : > { %v14642_v17 = vpop.permute.xlu0 %9101  ;;  %v3637_v4 = vpop.f32.mrf.mxu3  ;;  %18142 = vst [vmem:[#allocation88_spill] sm:$0xff] %v14651_v9  ;;  %v8934_v57 = vunpack.i.h.bf16 %v14055_v7  ;;  %v9014_v19 = vunpack.i.h.bf16 %v14470_v36 }
 0x3ba   : > { %3750 = vst.msk [vmem:[#allocation2 + $0x1b8] sm:$0xff] %vm307_vm1, %v3734_v40  ;;  %v3671_v46 = vmul.f32 %v14167_v34, %v3637_v4  ;;  %v9325_v40 = vpack.i.bf16 %v14644_v23, %v14651_v9  ;;  %v3763_v4 = vld [vmem:[#allocation2 + $0x7] sm:$0xff] }
 0x3bb   : > { %v3859_v41 = vsel %vm307_vm1, %v3763_v4, %v8853_v2  ;;  %v9013_v2 = vunpack.i.l.bf16 %v14470_v36 }
 0x3bc   : > { %v3687_v29 = vadd.f32 %v14180_v44, %v3671_v46  ;;  %9336 = vrot.lane.b32.xlu2 %v9335_v61, %s10341_s15  ;;  %v3860_v61 = vsel %vm307_vm1, %v3764_v15, %v8854_v52  ;;  %v8933_v15 = vunpack.i.l.bf16 %v14055_v7 }
 0x3bd   : > { %v3956_v23 = vsel %vm512_vm2, %v3860_v61, %v8894_v54  ;;  %v18147_v61 = vld [vmem:[#allocation66_spill] sm:$0xff] }
 0x3be   : > { %9331 = vrot.lane.b32.xlu1 %v18145_v20, %s10341_s15  ;;  %v3703_v27 = vmax.f32 %v3687_v29, 0.0  ;;  %v14668_v46 = vpop.permute.xlu2 %9171  ;;  %v3955_v29 = vsel %vm512_vm2, %v3859_v41, %v8893_v30  ;;  %v4039_v4 = vsel %vm596_vm3, %v3956_v23, %v8934_v57  ;;  %v9345_v30 = vpack.i.bf16 %v14481_v18, %v14455_v26  ;;  %v18146_v20 = vld [vmem:[#allocation3_spill] sm:$0xff] }
 0x3bf   : > { %9326 = vrot.lane.b32.xlu0 %v9325_v40, %s10340_s14  ;;  %v14671_v9 = vpop.permute.xlu1 %9121  ;;  %v8973_v40 = vunpack.i.l.bf16 %v14357_v42  ;;  %v4038_v42 = vsel %vm596_vm3, %v3955_v29, %v8933_v15  ;;  %v9093_v18 = vunpack.i.l.bf16 %v14616_v56  ;;  %v18148_v41 = vpack.i.bf16 %v18146_v20, %v18147_v61 }
 0x3c0   : > { %v3735_v28 = vmul.f32 %v3719_v58, %v3703_v27  ;;  %v9350_v27 = vpack.i.bf16 %v14475_v3, %v14479_v16  ;;  %v4109_v58 = vsel %vm667_vm4, %v4039_v4, %v8974_v35  ;;  %v3720_v3 = vld [vmem:[%s17260_s7 + $0x1a8] sm:$0xff]  ;;  %v14701_v16 = vld [vmem:[#allocation2 + $0x119] sm:$0xff]  ;;  %v9094_v35 = vunpack.i.h.bf16 %v14616_v56  ;;  %v10235_v4 = vld [vmem:[#allocation2 + $0x111] sm:$0xff] }
 0x3c1   : > { %v14676_v25 = vpop.permute.xlu0 %9116  ;;  %v3639_v52 = vpop.f32.mrf.mxu3  ;;  %v4108_v36 = vsel %vm667_vm4, %v4038_v42, %v8973_v40  ;;  %v9054_v29 = vunpack.i.h.bf16 %v14443_v12  ;;  %v9053_v40 = vunpack.i.l.bf16 %v14443_v12  ;;  %v8858_v56 = vunpack.i.l.bf16 %v13816_v31 }
 0x3c2   : > { %3751 = vst.msk [vmem:[#allocation2 + $0x1c0] sm:$0xff] %vm307_vm1, %v3735_v28  ;;  %v3672_v54 = vmul.f32 %v14167_v34, %v3639_v52  ;;  %v4179_v28 = vsel %vm738_vm5, %v4109_v58, %v9014_v19  ;;  %v4178_v26 = vsel %vm738_vm5, %v4108_v36, %v9013_v2  ;;  %v10234_v52 = vld [vmem:[#allocation2 + $0x109] sm:$0xff]  ;;  %v8859_v2 = vunpack.i.h.bf16 %v13816_v31 }
 0x3c3   : > { %v9360_v15 = vpack.i.bf16 %v10234_v52, %v14472_v0  ;;  %v4248_v42 = vsel %vm809_vm6, %v4178_v26, %v9053_v40  ;;  %v4249_v58 = vsel %vm809_vm6, %v4179_v28, %v9054_v29  ;;  %v8939_v26 = vunpack.i.h.bf16 %v14270_v6 }
 0x3c4   : > { %v3688_v7 = vadd.f32 %v14180_v44, %v3672_v54  ;;  %9351 = vrot.lane.b32.xlu2 %v9350_v27, %s10341_s15  ;;  %v4318_v0 = vsel %vm880_vm8, %v4248_v42, %v9093_v18  ;;  %v4319_v52 = vsel %vm880_vm8, %v4249_v58, %v9094_v35  ;;  %v8938_v40 = vunpack.i.l.bf16 %v14270_v6  ;;  %v10236_v18 = vld [vmem:[#allocation2 + $0x1f] sm:$0xff] }
 0x3c5   : > { %v18150_v6 = vld [vmem:[#allocation31_spill] sm:$0xff] }
 0x3c6   : > { %9346 = vrot.lane.b32.xlu1 %v9345_v30, %s10341_s15  ;;  %v3704_v23 = vmax.f32 %v3688_v7, 0.0  ;;  %v14710_v57 = vpop.permute.xlu2 %9186  ;;  %v9365_v30 = vpack.i.bf16 %v14701_v16, %v10235_v4 }
 0x3c7   : > { %9341 = vrot.lane.b32.xlu0 %v18148_v41, %s10341_s15  ;;  %18149 = vst [vmem:[#allocation76_spill] sm:$0xff] %v14710_v57  ;;  %v8899_v41 = vunpack.i.h.bf16 %v14110_v48  ;;  %v5300_v57 = vld [vmem:[%s17257_s4 + $0x20] sm:$0xf] }
 0x3c8   : > { %v14714_v19 = vpop.permute.xlu1 %9136  ;;  %v3736_v54 = vmul.f32 %v3720_v3, %v3704_v23  ;;  %v3765_v3 = vld [vmem:[#allocation2 + $0x17] sm:$0xff]  ;;  %v8898_v23 = vunpack.i.l.bf16 %v14110_v48 }
 0x3c9   : > { %v9132_v27 = vpop.permute.xlu0 %9131  ;;  %v3642_v36 = vpop.f32.mrf.mxu3  ;;  %v3721_v48 = vld [vmem:[%s17260_s7 + $0x1b0] sm:$0xff]  ;;  %v3861_v4 = vsel %vm307_vm1, %v3765_v3, %v8858_v56  ;;  %v9019_v56 = vunpack.i.h.bf16 %v14468_v49  ;;  %v8979_v3 = vunpack.i.h.bf16 %v14209_v63 }
 0x3ca   : > { %v9134_v7 = vunpack.i.h.bf16 %v9132_v27  ;;  %v9133_v12 = vunpack.i.l.bf16 %v9132_v27  ;;  %3752 = vst.msk [vmem:[#allocation2 + $0x1c8] sm:$0xff] %vm307_vm1, %v3736_v54  ;;  %v3673_v31 = vmul.f32 %v14167_v34, %v3642_v36  ;;  %v3862_v54 = vsel %vm307_vm1, %v10236_v18, %v8859_v2 }
 0x3cb   : > { %v3958_v42 = vsel %vm512_vm2, %v3862_v54, %v8899_v41  ;;  %v3957_v2 = vsel %vm512_vm2, %v3861_v4, %v8898_v23  ;;  %v9018_v41 = vunpack.i.l.bf16 %v14468_v49  ;;  %v9058_v23 = vunpack.i.l.bf16 %v14554_v37  ;;  %v14773_v54 = vld [vmem:[#allocation2 + $0x1c0] sm:$0xff] }
 0x3cc   : > { %v4388_v28 = vsel %vm951_vm7, %v4318_v0, %v9133_v12  ;;  %v4389_v29 = vsel %vm951_vm7, %v4319_v52, %v9134_v7  ;;  %v3689_v27 = vadd.f32 %v14180_v44, %v3673_v31  ;;  %9366 = vrot.lane.b32.xlu2 %v9365_v30, %s10341_s15  ;;  %v18151_v7 = vld [vmem:[#allocation32_spill] sm:$0xff]  ;;  %v4041_v36 = vsel %vm596_vm3, %v3958_v42, %v8939_v26 }
 0x3cd   : > { %v4404_v35 = vpack.c.bf16 %v4389_v29, %v4388_v28  ;;  %v18152_v12 = vpack.i.bf16 %v18150_v6, %v18151_v7  ;;  %v8978_v28 = vunpack.i.l.bf16 %v14209_v63  ;;  %v9059_v29 = vunpack.i.h.bf16 %v14554_v37  ;;  %18154 = vst [vmem:[#allocation3_spill] sm:$0xff] %v14773_v54 }
 0x3ce   : > { %9361 = vrot.lane.b32.xlu1 %v9360_v15, %s10341_s15  ;;  %v3705_v58 = vmax.f32 %v3689_v27, 0.0  ;;  %v14746_v30 = vpop.permute.xlu2 %9201  ;;  %v4040_v15 = vsel %vm596_vm3, %v3957_v2, %v8938_v40  ;;  %v9380_v49 = vpack.i.bf16 %v14530_v32, %v14528_v8  ;;  %v4111_v18 = vsel %vm667_vm4, %v4041_v36, %v8979_v3  ;;  %v10248_v8 = vld [vmem:[#allocation2 + $0x131] sm:$0xff] }
 0x3cf   : > { %9356 = vrot.lane.b32.xlu0 %v18152_v12, %s10341_s15  ;;  %7437 = vmatmul.msk.bf16.vlgmr.msrb.gmra.mxu0 %vm1012_vm9, %v4404_v35  ;;  %v4110_v35 = vsel %vm667_vm4, %v4040_v15, %v8978_v28  ;;  %v9375_v63 = vpack.i.bf16 %v14538_v59, %v14491_v33  ;;  %v9370_v37 = vpack.i.bf16 %v14497_v43, %v14495_v10  ;;  %v9139_v33 = vunpack.i.h.bf16 %v14714_v19  ;;  %v3722_v43 = vld [vmem:[%s17260_s7 + $0x1b8] sm:$0xff] }
 0x3d0   : > { %v14750_v0 = vpop.permute.xlu1 %9151  ;;  %v3737_v52 = vmul.f32 %v3721_v48, %v3705_v58  ;;  %v4181_v48 = vsel %vm738_vm5, %v4111_v18, %v9019_v56  ;;  %v4180_v4 = vsel %vm738_vm5, %v4110_v35, %v9018_v41  ;;  %v9138_v10 = vunpack.i.l.bf16 %v14714_v19  ;;  %v10238_v35 = vld [vmem:[#allocation2 + $0x2f] sm:$0xff] }
 0x3d1   : > { %v14755_v31 = vpop.permute.xlu0 %9146  ;;  %v3644_v26 = vpop.f32.mrf.mxu3  ;;  %v14761_v27 = vld [vmem:[#allocation2 + $0x1c8] sm:$0xff]  ;;  %v4251_v32 = vsel %vm809_vm6, %v4181_v48, %v9059_v29  ;;  %v4250_v59 = vsel %vm809_vm6, %v4180_v4, %v9058_v23  ;;  %v9099_v58 = vunpack.i.h.bf16 %v14513_v51  ;;  %v9098_v12 = vunpack.i.l.bf16 %v14513_v51 }
 0x3d2   : > { %18153 = vst [vmem:[#allocation77_spill] sm:$0xff] %v14761_v27  ;;  %v3674_v40 = vmul.f32 %v14167_v34, %v3644_v26  ;;  %v8864_v15 = vunpack.i.h.bf16 %v14016_v13  ;;  %v8863_v56 = vunpack.i.l.bf16 %v14016_v13  ;;  %v9395_v13 = vpack.i.bf16 %v14563_v62, %v14561_v14 }
 0x3d3   : > { %3753 = vst.msk [vmem:[#allocation2 + $0x1d0] sm:$0xff] %vm307_vm1, %v3737_v52  ;;  %v4320_v3 = vsel %vm880_vm8, %v4250_v59, %v9098_v12  ;;  %v4321_v28 = vsel %vm880_vm8, %v4251_v32, %v9099_v58  ;;  %v8944_v48 = vunpack.i.h.bf16 %v14265_v24  ;;  %v8943_v4 = vunpack.i.l.bf16 %v14265_v24 }
 0x3d4   : > { %v3690_v42 = vadd.f32 %v14180_v44, %v3674_v40  ;;  %9381 = vrot.lane.b32.xlu2 %v9380_v49, %s10342_s16  ;;  %v4390_v51 = vsel %vm951_vm7, %v4320_v3, %v9138_v10  ;;  %v4391_v23 = vsel %vm951_vm7, %v4321_v28, %v9139_v33  ;;  %v10237_v40 = vld [vmem:[#allocation2 + $0x27] sm:$0xff]  ;;  %v3864_v18 = vsel %vm307_vm1, %v10238_v35, %v8864_v15  ;;  %v14841_v15 = vld [vmem:[#allocation2 + $0x11f] sm:$0xff] }
 0x3d5   : > { %v3863_v49 = vsel %vm307_vm1, %v10237_v40, %v8863_v56  ;;  %v4405_v62 = vpack.c.bf16 %v4391_v23, %v4390_v51  ;;  %v8904_v14 = vunpack.i.h.bf16 %v13960_v45  ;;  %v8903_v32 = vunpack.i.l.bf16 %v13960_v45 }
 0x3d6   : > { %9376 = vrot.lane.b32.xlu1 %v9375_v63, %s10342_s16  ;;  %v3706_v2 = vmax.f32 %v3690_v42, 0.0  ;;  %v14792_v36 = vpop.permute.xlu2 %9216  ;;  %v9390_v63 = vpack.i.bf16 %v14568_v38, %v14517_v11  ;;  %v8984_v59 = vunpack.i.h.bf16 %v14411_v60  ;;  %v8983_v11 = vunpack.i.l.bf16 %v14411_v60 }
 0x3d7   : > { %9371 = vrot.lane.b32.xlu0 %v9370_v37, %s10342_s16  ;;  %v9385_v37 = vpack.i.bf16 %v14526_v55, %v14521_v39  ;;  %v3723_v39 = vld [vmem:[%s17260_s7 + $0x1c0] sm:$0xff]  ;;  %v3959_v38 = vsel %vm512_vm2, %v3863_v49, %v8903_v32  ;;  %v3960_v45 = vsel %vm512_vm2, %v3864_v18, %v8904_v14  ;;  %v9064_v3 = vunpack.i.h.bf16 %v14552_v50 }
 0x3d8   : > { %v14796_v19 = vpop.permute.xlu1 %9166  ;;  %v3738_v41 = vmul.f32 %v3722_v43, %v3706_v2  ;;  %v4043_v60 = vsel %vm596_vm3, %v3960_v45, %v8944_v48  ;;  %v4042_v10 = vsel %vm596_vm3, %v3959_v38, %v8943_v4  ;;  %v9024_v43 = vunpack.i.h.bf16 %v14353_v21  ;;  %v14839_v2 = vld [vmem:[#allocation2 + $0x12f] sm:$0xff]  ;;  %v14854_v49 = vld [vmem:[#allocation2 + $0x127] sm:$0xff] }
 0x3d9   : > { %v14798_v52 = vpop.permute.xlu0 %9161  ;;  %v3647_v29 = vpop.f32.mrf.mxu3  ;;  %v4113_v56 = vsel %vm667_vm4, %v4043_v60, %v8984_v59  ;;  %v9063_v28 = vunpack.i.l.bf16 %v14552_v50  ;;  %v9023_v23 = vunpack.i.l.bf16 %v14353_v21  ;;  %v9405_v35 = vpack.i.bf16 %v14839_v2, %v14854_v49 }
 0x3da   : > { %3754 = vst.msk [vmem:[#allocation2 + $0x1d8] sm:$0xff] %vm307_vm1, %v3738_v41  ;;  %v3675_v26 = vmul.f32 %v14167_v34, %v3647_v29  ;;  %v4112_v41 = vsel %vm667_vm4, %v4042_v10, %v8983_v11  ;;  %v9400_v50 = vpack.i.bf16 %v14841_v15, %v14556_v53  ;;  %v14860_v18 = vld [vmem:[#allocation2 + $0x1d0] sm:$0xff]  ;;  %v9144_v32 = vunpack.i.h.bf16 %v14614_v5 }
 0x3db   : > { %18157 = vst [vmem:[#allocation32_spill] sm:$0xff] %v14860_v18  ;;  %v4182_v21 = vsel %vm738_vm5, %v4112_v41, %v9023_v23  ;;  %v9143_v59 = vunpack.i.l.bf16 %v14614_v5  ;;  %v8869_v38 = vunpack.i.h.bf16 %v14010_v1  ;;  %v14899_v5 = vld [vmem:[%s17255_s2] ss:$0 sm:$0xff]  ;;  %v18161_v23 = vld [vmem:[#allocation14_spill] sm:$0xff]  ;;  %v9164_v54 = vunpack.i.h.bf16 %v14798_v52 }
 0x3dc   : > { %v3691_v42 = vadd.f32 %v14180_v44, %v3675_v26  ;;  %9396 = vrot.lane.b32.xlu2 %v9395_v13, %s10342_s16  ;;  %v9104_v26 = vunpack.i.h.bf16 %v14642_v17  ;;  %v9103_v13 = vunpack.i.l.bf16 %v14642_v17  ;;  %v4252_v4 = vsel %vm809_vm6, %v4182_v21, %v9063_v28  ;;  %v18164_v21 = vld [vmem:[#allocation25_spill] sm:$0xff] }
 0x3dd   : > { %v9163_v27 = vunpack.i.l.bf16 %v14798_v52 }
 0x3de   : > { %9391 = vrot.lane.b32.xlu1 %v9390_v63, %s10342_s16  ;;  %v3707_v24 = vmax.f32 %v3691_v42, 0.0  ;;  %v14828_v55 = vpop.permute.xlu2 %9231  ;;  %v4183_v63 = vsel %vm738_vm5, %v4113_v56, %v9024_v43  ;;  %v3724_v42 = vld [vmem:[%s17260_s7 + $0x1c8] sm:$0xff]  ;;  %v8909_v56 = vunpack.i.h.bf16 %v14156_v47 }
 0x3df   : > { %9386 = vrot.lane.b32.xlu0 %v9385_v37, %s10342_s16  ;;  %7438 = vmatmul.msk.bf16.gmra.mxu0 %vm1012_vm9, %v4405_v62  ;;  %v18158_v37 = vld [vmem:[#allocation81_spill] sm:$0xff]  ;;  %v4253_v53 = vsel %vm809_vm6, %v4183_v63, %v9064_v3  ;;  %v8908_v3 = vunpack.i.l.bf16 %v14156_v47  ;;  %v18165_v63 = vld [vmem:[#allocation8_spill] sm:$0xff] }
 0x3e0   : > { %v14832_v33 = vpop.permute.xlu1 %9181  ;;  %v3739_v58 = vmul.f32 %v3723_v39, %v3707_v24  ;;  %v4323_v14 = vsel %vm880_vm8, %v4253_v53, %v9104_v26  ;;  %v18162_v26 = vld [vmem:[#allocation33_spill] sm:$0xff] }
 0x3e1   : > { %18155 = vst [vmem:[#allocation66_spill] sm:$0xff] %v14832_v33  ;;  %v14837_v12 = vpop.permute.xlu0 %9176  ;;  %v3649_v29 = vpop.f32.mrf.mxu3  ;;  %v14847_v51 = vld [vmem:[#allocation2 + $0x1d8] sm:$0xff]  ;;  %v4393_v10 = vsel %vm951_vm7, %v4323_v14, %v9144_v32  ;;  %v3725_v47 = vld [vmem:[%s17260_s7 + $0x1d0] sm:$0xff]  ;;  %v18169_v14 = vld [vmem:[#allocation63_spill] sm:$0xff] }
 0x3e2   : > { %18156 = vst [vmem:[#allocation31_spill] sm:$0xff] %v14847_v51  ;;  %v3676_v40 = vmul.f32 %v14167_v34, %v3649_v29  ;;  %v18159_v34 = vpack.i.bf16 %v18158_v37, %v18131_v22  ;;  %v4322_v22 = vsel %vm880_vm8, %v4252_v4, %v9103_v13  ;;  %v18163_v13 = vpack.i.bf16 %v18161_v23, %v18162_v26  ;;  %v10242_v37 = vld [vmem:[#allocation2 + $0x37] sm:$0xff] }
 0x3e3   : > { %3755 = vst.msk [vmem:[#allocation2 + $0x1e0] sm:$0xff] %vm307_vm1, %v3739_v58  ;;  %v4392_v60 = vsel %vm951_vm7, %v4322_v22, %v9143_v59  ;;  %v8868_v58 = vunpack.i.l.bf16 %v14010_v1  ;;  %v14908_v1 = vld [vmem:[%s17256_s3] ss:$0 sm:$0xff]  ;;  %v18167_v53 = vld [vmem:[#allocation5_spill] sm:$0xff] }
 0x3e4   : > { %v3692_v17 = vadd.f32 %v14180_v44, %v3676_v40  ;;  %9411 = vrot.lane.b32.xlu2 %v18159_v34, %s10343_s17  ;;  %v4406_v40 = vpack.c.bf16 %v4393_v10, %v4392_v60  ;;  %v18168_v22 = vld [vmem:[#allocation17_spill] sm:$0xff]  ;;  %v8988_v60 = vunpack.i.l.bf16 %v18167_v53  ;;  %v18173_v10 = vld [vmem:[#allocation64_spill] sm:$0xff] }
 0x3e5   : > { %v3865_v34 = vsel %vm307_vm1, %v10242_v37, %v8868_v58  ;;  %v18170_v32 = vpack.i.bf16 %v18168_v22, %v18169_v14  ;;  %v9029_v58 = vunpack.i.h.bf16 %v18173_v10  ;;  %v18178_v14 = vld [vmem:[#allocation86_spill] sm:$0xff]  ;;  %v18215_v51 = vld [vmem:[#allocation9_spill] sm:$0xff] }
 0x3e6   : > { %9406 = vrot.lane.b32.xlu1 %v9405_v35, %s10342_s16  ;;  %v3708_v62 = vmax.f32 %v3692_v17, 0.0  ;;  %v14878_v44 = vpop.permute.xlu2 %9246  ;;  %v10241_v35 = vld [vmem:[#allocation2 + $0x3f] sm:$0xff]  ;;  %v18166_v17 = vpack.i.bf16 %v18164_v21, %v18165_v63 }
 0x3e7   : > { %9401 = vrot.lane.b32.xlu0 %v9400_v50, %s10342_s16  ;;  %v3866_v50 = vsel %vm307_vm1, %v10241_v35, %v8869_v38  ;;  %v10243_v63 = vld [vmem:[#allocation2 + $0x120] sm:$0xff] }
 0x3e8   : > { %v14884_v11 = vpop.permute.xlu1 %9196  ;;  %v3740_v39 = vmul.f32 %v3724_v42, %v3708_v62  ;;  %v3962_v4 = vsel %vm512_vm2, %v3866_v50, %v8909_v56  ;;  %v8989_v42 = vunpack.i.h.bf16 %v18167_v53  ;;  %v18177_v53 = vld [vmem:[#allocation88_spill] sm:$0xff] }
 0x3e9   : > { %v14886_v24 = vpop.permute.xlu0 %9191  ;;  %v3652_v45 = vpop.f32.mrf.mxu3 }
 0x3ea   : > { %v14891_v43 = vld [vmem:[#allocation2 + $0x1e0] sm:$0xff]  ;;  %3756 = vst.msk [vmem:[#allocation2 + $0x1e8] sm:$0xff] %vm307_vm1, %v3740_v39  ;;  %v3677_v41 = vmul.f32 %v14899_v5, %v3652_v45  ;;  %v3961_v45 = vsel %vm512_vm2, %v3865_v34, %v8908_v3 }
 0x3eb   : > { %18160 = vst [vmem:[#allocation81_spill] sm:$0xff] %v14891_v43  ;;  %v18172_v39 = vld [vmem:[#allocation55_spill] sm:$0xff]  ;;  %v9079_v43 = vunpack.i.h.bf16 %v18215_v51 }
 0x3ec   : > { %v3693_v29 = vadd.f32 %v14908_v1, %v3677_v41  ;;  %9426 = vrot.lane.b32.xlu2 %v18163_v13, %s10343_s17  ;;  %v8949_v38 = vunpack.i.h.bf16 %v18172_v39  ;;  %v8948_v41 = vunpack.i.l.bf16 %v18172_v39  ;;  %v9108_v39 = vunpack.i.l.bf16 %v18178_v14 }
 0x3ee   : > { %9421 = vrot.lane.b32.xlu1 %v18166_v17, %s10343_s17  ;;  %v3709_v62 = vmax.f32 %v3693_v29, 0.0  ;;  %v14931_v59 = vpop.permute.xlu2 %9261  ;;  %v9028_v29 = vunpack.i.l.bf16 %v18173_v10  ;;  %v4045_v13 = vsel %vm596_vm3, %v3962_v4, %v8949_v38  ;;  %v4044_v3 = vsel %vm596_vm3, %v3961_v45, %v8948_v41  ;;  %v18175_v17 = vld [vmem:[#allocation87_spill] sm:$0xff]  ;;  %v18179_v45 = vld [vmem:[#allocation54_spill] sm:$0xff] }
 0x3ef   : > { %9416 = vrot.lane.b32.xlu0 %v18170_v32, %s10343_s17  ;;  %7439 = vmatmul.msk.bf16.gmra.mxu0 %vm1012_vm9, %v4406_v40  ;;  %18171 = vst [vmem:[#allocation14_spill] sm:$0xff] %v14931_v59  ;;  %v4115_v50 = vsel %vm667_vm4, %v4045_v13, %v8989_v42  ;;  %v14951_v37 = vpack.i.bf16 %v10243_v63, %v18175_v17  ;;  %v18176_v4 = vld [vmem:[#allocation75_spill] sm:$0xff]  ;;  %v9109_v32 = vunpack.i.h.bf16 %v18178_v14  ;;  %v9068_v10 = vunpack.i.l.bf16 %v18179_v45  ;;  %v18185_v14 = vld [vmem:[#allocation12_spill] sm:$0xff] }
 0x3f0   : > { %v14937_v56 = vpop.permute.xlu1 %9211  ;;  %v3741_v23 = vmul.f32 %v3725_v47, %v3709_v62  ;;  %v4114_v47 = vsel %vm667_vm4, %v4044_v3, %v8988_v60  ;;  %v4185_v34 = vsel %vm738_vm5, %v4115_v50, %v9029_v58  ;;  %v14957_v62 = vpack.i.bf16 %v18177_v53, %v18176_v4  ;;  %v18180_v13 = vld [vmem:[#allocation7_spill] sm:$0xff] }
 0x3f1   : > { %v14941_v26 = vpop.permute.xlu0 %9206  ;;  %v3654_v40 = vpop.f32.mrf.mxu3  ;;  %v14944_v35 = vld [vmem:[#allocation2 + $0x1e8] sm:$0xff]  ;;  %v4184_v42 = vsel %vm738_vm5, %v4114_v47, %v9028_v29  ;;  %v9069_v60 = vunpack.i.h.bf16 %v18179_v45  ;;  %v9149_v58 = vunpack.i.h.bf16 %v14755_v31  ;;  %v9148_v41 = vunpack.i.l.bf16 %v14755_v31  ;;  %v3726_v29 = vld [vmem:[%s17260_s7 + $0x1d8] sm:$0xff] }
 0x3f2   : > { %18174 = vst [vmem:[#allocation33_spill] sm:$0xff] %v14944_v35  ;;  %v3678_v21 = vmul.f32 %v14899_v5, %v3654_v40  ;;  %v18181_v40 = vld [vmem:[#allocation38_spill] sm:$0xff]  ;;  %v4254_v63 = vsel %vm809_vm6, %v4184_v42, %v9068_v10  ;;  %v18187_v42 = vld [vmem:[#allocation37_spill] sm:$0xff]  ;;  %v18188_v10 = vld [vmem:[#allocation47_spill] sm:$0xff] }
 0x3f3   : > { %3757 = vst.msk [vmem:[#allocation2 + $0x1f0] sm:$0xff] %vm307_vm1, %v3741_v23  ;;  %v18182_v3 = vpack.i.bf16 %v18180_v13, %v18181_v40  ;;  %v4255_v31 = vsel %vm809_vm6, %v4185_v34, %v9069_v60  ;;  %v4324_v4 = vsel %vm880_vm8, %v4254_v63, %v9108_v39  ;;  %v14991_v13 = vld [vmem:[#allocation2 + $0x130] sm:$0xff]  ;;  %v8873_v34 = vunpack.i.l.bf16 %v18185_v14 }
 0x3f4   : > { %v3694_v38 = vadd.f32 %v14908_v1, %v3678_v21  ;;  %9441 = vrot.lane.b32.xlu2 %v14951_v37, %s10343_s17  ;;  %v4325_v53 = vsel %vm880_vm8, %v4255_v31, %v9109_v32  ;;  %v4394_v40 = vsel %vm951_vm7, %v4324_v4, %v9148_v41  ;;  %v8914_v60 = vunpack.i.h.bf16 %v18187_v42  ;;  %v18189_v63 = vld [vmem:[#allocation41_spill] sm:$0xff]  ;;  %v10244_v4 = vld [vmem:[#allocation2 + $0x128] sm:$0xff] }
 0x3f5   : > { %v8913_v32 = vunpack.i.l.bf16 %v18187_v42  ;;  %v8953_v41 = vunpack.i.l.bf16 %v18188_v10  ;;  %v18190_v31 = vpack.i.bf16 %v18189_v63, %v18146_v20  ;;  %v3727_v42 = vld [vmem:[%s17260_s7 + $0x1e0] sm:$0xff] }
 0x3f6   : > { %9436 = vrot.lane.b32.xlu1 %v14957_v62, %s10343_s17  ;;  %v3710_v23 = vmax.f32 %v3694_v38, 0.0  ;;  %v14980_v50 = vpop.permute.xlu2 %9276  ;;  %v8874_v38 = vunpack.i.h.bf16 %v18185_v14  ;;  %v10245_v14 = vld [vmem:[#allocation2 + $0x4f] sm:$0xff] }
 0x3f7   : > { %9431 = vrot.lane.b32.xlu0 %v18182_v3, %s10343_s17  ;;  %v4395_v3 = vsel %vm951_vm7, %v4325_v53, %v9149_v58 }
 0x3f8   : > { %v14982_v21 = vpop.permute.xlu1 %9226  ;;  %v3742_v17 = vmul.f32 %v3726_v29, %v3710_v23  ;;  %v8954_v29 = vunpack.i.h.bf16 %v18188_v10  ;;  %v4407_v53 = vpack.c.bf16 %v4395_v3, %v4394_v40  ;;  %v10246_v23 = vld [vmem:[#allocation2 + $0x47] sm:$0xff] }
 0x3f9   : > { %18183 = vst [vmem:[#allocation25_spill] sm:$0xff] %v14982_v21  ;;  %v14986_v47 = vpop.permute.xlu0 %9221  ;;  %v3657_v45 = vpop.f32.mrf.mxu3  ;;  %v3867_v20 = vsel %vm307_vm1, %v10246_v23, %v8873_v34  ;;  %v10264_v21 = vld [vmem:[#allocation2 + $0x139] sm:$0xff] }
 0x3fa   : > { %18184 = vst [vmem:[#allocation8_spill] sm:$0xff] %v14986_v47  ;;  %v14995_v22 = vld [vmem:[#allocation2 + $0x1f0] sm:$0xff]  ;;  %v3679_v39 = vmul.f32 %v14899_v5, %v3657_v45  ;;  %v3868_v45 = vsel %vm307_vm1, %v10245_v14, %v8874_v38  ;;  %v3963_v40 = vsel %vm512_vm2, %v3867_v20, %v8913_v32  ;;  %v18193_v14 = vld [vmem:[#allocation40_spill] sm:$0xff] }
 0x3fb   : > { %18186 = vst [vmem:[#allocation5_spill] sm:$0xff] %v14995_v22  ;;  %v3964_v63 = vsel %vm512_vm2, %v3868_v45, %v8914_v60  ;;  %v9034_v34 = vunpack.i.h.bf16 %v18193_v14  ;;  %v9033_v60 = vunpack.i.l.bf16 %v18193_v14  ;;  %v18194_v45 = vld [vmem:[#allocation35_spill] sm:$0xff]  ;;  %v15285_v47 = vld [vmem:[#allocation2 + $0x149] sm:$0xff] }
 0x3fc   : > { %3758 = vst.msk [vmem:[#allocation2 + $0x1f8] sm:$0xff] %vm307_vm1, %v3742_v17  ;;  %v3695_v58 = vadd.f32 %v14908_v1, %v3679_v39  ;;  %9456 = vrot.lane.b32.xlu2 %v18190_v31, %s10344_s18  ;;  %v15012_v17 = vpack.i.bf16 %v14991_v13, %v10244_v4  ;;  %v18191_v39 = vld [vmem:[#allocation65_spill] sm:$0xff]  ;;  %v4047_v3 = vsel %vm596_vm3, %v3964_v63, %v8954_v29 }
 0x3fd   : > { %v18192_v10 = vpack.i.bf16 %v18147_v61, %v18191_v39  ;;  %v4046_v61 = vsel %vm596_vm3, %v3963_v40, %v8953_v41  ;;  %v8994_v39 = vunpack.i.h.bf16 %v18194_v45  ;;  %18238 = vst [vmem:[#allocation41_spill] sm:$0xff] %v15285_v47 }
 0x3fe   : > { %v3711_v31 = vmax.f32 %v3695_v58, 0.0  ;;  %v15027_v38 = vpop.permute.xlu2 %9291 }
 0x3ff   : > { %9451 = vrot.lane.b32.xlu1 %v18192_v10, %s10344_s18  ;;  %9446 = vrot.lane.b32.xlu0 %v15012_v17, %s10343_s17  ;;  %v18195_v10 = vld [vmem:[#allocation23_spill] sm:$0xff] }
 0x400   : > { %7440 = vmatmul.msk.bf16.gmra.mxu0 %vm1012_vm9, %v4407_v53  ;;  %v15031_v4 = vpop.permute.xlu1 %9241  ;;  %v3743_v23 = vmul.f32 %v3727_v42, %v3711_v31  ;;  %v8993_v53 = vunpack.i.l.bf16 %v18194_v45  ;;  %v9074_v48 = vunpack.i.h.bf16 %v18195_v10  ;;  %v9073_v32 = vunpack.i.l.bf16 %v18195_v10  ;;  %v18197_v10 = vld [vmem:[#allocation27_spill] sm:$0xff]  ;;  %v10247_v31 = vld [vmem:[#allocation2 + $0x129] sm:$0xff] }
 0x401   : > { %v15036_v58 = vpop.permute.xlu0 %9236  ;;  %v3659_v29 = vpop.f32.mrf.mxu3  ;;  %v4117_v42 = vsel %vm667_vm4, %v4047_v3, %v8994_v39  ;;  %v18198_v28 = vpack.i.bf16 %v18197_v10, %v18150_v6  ;;  %v9154_v3 = vunpack.i.h.bf16 %v14750_v0  ;;  %v9153_v39 = vunpack.i.l.bf16 %v14750_v0 }
 0x402   : > { %3759 = vst.msk [vmem:[#allocation2 + $0x200] sm:$0xff] %vm307_vm1, %v3743_v23  ;;  %v3680_v41 = vmul.f32 %v14899_v5, %v3659_v29  ;;  %v4116_v63 = vsel %vm667_vm4, %v4046_v61, %v8993_v53  ;;  %v4187_v40 = vsel %vm738_vm5, %v4117_v42, %v9034_v34  ;;  %v3728_v34 = vld [vmem:[%s17260_s7 + $0x1e8] sm:$0xff]  ;;  %v18201_v29 = vld [vmem:[#allocation22_spill] sm:$0xff]  ;;  %v18206_v42 = vld [vmem:[#allocation29_spill] sm:$0xff]  ;;  %v15090_v35 = vpack.i.bf16 %v10248_v8, %v10247_v31 }
 0x403   : > { %v15042_v20 = vld [vmem:[#allocation2 + $0x1f8] sm:$0xff]  ;;  %v4186_v14 = vsel %vm738_vm5, %v4116_v63, %v9033_v60  ;;  %v4257_v23 = vsel %vm809_vm6, %v4187_v40, %v9074_v48  ;;  %v9114_v6 = vunpack.i.h.bf16 %v18201_v29  ;;  %v8879_v40 = vunpack.i.h.bf16 %v18206_v42 }
 0x404   : > { %18196 = vst [vmem:[#allocation17_spill] sm:$0xff] %v15042_v20  ;;  %v3696_v45 = vadd.f32 %v14908_v1, %v3680_v41  ;;  %9471 = vrot.lane.b32.xlu2 %v18198_v28, %s10344_s18  ;;  %v4256_v61 = vsel %vm809_vm6, %v4186_v14, %v9073_v32  ;;  %v18199_v60 = vld [vmem:[#allocation62_spill] sm:$0xff]  ;;  %v9113_v28 = vunpack.i.l.bf16 %v18201_v29  ;;  %v8878_v14 = vunpack.i.l.bf16 %v18206_v42  ;;  %v18213_v20 = vld [vmem:[#allocation52_spill] sm:$0xff] }
 0x405   : > { %v18200_v53 = vpack.i.bf16 %v18151_v7, %v18199_v60  ;;  %v18202_v32 = vld [vmem:[#allocation6_spill] sm:$0xff]  ;;  %v4327_v60 = vsel %vm880_vm8, %v4257_v23, %v9114_v6 }
 0x406   : > { %v3712_v48 = vmax.f32 %v3696_v45, 0.0  ;;  %v18203_v41 = vld [vmem:[#allocation70_spill] sm:$0xff]  ;;  %v15074_v0 = vpop.permute.xlu2 %9306  ;;  %v4326_v7 = vsel %vm880_vm8, %v4256_v61, %v9113_v28 }
 0x407   : > { %9466 = vrot.lane.b32.xlu1 %v18200_v53, %s10344_s18  ;;  %v18204_v63 = vpack.i.bf16 %v18202_v32, %v18203_v41  ;;  %18205 = vst [vmem:[#allocation63_spill] sm:$0xff] %v15074_v0  ;;  %v4396_v45 = vsel %vm951_vm7, %v4326_v7, %v9153_v39  ;;  %v4397_v32 = vsel %vm951_vm7, %v4327_v60, %v9154_v3  ;;  %v10249_v61 = vld [vmem:[#allocation2 + $0x57] sm:$0xff]  ;;  %v10251_v39 = vld [vmem:[#allocation2 + $0x121] sm:$0xff] }
 0x408   : > { %v15078_v10 = vpop.permute.xlu1 %9256  ;;  %v3744_v53 = vmul.f32 %v3728_v34, %v3712_v48  ;;  %v3869_v23 = vsel %vm307_vm1, %v10249_v61, %v8878_v14  ;;  %v10250_v34 = vld [vmem:[#allocation2 + $0x5f] sm:$0xff]  ;;  %v15095_v3 = vpack.i.bf16 %v10251_v39, %v14701_v16  ;;  %v4408_v31 = vpack.c.bf16 %v4397_v32, %v4396_v45  ;;  %v18210_v14 = vld [vmem:[#allocation45_spill] sm:$0xff] }
 0x409   : > { %9461 = vrot.lane.b32.xlu0 %v18204_v63, %s10344_s18  ;;  %18207 = vst [vmem:[#allocation55_spill] sm:$0xff] %v15078_v10  ;;  %v15082_v29 = vpop.permute.xlu0 %9251  ;;  %v3662_v41 = vpop.f32.mrf.mxu3  ;;  %v15086_v63 = vld [vmem:[#allocation2 + $0x200] sm:$0xff]  ;;  %v3870_v6 = vsel %vm307_vm1, %v10250_v34, %v8879_v40  ;;  %v18209_v48 = vld [vmem:[#allocation50_spill] sm:$0xff]  ;;  %v8918_v40 = vunpack.i.l.bf16 %v18210_v14  ;;  %v3729_v34 = vld [vmem:[%s17260_s7 + $0x1f0] sm:$0xff] }
 0x40a   : > { %18208 = vst [vmem:[#allocation64_spill] sm:$0xff] %v15086_v63  ;;  %v3681_v42 = vmul.f32 %v14899_v5, %v3662_v41  ;;  %v8959_v7 = vunpack.i.h.bf16 %v18209_v48  ;;  %v8958_v60 = vunpack.i.l.bf16 %v18209_v48  ;;  %v18211_v41 = vld [vmem:[#allocation34_spill] sm:$0xff]  ;;  %v18212_v39 = vld [vmem:[#allocation59_spill] sm:$0xff]  ;;  %v9039_v63 = vunpack.i.h.bf16 %v18213_v20 }
 0x40b   : > { %3760 = vst.msk [vmem:[#allocation2 + $0x208] sm:$0xff] %vm307_vm1, %v3744_v53  ;;  %v8919_v53 = vunpack.i.h.bf16 %v18210_v14  ;;  %v8999_v16 = vunpack.i.h.bf16 %v18211_v41  ;;  %v8998_v61 = vunpack.i.l.bf16 %v18211_v41  ;;  %v3965_v32 = vsel %vm512_vm2, %v3869_v23, %v8918_v40  ;;  %v18227_v0 = vld [vmem:[#allocation18_spill] sm:$0xff] }
 0x40c   : > { %v3697_v8 = vadd.f32 %v14908_v1, %v3681_v42  ;;  %9486 = vrot.lane.b32.xlu2 %v15090_v35, %s10344_s18  ;;  %v4048_v28 = vsel %vm596_vm3, %v3965_v32, %v8958_v60  ;;  %v9078_v23 = vunpack.i.l.bf16 %v18215_v51  ;;  %v9118_v60 = vunpack.i.l.bf16 %v14676_v25  ;;  %v15387_v10 = vld [vmem:[#allocation2 + $0x198] sm:$0xff] }
 0x40d   : > { %v3966_v48 = vsel %vm512_vm2, %v3870_v6, %v8919_v53  ;;  %v9038_v53 = vunpack.i.l.bf16 %v18213_v20 }
 0x40e   : > { %v3713_v42 = vmax.f32 %v3697_v8, 0.0  ;;  %v15116_v45 = vpop.permute.xlu2 %9321  ;;  %v4049_v41 = vsel %vm596_vm3, %v3966_v48, %v8959_v7  ;;  %v9119_v7 = vunpack.i.h.bf16 %v14676_v25  ;;  %v3730_v25 = vld [vmem:[%s17260_s7 + $0x1f8] sm:$0xff] }
 0x40f   : > { %9481 = vrot.lane.b32.xlu1 %v15095_v3, %s10344_s18  ;;  %v4119_v18 = vsel %vm667_vm4, %v4049_v41, %v8999_v16 }
 0x410   : > { %7441 = vmatmul.msk.bf16.gmra.mxu0 %vm1012_vm9, %v4408_v31  ;;  %v15120_v14 = vpop.permute.xlu1 %9271  ;;  %v3745_v8 = vmul.f32 %v3729_v34, %v3713_v42  ;;  %v4118_v31 = vsel %vm667_vm4, %v4048_v28, %v8998_v61  ;;  %v4189_v16 = vsel %vm738_vm5, %v4119_v18, %v9039_v63 }
 0x411   : > { %9476 = vrot.lane.b32.xlu0 %v18212_v39, %s10344_s18  ;;  %v15125_v22 = vpop.permute.xlu0 %9266  ;;  %v3664_v6 = vpop.f32.mrf.mxu3  ;;  %v4188_v34 = vsel %vm738_vm5, %v4118_v31, %v9038_v53  ;;  %v4259_v20 = vsel %vm809_vm6, %v4189_v16, %v9079_v43  ;;  %v15170_v16 = vld [vmem:[#allocation2 + $0x148] sm:$0xff] }
 0x412   : > { %18214 = vst [vmem:[#allocation87_spill] sm:$0xff] %v15125_v22  ;;  %v3682_v40 = vmul.f32 %v14899_v5, %v3664_v6  ;;  %v4258_v51 = vsel %vm809_vm6, %v4188_v34, %v9078_v23  ;;  %v4329_v18 = vsel %vm880_vm8, %v4259_v20, %v9119_v7  ;;  %v15165_v6 = vld [vmem:[#allocation2 + $0x160] sm:$0xff]  ;;  %v18219_v7 = vld [vmem:[#allocation24_spill] sm:$0xff]  ;;  %v10254_v34 = vld [vmem:[#allocation2 + $0x150] sm:$0xff]  ;;  %v8888_v22 = vunpack.i.l.bf16 %v18227_v0 }
 0x413   : > { %3761 = vst.msk [vmem:[#allocation2 + $0x210] sm:$0xff] %vm307_vm1, %v3745_v8  ;;  %v4328_v5 = vsel %vm880_vm8, %v4258_v51, %v9118_v60  ;;  %v18218_v8 = vld [vmem:[#allocation74_spill] sm:$0xff]  ;;  %v8924_v60 = vunpack.i.h.bf16 %v18219_v7  ;;  %v15174_v51 = vld [vmem:[#allocation2 + $0x140] sm:$0xff] }
 0x414   : > { %v3698_v28 = vadd.f32 %v14908_v1, %v3682_v40  ;;  %9501 = vrot.lane.b32.xlu2 %v15012_v17, %s10337_s11  ;;  %v18217_v17 = vld [vmem:[#allocation80_spill] sm:$0xff]  ;;  %v8884_v31 = vunpack.i.h.bf16 %v18218_v8  ;;  %v8883_v23 = vunpack.i.l.bf16 %v18218_v8  ;;  %v8923_v40 = vunpack.i.l.bf16 %v18219_v7  ;;  %v15176_v20 = vld [vmem:[#allocation2 + $0x138] sm:$0xff] }
 0x415   : > { %v9159_v61 = vunpack.i.h.bf16 %v18217_v17  ;;  %v9158_v43 = vunpack.i.l.bf16 %v18217_v17  ;;  %v10259_v17 = vld [vmem:[#allocation2 + $0x6f] sm:$0xff] }
 0x416   : > { %v3714_v63 = vmax.f32 %v3698_v28, 0.0  ;;  %v15152_v1 = vpop.permute.xlu2 %9336  ;;  %v9510_v28 = vpack.i.bf16 %v10254_v34, %v15170_v16  ;;  %v18223_v34 = vld [vmem:[#allocation42_spill] sm:$0xff] }
 0x417   : > { %9496 = vrot.lane.b32.xlu1 %v14951_v37, %s10337_s11  ;;  %18216 = vst [vmem:[#allocation75_spill] sm:$0xff] %v15152_v1  ;;  %v4398_v37 = vsel %vm951_vm7, %v4328_v5, %v9158_v43  ;;  %v4399_v41 = vsel %vm951_vm7, %v4329_v18, %v9159_v61  ;;  %v10258_v18 = vld [vmem:[#allocation2 + $0x67] sm:$0xff]  ;;  %v3872_v61 = vsel %vm307_vm1, %v10259_v17, %v8884_v31  ;;  %v4644_v1 = vld [vmem:[#allocation2 + $0x8f] sm:$0xff] }
 0x418   : > { %v15156_v42 = vpop.permute.xlu1 %9286  ;;  %v3746_v32 = vmul.f32 %v3730_v25, %v3714_v63  ;;  %v9505_v25 = vpack.i.bf16 %v15174_v51, %v15176_v20  ;;  %v4409_v5 = vpack.c.bf16 %v4399_v41, %v4398_v37  ;;  %v3871_v63 = vsel %vm307_vm1, %v10258_v18, %v8883_v23  ;;  %v18222_v23 = vld [vmem:[#allocation30_spill] sm:$0xff]  ;;  %v15203_v17 = vld [vmem:[#allocation2 + $0x180] sm:$0xff] }
 0x419   : > { %9491 = vrot.lane.b32.xlu0 %v14957_v62, %s10337_s11  ;;  %v15158_v48 = vpop.permute.xlu0 %9281  ;;  %v10252_v62 = vld [vmem:[#allocation2 + $0x158] sm:$0xff]  ;;  %v3967_v8 = vsel %vm512_vm2, %v3871_v63, %v8923_v40  ;;  %v8964_v7 = vunpack.i.h.bf16 %v18222_v23  ;;  %v8963_v31 = vunpack.i.l.bf16 %v18222_v23  ;;  %18225 = vst [vmem:[#allocation54_spill] sm:$0xff] %v15203_v17  ;;  %v15209_v23 = vld [vmem:[#allocation2 + $0x170] sm:$0xff] }
 0x41a   : > { %3762 = vst.msk [vmem:[#allocation2 + $0x218] sm:$0xff] %vm307_vm1, %v3746_v32  ;;  %v9515_v53 = vpack.i.bf16 %v15165_v6, %v10252_v62  ;;  %v3968_v32 = vsel %vm512_vm2, %v3872_v61, %v8924_v60  ;;  %v18220_v62 = vld [vmem:[#allocation53_spill] sm:$0xff]  ;;  %v15205_v61 = vld [vmem:[#allocation2 + $0x178] sm:$0xff] }
 0x41b   : > { %v9004_v37 = vunpack.i.h.bf16 %v18220_v62  ;;  %v9003_v41 = vunpack.i.l.bf16 %v18220_v62  ;;  %v4050_v60 = vsel %vm596_vm3, %v3967_v8, %v8963_v31  ;;  %v4051_v40 = vsel %vm596_vm3, %v3968_v32, %v8964_v7  ;;  %v18226_v31 = vld [vmem:[#allocation61_spill] sm:$0xff] }
 0x41c   : > { %9516 = vrot.lane.b32.xlu2 %v9515_v53, %s10337_s11  ;;  %v9525_v62 = vpack.i.bf16 %v15203_v17, %v15205_v61  ;;  %v9123_v7 = vunpack.i.l.bf16 %v14671_v9 }
 0x41d   : > { %v4121_v18 = vsel %vm667_vm4, %v4051_v40, %v9004_v37  ;;  %v4120_v63 = vsel %vm667_vm4, %v4050_v60, %v9003_v41  ;;  %v9124_v41 = vunpack.i.h.bf16 %v14671_v9  ;;  %v9084_v60 = vunpack.i.h.bf16 %v18226_v31 }
 0x41e   : > { %v15185_v43 = vpop.permute.xlu2 %9351  ;;  %v9083_v40 = vunpack.i.l.bf16 %v18226_v31 }
 0x41f   : > { %9511 = vrot.lane.b32.xlu1 %v9510_v28, %s10337_s11  ;;  %v9044_v28 = vunpack.i.h.bf16 %v18223_v34 }
 0x420   : > { %7442 = vmatmul.msk.bf16.gmra.mxu0 %vm1012_vm9, %v4409_v5  ;;  %v15191_v53 = vpop.permute.xlu1 %9301 }
 0x421   : > { %9506 = vrot.lane.b32.xlu0 %v9505_v25, %s10337_s11  ;;  %18221 = vst [vmem:[#allocation88_spill] sm:$0xff] %v15191_v53  ;;  %v9043_v25 = vunpack.i.l.bf16 %v18223_v34  ;;  %v15197_v5 = vpop.permute.xlu0 %9296  ;;  %v15211_v34 = vld [vmem:[#allocation2 + $0x168] sm:$0xff]  ;;  %v4191_v32 = vsel %vm738_vm5, %v4121_v18, %v9044_v28 }
 0x422   : > { %18224 = vst [vmem:[#allocation86_spill] sm:$0xff] %v15197_v5  ;;  %v9520_v8 = vpack.i.bf16 %v15209_v23, %v15211_v34  ;;  %v4261_v9 = vsel %vm809_vm6, %v4191_v32, %v9084_v60  ;;  %v18229_v60 = vld [vmem:[#allocation68_spill] sm:$0xff]  ;;  %v15370_v5 = vld [vmem:[#allocation2 + $0x197] sm:$0xff] }
 0x423   : > { %v4190_v37 = vsel %vm738_vm5, %v4120_v63, %v9043_v25  ;;  %v4331_v63 = vsel %vm880_vm8, %v4261_v9, %v9124_v41  ;;  %v18230_v41 = vld [vmem:[#allocation57_spill] sm:$0xff]  ;;  %18252 = vst [vmem:[#allocation34_spill] sm:$0xff] %v15370_v5 }
 0x424   : > { %9531 = vrot.lane.b32.xlu2 %v18212_v39, %s10338_s12  ;;  %v4260_v25 = vsel %vm809_vm6, %v4190_v37, %v9083_v40  ;;  %v15241_v37 = vld [vmem:[#allocation2 + $0x141] sm:$0xff]  ;;  %v8929_v40 = vunpack.i.h.bf16 %v18229_v60  ;;  %v8968_v9 = vunpack.i.l.bf16 %v18230_v41 }
 0x425   : > { %v4330_v39 = vsel %vm880_vm8, %v4260_v25, %v9123_v7  ;;  %18228 = vst [vmem:[#allocation7_spill] sm:$0xff] %v15241_v37  ;;  %v9545_v32 = vpack.i.bf16 %v15241_v37, %v10264_v21  ;;  %v8928_v7 = vunpack.i.l.bf16 %v18229_v60  ;;  %v8969_v25 = vunpack.i.h.bf16 %v18230_v41 }
 0x426   : > { %v15227_v28 = vpop.permute.xlu2 %9366  ;;  %v4400_v52 = vsel %vm951_vm7, %v4330_v39, %v9163_v27  ;;  %v10267_v39 = vld [vmem:[#allocation2 + $0x7f] sm:$0xff] }
 0x427   : > { %9526 = vrot.lane.b32.xlu1 %v9525_v62, %s10337_s11  ;;  %v4401_v62 = vsel %vm951_vm7, %v4331_v63, %v9164_v54  ;;  %v10266_v54 = vld [vmem:[#allocation2 + $0x77] sm:$0xff] }
 0x428   : > { %v15231_v18 = vpop.permute.xlu1 %9316  ;;  %v4410_v27 = vpack.c.bf16 %v4401_v62, %v4400_v52 }
 0x429   : > { %9521 = vrot.lane.b32.xlu0 %v9520_v8, %s10337_s11  ;;  %v15235_v31 = vpop.permute.xlu0 %9311  ;;  %v8889_v8 = vunpack.i.h.bf16 %v18227_v0  ;;  %v3873_v0 = vsel %vm307_vm1, %v10266_v54, %v8888_v22 }
 0x42a   : > { %v3969_v52 = vsel %vm512_vm2, %v3873_v0, %v8928_v7  ;;  %v10268_v0 = vld [vmem:[#allocation2 + $0x169] sm:$0xff] }
 0x42b   : > { %v3874_v21 = vsel %vm307_vm1, %v10267_v39, %v8889_v8  ;;  %v4052_v22 = vsel %vm596_vm3, %v3969_v52, %v8968_v9  ;;  %v10270_v52 = vld [vmem:[#allocation2 + $0x161] sm:$0xff] }
 0x42c   : > { %9546 = vrot.lane.b32.xlu2 %v9545_v32, %s10338_s12  ;;  %v3970_v60 = vsel %vm512_vm2, %v3874_v21, %v8929_v40  ;;  %v18232_v32 = vld [vmem:[#allocation82_spill] sm:$0xff] }
 0x42d   : > { %v9049_v41 = vunpack.i.h.bf16 %v18232_v32  ;;  %v9048_v8 = vunpack.i.l.bf16 %v18232_v32  ;;  %v15272_v21 = vld [vmem:[#allocation2 + $0x171] sm:$0xff]  ;;  %v15277_v32 = vld [vmem:[#allocation2 + $0x159] sm:$0xff] }
 0x42e   : > { %v15256_v63 = vpop.permute.xlu2 %9381  ;;  %18235 = vst [vmem:[#allocation12_spill] sm:$0xff] %v15272_v21  ;;  %v9555_v53 = vpack.i.bf16 %v10270_v52, %v15277_v32  ;;  %v15301_v52 = vld [vmem:[#allocation2 + $0x137] sm:$0xff] }
 0x42f   : > { %9541 = vrot.lane.b32.xlu1 %v15090_v35, %s10338_s12  ;;  %18231 = vst [vmem:[#allocation38_spill] sm:$0xff] %v15256_v63  ;;  %v4053_v35 = vsel %vm596_vm3, %v3970_v60, %v8969_v25  ;;  %v18234_v63 = vld [vmem:[#allocation78_spill] sm:$0xff]  ;;  %v9560_v25 = vpack.i.bf16 %v15272_v21, %v10268_v0  ;;  %v9168_v0 = vunpack.i.l.bf16 %v14796_v19  ;;  %v9179_v21 = vunpack.i.h.bf16 %v14837_v12 }
 0x430   : > { %7443 = vmatmul.msk.bf16.gmra.mxu0 %vm1012_vm9, %v4410_v27  ;;  %v15260_v62 = vpop.permute.xlu1 %9331  ;;  %v9089_v40 = vunpack.i.h.bf16 %v18234_v63  ;;  %v9088_v7 = vunpack.i.l.bf16 %v18234_v63  ;;  %18236 = vst [vmem:[#allocation37_spill] sm:$0xff] %v15277_v32  ;;  %v15283_v63 = vld [vmem:[#allocation2 + $0x151] sm:$0xff]  ;;  %v10282_v32 = vld [vmem:[#allocation2 + $0xc7] sm:$0xff] }
 0x431   : > { %9536 = vrot.lane.b32.xlu0 %v15095_v3, %s10338_s12  ;;  %v15266_v54 = vpop.permute.xlu0 %9326  ;;  %v18233_v3 = vld [vmem:[#allocation51_spill] sm:$0xff]  ;;  %18237 = vst [vmem:[#allocation47_spill] sm:$0xff] %v15283_v63 }
 0x432   : > { %v9009_v27 = vunpack.i.h.bf16 %v18233_v3  ;;  %v9008_v39 = vunpack.i.l.bf16 %v18233_v3  ;;  %18241 = vst [vmem:[#allocation40_spill] sm:$0xff] %v15301_v52 }
 0x434   : > { %v4122_v9 = vsel %vm667_vm4, %v4052_v22, %v9008_v39  ;;  %v4123_v60 = vsel %vm667_vm4, %v4053_v35, %v9009_v27  ;;  %9561 = vrot.lane.b32.xlu2 %v9560_v25, %s10338_s12  ;;  %v9550_v22 = vpack.i.bf16 %v15283_v63, %v15285_v47  ;;  %v9169_v39 = vunpack.i.h.bf16 %v14796_v19  ;;  %v15402_v47 = vld [vmem:[#allocation2 + $0x190] sm:$0xff] }
 0x435   : > { %v4192_v3 = vsel %vm738_vm5, %v4122_v9, %v9048_v8  ;;  %v4193_v59 = vsel %vm738_vm5, %v4123_v60, %v9049_v41  ;;  %v18239_v41 = vld [vmem:[#allocation46_spill] sm:$0xff]  ;;  %18255 = vst [vmem:[#allocation9_spill] sm:$0xff] %v15402_v47 }
 0x436   : > { %v4262_v35 = vsel %vm809_vm6, %v4192_v3, %v9088_v7  ;;  %v4263_v27 = vsel %vm809_vm6, %v4193_v59, %v9089_v40  ;;  %v9129_v8 = vunpack.i.h.bf16 %v18239_v41  ;;  %v9128_v25 = vunpack.i.l.bf16 %v18239_v41  ;;  %v15297_v9 = vpop.permute.xlu2 %9396  ;;  %v15314_v41 = vld [vmem:[#allocation2 + $0x181] sm:$0xff]  ;;  %v10285_v47 = vld [vmem:[#allocation2 + $0xf7] sm:$0xff] }
 0x437   : > { %9556 = vrot.lane.b32.xlu1 %v9555_v53, %s10338_s12  ;;  %v9575_v3 = vpack.i.bf16 %v15301_v52, %v14839_v2  ;;  %18243 = vst [vmem:[#allocation23_spill] sm:$0xff] %v15314_v41  ;;  %v15325_v2 = vld [vmem:[#allocation2 + $0x14f] sm:$0xff]  ;;  %v15364_v52 = vld [vmem:[#allocation2 + $0x17f] sm:$0xff] }
 0x438   : > { %v15299_v60 = vpop.permute.xlu1 %9346  ;;  %v4332_v59 = vsel %vm880_vm8, %v4262_v35, %v9128_v25  ;;  %v4333_v40 = vsel %vm880_vm8, %v4263_v27, %v9129_v8  ;;  %v15320_v8 = vld [vmem:[#allocation2 + $0x13f] sm:$0xff]  ;;  %18247 = vst [vmem:[#allocation6_spill] sm:$0xff] %v15325_v2  ;;  %v15335_v25 = vld [vmem:[#allocation2 + $0x167] sm:$0xff] }
 0x439   : > { %9551 = vrot.lane.b32.xlu0 %v9550_v22, %s10338_s12  ;;  %18240 = vst [vmem:[#allocation65_spill] sm:$0xff] %v15299_v60  ;;  %v15305_v7 = vpop.permute.xlu0 %9341  ;;  %v4402_v19 = vsel %vm951_vm7, %v4332_v59, %v9168_v0  ;;  %v4403_v53 = vsel %vm951_vm7, %v4333_v40, %v9169_v39  ;;  %v9570_v22 = vpack.i.bf16 %v14854_v49, %v14841_v15  ;;  %v15316_v60 = vld [vmem:[#allocation2 + $0x179] sm:$0xff]  ;;  %v15322_v0 = vld [vmem:[#allocation2 + $0x147] sm:$0xff] }
 0x43a   : > { %18242 = vst [vmem:[#allocation35_spill] sm:$0xff] %v15305_v7  ;;  %v9565_v35 = vpack.i.bf16 %v15314_v41, %v15316_v60  ;;  %v4411_v27 = vpack.c.bf16 %v4403_v53, %v4402_v19  ;;  %v15327_v39 = vld [vmem:[#allocation2 + $0x157] sm:$0xff]  ;;  %v15333_v49 = vld [vmem:[#allocation2 + $0x15f] sm:$0xff]  ;;  %v9580_v40 = vpack.i.bf16 %v15322_v0, %v15320_v8  ;;  %v15341_v19 = vld [vmem:[#allocation2 + $0x16f] sm:$0xff]  ;;  %v9174_v7 = vunpack.i.h.bf16 %v14668_v46 }
 0x43b   : > { %18244 = vst [vmem:[#allocation27_spill] sm:$0xff] %v15316_v60  ;;  %v15343_v53 = vld [vmem:[#allocation2 + $0x177] sm:$0xff]  ;;  %v9178_v41 = vunpack.i.l.bf16 %v14837_v12 }
 0x43c   : > { %9576 = vrot.lane.b32.xlu2 %v9575_v3, %s10339_s13  ;;  %18245 = vst [vmem:[#allocation62_spill] sm:$0xff] %v15320_v8  ;;  %v5318_v8 = vunpack.c.l.b16 %v5300_v57  ;;  %v15380_v57 = vld [vmem:[#allocation2 + $0x189] sm:$0xff]  ;;  %v9203_v3 = vunpack.i.l.bf16 %v14746_v30  ;;  %v7543_v12 = vld [vmem:[%s17257_s4 + $0x18] sm:$0xff] }
 0x43d   : > { %18246 = vst [vmem:[#allocation22_spill] sm:$0xff] %v15322_v0  ;;  %v15391_v0 = vld [vmem:[#allocation2 + $0x187] sm:$0xff] }
 0x43e   : > { %18248 = vst [vmem:[#allocation70_spill] sm:$0xff] %v15327_v39  ;;  %v15331_v15 = vpop.permute.xlu2 %9411  ;;  %v5323_v33 = vpack.c.b16 %v5318_v8, %v5318_v8  ;;  %v10277_v8 = vld [vmem:[#allocation2 + $0x18f] sm:$0xff] }
 0x43f   : > { %9571 = vrot.lane.b32.xlu1 %v9570_v22, %s10339_s13  ;;  %18249 = vst [vmem:[#allocation29_spill] sm:$0xff] %v15331_v15  ;;  %v9590_v22 = vpack.i.bf16 %v15335_v25, %v15333_v49  ;;  %v4643_v15 = vld [vmem:[#allocation2 + $0x87] sm:$0xff] }
 0x440   : > { %7444 = vmatmul.msk.bf16.gmra.mxu0 %vm1012_vm9, %v4411_v27  ;;  %18250 = vst [vmem:[#allocation50_spill] sm:$0xff] %v15333_v49  ;;  %v15337_v59 = vpop.permute.xlu1 %9361  ;;  %v9585_v27 = vpack.i.bf16 %v15327_v39, %v15325_v2  ;;  %v15378_v2 = vld [vmem:[#allocation2 + $0x188] sm:$0xff]  ;;  %v9173_v39 = vunpack.i.l.bf16 %v14668_v46  ;;  %v9204_v49 = vunpack.i.h.bf16 %v14746_v30  ;;  %v5353_v30 = vsel %vm1037_vm0, %v5323_v33, 0 }
 0x441   : > { %9566 = vrot.lane.b32.xlu0 %v9565_v35, %s10338_s12  ;;  %18251 = vst [vmem:[#allocation45_spill] sm:$0xff] %v15335_v25  ;;  %v15349_v35 = vpop.permute.xlu0 %9356  ;;  %v9605_v25 = vpack.i.bf16 %v15370_v5, %v10277_v8  ;;  %v9194_v46 = vunpack.i.h.bf16 %v14886_v24  ;;  %5358 = vmatpush.bf16.msrb.mxu1 %v5353_v30  ;;  %v10278_v5 = vld [vmem:[#allocation2 + $0xef] sm:$0xff]  ;;  %v9199_v30 = vunpack.i.h.bf16 %v14884_v11  ;;  %v9198_v33 = vunpack.i.l.bf16 %v14884_v11 }
 0x442   : > { %18253 = vst [vmem:[#allocation59_spill] sm:$0xff] %v15378_v2  ;;  %v4739_v37 = vsel %vm307_vm1, %v4643_v15, %v9173_v39  ;;  %v15419_v60 = vsel %vm307_vm1, %v10278_v5, %v9204_v49  ;;  %v15435_v5 = vld [vmem:[%s17258_s5] ss:$0 sm:$0xff]  ;;  %v9234_v15 = vunpack.i.h.bf16 %v14828_v55  ;;  %v9233_v49 = vunpack.i.l.bf16 %v14828_v55 }
 0x443   : > { %18254 = vst [vmem:[#allocation52_spill] sm:$0xff] %v15380_v57  ;;  %v9209_v11 = vunpack.i.h.bf16 %v14941_v26  ;;  %v9213_v2 = vunpack.i.l.bf16 %v14937_v56  ;;  %v15453_v39 = vld [vmem:[%s17259_s6] ss:$0 sm:$0xff] }
 0x444   : > { %9591 = vrot.lane.b32.xlu2 %v9590_v22, %s10339_s13  ;;  %v4740_v22 = vsel %vm307_vm1, %v4644_v1, %v9174_v7  ;;  %v9208_v1 = vunpack.i.l.bf16 %v14941_v26  ;;  %v9249_v26 = vunpack.i.h.bf16 %v14878_v44 }
 0x445   : > { %5359 = vmatpush.bf16.msrb.mxu1 %v7543_v12 }
 0x446   : > { %v15412_v8 = vpop.permute.xlu2 %9426  ;;  %v4753_v12 = vsel %vm307_vm1, %v10285_v47, %v9208_v1  ;;  %v4524_v47 = vld [vmem:[%s10405_s10 + $0x20] sm:$0xff]  ;;  %v4835_v1 = vsel %vm512_vm2, %v4739_v37, %v9213_v2  ;;  %v9243_v37 = vunpack.i.l.bf16 %v15031_v4 }
 0x447   : > { %9586 = vrot.lane.b32.xlu1 %v9585_v27, %s10339_s13  ;;  %v9193_v27 = vunpack.i.l.bf16 %v14886_v24  ;;  %18256 = vst [vmem:[#allocation80_spill] sm:$0xff] %v15412_v8  ;;  %v10279_v24 = vld [vmem:[#allocation2 + $0xe7] sm:$0xff] }
 0x448   : > { %v15422_v57 = vpop.permute.xlu1 %9376 }
 0x449   : > { %9581 = vrot.lane.b32.xlu0 %v9580_v40, %s10339_s13  ;;  %18257 = vst [vmem:[#allocation74_spill] sm:$0xff] %v15422_v57  ;;  %v15425_v40 = vsel %vm307_vm1, %v10279_v24, %v9203_v3  ;;  %v15430_v7 = vpop.permute.xlu0 %9371  ;;  %v4645_v3 = vld [vmem:[#allocation2 + $0x97] sm:$0xff]  ;;  %v10280_v24 = vld [vmem:[#allocation2 + $0x9f] sm:$0xff]  ;;  %v10281_v57 = vld [vmem:[#allocation2 + $0xcf] sm:$0xff]  ;;  %v4747_v17 = vsel %vm307_vm1, %v10282_v32, %v9193_v27 }
 0x44a   : > { %v15445_v8 = vsel %vm307_vm1, %v10280_v24, %v9179_v21  ;;  %v4748_v63 = vsel %vm307_vm1, %v10281_v57, %v9194_v46  ;;  %v15456_v55 = vsel %vm307_vm1, %v4645_v3, %v9178_v41  ;;  %v9248_v21 = vunpack.i.l.bf16 %v14878_v44  ;;  %v10283_v32 = vld [vmem:[#allocation2 + $0xdf] sm:$0xff]  ;;  %v10284_v24 = vld [vmem:[#allocation2 + $0xd7] sm:$0xff] }
 0x44b   : > { %18258 = vst [vmem:[#allocation24_spill] sm:$0xff] %v15445_v8  ;;  %v9214_v57 = vunpack.i.h.bf16 %v14937_v56  ;;  %v4750_v27 = vsel %vm307_vm1, %v10283_v32, %v9199_v30  ;;  %v4749_v8 = vsel %vm307_vm1, %v10284_v24, %v9198_v33  ;;  %v7542_v44 = vld [vmem:[%s17257_s4 + $0x10] sm:$0xff]  ;;  %v10286_v56 = vld [vmem:[#allocation2 + $0xff] sm:$0xff]  ;;  %v15472_v30 = vsel %vm512_vm2, %v4747_v17, %v9233_v49 }
 0x44c   : > { %18259 = vst [vmem:[#allocation53_spill] sm:$0xff] %v15456_v55  ;;  %v4484_v46 = vpop.f32.mrf.mxu0  ;;  %9606 = vrot.lane.b32.xlu2 %v9605_v25, %s10339_s13  ;;  %v4754_v3 = vsel %vm307_vm1, %v10286_v56, %v9209_v11  ;;  %v9238_v55 = vunpack.i.l.bf16 %v15036_v58  ;;  %v15475_v33 = vsel %vm512_vm2, %v4748_v63, %v9234_v15  ;;  %v18260_v25 = vpack.i.bf16 %v15391_v0, %v15364_v52 }
 0x44d   : > { %v4543_v41 = vmul.f32 %v15435_v5, %v4484_v46  ;;  %v9239_v46 = vunpack.i.h.bf16 %v15036_v58  ;;  %v9253_v11 = vunpack.i.l.bf16 %v15082_v29  ;;  %v18261_v17 = vpack.i.bf16 %v15343_v53, %v15341_v19  ;;  %5360 = vmatpush.bf16.msrb.mxu1 %v7542_v44 }
 0x44e   : > { %v15490_v63 = vpop.permute.xlu2 %9441  ;;  %v4836_v0 = vsel %vm512_vm2, %v4740_v22, %v9214_v57  ;;  %v9244_v15 = vunpack.i.h.bf16 %v15031_v4  ;;  %v15496_v58 = vsel %vm512_vm2, %v4753_v12, %v9248_v21  ;;  %v9279_v49 = vunpack.i.h.bf16 %v14980_v50  ;;  %v7541_v4 = vld [vmem:[%s17257_s4 + $0x8] sm:$0xff] }
 0x44f   : > { %9601 = vrot.lane.b32.xlu1 %v18260_v25, %s10339_s13  ;;  %v4562_v32 = vadd.f32 %v15453_v39, %v4543_v41  ;;  %v9254_v24 = vunpack.i.h.bf16 %v15082_v29  ;;  %v15503_v41 = vsel %vm512_vm2, %v4754_v3, %v9249_v26  ;;  %v9278_v22 = vunpack.i.l.bf16 %v14980_v50 }
 0x450   : > { %v15498_v2 = vpop.permute.xlu1 %9391  ;;  %v9294_v21 = vunpack.i.h.bf16 %v15027_v38  ;;  %v4845_v57 = vsel %vm512_vm2, %v4749_v8, %v9238_v55  ;;  %v9283_v12 = vunpack.i.l.bf16 %v15158_v48  ;;  %v4846_v29 = vsel %vm512_vm2, %v4750_v27, %v9239_v46 }
 0x451   : > { %9596 = vrot.lane.b32.xlu0 %v18261_v17, %s10339_s13  ;;  %v4578_v44 = vadd.f32 %v4562_v32, %v4524_v47  ;;  %v15506_v56 = vpop.permute.xlu0 %9386  ;;  %v4918_v26 = vsel %vm596_vm3, %v4835_v1, %v9253_v11  ;;  %v9284_v3 = vunpack.i.h.bf16 %v15158_v48  ;;  %5361 = vmatpush.bf16.msrb.mxu1 %v7541_v4  ;;  %v4847_v25 = vsel %vm512_vm2, %v15425_v40, %v9243_v37 }
 0x452   : > { %v4848_v50 = vsel %vm512_vm2, %v15419_v60, %v9244_v15  ;;  %v9293_v32 = vunpack.i.l.bf16 %v15027_v38  ;;  %v4919_v48 = vsel %vm596_vm3, %v4836_v0, %v9254_v24  ;;  %v15530_v55 = vsel %vm596_vm3, %v4845_v57, %v9278_v22  ;;  %v7540_v60 = vld [vmem:[%s17257_s4] sm:$0xff]  ;;  %v4525_v0 = vld [vmem:[%s10405_s10 + $0x28] sm:$0xff] }
 0x453   : > { %v4594_v47 = vmax.f32 %v4578_v44, 0.0  ;;  %v18262_v38 = vpack.i.bf16 %v15170_v16, %v15174_v51  ;;  %v4930_v1 = vsel %vm596_vm3, %v4847_v25, %v9283_v12  ;;  %v15542_v46 = vsel %vm596_vm3, %v4846_v29, %v9279_v49  ;;  %v18264_v24 = vld [vmem:[#allocation56_spill] sm:$0xff] }
 0x454   : > { %v4486_v8 = vpop.f32.mrf.mxu0  ;;  %v15545_v11 = vsel %vm667_vm4, %v4918_v26, %v9293_v32  ;;  %v9363_v17 = vunpack.i.l.bf16 %v15337_v59  ;;  %v18263_v16 = vpack.i.bf16 %v15176_v20, %v14991_v13  ;;  %v9323_v51 = vunpack.i.l.bf16 %v15116_v45  ;;  %v18265_v44 = vld [vmem:[#allocation48_spill] sm:$0xff] }
 0x455   : > { %v4610_v40 = vpack.c.bf16 %v4594_v47, %v4594_v47  ;;  %v4544_v27 = vmul.f32 %v15435_v5, %v4486_v8  ;;  %9621 = vrot.lane.b32.xlu2 %v18262_v38, %s10340_s14  ;;  %v4931_v15 = vsel %vm596_vm3, %v4848_v50, %v9284_v3  ;;  %v9364_v37 = vunpack.i.h.bf16 %v15337_v59  ;;  %5362 = vmatpush.bf16.msrb.mxu1 %v7540_v60 }
 0x456   : > { %v18266_v4 = vpack.i.bf16 %v18264_v24, %v18265_v44  ;;  %v15563_v22 = vpop.permute.xlu2 %9456  ;;  %v9274_v13 = vunpack.i.h.bf16 %v15120_v14  ;;  %v9273_v20 = vunpack.i.l.bf16 %v15120_v14  ;;  %v9324_v57 = vunpack.i.h.bf16 %v15116_v45  ;;  %v4526_v24 = vld [vmem:[%s10405_s10 + $0x30] sm:$0xff] }
 0x457   : > { %9616 = vrot.lane.b32.xlu1 %v18263_v16, %s10340_s14  ;;  %4627 = vst.msk [vmem:[%s15526_s22] sm:$0xf] %vm4626_vm10, %v4610_v40  ;;  %v4563_v49 = vadd.f32 %v15453_v39, %v4544_v27  ;;  %v15569_v59 = vsel %vm667_vm4, %v4919_v48, %v9294_v21  ;;  %v9289_v29 = vunpack.i.h.bf16 %v15156_v42  ;;  %v9288_v26 = vunpack.i.l.bf16 %v15156_v42 }
 0x458   : > { %v15571_v12 = vpop.permute.xlu1 %9406  ;;  %v5000_v3 = vsel %vm667_vm4, %v4930_v1, %v9323_v51  ;;  %v5001_v50 = vsel %vm667_vm4, %v4931_v15, %v9324_v57  ;;  %v9444_v21 = vunpack.i.h.bf16 %v15490_v63  ;;  %v9443_v48 = vunpack.i.l.bf16 %v15490_v63 }
 0x459   : > { %9611 = vrot.lane.b32.xlu0 %v18266_v4, %s10340_s14  ;;  %v4579_v47 = vadd.f32 %v4563_v49, %v4525_v0  ;;  %v9402_v25 = vpop.permute.xlu0 %9401  ;;  %v5070_v32 = vsel %vm738_vm5, %v5000_v3, %v9363_v17  ;;  %v5071_v45 = vsel %vm738_vm5, %v5001_v50, %v9364_v37  ;;  %v9314_v42 = vunpack.i.h.bf16 %v15235_v31  ;;  %v18270_v4 = vld [vmem:[#allocation72_spill] sm:$0xff] }
 0x45a   : > { %v9404_v14 = vunpack.i.h.bf16 %v9402_v25  ;;  %v9403_v8 = vunpack.i.l.bf16 %v9402_v25  ;;  %v9313_v27 = vunpack.i.l.bf16 %v15235_v31  ;;  %v18267_v16 = vpack.i.bf16 %v15205_v61, %v15209_v23 }
 0x45b   : > { %v4595_v40 = vmax.f32 %v4579_v47, 0.0  ;;  %v4926_v31 = vsel %vm596_vm3, %v15472_v30, %v9273_v20  ;;  %v4927_v15 = vsel %vm596_vm3, %v15475_v33, %v9274_v13  ;;  %v9319_v37 = vunpack.i.h.bf16 %v15231_v18 }
 0x45c   : > { %v5140_v38 = vsel %vm809_vm6, %v5070_v32, %v9403_v8  ;;  %v5141_v60 = vsel %vm809_vm6, %v5071_v45, %v9404_v14  ;;  %v4489_v1 = vpop.f32.mrf.mxu0  ;;  %v9318_v49 = vunpack.i.l.bf16 %v15231_v18  ;;  %v18268_v61 = vpack.i.bf16 %v15211_v34, %v15165_v6  ;;  %v18269_v18 = vld [vmem:[#allocation36_spill] sm:$0xff] }
 0x45d   : > { %v4611_v17 = vpack.c.bf16 %v4595_v40, %v4595_v40  ;;  %v4545_v0 = vmul.f32 %v15435_v5, %v4489_v1  ;;  %9636 = vrot.lane.b32.xlu2 %v18267_v16, %s10340_s14  ;;  %v15591_v63 = vsel %vm880_vm8, %v5140_v38, %v9443_v48  ;;  %v15594_v51 = vsel %vm880_vm8, %v5141_v60, %v9444_v21  ;;  %v18272_v60 = vld [vmem:[#allocation16_spill] sm:$0xff]  ;;  %v18273_v1 = vld [vmem:[#allocation26_spill] sm:$0xff] }
 0x45e   : > { %v9218_v23 = vunpack.i.l.bf16 %v14792_v36  ;;  %v4932_v44 = vsel %vm596_vm3, %v15496_v58, %v9288_v26  ;;  %v4933_v30 = vsel %vm596_vm3, %v15503_v41, %v9289_v29  ;;  %v18271_v13 = vpack.i.bf16 %v18269_v18, %v18270_v4  ;;  %v15619_v20 = vpop.permute.xlu2 %9471 }
 0x45f   : > { %9631 = vrot.lane.b32.xlu1 %v18268_v61, %s10340_s14  ;;  %4628 = vst.msk [vmem:[%s15526_s22 + $0x4] sm:$0xf] %vm4626_vm10, %v4611_v17  ;;  %v4564_v33 = vadd.f32 %v15453_v39, %v4545_v0  ;;  %v9354_v6 = vunpack.i.h.bf16 %v15185_v43  ;;  %v4996_v34 = vsel %vm667_vm4, %v4926_v31, %v9313_v27  ;;  %v9333_v58 = vunpack.i.l.bf16 %v15260_v62 }
 0x460   : > { %v9358_v57 = vunpack.i.l.bf16 %v15349_v35  ;;  %v15625_v41 = vpop.permute.xlu1 %9421  ;;  %v9353_v29 = vunpack.i.l.bf16 %v15185_v43  ;;  %v4997_v26 = vsel %vm667_vm4, %v4927_v15, %v9314_v42  ;;  %v9359_v3 = vunpack.i.h.bf16 %v15349_v35  ;;  %v4527_v15 = vld [vmem:[%s10405_s10 + $0x38] sm:$0xff] }
 0x461   : > { %9626 = vrot.lane.b32.xlu0 %v18271_v13, %s10340_s14  ;;  %v4580_v47 = vadd.f32 %v4564_v33, %v4526_v24  ;;  %v15630_v25 = vpop.permute.xlu0 %9416  ;;  %v4998_v50 = vsel %vm667_vm4, %v15530_v55, %v9318_v49  ;;  %v4999_v32 = vsel %vm667_vm4, %v15542_v46, %v9319_v37  ;;  %v9369_v14 = vunpack.i.h.bf16 %v15227_v28  ;;  %v18275_v37 = vld [vmem:[#allocation9_spill] sm:$0xff]  ;;  %v18278_v13 = vld [vmem:[#allocation54_spill] sm:$0xff] }
 0x462   : > { %v9334_v8 = vunpack.i.h.bf16 %v15260_v62  ;;  %v9329_v45 = vunpack.i.h.bf16 %v15266_v54  ;;  %v9328_v43 = vunpack.i.l.bf16 %v15266_v54  ;;  %v5066_v21 = vsel %vm738_vm5, %v4996_v34, %v9353_v29 }
 0x463   : > { %v4596_v35 = vmax.f32 %v4580_v47, 0.0  ;;  %v5058_v48 = vsel %vm738_vm5, %v15545_v11, %v9333_v58  ;;  %v5068_v55 = vsel %vm738_vm5, %v4998_v50, %v9358_v57  ;;  %v9373_v40 = vunpack.i.l.bf16 %v15430_v7 }
 0x464   : > { %v5067_v46 = vsel %vm738_vm5, %v4997_v26, %v9354_v6  ;;  %v4491_v42 = vpop.f32.mrf.mxu0  ;;  %v5069_v62 = vsel %vm738_vm5, %v4999_v32, %v9359_v3  ;;  %v9393_v27 = vunpack.i.l.bf16 %v15498_v2  ;;  %v18274_v17 = vpack.i.bf16 %v18272_v60, %v18273_v1 }
 0x465   : > { %v4612_v54 = vpack.c.bf16 %v4596_v35, %v4596_v35  ;;  %v4546_v38 = vmul.f32 %v15435_v5, %v4491_v42  ;;  %v5059_v11 = vsel %vm738_vm5, %v15569_v59, %v9334_v8  ;;  %v9399_v0 = vunpack.i.h.bf16 %v15297_v9 }
 0x466   : > { %9651 = vrot.lane.b32.xlu2 %v18274_v17, %s10341_s15  ;;  %v9398_v16 = vunpack.i.l.bf16 %v15297_v9  ;;  %v9394_v31 = vunpack.i.h.bf16 %v15498_v2  ;;  %v18276_v49 = vpack.i.bf16 %v15387_v10, %v18275_v37  ;;  %v9368_v24 = vunpack.i.l.bf16 %v15227_v28  ;;  %v18277_v9 = vld [vmem:[#allocation59_spill] sm:$0xff]  ;;  %v15673_v6 = vpop.permute.xlu2 %9486 }
 0x467   : > { %v5002_v61 = vsel %vm667_vm4, %v4932_v44, %v9328_v43  ;;  %v5003_v33 = vsel %vm667_vm4, %v4933_v30, %v9329_v45  ;;  %4629 = vst.msk [vmem:[%s15526_s22 + $0x8] sm:$0xf] %vm4626_vm10, %v4612_v54  ;;  %v4565_v59 = vadd.f32 %v15453_v39, %v4546_v38  ;;  %v18279_v2 = vpack.i.bf16 %v18277_v9, %v18278_v13  ;;  %v18280_v54 = vld [vmem:[#allocation37_spill] sm:$0xff]  ;;  %v18281_v38 = vld [vmem:[#allocation47_spill] sm:$0xff] }
 0x468   : > { %9646 = vrot.lane.b32.xlu1 %v18276_v49, %s10340_s14  ;;  %v9374_v34 = vunpack.i.h.bf16 %v15430_v7  ;;  %v5128_v58 = vsel %vm809_vm6, %v5058_v48, %v9373_v40  ;;  %v9437_v57 = vpop.permute.xlu1 %9436  ;;  %v5138_v44 = vsel %vm809_vm6, %v5068_v55, %v9398_v16  ;;  %v5139_v30 = vsel %vm809_vm6, %v5069_v62, %v9399_v0  ;;  %v18284_v49 = vld [vmem:[#allocation41_spill] sm:$0xff] }
 0x469   : > { %9641 = vrot.lane.b32.xlu0 %v18279_v2, %s10340_s14  ;;  %v5136_v29 = vsel %vm809_vm6, %v5066_v21, %v9393_v27  ;;  %v4581_v26 = vadd.f32 %v4565_v59, %v4527_v15  ;;  %v9439_v3 = vunpack.i.h.bf16 %v9437_v57  ;;  %v9438_v47 = vunpack.i.l.bf16 %v9437_v57  ;;  %v9432_v50 = vpop.permute.xlu0 %9431  ;;  %v4528_v15 = vld [vmem:[%s10405_s10 + $0x40] sm:$0xff] }
 0x46a   : > { %v5137_v32 = vsel %vm809_vm6, %v5067_v46, %v9394_v31  ;;  %v9474_v8 = vunpack.i.h.bf16 %v15619_v20  ;;  %v9434_v45 = vunpack.i.h.bf16 %v9432_v50  ;;  %v9433_v43 = vunpack.i.l.bf16 %v9432_v50  ;;  %v18285_v59 = vld [vmem:[#allocation7_spill] sm:$0xff] }
 0x46b   : > { %v9473_v7 = vunpack.i.l.bf16 %v15619_v20  ;;  %v4597_v35 = vmax.f32 %v4581_v26, 0.0  ;;  %v15684_v48 = vsel %vm880_vm8, %v5138_v44, %v9438_v47  ;;  %v15687_v55 = vsel %vm880_vm8, %v5139_v30, %v9439_v3  ;;  %v18288_v30 = vld [vmem:[#allocation86_spill] sm:$0xff]  ;;  %v18290_v3 = vld [vmem:[#allocation83_spill] sm:$0xff] }
 0x46c   : > { %v5129_v21 = vsel %vm809_vm6, %v5059_v11, %v9374_v34  ;;  %v9408_v40 = vunpack.i.l.bf16 %v15571_v12  ;;  %v5206_v46 = vsel %vm880_vm8, %v5136_v29, %v9433_v43  ;;  %v5207_v42 = vsel %vm880_vm8, %v5137_v32, %v9434_v45  ;;  %v4494_v62 = vpop.f32.mrf.mxu0  ;;  %v18283_v11 = vld [vmem:[#allocation29_spill] sm:$0xff]  ;;  %v18287_v34 = vld [vmem:[#allocation55_spill] sm:$0xff] }
 0x46d   : > { %v4613_v27 = vpack.c.bf16 %v4597_v35, %v4597_v35  ;;  %v4547_v20 = vmul.f32 %v15435_v5, %v4494_v62  ;;  %v18282_v60 = vpack.i.bf16 %v18280_v54, %v18281_v38  ;;  %v15699_v1 = vsel %vm951_vm7, %v5206_v46, %v9473_v7 }
 0x46e   : > { %v15702_v17 = vsel %vm951_vm7, %v5207_v42, %v9474_v8  ;;  %v9414_v0 = vunpack.i.h.bf16 %v18283_v11  ;;  %v9413_v16 = vunpack.i.l.bf16 %v18283_v11  ;;  %v9409_v31 = vunpack.i.h.bf16 %v15571_v12  ;;  %v18289_v12 = vld [vmem:[#allocation49_spill] sm:$0xff]  ;;  %v15724_v50 = vpop.permute.xlu2 %9501 }
 0x46f   : > { %9666 = vrot.lane.b32.xlu2 %v18282_v60, %s10341_s15  ;;  %v18286_v13 = vpack.i.bf16 %v18284_v49, %v18285_v59  ;;  %v9259_v57 = vunpack.i.h.bf16 %v18287_v34  ;;  %v9258_v44 = vunpack.i.l.bf16 %v18287_v34  ;;  %v9299_v29 = vunpack.i.h.bf16 %v18288_v30  ;;  %4630 = vst.msk [vmem:[%s15526_s22 + $0xc] sm:$0xf] %vm4626_vm10, %v4613_v27  ;;  %v15748_v59 = vld [vmem:[#allocation2 + $0x191] sm:$0xff] }
 0x470   : > { %v4566_v26 = vadd.f32 %v15453_v39, %v4547_v20  ;;  %v18291_v47 = vpack.i.bf16 %v18289_v12, %v18290_v3  ;;  %v5072_v32 = vsel %vm738_vm5, %v5002_v61, %v9368_v24  ;;  %v5073_v8 = vsel %vm738_vm5, %v5003_v33, %v9369_v14  ;;  %v4529_v3 = vld [vmem:[%s10405_s10 + $0x48] sm:$0xff] }
 0x471   : > { %9661 = vrot.lane.b32.xlu1 %v18286_v13, %s10341_s15  ;;  %v9452_v45 = vpop.permute.xlu1 %9451  ;;  %v5198_v43 = vsel %vm880_vm8, %v5128_v58, %v9413_v16  ;;  %v5199_v7 = vsel %vm880_vm8, %v5129_v21, %v9414_v0  ;;  %v5142_v35 = vsel %vm809_vm6, %v5072_v32, %v9408_v40  ;;  %v9447_v27 = vpop.permute.xlu0 %9446  ;;  %v5143_v20 = vsel %vm809_vm6, %v5073_v8, %v9409_v31  ;;  %v15738_v21 = vld [vmem:[#allocation2 + $0x199] sm:$0xff]  ;;  %v18292_v31 = vld [vmem:[#allocation52_spill] sm:$0xff] }
 0x472   : > { %9656 = vrot.lane.b32.xlu0 %v18291_v47, %s10341_s15  ;;  %v4582_v46 = vadd.f32 %v4566_v26, %v4528_v15  ;;  %v9454_v42 = vunpack.i.h.bf16 %v9452_v45  ;;  %v9453_v62 = vunpack.i.l.bf16 %v9452_v45  ;;  %v9489_v54 = vunpack.i.h.bf16 %v15673_v6  ;;  %v18293_v15 = vld [vmem:[#allocation23_spill] sm:$0xff]  ;;  %v18298_v32 = vld [vmem:[#allocation12_spill] sm:$0xff] }
 0x473   : > { %v9449_v24 = vunpack.i.h.bf16 %v9447_v27  ;;  %v9448_v61 = vunpack.i.l.bf16 %v9447_v27  ;;  %v9488_v28 = vunpack.i.l.bf16 %v15673_v6  ;;  %v9298_v40 = vunpack.i.l.bf16 %v18288_v30  ;;  %v18296_v30 = vld [vmem:[#allocation53_spill] sm:$0xff]  ;;  %v18297_v47 = vld [vmem:[#allocation27_spill] sm:$0xff] }
 0x474   : > { %v4598_v14 = vmax.f32 %v4582_v46, 0.0  ;;  %v5268_v33 = vsel %vm951_vm7, %v5198_v43, %v9453_v62  ;;  %v5269_v58 = vsel %vm951_vm7, %v5199_v7, %v9454_v42  ;;  %v4496_v0 = vpop.f32.mrf.mxu0  ;;  %v18294_v49 = vpack.i.bf16 %v18292_v31, %v18293_v15  ;;  %v18302_v62 = vld [vmem:[#allocation71_spill] sm:$0xff] }
 0x475   : > { %v5284_v38 = vpack.c.bf16 %v5269_v58, %v5268_v33  ;;  %v5212_v60 = vsel %vm880_vm8, %v5142_v35, %v9448_v61  ;;  %v5213_v11 = vsel %vm880_vm8, %v5143_v20, %v9449_v24  ;;  %v4548_v6 = vmul.f32 %v15435_v5, %v4496_v0  ;;  %v18301_v35 = vld [vmem:[#allocation24_spill] sm:$0xff]  ;;  %v18303_v27 = vld [vmem:[#allocation43_spill] sm:$0xff]  ;;  %v18306_v33 = vld [vmem:[#allocation74_spill] sm:$0xff] }
 0x476   : > { %v4614_v16 = vpack.c.bf16 %v4598_v14, %v4598_v14  ;;  %v15751_v13 = vsel %vm951_vm7, %v5212_v60, %v9488_v28  ;;  %v15754_v34 = vsel %vm951_vm7, %v5213_v11, %v9489_v54  ;;  %v4837_v26 = vsel %vm512_vm2, %v18296_v30, %v9218_v23  ;;  %v15782_v54 = vpop.permute.xlu2 %9516  ;;  %v15784_v24 = vld [vmem:[#allocation2 + $0x19f] sm:$0xff]  ;;  %v15786_v61 = vld [vmem:[#allocation2 + $0x1af] sm:$0xff]  ;;  %v15799_v31 = vld [vmem:[#allocation2 + $0x1a7] sm:$0xff] }
 0x477   : > { %9681 = vrot.lane.b32.xlu2 %v18294_v49, %s10341_s15  ;;  %18295 = vst [vmem:[#allocation30_spill] sm:$0xff] %v15751_v13  ;;  %v18299_v8 = vpack.i.bf16 %v18297_v47, %v18298_v32  ;;  %7461 = vmatmul.msk.bf16.vlgmr.msrb.gmra.mxu1 %vm1012_vm9, %v5284_v38  ;;  %v9685_v45 = vpack.i.bf16 %v15738_v21, %v15748_v59  ;;  %v18300_v7 = vunpack.i.h.bf16 %v14792_v36  ;;  %v18305_v28 = vld [vmem:[#allocation75_spill] sm:$0xff]  ;;  %v9378_v58 = vunpack.i.l.bf16 %v18306_v33 }
 0x478   : > { %v4920_v23 = vsel %vm596_vm3, %v4837_v26, %v9258_v44  ;;  %4631 = vst.msk [vmem:[%s15526_s22 + $0x10] sm:$0xf] %vm4626_vm10, %v4614_v16  ;;  %v4567_v42 = vadd.f32 %v15453_v39, %v4548_v6  ;;  %v18304_v20 = vpack.i.bf16 %v18302_v62, %v18303_v27  ;;  %v9338_v14 = vunpack.i.l.bf16 %v18305_v28 }
 0x479   : > { %9676 = vrot.lane.b32.xlu1 %v18299_v8, %s10341_s15  ;;  %v4838_v46 = vsel %vm512_vm2, %v18301_v35, %v18300_v7  ;;  %v4990_v44 = vsel %vm667_vm4, %v4920_v23, %v9298_v40  ;;  %v15792_v38 = vpop.permute.xlu1 %9466  ;;  %v9379_v11 = vunpack.i.h.bf16 %v18306_v33  ;;  %v9418_v0 = vunpack.i.l.bf16 %v15630_v25  ;;  %v18307_v40 = vld [vmem:[#allocation34_spill] sm:$0xff]  ;;  %v18309_v8 = vld [vmem:[#allocation76_spill] sm:$0xff] }
 0x47a   : > { %9671 = vrot.lane.b32.xlu0 %v18304_v20, %s10341_s15  ;;  %v4921_v36 = vsel %vm596_vm3, %v4838_v46, %v9259_v57  ;;  %v4583_v16 = vadd.f32 %v4567_v42, %v4529_v3  ;;  %v9339_v57 = vunpack.i.h.bf16 %v18305_v28  ;;  %v9419_v15 = vunpack.i.h.bf16 %v15630_v25  ;;  %v18310_v35 = vld [vmem:[#allocation8_spill] sm:$0xff] }
 0x47b   : > { %v4991_v60 = vsel %vm667_vm4, %v4921_v36, %v9299_v29  ;;  %v15797_v6 = vpop.permute.xlu0 %9461  ;;  %v18308_v29 = vld [vmem:[#allocation66_spill] sm:$0xff]  ;;  %v5060_v3 = vsel %vm738_vm5, %v4990_v44, %v9338_v14  ;;  %v9189_v7 = vunpack.i.h.bf16 %v18309_v8  ;;  %v9224_v46 = vunpack.i.h.bf16 %v18310_v35 }
 0x47c   : > { %v9184_v26 = vunpack.i.h.bf16 %v18308_v29  ;;  %v9183_v47 = vunpack.i.l.bf16 %v18308_v29  ;;  %v4599_v32 = vmax.f32 %v4583_v16, 0.0  ;;  %v5061_v25 = vsel %vm738_vm5, %v4991_v60, %v9339_v57  ;;  %v18311_v14 = vld [vmem:[#allocation6_spill] sm:$0xff] }
 0x47d   : > { %v5130_v23 = vsel %vm809_vm6, %v5060_v3, %v9378_v58  ;;  %v4499_v42 = vpop.f32.mrf.mxu0  ;;  %v5131_v20 = vsel %vm809_vm6, %v5061_v25, %v9379_v11  ;;  %v18312_v44 = vld [vmem:[#allocation22_spill] sm:$0xff]  ;;  %v9188_v29 = vunpack.i.l.bf16 %v18309_v8  ;;  %v9223_v60 = vunpack.i.l.bf16 %v18310_v35  ;;  %v4530_v11 = vld [vmem:[%s10405_s10 + $0x50] sm:$0xff] }
 0x47e   : > { %v5200_v36 = vsel %vm880_vm8, %v5130_v23, %v9418_v0  ;;  %v4615_v28 = vpack.c.bf16 %v4599_v32, %v4599_v32  ;;  %v4549_v33 = vmul.f32 %v15435_v5, %v4499_v42  ;;  %v18313_v16 = vpack.i.bf16 %v18311_v14, %v18312_v44  ;;  %v18314_v3 = vld [vmem:[#allocation62_spill] sm:$0xff]  ;;  %v18315_v0 = vld [vmem:[#allocation40_spill] sm:$0xff] }
 0x47f   : > { %v9458_v58 = vunpack.i.l.bf16 %v15563_v22  ;;  %v5201_v57 = vsel %vm880_vm8, %v5131_v20, %v9419_v15  ;;  %v18316_v32 = vpack.i.bf16 %v18314_v3, %v18315_v0  ;;  %v10287_v25 = vld [vmem:[#allocation2 + $0xaf] sm:$0xff]  ;;  %v10288_v42 = vld [vmem:[#allocation2 + $0xa7] sm:$0xff]  ;;  %v9459_v8 = vunpack.i.h.bf16 %v15563_v22  ;;  %v15837_v15 = vpop.permute.xlu2 %9531  ;;  %v18317_v20 = vld [vmem:[#allocation14_spill] sm:$0xff] }
 0x480   : > { %9696 = vrot.lane.b32.xlu2 %v18313_v16, %s10342_s16  ;;  %v4744_v23 = vsel %vm307_vm1, %v10287_v25, %v9184_v26  ;;  %v4743_v14 = vsel %vm307_vm1, %v10288_v42, %v9183_v47  ;;  %4632 = vst.msk [vmem:[%s15526_s22 + $0x14] sm:$0xf] %vm4626_vm10, %v4615_v28  ;;  %v4568_v35 = vadd.f32 %v15453_v39, %v4549_v33  ;;  %v9264_v44 = vunpack.i.h.bf16 %v18317_v20 }
 0x481   : > { %9691 = vrot.lane.b32.xlu1 %v18316_v32, %s10342_s16  ;;  %v9263_v16 = vunpack.i.l.bf16 %v18317_v20  ;;  %v4840_v32 = vsel %vm512_vm2, %v4744_v23, %v9224_v46  ;;  %v9482_v26 = vpop.permute.xlu1 %9481  ;;  %v5270_v25 = vsel %vm951_vm7, %v5200_v36, %v9458_v58  ;;  %v5271_v28 = vsel %vm951_vm7, %v5201_v57, %v9459_v8  ;;  %v5516_v58 = vld [vmem:[#allocation2 + $0x107] sm:$0xff] }
 0x482   : > { %9686 = vrot.lane.b32.xlu0 %v9685_v45, %s10341_s15  ;;  %v4584_v47 = vadd.f32 %v4568_v35, %v4530_v11  ;;  %v9484_v42 = vunpack.i.h.bf16 %v9482_v26  ;;  %v9483_v22 = vunpack.i.l.bf16 %v9482_v26  ;;  %v4839_v33 = vsel %vm512_vm2, %v4743_v14, %v9223_v60  ;;  %v18318_v45 = vld [vmem:[#allocation88_spill] sm:$0xff]  ;;  %v18321_v26 = vld [vmem:[#allocation25_spill] sm:$0xff] }
 0x483   : > { %v9477_v43 = vpop.permute.xlu0 %9476  ;;  %v9304_v2 = vunpack.i.h.bf16 %v18318_v45  ;;  %v9303_v13 = vunpack.i.l.bf16 %v18318_v45  ;;  %v5285_v11 = vpack.c.bf16 %v5271_v28, %v5270_v25  ;;  %v9229_v25 = vunpack.i.h.bf16 %v18321_v26  ;;  %v18324_v45 = vld [vmem:[#allocation50_spill] sm:$0xff] }
 0x484   : > { %v9479_v49 = vunpack.i.h.bf16 %v9477_v43  ;;  %v9478_v30 = vunpack.i.l.bf16 %v9477_v43  ;;  %v4600_v20 = vmax.f32 %v4584_v47, 0.0  ;;  %v15849_v46 = vsel %vm951_vm7, %v15591_v63, %v9483_v22  ;;  %v18319_v63 = vld [vmem:[#allocation35_spill] sm:$0xff]  ;;  %v18322_v22 = vld [vmem:[#allocation45_spill] sm:$0xff] }
 0x485   : > { %v15853_v36 = vsel %vm951_vm7, %v15594_v51, %v9484_v42  ;;  %v4501_v57 = vpop.f32.mrf.mxu0  ;;  %v9343_v23 = vunpack.i.l.bf16 %v18319_v63  ;;  %v9344_v47 = vunpack.i.h.bf16 %v18319_v63  ;;  %v4531_v42 = vld [vmem:[%s10405_s10 + $0x58] sm:$0xff]  ;;  %v18323_v28 = vpack.i.bf16 %v15341_v19, %v18322_v22 }
 0x486   : > { %v15859_v60 = vsel %vm951_vm7, %v15684_v48, %v9478_v30  ;;  %v15863_v43 = vsel %vm951_vm7, %v15687_v55, %v9479_v49  ;;  %v4616_v14 = vpack.c.bf16 %v4600_v20, %v4600_v20  ;;  %v4550_v8 = vmul.f32 %v15435_v5, %v4501_v57  ;;  %v10289_v30 = vld [vmem:[#allocation2 + $0xbf] sm:$0xff]  ;;  %v10290_v49 = vld [vmem:[#allocation2 + $0xb7] sm:$0xff] }
 0x487   : > { %v5289_v51 = vpack.c.bf16 %v15863_v43, %v15859_v60  ;;  %v18320_v48 = vpack.i.bf16 %v15364_v52, %v15343_v53  ;;  %v4746_v55 = vsel %vm307_vm1, %v10289_v30, %v9189_v7  ;;  %v4745_v35 = vsel %vm307_vm1, %v10290_v49, %v9188_v29  ;;  %7462 = vmatmul.msk.bf16.gmra.mxu1 %vm1012_vm9, %v5285_v11  ;;  %v18325_v20 = vld [vmem:[#allocation70_spill] sm:$0xff]  ;;  %v15893_v63 = vpop.permute.xlu2 %9546 }
 0x488   : > { %v9228_v52 = vunpack.i.l.bf16 %v18321_v26  ;;  %v4922_v53 = vsel %vm596_vm3, %v4839_v33, %v9263_v16  ;;  %v4923_v7 = vsel %vm596_vm3, %v4840_v32, %v9264_v44  ;;  %4633 = vst.msk [vmem:[%s15526_s22 + $0x18] sm:$0xf] %vm4626_vm10, %v4616_v14  ;;  %v4569_v29 = vadd.f32 %v15453_v39, %v4550_v8  ;;  %v18328_v32 = vld [vmem:[#allocation38_spill] sm:$0xff] }
 0x489   : > { %9711 = vrot.lane.b32.xlu2 %v18320_v48, %s10342_s16  ;;  %9706 = vrot.lane.b32.xlu1 %v18323_v28, %s10342_s16  ;;  %v18326_v57 = vpack.i.bf16 %v18324_v45, %v18325_v20  ;;  %v18327_v48 = vld [vmem:[#allocation87_spill] sm:$0xff]  ;;  %v4992_v49 = vsel %vm667_vm4, %v4922_v53, %v9303_v13  ;;  %v4993_v16 = vsel %vm667_vm4, %v4923_v7, %v9304_v2  ;;  %v15899_v44 = vpop.permute.xlu1 %9496  ;;  %v9384_v33 = vunpack.i.h.bf16 %v18328_v32 }
 0x48a   : > { %v9269_v30 = vunpack.i.h.bf16 %v18327_v48  ;;  %v9268_v11 = vunpack.i.l.bf16 %v18327_v48  ;;  %v9383_v14 = vunpack.i.l.bf16 %v18328_v32  ;;  %v5062_v8 = vsel %vm738_vm5, %v4992_v49, %v9343_v23  ;;  %v5517_v32 = vld [vmem:[#allocation2 + $0x10f] sm:$0xff] }
 0x48b   : > { %9701 = vrot.lane.b32.xlu0 %v18326_v57, %s10342_s16  ;;  %v4585_v26 = vadd.f32 %v4569_v29, %v4531_v42  ;;  %v9492_v28 = vpop.permute.xlu0 %9491  ;;  %v5063_v45 = vsel %vm738_vm5, %v4993_v16, %v9344_v47  ;;  %v9424_v20 = vunpack.i.h.bf16 %v15625_v41  ;;  %v9423_v13 = vunpack.i.l.bf16 %v15625_v41 }
 0x48c   : > { %v9494_v57 = vunpack.i.h.bf16 %v9492_v28  ;;  %v9493_v48 = vunpack.i.l.bf16 %v9492_v28  ;;  %v9534_v2 = vunpack.i.h.bf16 %v15837_v15  ;;  %v9533_v53 = vunpack.i.l.bf16 %v15837_v15 }
 0x48d   : > { %v4601_v7 = vmax.f32 %v4585_v26, 0.0  ;;  %v9464_v23 = vunpack.i.h.bf16 %v15797_v6  ;;  %v9463_v42 = vunpack.i.l.bf16 %v15797_v6  ;;  %v4504_v49 = vpop.f32.mrf.mxu0  ;;  %v18329_v15 = vpack.i.bf16 %v15786_v61, %v15799_v31 }
 0x48e   : > { %v5613_v47 = vsel %vm307_vm1, %v5517_v32, %v9494_v57  ;;  %v5612_v29 = vsel %vm307_vm1, %v5516_v58, %v9493_v48  ;;  %v4551_v41 = vmul.f32 %v15435_v5, %v4504_v49  ;;  %v4841_v6 = vsel %vm512_vm2, %v4745_v35, %v9228_v52  ;;  %v4532_v58 = vld [vmem:[%s10405_s10 + $0x60] sm:$0xff]  ;;  %v18332_v35 = vld [vmem:[#allocation28_spill] sm:$0xff] }
 0x48f   : > { %v4617_v16 = vpack.c.bf16 %v4601_v7, %v4601_v7  ;;  %v15919_v26 = vsel %vm512_vm2, %v5612_v29, %v9533_v53  ;;  %v15922_v28 = vsel %vm512_vm2, %v5613_v47, %v9534_v2  ;;  %v4842_v57 = vsel %vm512_vm2, %v4746_v55, %v9229_v25  ;;  %v18331_v7 = vld [vmem:[#allocation63_spill] sm:$0xff]  ;;  %v15941_v25 = vpop.permute.xlu2 %9561 }
 0x490   : > { %v18330_v48 = vpack.i.bf16 %v15784_v24, %v18307_v40  ;;  %v9309_v32 = vunpack.i.h.bf16 %v18331_v7  ;;  %v5132_v49 = vsel %vm809_vm6, %v5062_v8, %v9383_v14  ;;  %v5133_v53 = vsel %vm809_vm6, %v5063_v45, %v9384_v33  ;;  %v18333_v52 = vld [vmem:[#allocation19_spill] sm:$0xff] }
 0x491   : > { %9726 = vrot.lane.b32.xlu2 %v18329_v15, %s10342_s16  ;;  %4634 = vst.msk [vmem:[%s15526_s22 + $0x1c] sm:$0xf] %vm4626_vm10, %v4617_v16  ;;  %v4570_v2 = vadd.f32 %v15453_v39, %v4551_v41  ;;  %v18334_v55 = vpack.i.bf16 %v18332_v35, %v18333_v52  ;;  %v9308_v40 = vunpack.i.l.bf16 %v18331_v7  ;;  %v4925_v47 = vsel %vm596_vm3, %v4842_v57, %v9269_v30  ;;  %v15947_v33 = vpop.permute.xlu1 %9511 }
 0x492   : > { %9721 = vrot.lane.b32.xlu1 %v18330_v48, %s10342_s16  ;;  %v5202_v29 = vsel %vm880_vm8, %v5132_v49, %v9423_v13  ;;  %v5203_v14 = vsel %vm880_vm8, %v5133_v53, %v9424_v20  ;;  %v4924_v8 = vsel %vm596_vm3, %v4841_v6, %v9268_v11  ;;  %v18335_v48 = vld [vmem:[#allocation65_spill] sm:$0xff]  ;;  %v9389_v13 = vunpack.i.h.bf16 %v15506_v56 }
 0x493   : > { %9716 = vrot.lane.b32.xlu0 %v18334_v55, %s10342_s16  ;;  %v4586_v45 = vadd.f32 %v4570_v2, %v4532_v58  ;;  %v9507_v16 = vpop.permute.xlu0 %9506  ;;  %v5272_v41 = vsel %vm951_vm7, %v5202_v29, %v9463_v42  ;;  %v5273_v15 = vsel %vm951_vm7, %v5203_v14, %v9464_v23  ;;  %v9349_v35 = vunpack.i.h.bf16 %v18335_v48  ;;  %v18336_v55 = vld [vmem:[#allocation69_spill] sm:$0xff] }
 0x494   : > { %v9348_v7 = vunpack.i.l.bf16 %v18335_v48  ;;  %v9509_v52 = vunpack.i.h.bf16 %v9507_v16  ;;  %v9508_v30 = vunpack.i.l.bf16 %v9507_v16  ;;  %v9549_v20 = vunpack.i.h.bf16 %v15893_v63  ;;  %v18341_v48 = vld [vmem:[#allocation84_spill] sm:$0xff] }
 0x495   : > { %v9548_v57 = vunpack.i.l.bf16 %v15893_v63  ;;  %v4602_v11 = vmax.f32 %v4586_v45, 0.0  ;;  %v9388_v6 = vunpack.i.l.bf16 %v15506_v56  ;;  %v4506_v58 = vpop.f32.mrf.mxu0  ;;  %v5286_v49 = vpack.c.bf16 %v5273_v15, %v5272_v41  ;;  %v18340_v15 = vld [vmem:[#allocation21_spill] sm:$0xff] }
 0x496   : > { %v5619_v23 = vsel %vm307_vm1, %v18314_v3, %v9509_v52  ;;  %v5618_v42 = vsel %vm307_vm1, %v18315_v0, %v9508_v30  ;;  %v4552_v2 = vmul.f32 %v15435_v5, %v4506_v58  ;;  %v18337_v29 = vpack.i.bf16 %v18336_v55, %v18269_v18  ;;  %v4533_v3 = vld [vmem:[%s10405_s10 + $0x68] sm:$0xff]  ;;  %v18338_v0 = vld [vmem:[#allocation39_spill] sm:$0xff] }
 0x497   : > { %v4618_v53 = vpack.c.bf16 %v4602_v11, %v4602_v11  ;;  %v15968_v63 = vsel %vm512_vm2, %v5618_v42, %v9548_v57  ;;  %v15971_v56 = vsel %vm512_vm2, %v5619_v23, %v9549_v20  ;;  %v18339_v14 = vpack.i.bf16 %v18270_v4, %v18338_v0  ;;  %7463 = vmatmul.msk.bf16.gmra.mxu1 %vm1012_vm9, %v5286_v49  ;;  %v15992_v4 = vpop.permute.xlu2 %9576 }
 0x498   : > { %v15981_v45 = vpack.i.bf16 %v18275_v37, %v18277_v9  ;;  %v4994_v18 = vsel %vm667_vm4, %v4924_v8, %v9308_v40  ;;  %v4995_v16 = vsel %vm667_vm4, %v4925_v47, %v9309_v32  ;;  %v4571_v41 = vadd.f32 %v15453_v39, %v4552_v2  ;;  %v18343_v9 = vld [vmem:[#allocation80_spill] sm:$0xff]  ;;  %v10291_v32 = vld [vmem:[#allocation2 + $0x1a0] sm:$0xff] }
 0x499   : > { %9741 = vrot.lane.b32.xlu2 %v18337_v29, %s10343_s17  ;;  %4635 = vst.msk [vmem:[%s15526_s22 + $0x20] sm:$0xf] %vm4626_vm10, %v4618_v53  ;;  %v18342_v52 = vpack.i.bf16 %v18340_v15, %v18341_v48  ;;  %v5064_v30 = vsel %vm738_vm5, %v4994_v18, %v9348_v7  ;;  %v5065_v37 = vsel %vm738_vm5, %v4995_v16, %v9349_v35  ;;  %v9429_v20 = vunpack.i.h.bf16 %v18343_v9  ;;  %v15997_v40 = vpop.permute.xlu1 %9526  ;;  %v16010_v29 = vld [vmem:[#allocation2 + $0x1b0] sm:$0xff]  ;;  %v10292_v48 = vld [vmem:[#allocation2 + $0x1a8] sm:$0xff] }
 0x49a   : > { %9736 = vrot.lane.b32.xlu1 %v18339_v14, %s10343_s17  ;;  %v16000_v47 = vpack.i.bf16 %v10291_v32, %v15387_v10  ;;  %v9428_v8 = vunpack.i.l.bf16 %v18343_v9  ;;  %v5134_v57 = vsel %vm809_vm6, %v5064_v30, %v9388_v6  ;;  %v5135_v11 = vsel %vm809_vm6, %v5065_v37, %v9389_v13  ;;  %v10293_v9 = vld [vmem:[#allocation2 + $0x12f] sm:$0xff] }
 0x49b   : > { %9731 = vrot.lane.b32.xlu0 %v18342_v52, %s10343_s17  ;;  %v4587_v23 = vadd.f32 %v4571_v41, %v4533_v3  ;;  %v9522_v42 = vpop.permute.xlu0 %9521  ;;  %v9504_v7 = vunpack.i.h.bf16 %v15724_v50  ;;  %v9503_v35 = vunpack.i.l.bf16 %v15724_v50  ;;  %v9469_v53 = vunpack.i.h.bf16 %v15792_v38  ;;  %v18344_v41 = vld [vmem:[#allocation20_spill] sm:$0xff] }
 0x49c   : > { %v9524_v58 = vunpack.i.h.bf16 %v9522_v42  ;;  %v9523_v49 = vunpack.i.l.bf16 %v9522_v42  ;;  %v9564_v10 = vunpack.i.h.bf16 %v15941_v25  ;;  %v9563_v2 = vunpack.i.l.bf16 %v15941_v25 }
 0x49d   : > { %v4603_v55 = vmax.f32 %v4587_v23, 0.0  ;;  %v9468_v13 = vunpack.i.l.bf16 %v15792_v38  ;;  %v9499_v6 = vunpack.i.h.bf16 %v15899_v44  ;;  %v4509_v0 = vpop.f32.mrf.mxu0  ;;  %v9498_v16 = vunpack.i.l.bf16 %v15899_v44  ;;  %v10294_v23 = vld [vmem:[#allocation2 + $0x127] sm:$0xff] }
 0x49e   : > { %v5625_v3 = vsel %vm307_vm1, %v15341_v19, %v9524_v58  ;;  %v5624_v50 = vsel %vm307_vm1, %v18322_v22, %v9523_v49  ;;  %v4553_v18 = vmul.f32 %v15435_v5, %v4509_v0  ;;  %v4534_v19 = vld [vmem:[%s10405_s10 + $0x70] sm:$0xff]  ;;  %v18345_v22 = vld [vmem:[#allocation11_spill] sm:$0xff]  ;;  %v16034_v52 = vpack.i.bf16 %v16010_v29, %v10292_v48  ;;  %v18347_v58 = vld [vmem:[#allocation10_spill] sm:$0xff] }
 0x49f   : > { %v4619_v14 = vpack.c.bf16 %v4603_v55, %v4603_v55  ;;  %v16022_v25 = vsel %vm512_vm2, %v5624_v50, %v9563_v2  ;;  %v16025_v38 = vsel %vm512_vm2, %v5625_v3, %v9564_v10  ;;  %v18346_v15 = vpack.i.bf16 %v18344_v41, %v18345_v22  ;;  %v18348_v49 = vld [vmem:[#allocation13_spill] sm:$0xff]  ;;  %v16047_v2 = vpop.permute.xlu2 %9591  ;;  %v10295_v55 = vld [vmem:[#allocation2 + $0x11f] sm:$0xff] }
 0x4a0   : > { %v5204_v30 = vsel %vm880_vm8, %v5134_v57, %v9428_v8  ;;  %v5205_v37 = vsel %vm880_vm8, %v5135_v11, %v9429_v20  ;;  %v5617_v32 = vsel %vm307_vm1, %v10293_v9, %v9504_v7  ;;  %v5616_v44 = vsel %vm307_vm1, %v10294_v23, %v9503_v35  ;;  %v5518_v35 = vld [vmem:[#allocation2 + $0x117] sm:$0xff] }
 0x4a1   : > { %9756 = vrot.lane.b32.xlu2 %v15981_v45, %s10343_s17  ;;  %4636 = vst.msk [vmem:[%s15526_s22 + $0x24] sm:$0xf] %vm4626_vm10, %v4619_v14  ;;  %v4572_v42 = vadd.f32 %v15453_v39, %v4553_v18  ;;  %v18349_v10 = vpack.i.bf16 %v18347_v58, %v18348_v49  ;;  %v9519_v8 = vunpack.i.h.bf16 %v15782_v54  ;;  %v9518_v20 = vunpack.i.l.bf16 %v15782_v54  ;;  %v9542_v57 = vpop.permute.xlu1 %9541 }
 0x4a2   : > { %9751 = vrot.lane.b32.xlu1 %v18346_v15, %s10343_s17  ;;  %v5274_v11 = vsel %vm951_vm7, %v5204_v30, %v9468_v13  ;;  %v5275_v7 = vsel %vm951_vm7, %v5205_v37, %v9469_v53  ;;  %v5615_v3 = vsel %vm307_vm1, %v10295_v55, %v9499_v6  ;;  %v9544_v0 = vunpack.i.h.bf16 %v9542_v57  ;;  %v10298_v55 = vld [vmem:[#allocation2 + $0x14f] sm:$0xff] }
 0x4a3   : > { %9746 = vrot.lane.b32.xlu0 %v18349_v10, %s10343_s17  ;;  %v4588_v50 = vadd.f32 %v4572_v42, %v4534_v19  ;;  %v9543_v14 = vunpack.i.l.bf16 %v9542_v57  ;;  %v9537_v18 = vpop.permute.xlu0 %9536  ;;  %v5614_v41 = vsel %vm307_vm1, %v5518_v35, %v9498_v16  ;;  %v9579_v22 = vunpack.i.h.bf16 %v15992_v4  ;;  %v4535_v10 = vld [vmem:[%s10405_s10 + $0x78] sm:$0xff] }
 0x4a4   : > { %v9539_v15 = vunpack.i.h.bf16 %v9537_v18  ;;  %v9538_v48 = vunpack.i.l.bf16 %v9537_v18  ;;  %v9578_v54 = vunpack.i.l.bf16 %v15992_v4  ;;  %v16061_v6 = vsel %vm512_vm2, %v5617_v32, %v9544_v0  ;;  %v18350_v4 = vld [vmem:[#allocation85_spill] sm:$0xff]  ;;  %v10296_v57 = vld [vmem:[#allocation2 + $0x15f] sm:$0xff] }
 0x4a5   : > { %v4604_v13 = vmax.f32 %v4588_v50, 0.0  ;;  %v16058_v53 = vsel %vm512_vm2, %v5616_v44, %v9543_v14  ;;  %v9514_v19 = vunpack.i.h.bf16 %v15947_v33  ;;  %v4511_v37 = vpop.f32.mrf.mxu0  ;;  %v5287_v9 = vpack.c.bf16 %v5275_v7, %v5274_v11  ;;  %v10297_v7 = vld [vmem:[#allocation2 + $0x157] sm:$0xff] }
 0x4a6   : > { %v5711_v30 = vsel %vm512_vm2, %v5615_v3, %v9539_v15  ;;  %v5710_v16 = vsel %vm512_vm2, %v5614_v41, %v9538_v48  ;;  %v4554_v42 = vmul.f32 %v15435_v5, %v4511_v37  ;;  %v18351_v44 = vpack.i.bf16 %v18350_v4, %v18289_v12  ;;  %v10299_v41 = vld [vmem:[#allocation2 + $0x147] sm:$0xff] }
 0x4a7   : > { %v4620_v23 = vpack.c.bf16 %v4604_v13, %v4604_v13  ;;  %v16072_v58 = vsel %vm596_vm3, %v5710_v16, %v9578_v54  ;;  %v16075_v32 = vsel %vm596_vm3, %v5711_v30, %v9579_v22  ;;  %v9513_v49 = vunpack.i.l.bf16 %v15947_v33  ;;  %7464 = vmatmul.msk.bf16.gmra.mxu1 %vm1012_vm9, %v5287_v9  ;;  %v16087_v12 = vpop.permute.xlu2 %9606  ;;  %v18352_v4 = vld [vmem:[#allocation79_spill] sm:$0xff] }
 0x4a8   : > { %v4573_v5 = vadd.f32 %v15453_v39, %v4554_v42  ;;  %v5623_v11 = vsel %vm307_vm1, %v10296_v57, %v9519_v8  ;;  %v5622_v33 = vsel %vm307_vm1, %v10297_v7, %v9518_v20  ;;  %v5621_v3 = vsel %vm307_vm1, %v10298_v55, %v9514_v19  ;;  %v18354_v7 = vld [vmem:[#allocation4_spill] sm:$0xff] }
 0x4a9   : > { %9771 = vrot.lane.b32.xlu2 %v18351_v44, %s10344_s18  ;;  %4637 = vst.msk [vmem:[%s15526_s22 + $0x28] sm:$0xf] %vm4626_vm10, %v4620_v23  ;;  %v9557_v35 = vpop.permute.xlu1 %9556  ;;  %v5620_v22 = vsel %vm307_vm1, %v10299_v41, %v9513_v49  ;;  %v9594_v15 = vunpack.i.h.bf16 %v16047_v2  ;;  %v9593_v8 = vunpack.i.l.bf16 %v16047_v2  ;;  %v9529_v30 = vunpack.i.h.bf16 %v15997_v40  ;;  %v16107_v2 = vld [vmem:[%s17258_s5] ss:$0 sm:$0xff]  ;;  %v16114_v49 = vld [vmem:[#allocation2 + $0x1a1] sm:$0xff] }
 0x4aa   : > { %9766 = vrot.lane.b32.xlu1 %v16034_v52, %s10343_s17  ;;  %v4589_v50 = vadd.f32 %v4573_v5, %v4535_v10  ;;  %v9559_v0 = vunpack.i.h.bf16 %v9557_v35  ;;  %v9558_v14 = vunpack.i.l.bf16 %v9557_v35  ;;  %v18353_v44 = vpack.i.bf16 %v18352_v4, %v18302_v62  ;;  %v18356_v35 = vld [vmem:[#allocation44_spill] sm:$0xff] }
 0x4ab   : > { %9761 = vrot.lane.b32.xlu0 %v16000_v47, %s10343_s17  ;;  %v9552_v18 = vpop.permute.xlu0 %9551  ;;  %v9528_v57 = vunpack.i.l.bf16 %v15997_v40  ;;  %v18357_v55 = vld [vmem:[#allocation60_spill] sm:$0xff]  ;;  %v16137_v40 = vpack.i.bf16 %v16114_v49, %v15738_v21 }
 0x4ac   : > { %v9554_v48 = vunpack.i.h.bf16 %v9552_v18  ;;  %v9553_v54 = vunpack.i.l.bf16 %v9552_v18  ;;  %v4605_v13 = vmax.f32 %v4589_v50, 0.0  ;;  %v16096_v20 = vsel %vm512_vm2, %v5622_v33, %v9558_v14  ;;  %v10301_v14 = vld [vmem:[#allocation2 + $0x17f] sm:$0xff]  ;;  %v10303_v4 = vld [vmem:[#allocation2 + $0x189] sm:$0xff] }
 0x4ad   : > { %v16099_v19 = vsel %vm512_vm2, %v5623_v11, %v9559_v0  ;;  %v4514_v9 = vpop.f32.mrf.mxu0  ;;  %v4536_v11 = vld [vmem:[%s10405_s10 + $0x80] sm:$0xff]  ;;  %v18355_v33 = vpack.i.bf16 %v18303_v27, %v18354_v7  ;;  %v5627_v18 = vsel %vm307_vm1, %v10301_v14, %v9529_v30 }
 0x4ae   : > { %v5717_v16 = vsel %vm512_vm2, %v5621_v3, %v9554_v48  ;;  %v5716_v37 = vsel %vm512_vm2, %v5620_v22, %v9553_v54  ;;  %v4621_v23 = vpack.c.bf16 %v4605_v13, %v4605_v13  ;;  %v4555_v42 = vmul.f32 %v16107_v2, %v4514_v9  ;;  %v10302_v48 = vld [vmem:[#allocation2 + $0x177] sm:$0xff]  ;;  %v16177_v7 = vld [vmem:[%s17259_s6] ss:$0 sm:$0xff] }
 0x4af   : > { %v16117_v10 = vsel %vm596_vm3, %v5716_v37, %v9593_v8  ;;  %v16120_v5 = vsel %vm596_vm3, %v5717_v16, %v9594_v15  ;;  %v18358_v3 = vpack.i.bf16 %v18356_v35, %v18357_v55  ;;  %v9622_v50 = vpop.permute.xlu2 %9621  ;;  %v9609_v54 = vunpack.i.h.bf16 %v16087_v12  ;;  %v18361_v35 = vld [vmem:[#allocation73_spill] sm:$0xff] }
 0x4b0   : > { %4638 = vst.msk [vmem:[%s15526_s22 + $0x2c] sm:$0xf] %vm4626_vm10, %v4621_v23  ;;  %v4574_v62 = vadd.f32 %v15453_v39, %v4555_v42  ;;  %v5626_v39 = vsel %vm307_vm1, %v10302_v48, %v9528_v57  ;;  %v9608_v16 = vunpack.i.l.bf16 %v16087_v12  ;;  %v9623_v48 = vunpack.i.l.bf16 %v9622_v50 }
 0x4b1   : > { %9786 = vrot.lane.b32.xlu2 %v18353_v44, %s10344_s18  ;;  %v9572_v0 = vpop.permute.xlu1 %9571  ;;  %v16154_v44 = vpack.i.bf16 %v15748_v59, %v10303_v4  ;;  %v18359_v59 = vpack.c.bf16 %v15702_v17, %v15699_v1 }
 0x4b2   : > { %9781 = vrot.lane.b32.xlu1 %v18355_v33, %s10344_s18  ;;  %v4590_v27 = vadd.f32 %v4574_v62, %v4536_v11  ;;  %v9574_v41 = vunpack.i.h.bf16 %v9572_v0  ;;  %v9573_v22 = vunpack.i.l.bf16 %v9572_v0  ;;  %v4537_v11 = vld [vmem:[%s10405_s10 + $0x88] sm:$0xff]  ;;  %v18360_v62 = vld [vmem:[#allocation58_spill] sm:$0xff] }
 0x4b3   : > { %9776 = vrot.lane.b32.xlu0 %v18358_v3, %s10344_s18  ;;  %v9567_v15 = vpop.permute.xlu0 %9566  ;;  %v18362_v55 = vpack.i.bf16 %v18360_v62, %v18361_v35 }
 0x4b4   : > { %v9569_v8 = vunpack.i.h.bf16 %v9567_v15  ;;  %v9568_v13 = vunpack.i.l.bf16 %v9567_v15  ;;  %v4606_v37 = vmax.f32 %v4590_v27, 0.0  ;;  %v16145_v21 = vsel %vm596_vm3, %v15919_v26, %v9573_v22  ;;  %v16184_v27 = vld [vmem:[#allocation2 + $0x1b1] sm:$0xff] }
 0x4b5   : > { %v16149_v30 = vsel %vm596_vm3, %v15922_v28, %v9574_v41  ;;  %v4516_v42 = vpop.f32.mrf.mxu0  ;;  %v9624_v41 = vunpack.i.h.bf16 %v9622_v50 }
 0x4b6   : > { %v5723_v9 = vsel %vm512_vm2, %v5627_v18, %v9569_v8  ;;  %v5722_v23 = vsel %vm512_vm2, %v5626_v39, %v9568_v13  ;;  %v4622_v12 = vpack.c.bf16 %v4606_v37, %v4606_v37  ;;  %v4556_v57 = vmul.f32 %v16107_v2, %v4516_v42  ;;  %v16194_v13 = vld [vmem:[#allocation2 + $0x1a9] sm:$0xff] }
 0x4b7   : > { %v16160_v26 = vsel %vm596_vm3, %v5722_v23, %v9608_v16  ;;  %v16163_v28 = vsel %vm596_vm3, %v5723_v9, %v9609_v54  ;;  %7465 = vmatmul.msk.bf16.gmra.mxu1 %vm1012_vm9, %v18359_v59  ;;  %v9637_v3 = vpop.permute.xlu2 %9636  ;;  %v16202_v50 = vpack.i.bf16 %v16184_v27, %v16194_v13 }
 0x4b8   : > { %4639 = vst.msk [vmem:[%s15526_s22 + $0x30] sm:$0xf] %vm4626_vm10, %v4622_v12  ;;  %v4575_v33 = vadd.f32 %v16177_v7, %v4556_v57 }
 0x4b9   : > { %9801 = vrot.lane.b32.xlu2 %v16137_v40, %s10344_s18  ;;  %v9587_v0 = vpop.permute.xlu1 %9586 }
 0x4ba   : > { %9796 = vrot.lane.b32.xlu1 %v16154_v44, %s10344_s18  ;;  %v4591_v14 = vadd.f32 %v4575_v33, %v4537_v11  ;;  %v9589_v1 = vunpack.i.h.bf16 %v9587_v0  ;;  %v9588_v17 = vunpack.i.l.bf16 %v9587_v0  ;;  %v9639_v33 = vunpack.i.h.bf16 %v9637_v3  ;;  %v10306_v0 = vld [vmem:[#allocation2 + $0x1d0] sm:$0xff] }
 0x4bb   : > { %9791 = vrot.lane.b32.xlu0 %v18362_v55, %s10344_s18  ;;  %v9582_v18 = vpop.permute.xlu0 %9581  ;;  %v10305_v55 = vld [vmem:[#allocation2 + $0x1c8] sm:$0xff] }
 0x4bc   : > { %v9584_v22 = vunpack.i.h.bf16 %v9582_v18  ;;  %v9583_v15 = vunpack.i.l.bf16 %v9582_v18  ;;  %v4607_v39 = vmax.f32 %v4591_v14, 0.0  ;;  %v16188_v54 = vsel %vm596_vm3, %v15968_v63, %v9588_v17 }
 0x4bd   : > { %v16192_v8 = vsel %vm596_vm3, %v15971_v56, %v9589_v1  ;;  %v4519_v9 = vpop.f32.mrf.mxu0  ;;  %v9638_v14 = vunpack.i.l.bf16 %v9637_v3  ;;  %v10307_v3 = vld [vmem:[#allocation2 + $0x1c0] sm:$0xff] }
 0x4be   : > { %v5796_v16 = vsel %vm596_vm3, %v16061_v6, %v9584_v22  ;;  %v5795_v37 = vsel %vm596_vm3, %v16058_v53, %v9583_v15  ;;  %v4623_v23 = vpack.c.bf16 %v4607_v39, %v4607_v39  ;;  %v4557_v63 = vmul.f32 %v16107_v2, %v4519_v9  ;;  %v4538_v6 = vld [vmem:[%s10405_s10 + $0x90] sm:$0xff] }
 0x4bf   : > { %v16208_v56 = vsel %vm667_vm4, %v5795_v37, %v9623_v48  ;;  %v16211_v42 = vsel %vm667_vm4, %v5796_v16, %v9624_v41  ;;  %v16233_v41 = vld [vmem:[#allocation2 + $0x1b8] sm:$0xff] }
 0x4c0   : > { %4640 = vst.msk [vmem:[%s15526_s22 + $0x34] sm:$0xf] %vm4626_vm10, %v4623_v23  ;;  %v4576_v53 = vadd.f32 %v16177_v7, %v4557_v63  ;;  %v16221_v4 = vpop.permute.xlu2 %9651  ;;  %v16240_v39 = vpack.i.bf16 %v10307_v3, %v16233_v41 }
 0x4c1   : > { %9816 = vrot.lane.b32.xlu2 %v16000_v47, %s10337_s11  ;;  %v9602_v47 = vpop.permute.xlu1 %9601 }
 0x4c2   : > { %9811 = vrot.lane.b32.xlu1 %v15981_v45, %s10337_s11  ;;  %v4592_v12 = vadd.f32 %v4576_v53, %v4538_v6  ;;  %v9604_v57 = vunpack.i.h.bf16 %v9602_v47  ;;  %v9603_v11 = vunpack.i.l.bf16 %v9602_v47  ;;  %v16223_v45 = vpack.i.bf16 %v10306_v0, %v10305_v55  ;;  %v10313_v55 = vld [vmem:[#allocation2 + $0x1e0] sm:$0xff] }
 0x4c3   : > { %9806 = vrot.lane.b32.xlu0 %v16202_v50, %s10344_s18  ;;  %v9597_v59 = vpop.permute.xlu0 %9596 }
 0x4c4   : > { %v9599_v62 = vunpack.i.h.bf16 %v9597_v59  ;;  %v9598_v35 = vunpack.i.l.bf16 %v9597_v59  ;;  %v4608_v1 = vmax.f32 %v4592_v12, 0.0  ;;  %v16227_v17 = vsel %vm596_vm3, %v16022_v25, %v9603_v11  ;;  %v10310_v11 = vld [vmem:[#allocation2 + $0x1e8] sm:$0xff]  ;;  %v10311_v59 = vld [vmem:[#allocation2 + $0x1f0] sm:$0xff] }
 0x4c5   : > { %v16231_v18 = vsel %vm596_vm3, %v16025_v38, %v9604_v57  ;;  %v4521_v48 = vpop.f32.mrf.mxu0  ;;  %v16273_v57 = vld [vmem:[#allocation2 + $0x200] sm:$0xff] }
 0x4c6   : > { %v5802_v22 = vsel %vm596_vm3, %v16099_v19, %v9599_v62  ;;  %v5801_v15 = vsel %vm596_vm3, %v16096_v20, %v9598_v35  ;;  %v4624_v25 = vpack.c.bf16 %v4608_v1, %v4608_v1  ;;  %v4558_v16 = vmul.f32 %v16107_v2, %v4521_v48  ;;  %v4539_v19 = vld [vmem:[%s10405_s10 + $0x98] sm:$0xff] }
 0x4c7   : > { %v16246_v38 = vsel %vm667_vm4, %v5801_v15, %v9638_v14  ;;  %v16249_v37 = vsel %vm667_vm4, %v5802_v22, %v9639_v33  ;;  %7466 = vmatmul.msk.bf16.gmra.mxu1 %vm1012_vm9, %v5289_v51  ;;  %v10308_v51 = vld [vmem:[#allocation2 + $0x1f8] sm:$0xff]  ;;  %v9840_v33 = vpack.i.bf16 %v10311_v59, %v10310_v11  ;;  %v7046_v14 = vld [vmem:[%s17257_s4 + $0x20] sm:$0xf] }
 0x4c8   : > { %4641 = vst.msk [vmem:[%s15526_s22 + $0x38] sm:$0xf] %vm4626_vm10, %v4624_v25  ;;  %v4577_v20 = vadd.f32 %v16177_v7, %v4558_v16  ;;  %v10312_v35 = vld [vmem:[#allocation2 + $0x1d8] sm:$0xff]  ;;  %v7064_v15 = vunpack.c.l.b16 %v7046_v14 }
 0x4c9   : > { %9831 = vrot.lane.b32.xlu2 %v16223_v45, %s10337_s11  ;;  %v9667_v9 = vpop.permute.xlu2 %9666  ;;  %v9617_v23 = vpop.permute.xlu1 %9616  ;;  %v9835_v0 = vpack.i.bf16 %v10313_v55, %v10312_v35  ;;  %v16319_v35 = vld [vmem:[#allocation2 + $0x1d1] sm:$0xff] }
 0x4ca   : > { %9826 = vrot.lane.b32.xlu1 %v16240_v39, %s10337_s11  ;;  %v4593_v63 = vadd.f32 %v4577_v20, %v4539_v19  ;;  %v9619_v6 = vunpack.i.h.bf16 %v9617_v23  ;;  %v9618_v53 = vunpack.i.l.bf16 %v9617_v23  ;;  %v7069_v23 = vpack.c.b16 %v7064_v15, %v7064_v15 }
 0x4cb   : > { %9821 = vrot.lane.b32.xlu0 %v16034_v52, %s10337_s11  ;;  %v16263_v47 = vpop.permute.xlu0 %9611  ;;  %v9845_v52 = vpack.i.bf16 %v16273_v57, %v10308_v51 }
 0x4cc   : > { %v4609_v12 = vmax.f32 %v4593_v63, 0.0  ;;  %v16267_v60 = vsel %vm667_vm4, %v16072_v58, %v9618_v53  ;;  %v16271_v43 = vsel %vm667_vm4, %v16075_v32, %v9619_v6  ;;  %v6173_v32 = vld [vmem:[%s17257_s4 + $0x20] sm:$0xf]  ;;  %v9669_v63 = vunpack.i.h.bf16 %v9667_v9 }
 0x4cd   : > { %v6191_v22 = vunpack.c.l.b16 %v6173_v32  ;;  %v9668_v6 = vunpack.i.l.bf16 %v9667_v9  ;;  %v7099_v59 = vsel %vm1037_vm0, %v7069_v23, 0 }
 0x4ce   : > { %v4625_v62 = vpack.c.bf16 %v4609_v12, %v4609_v12  ;;  %7104 = vmatpush.bf16.msrb.mxu3 %v7099_v59  ;;  %v18367_v59 = vld [vmem:[#allocation15_spill] sm:$0xff] }
 0x4cf   : > { %v6196_v20 = vpack.c.b16 %v6191_v22, %v6191_v22 }
 0x4d0   : > { %4642 = vst.msk [vmem:[%s15526_s22 + $0x3c] sm:$0xf] %vm4626_vm10, %v4625_v62 }
 0x4d1   : > { %9846 = vrot.lane.b32.xlu2 %v9845_v52, %s10337_s11  ;;  %v9682_v58 = vpop.permute.xlu2 %9681  ;;  %v9632_v1 = vpop.permute.xlu1 %9631  ;;  %v6226_v11 = vsel %vm1037_vm0, %v6196_v20, 0  ;;  %v7547_v20 = vld [vmem:[%s17257_s4 + $0x18] sm:$0xff] }
 0x4d2   : > { %9841 = vrot.lane.b32.xlu1 %v9840_v33, %s10337_s11  ;;  %v9634_v48 = vunpack.i.h.bf16 %v9632_v1  ;;  %v9633_v3 = vunpack.i.l.bf16 %v9632_v1  ;;  %6231 = vmatpush.bf16.msrb.mxu2 %v6226_v11  ;;  %v9683_v32 = vunpack.i.l.bf16 %v9682_v58  ;;  %v16333_v1 = vld [vmem:[#allocation2 + $0x1c9] sm:$0xff] }
 0x4d3   : > { %9836 = vrot.lane.b32.xlu0 %v9835_v0, %s10337_s11  ;;  %v9627_v25 = vpop.permute.xlu0 %9626 }
 0x4d4   : > { %v9629_v16 = vunpack.i.h.bf16 %v9627_v25  ;;  %v9628_v19 = vunpack.i.l.bf16 %v9627_v25  ;;  %v16289_v53 = vsel %vm667_vm4, %v16117_v10, %v9633_v3  ;;  %v16293_v12 = vsel %vm667_vm4, %v16120_v5, %v9634_v48  ;;  %v16357_v48 = vld [vmem:[#allocation2 + $0x1bf] sm:$0xff] }
 0x4d6   : > { %v5867_v51 = vsel %vm667_vm4, %v16188_v54, %v9628_v19  ;;  %v5868_v52 = vsel %vm667_vm4, %v16192_v8, %v9629_v16  ;;  %v18363_v54 = vpack.c.bf16 %v15853_v36, %v15849_v46  ;;  %v16323_v46 = vld [vmem:[#allocation2 + $0x1c1] sm:$0xff]  ;;  %v9684_v36 = vunpack.i.h.bf16 %v9682_v58  ;;  %v16343_v58 = vld [vmem:[#allocation2 + $0x1b9] sm:$0xff]  ;;  %6232 = vmatpush.bf16.msrb.mxu2 %v7547_v20 }
 0x4d7   : > { %v16304_v10 = vsel %vm738_vm5, %v5867_v51, %v9668_v6  ;;  %v16307_v5 = vsel %vm738_vm5, %v5868_v52, %v9669_v63  ;;  %v6395_v19 = vld [vmem:[#allocation2 + $0x1b7] sm:$0xff]  ;;  %v9885_v51 = vpack.i.bf16 %v16194_v13, %v16114_v49  ;;  %v16426_v20 = vld [vmem:[#allocation2 + $0x1c7] sm:$0xff] }
 0x4d8   : > { %7467 = vmatmul.msk.bf16.gmra.mxu1 %vm1012_vm9, %v18363_v54  ;;  %v9890_v6 = vpack.i.bf16 %v16357_v48, %v6395_v19  ;;  %v18364_v52 = vld [vmem:[#allocation30_spill] sm:$0xff] }
 0x4d9   : > { %9861 = vrot.lane.b32.xlu2 %v16202_v50, %s10338_s12  ;;  %v18365_v11 = vpack.c.bf16 %v15754_v34, %v18364_v52  ;;  %v9905_v34 = vpack.i.bf16 %v6395_v19, %v15786_v61 }
 0x4da   : > { %9856 = vrot.lane.b32.xlu1 %v16137_v40, %s10338_s12  ;;  %v16317_v8 = vpop.permute.xlu2 %9696  ;;  %v9647_v50 = vpop.permute.xlu1 %9646  ;;  %v9875_v40 = vpack.i.bf16 %v15799_v31, %v15784_v24  ;;  %v16341_v31 = vpack.i.bf16 %v16319_v35, %v16333_v1 }
 0x4db   : > { %9851 = vrot.lane.b32.xlu0 %v16154_v44, %s10338_s12  ;;  %v9649_v9 = vunpack.i.h.bf16 %v9647_v50  ;;  %v9648_v33 = vunpack.i.l.bf16 %v9647_v50  ;;  %v9642_v62 = vpop.permute.xlu0 %9641 }
 0x4dc   : > { %v9644_v55 = vunpack.i.h.bf16 %v9642_v62  ;;  %v9643_v0 = vunpack.i.l.bf16 %v9642_v62 }
 0x4dd   : > { %v16327_v44 = vsel %vm667_vm4, %v16160_v26, %v9648_v33  ;;  %v16331_v14 = vsel %vm667_vm4, %v16163_v28, %v9649_v9  ;;  %v9865_v26 = vpack.i.bf16 %v16323_v46, %v16343_v58 }
 0x4de   : > { %v5873_v22 = vsel %vm667_vm4, %v16227_v17, %v9643_v0  ;;  %v5874_v24 = vsel %vm667_vm4, %v16231_v18, %v9644_v55  ;;  %v7545_v0 = vld [vmem:[%s17257_s4 + $0x8] sm:$0xff] }
 0x4df   : > { %v16349_v28 = vsel %vm738_vm5, %v5873_v22, %v9683_v32  ;;  %v16352_v15 = vsel %vm738_vm5, %v5874_v24, %v9684_v36 }
 0x4e1   : > { %9876 = vrot.lane.b32.xlu2 %v9875_v40, %s10339_s13 }
 0x4e2   : > { %9871 = vrot.lane.b32.xlu1 %v16341_v31, %s10338_s12 }
 0x4e3   : > { %9866 = vrot.lane.b32.xlu0 %v9865_v26, %s10338_s12  ;;  %v9712_v17 = vpop.permute.xlu2 %9711  ;;  %v9662_v18 = vpop.permute.xlu1 %9661 }
 0x4e4   : > { %v9664_v3 = vunpack.i.h.bf16 %v9662_v18  ;;  %v9663_v25 = vunpack.i.l.bf16 %v9662_v18  ;;  %v16359_v16 = vpop.permute.xlu0 %9656  ;;  %v9714_v40 = vunpack.i.h.bf16 %v9712_v17  ;;  %v9713_v36 = vunpack.i.l.bf16 %v9712_v17 }
 0x4e6   : > { %v16366_v23 = vsel %vm738_vm5, %v16208_v56, %v9663_v25  ;;  %v16370_v63 = vsel %vm738_vm5, %v16211_v42, %v9664_v3  ;;  %v7546_v56 = vld [vmem:[%s17257_s4 + $0x10] sm:$0xff]  ;;  %v18366_v42 = vld [vmem:[#allocation67_spill] sm:$0xff] }
 0x4e7   : > { %v18368_v54 = vpack.i.bf16 %v18366_v42, %v18367_v59  ;;  %6233 = vmatpush.bf16.msrb.mxu2 %v7546_v56  ;;  %v16424_v3 = vld [vmem:[#allocation2 + $0x1cf] sm:$0xff]  ;;  %v9915_v59 = vpack.i.bf16 %v16343_v58, %v16184_v27 }
 0x4e8   : > { %7468 = vmatmul.msk.bf16.gmra.mxu1 %vm1012_vm9, %v18365_v11 }
 0x4e9   : > { %9891 = vrot.lane.b32.xlu2 %v9890_v6, %s10342_s16 }
 0x4ea   : > { %9886 = vrot.lane.b32.xlu1 %v9885_v51, %s10341_s15 }
 0x4eb   : > { %9881 = vrot.lane.b32.xlu0 %v18368_v54, %s10340_s14  ;;  %v9727_v49 = vpop.permute.xlu2 %9726  ;;  %v9677_v13 = vpop.permute.xlu1 %9676  ;;  %6234 = vmatpush.bf16.msrb.mxu2 %v7545_v0  ;;  %v5404_v54 = vld [vmem:[%s10405_s10 + $0xa0] sm:$0xff]  ;;  %v9935_v0 = vpack.i.bf16 %v16426_v20, %v16357_v48 }
 0x4ec   : > { %v9679_v50 = vunpack.i.h.bf16 %v9677_v13  ;;  %v9678_v9 = vunpack.i.l.bf16 %v9677_v13  ;;  %v9672_v33 = vpop.permute.xlu0 %9671  ;;  %v9729_v6 = vunpack.i.h.bf16 %v9727_v49  ;;  %v9728_v51 = vunpack.i.l.bf16 %v9727_v49 }
 0x4ed   : > { %v9674_v62 = vunpack.i.h.bf16 %v9672_v33  ;;  %v9673_v55 = vunpack.i.l.bf16 %v9672_v33  ;;  %v9910_v49 = vpack.i.bf16 %v16233_v41, %v16010_v29 }
 0x4ee   : > { %v16394_v32 = vsel %vm738_vm5, %v16246_v38, %v9678_v9  ;;  %v16398_v22 = vsel %vm738_vm5, %v16249_v37, %v9679_v50  ;;  %v7551_v38 = vld [vmem:[%s17257_s4 + $0x18] sm:$0xff]  ;;  %v7544_v37 = vld [vmem:[%s17257_s4] sm:$0xff] }
 0x4ef   : > { %v5939_v24 = vsel %vm738_vm5, %v16289_v53, %v9673_v55  ;;  %v5940_v61 = vsel %vm738_vm5, %v16293_v12, %v9674_v62  ;;  %7105 = vmatpush.bf16.msrb.mxu3 %v7551_v38  ;;  %6235 = vmatpush.bf16.msrb.mxu2 %v7544_v37  ;;  %v9945_v37 = vpack.i.bf16 %v16333_v1, %v16323_v46 }
 0x4f0   : > { %v16406_v18 = vsel %vm809_vm6, %v5939_v24, %v9713_v36  ;;  %v16409_v17 = vsel %vm809_vm6, %v5940_v61, %v9714_v40  ;;  %v5405_v24 = vld [vmem:[%s10405_s10 + $0xa8] sm:$0xff] }
 0x4f1   : > { %9906 = vrot.lane.b32.xlu2 %v9905_v34, %s10339_s13 }
 0x4f2   : > { %9901 = vrot.lane.b32.xlu1 %v9865_v26, %s10344_s18 }
 0x4f3   : > { %9896 = vrot.lane.b32.xlu0 %v16240_v39, %s10343_s17  ;;  %v16420_v53 = vpop.permute.xlu2 %9741  ;;  %v16422_v12 = vpop.permute.xlu1 %9691  ;;  %v9920_v39 = vpack.i.bf16 %v16424_v3, %v16426_v20 }
 0x4f4   : > { %v9687_v26 = vpop.permute.xlu0 %9686  ;;  %v5364_v52 = vpop.f32.mrf.mxu1 }
 0x4f5   : > { %v9689_v25 = vunpack.i.h.bf16 %v9687_v26  ;;  %v9688_v19 = vunpack.i.l.bf16 %v9687_v26  ;;  %v5420_v42 = vmul.f32 %v16107_v2, %v5364_v52  ;;  %v6399_v26 = vld [vmem:[#allocation2 + $0x1d7] sm:$0xff]  ;;  %v9613_v52 = vunpack.i.l.bf16 %v16263_v47 }
 0x4f7   : > { %v5945_v11 = vsel %vm738_vm5, %v16327_v44, %v9688_v19  ;;  %v5946_v56 = vsel %vm738_vm5, %v16331_v14, %v9689_v25  ;;  %v5436_v44 = vadd.f32 %v16177_v7, %v5420_v42  ;;  %v9614_v25 = vunpack.i.h.bf16 %v16263_v47 }
 0x4f8   : > { %v16442_v13 = vsel %vm809_vm6, %v5945_v11, %v9728_v51  ;;  %v16445_v50 = vsel %vm809_vm6, %v5946_v56, %v9729_v6 }
 0x4f9   : > { %9921 = vrot.lane.b32.xlu2 %v9920_v39, %s10342_s16  ;;  %v5452_v14 = vadd.f32 %v5436_v44, %v5404_v54 }
 0x4fa   : > { %9916 = vrot.lane.b32.xlu1 %v9915_v59, %s10341_s15 }
 0x4fb   : > { %9911 = vrot.lane.b32.xlu0 %v9910_v49, %s10340_s14  ;;  %v9757_v27 = vpop.permute.xlu2 %9756  ;;  %v9707_v58 = vpop.permute.xlu1 %9706  ;;  %v5468_v41 = vmax.f32 %v5452_v14, 0.0  ;;  %v5406_v14 = vld [vmem:[%s10405_s10 + $0xb0] sm:$0xff] }
 0x4fc   : > { %v9709_v9 = vunpack.i.h.bf16 %v9707_v58  ;;  %v9708_v33 = vunpack.i.l.bf16 %v9707_v58  ;;  %v5366_v34 = vpop.f32.mrf.mxu1  ;;  %v9759_v56 = vunpack.i.h.bf16 %v9757_v27  ;;  %v9758_v42 = vunpack.i.l.bf16 %v9757_v27 }
 0x4fd   : > { %v16450_v29 = vpop.permute.xlu0 %9701  ;;  %v5484_v40 = vpack.c.bf16 %v5468_v41, %v5468_v41  ;;  %v5421_v36 = vmul.f32 %v16107_v2, %v5366_v34  ;;  %v9653_v58 = vunpack.i.l.bf16 %v16221_v4  ;;  %v9693_v41 = vunpack.i.l.bf16 %v16422_v12  ;;  %v18369_v34 = vld [vmem:[#allocation77_spill] sm:$0xff] }
 0x4fe   : > { %v16454_v62 = vsel %vm809_vm6, %v16304_v10, %v9708_v33  ;;  %v16458_v55 = vsel %vm809_vm6, %v16307_v5, %v9709_v9  ;;  %v16470_v10 = vld [vmem:[#allocation2 + $0x1df] sm:$0xff]  ;;  %v5862_v9 = vsel %vm667_vm4, %v16149_v30, %v9614_v25  ;;  %v9694_v33 = vunpack.i.h.bf16 %v16422_v12 }
 0x4ff   : > { %5500 = vst.msk [vmem:[%s15526_s22 + $0x40] sm:$0xf] %vm4626_vm10, %v5484_v40  ;;  %v5437_v61 = vadd.f32 %v16177_v7, %v5421_v36  ;;  %v9654_v36 = vunpack.i.h.bf16 %v16221_v4  ;;  %v9965_v12 = vpack.i.bf16 %v6399_v26, %v16424_v3 }
 0x501   : > { %9936 = vrot.lane.b32.xlu2 %v9935_v0, %s10339_s13  ;;  %v5453_v48 = vadd.f32 %v5437_v61, %v5405_v24  ;;  %v5932_v25 = vsel %vm738_vm5, %v5862_v9, %v9654_v36 }
 0x502   : > { %9931 = vrot.lane.b32.xlu1 %v16341_v31, %s10344_s18  ;;  %v9950_v31 = vpack.i.bf16 %v16470_v10, %v6399_v26 }
 0x503   : > { %9926 = vrot.lane.b32.xlu0 %v16223_v45, %s10343_s17  ;;  %v16474_v5 = vpop.permute.xlu2 %9771  ;;  %v5469_v39 = vmax.f32 %v5453_v48, 0.0  ;;  %v6511_v48 = vld [vmem:[#allocation2 + $0x1d9] sm:$0xff] }
 0x504   : > { %v9722_v38 = vpop.permute.xlu1 %9721  ;;  %v5369_v59 = vpop.f32.mrf.mxu1 }
 0x505   : > { %v9724_v19 = vunpack.i.h.bf16 %v9722_v38  ;;  %v9723_v6 = vunpack.i.l.bf16 %v9722_v38  ;;  %v9717_v51 = vpop.permute.xlu0 %9716  ;;  %v5485_v54 = vpack.c.bf16 %v5469_v39, %v5469_v39  ;;  %v5422_v44 = vmul.f32 %v16107_v2, %v5369_v59  ;;  %v5407_v59 = vld [vmem:[%s10405_s10 + $0xb8] sm:$0xff] }
 0x506   : > { %v9719_v45 = vunpack.i.h.bf16 %v9717_v51  ;;  %v9718_v11 = vunpack.i.l.bf16 %v9717_v51  ;;  %v9773_v39 = vunpack.i.l.bf16 %v16474_v5 }
 0x507   : > { %v16483_v46 = vsel %vm809_vm6, %v16349_v28, %v9723_v6  ;;  %v16487_v1 = vsel %vm809_vm6, %v16352_v15, %v9724_v19  ;;  %v5861_v15 = vsel %vm667_vm4, %v16145_v21, %v9613_v52  ;;  %5501 = vst.msk [vmem:[%s15526_s22 + $0x44] sm:$0xf] %vm4626_vm10, %v5485_v54  ;;  %v18370_v21 = vld [vmem:[#allocation3_spill] sm:$0xff]  ;;  %v9774_v52 = vunpack.i.h.bf16 %v16474_v5 }
 0x508   : > { %v6011_v49 = vsel %vm809_vm6, %v16394_v32, %v9718_v11  ;;  %v6012_v47 = vsel %vm809_vm6, %v16398_v22, %v9719_v45  ;;  %v5438_v32 = vadd.f32 %v16177_v7, %v5422_v44  ;;  %v16508_v22 = vld [vmem:[#allocation2 + $0x1e1] sm:$0xff]  ;;  %v18371_v0 = vpack.i.bf16 %v18369_v34, %v18370_v21  ;;  %v7550_v44 = vld [vmem:[%s17257_s4 + $0x10] sm:$0xff] }
 0x509   : > { %9951 = vrot.lane.b32.xlu2 %v9950_v31, %s10342_s16  ;;  %v16497_v28 = vsel %vm880_vm8, %v6011_v49, %v9758_v42  ;;  %v16500_v27 = vsel %vm880_vm8, %v6012_v47, %v9759_v56  ;;  %v5931_v38 = vsel %vm738_vm5, %v5861_v15, %v9653_v58  ;;  %v16524_v30 = vpack.i.bf16 %v16508_v22, %v6511_v48  ;;  %v18373_v15 = vld [vmem:[#allocation31_spill] sm:$0xff] }
 0x50a   : > { %9946 = vrot.lane.b32.xlu1 %v9945_v37, %s10341_s15  ;;  %v5454_v24 = vadd.f32 %v5438_v32, %v5406_v14  ;;  %v6001_v4 = vsel %vm809_vm6, %v5931_v38, %v9693_v41  ;;  %v6002_v31 = vsel %vm809_vm6, %v5932_v25, %v9694_v33  ;;  %v18372_v14 = vld [vmem:[#allocation81_spill] sm:$0xff]  ;;  %7106 = vmatpush.bf16.msrb.mxu3 %v7550_v44  ;;  %v9659_v44 = vunpack.i.h.bf16 %v16359_v16 }
 0x50b   : > { %9941 = vrot.lane.b32.xlu0 %v18371_v0, %s10340_s14  ;;  %v9787_v40 = vpop.permute.xlu2 %9786  ;;  %v18374_v32 = vpack.i.bf16 %v18372_v14, %v18373_v15  ;;  %v16556_v41 = vld [vmem:[#allocation2 + $0x1ef] sm:$0xff]  ;;  %v9975_v25 = vpack.i.bf16 %v6511_v48, %v16319_v35 }
 0x50c   : > { %v16520_v61 = vpop.permute.xlu1 %9736  ;;  %v5470_v19 = vmax.f32 %v5454_v24, 0.0  ;;  %v5371_v45 = vpop.f32.mrf.mxu1  ;;  %v6401_v24 = vld [vmem:[#allocation2 + $0x1e7] sm:$0xff]  ;;  %v9789_v38 = vunpack.i.h.bf16 %v9787_v40 }
 0x50d   : > { %v9732_v37 = vpop.permute.xlu0 %9731  ;;  %v5423_v42 = vmul.f32 %v16107_v2, %v5371_v45  ;;  %v18375_v45 = vld [vmem:[#allocation32_spill] sm:$0xff] }
 0x50e   : > { %v9734_v6 = vunpack.i.h.bf16 %v9732_v37  ;;  %v9733_v51 = vunpack.i.l.bf16 %v9732_v37  ;;  %v5486_v11 = vpack.c.bf16 %v5470_v19, %v5470_v19  ;;  %v9788_v37 = vunpack.i.l.bf16 %v9787_v40  ;;  %v16569_v40 = vld [vmem:[#allocation2 + $0x1f1] sm:$0xff] }
 0x50f   : > { %v5439_v47 = vadd.f32 %v16177_v7, %v5423_v42  ;;  %v9980_v19 = vpack.i.bf16 %v16556_v41, %v6401_v24 }
 0x510   : > { %v6071_v56 = vsel %vm880_vm8, %v6001_v4, %v9733_v51  ;;  %v6072_v26 = vsel %vm880_vm8, %v6002_v31, %v9734_v6  ;;  %5502 = vst.msk [vmem:[%s15526_s22 + $0x48] sm:$0xf] %vm4626_vm10, %v5486_v11  ;;  %v18376_v11 = vpack.i.bf16 %v18373_v15, %v18375_v45  ;;  %v9658_v15 = vunpack.i.l.bf16 %v16359_v16  ;;  %v18378_v45 = vld [vmem:[#allocation33_spill] sm:$0xff] }
 0x511   : > { %9966 = vrot.lane.b32.xlu2 %v9965_v12, %s10339_s13  ;;  %v6141_v54 = vsel %vm951_vm7, %v6071_v56, %v9773_v39  ;;  %v6142_v49 = vsel %vm951_vm7, %v6072_v26, %v9774_v52  ;;  %v5455_v9 = vadd.f32 %v5439_v47, %v5407_v59  ;;  %v16565_v52 = vld [vmem:[#allocation2 + $0x1e9] sm:$0xff]  ;;  %v5408_v39 = vld [vmem:[%s10405_s10 + $0xc0] sm:$0xff]  ;;  %v9995_v26 = vpack.i.bf16 %v6401_v24, %v16470_v10 }
 0x512   : > { %9961 = vrot.lane.b32.xlu1 %v16524_v30, %s10344_s18  ;;  %v6157_v5 = vpack.c.bf16 %v6142_v49, %v6141_v54  ;;  %v10005_v42 = vpack.i.bf16 %v16565_v52, %v16508_v22  ;;  %v9699_v59 = vunpack.i.h.bf16 %v16317_v8  ;;  %v9698_v54 = vunpack.i.l.bf16 %v16317_v8 }
 0x513   : > { %9956 = vrot.lane.b32.xlu0 %v18374_v32, %s10343_s17  ;;  %v16551_v58 = vpop.permute.xlu2 %9801  ;;  %v5471_v21 = vmax.f32 %v5455_v9, 0.0 }
 0x514   : > { %7485 = vmatmul.msk.bf16.vlgmr.msrb.gmra.mxu2 %vm1012_vm9, %v6157_v5  ;;  %v16554_v33 = vpop.permute.xlu1 %9751  ;;  %v5374_v12 = vpop.f32.mrf.mxu1  ;;  %v16596_v5 = vpack.i.bf16 %v16569_v40, %v16565_v52 }
 0x515   : > { %v9747_v34 = vpop.permute.xlu0 %9746  ;;  %v5487_v6 = vpack.c.bf16 %v5471_v21, %v5471_v21  ;;  %v5424_v31 = vmul.f32 %v16107_v2, %v5374_v12  ;;  %v9703_v21 = vunpack.i.l.bf16 %v16450_v29  ;;  %v9803_v12 = vunpack.i.l.bf16 %v16551_v58 }
 0x516   : > { %v9749_v0 = vunpack.i.h.bf16 %v9747_v34  ;;  %v9748_v36 = vunpack.i.l.bf16 %v9747_v34  ;;  %v9704_v34 = vunpack.i.h.bf16 %v16450_v29 }
 0x517   : > { %5503 = vst.msk [vmem:[%s15526_s22 + $0x4c] sm:$0xf] %vm4626_vm10, %v5487_v6  ;;  %v5933_v6 = vsel %vm738_vm5, %v16267_v60, %v9658_v15 }
 0x518   : > { %v6077_v51 = vsel %vm880_vm8, %v16454_v62, %v9748_v36  ;;  %v6078_v4 = vsel %vm880_vm8, %v16458_v55, %v9749_v0  ;;  %v5440_v62 = vadd.f32 %v16177_v7, %v5424_v31  ;;  %v9804_v36 = vunpack.i.h.bf16 %v16551_v58 }
 0x519   : > { %9981 = vrot.lane.b32.xlu2 %v9980_v19, %s10342_s16  ;;  %v16572_v35 = vsel %vm951_vm7, %v6077_v51, %v9788_v37  ;;  %v16575_v48 = vsel %vm951_vm7, %v6078_v4, %v9789_v38  ;;  %v5409_v51 = vld [vmem:[%s10405_s10 + $0xc8] sm:$0xff]  ;;  %v16623_v4 = vld [vmem:[#allocation2 + $0x1ff] sm:$0xff]  ;;  %v9738_v31 = vunpack.i.l.bf16 %v16520_v61  ;;  %v6003_v15 = vsel %vm809_vm6, %v5933_v6, %v9698_v54 }
 0x51a   : > { %9976 = vrot.lane.b32.xlu1 %v9975_v25, %s10341_s15  ;;  %v6160_v55 = vpack.c.bf16 %v16575_v48, %v16572_v35  ;;  %v5456_v49 = vadd.f32 %v5440_v62, %v5408_v39  ;;  %v6006_v39 = vsel %vm809_vm6, %v16370_v63, %v9704_v34  ;;  %v9739_v62 = vunpack.i.h.bf16 %v16520_v61 }
 0x51b   : > { %9971 = vrot.lane.b32.xlu0 %v18376_v11, %s10340_s14  ;;  %v16587_v56 = vpop.permute.xlu2 %9816 }
 0x51c   : > { %v9767_v47 = vpop.permute.xlu1 %9766  ;;  %v5472_v0 = vmax.f32 %v5456_v49, 0.0  ;;  %v5376_v37 = vpop.f32.mrf.mxu1  ;;  %v16649_v49 = vld [vmem:[#allocation2 + $0x1f7] sm:$0xff] }
 0x51d   : > { %v9769_v32 = vunpack.i.h.bf16 %v9767_v47  ;;  %v9768_v9 = vunpack.i.l.bf16 %v9767_v47  ;;  %v9762_v10 = vpop.permute.xlu0 %9761  ;;  %v5425_v19 = vmul.f32 %v16107_v2, %v5376_v37  ;;  %v10010_v61 = vpack.i.bf16 %v16623_v4, %v16649_v49 }
 0x51e   : > { %v9764_v8 = vunpack.i.h.bf16 %v9762_v10  ;;  %v9763_v16 = vunpack.i.l.bf16 %v9762_v10  ;;  %v5488_v25 = vpack.c.bf16 %v5472_v0, %v5472_v0 }
 0x51f   : > { %v16605_v24 = vsel %vm880_vm8, %v16442_v13, %v9768_v9  ;;  %v16609_v38 = vsel %vm880_vm8, %v16445_v50, %v9769_v32  ;;  %v5934_v13 = vsel %vm738_vm5, %v16271_v43, %v9659_v44  ;;  %v5441_v60 = vadd.f32 %v16177_v7, %v5425_v19 }
 0x520   : > { %v6084_v29 = vsel %vm880_vm8, %v16487_v1, %v9764_v8  ;;  %v6083_v50 = vsel %vm880_vm8, %v16483_v46, %v9763_v16  ;;  %v6005_v1 = vsel %vm809_vm6, %v16366_v23, %v9703_v21  ;;  %5504 = vst.msk [vmem:[%s15526_s22 + $0x50] sm:$0xf] %vm4626_vm10, %v5488_v25  ;;  %v9743_v46 = vunpack.i.l.bf16 %v16420_v53  ;;  %v18377_v23 = vld [vmem:[#allocation5_spill] sm:$0xff] }
 0x521   : > { %9996 = vrot.lane.b32.xlu2 %v9995_v26, %s10339_s13  ;;  %v16626_v58 = vsel %vm951_vm7, %v6084_v29, %v9804_v36  ;;  %v16637_v43 = vsel %vm951_vm7, %v6083_v50, %v9803_v12  ;;  %v18379_v11 = vpack.i.bf16 %v18377_v23, %v18378_v45  ;;  %v9744_v44 = vunpack.i.h.bf16 %v16420_v53  ;;  %v5410_v50 = vld [vmem:[%s10405_s10 + $0xd0] sm:$0xff] }
 0x522   : > { %9991 = vrot.lane.b32.xlu1 %v16596_v5, %s10344_s18  ;;  %v6163_v47 = vpack.c.bf16 %v16626_v58, %v16637_v43  ;;  %v5457_v32 = vadd.f32 %v5441_v60, %v5409_v51  ;;  %v6004_v9 = vsel %vm809_vm6, %v5934_v13, %v9699_v59  ;;  %v6075_v0 = vsel %vm880_vm8, %v6005_v1, %v9743_v46  ;;  %v7549_v46 = vld [vmem:[%s17257_s4 + $0x8] sm:$0xff] }
 0x523   : > { %9986 = vrot.lane.b32.xlu0 %v18379_v11, %s10343_s17  ;;  %v16647_v26 = vpop.permute.xlu2 %9831  ;;  %v6073_v8 = vsel %vm880_vm8, %v6003_v15, %v9738_v31  ;;  %v6076_v54 = vsel %vm880_vm8, %v6006_v39, %v9744_v44  ;;  %v6074_v16 = vsel %vm880_vm8, %v6004_v9, %v9739_v62  ;;  %v9753_v1 = vunpack.i.l.bf16 %v16554_v33  ;;  %v16693_v44 = vld [vmem:[#allocation2 + $0x201] sm:$0xff]  ;;  %7107 = vmatpush.bf16.msrb.mxu3 %v7549_v46 }
 0x524   : > { %v9782_v63 = vpop.permute.xlu1 %9781  ;;  %v5473_v36 = vmax.f32 %v5457_v32, 0.0  ;;  %v5379_v12 = vpop.f32.mrf.mxu1  ;;  %v9754_v39 = vunpack.i.h.bf16 %v16554_v33  ;;  %v18380_v62 = vpack.i.bf16 %v18378_v45, %v18372_v14 }
 0x525   : > { %v9784_v10 = vunpack.i.h.bf16 %v9782_v63  ;;  %v9783_v34 = vunpack.i.l.bf16 %v9782_v63  ;;  %v9777_v21 = vpop.permute.xlu0 %9776  ;;  %v5426_v19 = vmul.f32 %v16107_v2, %v5379_v12  ;;  %v6515_v63 = vld [vmem:[#allocation2 + $0x1f9] sm:$0xff]  ;;  %v6079_v33 = vsel %vm880_vm8, %v16406_v18, %v9753_v1 }
 0x526   : > { %v9779_v53 = vunpack.i.h.bf16 %v9777_v21  ;;  %v9778_v37 = vunpack.i.l.bf16 %v9777_v21  ;;  %v5489_v29 = vpack.c.bf16 %v5473_v36, %v5473_v36  ;;  %v6080_v9 = vsel %vm880_vm8, %v16409_v17, %v9754_v39 }
 0x527   : > { %v16663_v25 = vsel %vm951_vm7, %v6075_v0, %v9783_v34  ;;  %v16666_v59 = vsel %vm951_vm7, %v6076_v54, %v9784_v10  ;;  %v5442_v31 = vadd.f32 %v16177_v7, %v5426_v19 }
 0x528   : > { %v6144_v6 = vsel %vm951_vm7, %v6074_v16, %v9779_v53  ;;  %v6159_v13 = vpack.c.bf16 %v16666_v59, %v16663_v25  ;;  %v6143_v51 = vsel %vm951_vm7, %v6073_v8, %v9778_v37  ;;  %5505 = vst.msk [vmem:[%s15526_s22 + $0x54] sm:$0xf] %vm4626_vm10, %v5489_v29  ;;  %v18381_v16 = vld [vmem:[#allocation64_spill] sm:$0xff]  ;;  %v18382_v37 = vld [vmem:[#allocation17_spill] sm:$0xff] }
 0x529   : > { %10011 = vrot.lane.b32.xlu2 %v10010_v61, %s10342_s16  ;;  %v6158_v60 = vpack.c.bf16 %v6144_v6, %v6143_v51  ;;  %v5458_v15 = vadd.f32 %v5442_v31, %v5410_v50  ;;  %v16699_v61 = vpack.i.bf16 %v16693_v44, %v6515_v63  ;;  %v18383_v12 = vpack.i.bf16 %v18381_v16, %v18382_v37  ;;  %v7548_v16 = vld [vmem:[%s17257_s4] sm:$0xff] }
 0x52a   : > { %10006 = vrot.lane.b32.xlu1 %v10005_v42, %s10341_s15  ;;  %7108 = vmatpush.bf16.msrb.mxu3 %v7548_v16 }
 0x52b   : > { %10001 = vrot.lane.b32.xlu0 %v18380_v62, %s10340_s14  ;;  %v16691_v11 = vpop.permute.xlu2 %9846  ;;  %7486 = vmatmul.msk.bf16.gmra.mxu2 %vm1012_vm9, %v6158_v60  ;;  %v5474_v14 = vmax.f32 %v5458_v15, 0.0  ;;  %v10040_v60 = vpack.i.bf16 %v6515_v63, %v16569_v40  ;;  %v10030_v40 = vpack.i.bf16 %v16649_v49, %v16556_v41  ;;  %v16770_v49 = vld [vmem:[#allocation2 + $0x211] sm:$0xff] }
 0x52c   : > { %v9797_v22 = vpop.permute.xlu1 %9796  ;;  %v5381_v0 = vpop.f32.mrf.mxu1 }
 0x52d   : > { %v9799_v52 = vunpack.i.h.bf16 %v9797_v22  ;;  %v9798_v42 = vunpack.i.l.bf16 %v9797_v22  ;;  %v9792_v32 = vpop.permute.xlu0 %9791  ;;  %v5490_v18 = vpack.c.bf16 %v5474_v14, %v5474_v14  ;;  %v5427_v53 = vmul.f32 %v16107_v2, %v5381_v0  ;;  %v6750_v14 = vld [vmem:[#allocation2 + $0x209] sm:$0xff] }
 0x52e   : > { %v9794_v45 = vunpack.i.h.bf16 %v9792_v32  ;;  %v9793_v21 = vunpack.i.l.bf16 %v9792_v32  ;;  %v10055_v25 = vpack.i.bf16 %v16770_v49, %v6750_v14 }
 0x52f   : > { %v16705_v10 = vsel %vm951_vm7, %v16497_v28, %v9798_v42  ;;  %v16709_v34 = vsel %vm951_vm7, %v16500_v27, %v9799_v52  ;;  %v5411_v28 = vld [vmem:[%s10405_s10 + $0xd8] sm:$0xff]  ;;  %5506 = vst.msk [vmem:[%s15526_s22 + $0x58] sm:$0xf] %vm4626_vm10, %v5490_v18  ;;  %v5443_v54 = vadd.f32 %v16177_v7, %v5427_v53  ;;  %v5412_v52 = vld [vmem:[%s10405_s10 + $0xe0] sm:$0xff]  ;;  %v5413_v53 = vld [vmem:[%s10405_s10 + $0xe8] sm:$0xff] }
 0x530   : > { %v6162_v8 = vpack.c.bf16 %v16709_v34, %v16705_v10  ;;  %v16714_v36 = vsel %vm951_vm7, %v6080_v9, %v9794_v45  ;;  %v16718_v17 = vsel %vm951_vm7, %v6079_v33, %v9793_v21  ;;  %v16776_v45 = vld [vmem:[#allocation2 + $0x20f] sm:$0xff]  ;;  %v6597_v18 = vld [vmem:[#allocation2 + $0x207] sm:$0xff] }
 0x531   : > { %10026 = vrot.lane.b32.xlu2 %v16524_v30, %s10338_s12  ;;  %v6161_v27 = vpack.c.bf16 %v16714_v36, %v16718_v17  ;;  %v5459_v19 = vadd.f32 %v5443_v54, %v5411_v28  ;;  %v6680_v21 = vld [vmem:[#allocation2 + $0x208] sm:$0xff]  ;;  %v10045_v28 = vpack.i.bf16 %v16776_v45, %v6597_v18 }
 0x532   : > { %10021 = vrot.lane.b32.xlu1 %v16699_v61, %s10344_s18 }
 0x533   : > { %10016 = vrot.lane.b32.xlu0 %v18383_v12, %s10343_s17  ;;  %v16734_v29 = vpop.permute.xlu2 %9861  ;;  %v5475_v50 = vmax.f32 %v5459_v19, 0.0 }
 0x534   : > { %v16736_v30 = vpop.permute.xlu1 %9811  ;;  %v5384_v31 = vpop.f32.mrf.mxu1 }
 0x535   : > { %v9807_v6 = vpop.permute.xlu0 %9806  ;;  %v5491_v46 = vpack.c.bf16 %v5475_v50, %v5475_v50  ;;  %v5428_v15 = vmul.f32 %v16107_v2, %v5384_v31  ;;  %v16802_v31 = vld [vmem:[%s17258_s5] ss:$0 sm:$0xff] }
 0x536   : > { %v9809_v51 = vunpack.i.h.bf16 %v9807_v6  ;;  %v9808_v1 = vunpack.i.l.bf16 %v9807_v6 }
 0x537   : > { %5507 = vst.msk [vmem:[%s15526_s22 + $0x5c] sm:$0xf] %vm4626_vm10, %v5491_v46  ;;  %v10065_v46 = vpack.i.bf16 %v6597_v18, %v16623_v4  ;;  %v16820_v4 = vld [vmem:[#allocation2 + $0x218] sm:$0xff]  ;;  %v16837_v18 = vld [vmem:[%s17259_s6] ss:$0 sm:$0xff] }
 0x538   : > { %v16741_v39 = vsel %vm951_vm7, %v16605_v24, %v9808_v1  ;;  %v16745_v62 = vsel %vm951_vm7, %v16609_v38, %v9809_v51  ;;  %v5444_v24 = vadd.f32 %v16177_v7, %v5428_v15  ;;  %v18384_v38 = vpack.i.bf16 %v18382_v37, %v18377_v23  ;;  %v16774_v23 = vld [vmem:[#allocation2 + $0x210] sm:$0xff] }
 0x539   : > { %v6164_v22 = vpack.c.bf16 %v16745_v62, %v16741_v39  ;;  %10041 = vrot.lane.b32.xlu2 %v10040_v60, %s10341_s15  ;;  %v10050_v0 = vpack.i.bf16 %v16774_v23, %v6680_v21  ;;  %v10070_v51 = vpack.i.bf16 %v6680_v21, %v16273_v57  ;;  %v5414_v15 = vld [vmem:[%s10405_s10 + $0xf0] sm:$0xff] }
 0x53a   : > { %10036 = vrot.lane.b32.xlu1 %v18384_v38, %s10340_s14  ;;  %v5460_v32 = vadd.f32 %v5444_v24, %v5412_v52  ;;  %v6890_v24 = vld [vmem:[#allocation2 + $0x220] sm:$0xff] }
 0x53b   : > { %10031 = vrot.lane.b32.xlu0 %v10030_v40, %s10339_s13  ;;  %v16762_v42 = vpop.permute.xlu2 %9876  ;;  %7487 = vmatmul.msk.bf16.gmra.mxu2 %vm1012_vm9, %v6159_v13  ;;  %v10085_v21 = vpack.i.bf16 %v6890_v24, %v16820_v4 }
 0x53c   : > { %v16768_v41 = vpop.permute.xlu1 %9826  ;;  %v5476_v33 = vmax.f32 %v5460_v32, 0.0  ;;  %v5386_v9 = vpop.f32.mrf.mxu1  ;;  %v6820_v32 = vld [vmem:[#allocation2 + $0x21f] sm:$0xff] }
 0x53d   : > { %v16772_v63 = vpop.permute.xlu0 %9821  ;;  %v5429_v13 = vmul.f32 %v16107_v2, %v5386_v9 }
 0x53e   : > { %v5492_v59 = vpack.c.bf16 %v5476_v33, %v5476_v33 }
 0x53f   : > { %v5445_v54 = vadd.f32 %v16177_v7, %v5429_v13  ;;  %v9833_v13 = vunpack.i.l.bf16 %v16647_v26 }
 0x540   : > { %5508 = vst.msk [vmem:[%s15526_s22 + $0x60] sm:$0xf] %vm4626_vm10, %v5492_v59  ;;  %v9834_v59 = vunpack.i.h.bf16 %v16647_v26 }
 0x541   : > { %10056 = vrot.lane.b32.xlu2 %v10055_v25, %s10344_s18  ;;  %v5461_v2 = vadd.f32 %v5445_v54, %v5413_v53 }
 0x542   : > { %10051 = vrot.lane.b32.xlu1 %v10050_v0, %s10343_s17  ;;  %v5415_v0 = vld [vmem:[%s10405_s10 + $0xf8] sm:$0xff]  ;;  %v6494_v26 = vsel %vm307_vm1, %v16424_v3, %v9834_v59 }
 0x543   : > { %10046 = vrot.lane.b32.xlu0 %v10045_v28, %s10342_s16  ;;  %v16794_v12 = vpop.permute.xlu2 %9891  ;;  %v5477_v6 = vmax.f32 %v5461_v2, 0.0  ;;  %v6493_v2 = vsel %vm307_vm1, %v16426_v20, %v9833_v13  ;;  %v9878_v13 = vunpack.i.l.bf16 %v16762_v42 }
 0x544   : > { %v16792_v37 = vpop.permute.xlu1 %9841  ;;  %v5389_v50 = vpop.f32.mrf.mxu1 }
 0x545   : > { %v16796_v19 = vpop.permute.xlu0 %9836  ;;  %v5493_v1 = vpack.c.bf16 %v5477_v6, %v5477_v6  ;;  %v5430_v60 = vmul.f32 %v16802_v31, %v5389_v50  ;;  %v9814_v6 = vunpack.i.h.bf16 %v16736_v30 }
 0x547   : > { %5509 = vst.msk [vmem:[%s15526_s22 + $0x64] sm:$0xf] %vm4626_vm10, %v5493_v1  ;;  %v5446_v52 = vadd.f32 %v16177_v7, %v5430_v60  ;;  %v6599_v7 = vld [vmem:[#allocation2 + $0x217] sm:$0xff]  ;;  %v6960_v1 = vld [vmem:[#allocation2 + $0x221] sm:$0xff]  ;;  %v9813_v60 = vunpack.i.l.bf16 %v16736_v30 }
 0x548   : > { %v10080_v35 = vpack.i.bf16 %v6820_v32, %v6599_v7  ;;  %v10100_v50 = vpack.i.bf16 %v6599_v7, %v16776_v45  ;;  %v5416_v7 = vld [vmem:[%s10405_s10 + $0x100] sm:$0xff] }
 0x549   : > { %10071 = vrot.lane.b32.xlu2 %v10070_v51, %s10340_s14  ;;  %v5462_v57 = vadd.f32 %v5446_v52, %v5414_v15  ;;  %v6752_v51 = vld [vmem:[#allocation2 + $0x219] sm:$0xff] }
 0x54a   : > { %10066 = vrot.lane.b32.xlu1 %v10065_v46, %s10339_s13  ;;  %v10090_v30 = vpack.i.bf16 %v6960_v1, %v6752_v51 }
 0x54b   : > { %10061 = vrot.lane.b32.xlu0 %v16596_v5, %s10338_s12  ;;  %7488 = vmatmul.msk.bf16.gmra.mxu2 %vm1012_vm9, %v6160_v55  ;;  %v5478_v33 = vmax.f32 %v5462_v57, 0.0  ;;  %v16822_v9 = vpop.permute.xlu2 %9906  ;;  %v10075_v55 = vpack.i.bf16 %v6750_v14, %v16693_v44 }
 0x54c   : > { %v16818_v40 = vpop.permute.xlu1 %9856  ;;  %v5391_v5 = vpop.f32.mrf.mxu1 }
 0x54d   : > { %v9852_v38 = vpop.permute.xlu0 %9851  ;;  %v5494_v25 = vpack.c.bf16 %v5478_v33, %v5478_v33  ;;  %v5431_v48 = vmul.f32 %v16802_v31, %v5391_v5  ;;  %v6389_v33 = vld [vmem:[#allocation2 + $0x187] sm:$0xff]  ;;  %v6390_v5 = vld [vmem:[#allocation2 + $0x18f] sm:$0xff] }
 0x54e   : > { %v9854_v57 = vunpack.i.h.bf16 %v9852_v38  ;;  %v9853_v24 = vunpack.i.l.bf16 %v9852_v38  ;;  %v6485_v38 = vsel %vm307_vm1, %v6389_v33, %v9813_v60 }
 0x54f   : > { %5510 = vst.msk [vmem:[%s15526_s22 + $0x68] sm:$0xf] %vm4626_vm10, %v5494_v25  ;;  %v5447_v53 = vadd.f32 %v16837_v18, %v5431_v48  ;;  %v6486_v25 = vsel %vm307_vm1, %v6390_v5, %v9814_v6 }
 0x550   : > { %v6581_v48 = vsel %vm512_vm2, %v6485_v38, %v9853_v24  ;;  %v6891_v24 = vld [vmem:[#allocation2 + $0x228] sm:$0xff]  ;;  %v9893_v38 = vunpack.i.l.bf16 %v16794_v12 }
 0x551   : > { %10086 = vrot.lane.b32.xlu2 %v10085_v21, %s10343_s17  ;;  %v5463_v44 = vadd.f32 %v5447_v53, %v5415_v0  ;;  %v6821_v53 = vld [vmem:[#allocation2 + $0x227] sm:$0xff] }
 0x552   : > { %10081 = vrot.lane.b32.xlu1 %v10080_v35, %s10342_s16  ;;  %v6582_v35 = vsel %vm512_vm2, %v6486_v25, %v9854_v57 }
 0x553   : > { %10076 = vrot.lane.b32.xlu0 %v10075_v55, %s10341_s15  ;;  %v5479_v46 = vmax.f32 %v5463_v44, 0.0  ;;  %v16856_v20 = vpop.permute.xlu2 %9921 }
 0x554   : > { %v9872_v28 = vpop.permute.xlu1 %9871 }
 0x555   : > { %v9874_v14 = vunpack.i.h.bf16 %v9872_v28  ;;  %v9873_v54 = vunpack.i.l.bf16 %v9872_v28  ;;  %v16841_v16 = vpop.permute.xlu0 %9866  ;;  %v5394_v3 = vpop.f32.mrf.mxu1  ;;  %v5495_v45 = vpack.c.bf16 %v5479_v46, %v5479_v46  ;;  %v6822_v28 = vld [vmem:[#allocation2 + $0x22f] sm:$0xff] }
 0x556   : > { %v5432_v32 = vmul.f32 %v16802_v31, %v5394_v3  ;;  %v5417_v3 = vld [vmem:[%s10405_s10 + $0x108] sm:$0xff] }
 0x557   : > { %v16851_v15 = vsel %vm512_vm2, %v6493_v2, %v9873_v54  ;;  %v16854_v52 = vsel %vm512_vm2, %v6494_v26, %v9874_v14  ;;  %5511 = vst.msk [vmem:[%s15526_s22 + $0x6c] sm:$0xf] %vm4626_vm10, %v5495_v45  ;;  %v10110_v54 = vpack.i.bf16 %v6752_v51, %v16770_v49  ;;  %v6664_v2 = vsel %vm596_vm3, %v6581_v48, %v9878_v13 }
 0x558   : > { %v5448_v21 = vadd.f32 %v16837_v18, %v5432_v32  ;;  %v10105_v49 = vpack.i.bf16 %v16820_v4, %v16774_v23  ;;  %v6892_v32 = vld [vmem:[#allocation2 + $0x230] sm:$0xff]  ;;  %v9819_v45 = vunpack.i.h.bf16 %v16587_v56  ;;  %v9894_v4 = vunpack.i.h.bf16 %v16794_v12 }
 0x559   : > { %10101 = vrot.lane.b32.xlu2 %v10100_v50, %s10339_s13  ;;  %v6962_v23 = vld [vmem:[#allocation2 + $0x231] sm:$0xff] }
 0x55a   : > { %10096 = vrot.lane.b32.xlu1 %v16699_v61, %s10338_s12  ;;  %v5464_v55 = vadd.f32 %v5448_v21, %v5416_v7  ;;  %v9879_v61 = vunpack.i.h.bf16 %v16762_v42  ;;  %v9818_v7 = vunpack.i.l.bf16 %v16587_v56 }
 0x55b   : > { %10091 = vrot.lane.b32.xlu0 %v10090_v30, %s10344_s18  ;;  %7489 = vmatmul.msk.bf16.gmra.mxu2 %vm1012_vm9, %v6161_v27  ;;  %v10115_v27 = vpack.i.bf16 %v6822_v28, %v6821_v53  ;;  %v16889_v51 = vpop.permute.xlu2 %9936  ;;  %v6961_v30 = vld [vmem:[#allocation2 + $0x229] sm:$0xff]  ;;  %v9859_v53 = vunpack.i.h.bf16 %v16818_v40  ;;  %v9858_v28 = vunpack.i.l.bf16 %v16818_v40 }
 0x55c   : > { %v9887_v59 = vpop.permute.xlu1 %9886  ;;  %v5480_v44 = vmax.f32 %v5464_v55, 0.0  ;;  %v6665_v36 = vsel %vm596_vm3, %v6582_v35, %v9879_v61 }
 0x55d   : > { %v9882_v0 = vpop.permute.xlu0 %9881  ;;  %v5396_v17 = vpop.f32.mrf.mxu1  ;;  %v9889_v50 = vunpack.i.h.bf16 %v9887_v59  ;;  %v9888_v1 = vunpack.i.l.bf16 %v9887_v59  ;;  %v10120_v59 = vpack.i.bf16 %v6892_v32, %v6891_v24 }
 0x55e   : > { %v9884_v14 = vunpack.i.h.bf16 %v9882_v0  ;;  %v9883_v26 = vunpack.i.l.bf16 %v9882_v0  ;;  %v5496_v6 = vpack.c.bf16 %v5480_v44, %v5480_v44  ;;  %v5433_v42 = vmul.f32 %v16802_v31, %v5396_v17  ;;  %v5418_v17 = vld [vmem:[%s10405_s10 + $0x110] sm:$0xff] }
 0x55f   : > { %v10125_v0 = vpack.i.bf16 %v6962_v23, %v6961_v30 }
 0x560   : > { %v6734_v60 = vsel %vm667_vm4, %v6664_v2, %v9883_v26  ;;  %v6735_v46 = vsel %vm667_vm4, %v6665_v36, %v9884_v14  ;;  %5512 = vst.msk [vmem:[%s15526_s22 + $0x70] sm:$0xf] %vm4626_vm10, %v5496_v6  ;;  %v5449_v57 = vadd.f32 %v16837_v18, %v5433_v42  ;;  %v10316_v42 = vld [vmem:[#allocation2 + $0x19f] sm:$0xff] }
 0x561   : > { %10116 = vrot.lane.b32.xlu2 %v10115_v27, %s10342_s16  ;;  %v6804_v33 = vsel %vm738_vm5, %v6734_v60, %v9888_v1  ;;  %v6805_v5 = vsel %vm738_vm5, %v6735_v46, %v9889_v50  ;;  %v6391_v50 = vld [vmem:[#allocation2 + $0x197] sm:$0xff]  ;;  %v6488_v60 = vsel %vm307_vm1, %v10316_v42, %v9819_v45 }
 0x562   : > { %10111 = vrot.lane.b32.xlu1 %v10110_v54, %s10341_s15  ;;  %v5465_v21 = vadd.f32 %v5449_v57, %v5417_v3  ;;  %v6874_v44 = vsel %vm809_vm6, %v6804_v33, %v9893_v38  ;;  %v6875_v14 = vsel %vm809_vm6, %v6805_v5, %v9894_v4  ;;  %v6487_v46 = vsel %vm307_vm1, %v6391_v50, %v9818_v7 }
 0x563   : > { %10106 = vrot.lane.b32.xlu0 %v10105_v49, %s10340_s14  ;;  %v9909_v3 = vunpack.i.h.bf16 %v16822_v9  ;;  %v9908_v49 = vunpack.i.l.bf16 %v16822_v9  ;;  %v6583_v57 = vsel %vm512_vm2, %v6487_v46, %v9858_v28  ;;  %v6584_v24 = vsel %vm512_vm2, %v6488_v60, %v9859_v53  ;;  %v16921_v32 = vpop.permute.xlu2 %9951  ;;  %v10317_v46 = vld [vmem:[#allocation2 + $0x1af] sm:$0xff] }
 0x564   : > { %v9902_v25 = vpop.permute.xlu1 %9901  ;;  %v5481_v56 = vmax.f32 %v5465_v21, 0.0  ;;  %v9923_v53 = vunpack.i.l.bf16 %v16856_v20 }
 0x565   : > { %v9904_v35 = vunpack.i.h.bf16 %v9902_v25  ;;  %v9903_v48 = vunpack.i.l.bf16 %v9902_v25  ;;  %v9897_v55 = vpop.permute.xlu0 %9896  ;;  %v5399_v54 = vpop.f32.mrf.mxu1  ;;  %v6666_v4 = vsel %vm596_vm3, %v6583_v57, %v9908_v49  ;;  %v6667_v33 = vsel %vm596_vm3, %v6584_v24, %v9909_v3  ;;  %v10318_v49 = vld [vmem:[#allocation2 + $0x1a7] sm:$0xff] }
 0x566   : > { %v9899_v61 = vunpack.i.h.bf16 %v9897_v55  ;;  %v9898_v13 = vunpack.i.l.bf16 %v9897_v55  ;;  %v5497_v12 = vpack.c.bf16 %v5481_v56, %v5481_v56  ;;  %v5434_v36 = vmul.f32 %v16802_v31, %v5399_v54 }
 0x567   : > { %v9938_v24 = vunpack.i.l.bf16 %v16889_v51 }
 0x568   : > { %v6944_v26 = vsel %vm880_vm8, %v6874_v44, %v9898_v13  ;;  %v6945_v2 = vsel %vm880_vm8, %v6875_v14, %v9899_v61  ;;  %5513 = vst.msk [vmem:[%s15526_s22 + $0x74] sm:$0xf] %vm4626_vm10, %v5497_v12  ;;  %v5450_v40 = vadd.f32 %v16837_v18, %v5434_v36  ;;  %v9824_v36 = vunpack.i.h.bf16 %v16772_v63 }
 0x569   : > { %v7014_v27 = vsel %vm951_vm7, %v6944_v26, %v9903_v48  ;;  %v7015_v6 = vsel %vm951_vm7, %v6945_v2, %v9904_v35  ;;  %v5419_v48 = vld [vmem:[%s10405_s10 + $0x118] sm:$0xff] }
 0x56a   : > { %10126 = vrot.lane.b32.xlu1 %v10125_v0, %s10344_s18  ;;  %v7030_v1 = vpack.c.bf16 %v7015_v6, %v7014_v27  ;;  %v5466_v30 = vadd.f32 %v5450_v40, %v5418_v17  ;;  %v9924_v0 = vunpack.i.h.bf16 %v16856_v20  ;;  %v9823_v6 = vunpack.i.l.bf16 %v16772_v63 }
 0x56b   : > { %10121 = vrot.lane.b32.xlu0 %v10120_v59, %s10343_s17  ;;  %7490 = vmatmul.msk.bf16.gmra.mxu2 %vm1012_vm9, %v6162_v8  ;;  %v16941_v54 = vpop.permute.xlu2 %9966  ;;  %v6490_v3 = vsel %vm307_vm1, %v10317_v46, %v9824_v36  ;;  %v9939_v63 = vunpack.i.h.bf16 %v16889_v51  ;;  %v9869_v36 = vunpack.i.h.bf16 %v16841_v16 }
 0x56c   : > { %7509 = vmatmul.msk.bf16.vlgmr.msrb.gmra.mxu3 %vm1012_vm9, %v7030_v1  ;;  %v9917_v45 = vpop.permute.xlu1 %9916  ;;  %v5482_v7 = vmax.f32 %v5466_v30, 0.0  ;;  %v6489_v57 = vsel %vm307_vm1, %v10318_v49, %v9823_v6  ;;  %v9968_v6 = vunpack.i.l.bf16 %v16941_v54 }
 0x56d   : > { %v9912_v9 = vpop.permute.xlu0 %9911  ;;  %v5401_v21 = vpop.f32.mrf.mxu1  ;;  %v9919_v38 = vunpack.i.h.bf16 %v9917_v45  ;;  %v9918_v35 = vunpack.i.l.bf16 %v9917_v45  ;;  %v9864_v45 = vunpack.i.h.bf16 %v16734_v29 }
 0x56e   : > { %v9914_v23 = vunpack.i.h.bf16 %v9912_v9  ;;  %v9913_v5 = vunpack.i.l.bf16 %v9912_v9  ;;  %v5498_v25 = vpack.c.bf16 %v5482_v7, %v5482_v7  ;;  %v5435_v10 = vmul.f32 %v16802_v31, %v5401_v21 }
 0x56f   : > { %v9863_v9 = vunpack.i.l.bf16 %v16734_v29 }
 0x570   : > { %v6737_v34 = vsel %vm667_vm4, %v6667_v33, %v9914_v23  ;;  %v6736_v8 = vsel %vm667_vm4, %v6666_v4, %v9913_v5  ;;  %5514 = vst.msk [vmem:[%s15526_s22 + $0x78] sm:$0xf] %vm4626_vm10, %v5498_v25  ;;  %v5451_v55 = vadd.f32 %v16837_v18, %v5435_v10  ;;  %v6586_v5 = vsel %vm512_vm2, %v6490_v3, %v9864_v45 }
 0x571   : > { %v6807_v59 = vsel %vm738_vm5, %v6737_v34, %v9919_v38  ;;  %v6806_v56 = vsel %vm738_vm5, %v6736_v8, %v9918_v35  ;;  %v6585_v33 = vsel %vm512_vm2, %v6489_v57, %v9863_v9  ;;  %v6669_v58 = vsel %vm596_vm3, %v6586_v5, %v9939_v63 }
 0x572   : > { %v5467_v61 = vadd.f32 %v5451_v55, %v5419_v48  ;;  %v6876_v17 = vsel %vm809_vm6, %v6806_v56, %v9923_v53  ;;  %v6877_v27 = vsel %vm809_vm6, %v6807_v59, %v9924_v0  ;;  %v6668_v51 = vsel %vm596_vm3, %v6585_v33, %v9938_v24 }
 0x573   : > { %v9982_v43 = vpop.permute.xlu2 %9981  ;;  %v9954_v34 = vunpack.i.h.bf16 %v16921_v32  ;;  %v9953_v8 = vunpack.i.l.bf16 %v16921_v32  ;;  %v9828_v32 = vunpack.i.l.bf16 %v16768_v41 }
 0x574   : > { %v9932_v13 = vpop.permute.xlu1 %9931  ;;  %v5483_v12 = vmax.f32 %v5467_v61, 0.0  ;;  %v9984_v9 = vunpack.i.h.bf16 %v9982_v43 }
 0x575   : > { %v9934_v28 = vunpack.i.h.bf16 %v9932_v13  ;;  %v9933_v44 = vunpack.i.l.bf16 %v9932_v13  ;;  %v9927_v14 = vpop.permute.xlu0 %9926 }
 0x576   : > { %v9929_v26 = vunpack.i.h.bf16 %v9927_v14  ;;  %v9928_v2 = vunpack.i.l.bf16 %v9927_v14  ;;  %v5499_v50 = vpack.c.bf16 %v5483_v12, %v5483_v12  ;;  %v9829_v12 = vunpack.i.h.bf16 %v16768_v41  ;;  %v10319_v41 = vld [vmem:[#allocation2 + $0x1bf] sm:$0xff] }
 0x578   : > { %v6946_v20 = vsel %vm880_vm8, %v6876_v17, %v9928_v2  ;;  %v6947_v40 = vsel %vm880_vm8, %v6877_v27, %v9929_v26  ;;  %5515 = vst.msk [vmem:[%s15526_s22 + $0x7c] sm:$0xf] %vm4626_vm10, %v5499_v50  ;;  %v9868_v17 = vunpack.i.l.bf16 %v16841_v16  ;;  %v9969_v27 = vunpack.i.h.bf16 %v16941_v54 }
 0x579   : > { %v7016_v1 = vsel %vm951_vm7, %v6946_v20, %v9933_v44  ;;  %v7017_v42 = vsel %vm951_vm7, %v6947_v40, %v9934_v28  ;;  %v6492_v40 = vsel %vm307_vm1, %v10319_v41, %v9829_v12 }
 0x57a   : > { %v7031_v60 = vpack.c.bf16 %v7017_v42, %v7016_v1  ;;  %v10320_v1 = vld [vmem:[#allocation2 + $0x1b7] sm:$0xff]  ;;  %v6588_v46 = vsel %vm512_vm2, %v6492_v40, %v9869_v36 }
 0x57b   : > { %7491 = vmatmul.msk.bf16.gmra.mxu2 %vm1012_vm9, %v6163_v47  ;;  %v9997_v26 = vpop.permute.xlu2 %9996  ;;  %v6491_v42 = vsel %vm307_vm1, %v10320_v1, %v9828_v32  ;;  %v6671_v62 = vsel %vm596_vm3, %v6588_v46, %v9969_v27 }
 0x57c   : > { %7510 = vmatmul.msk.bf16.gmra.mxu3 %vm1012_vm9, %v7031_v60  ;;  %v9947_v30 = vpop.permute.xlu1 %9946  ;;  %v6587_v54 = vsel %vm512_vm2, %v6491_v42, %v9868_v17 }
 0x57d   : > { %v9942_v7 = vpop.permute.xlu0 %9941  ;;  %v9949_v47 = vunpack.i.h.bf16 %v9947_v30  ;;  %v9948_v21 = vunpack.i.l.bf16 %v9947_v30  ;;  %v6670_v39 = vsel %vm596_vm3, %v6587_v54, %v9968_v6  ;;  %v6278_v6 = vld [vmem:[%s10405_s10 + $0x128] sm:$0xff] }
 0x57e   : > { %v9944_v23 = vunpack.i.h.bf16 %v9942_v7  ;;  %v9943_v4 = vunpack.i.l.bf16 %v9942_v7  ;;  %v9983_v7 = vunpack.i.l.bf16 %v9982_v43 }
 0x580   : > { %v6738_v25 = vsel %vm667_vm4, %v6668_v51, %v9943_v4  ;;  %v6739_v38 = vsel %vm667_vm4, %v6669_v58, %v9944_v23 }
 0x581   : > { %v6808_v29 = vsel %vm738_vm5, %v6738_v25, %v9948_v21  ;;  %v6809_v35 = vsel %vm738_vm5, %v6739_v38, %v9949_v47 }
 0x582   : > { %v6878_v13 = vsel %vm809_vm6, %v6808_v29, %v9953_v8  ;;  %v6879_v0 = vsel %vm809_vm6, %v6809_v35, %v9954_v34  ;;  %v6277_v35 = vld [vmem:[%s10405_s10 + $0x120] sm:$0xff] }
 0x583   : > { %v10012_v63 = vpop.permute.xlu2 %10011 }
 0x584   : > { %v9962_v10 = vpop.permute.xlu1 %9961  ;;  %v10014_v40 = vunpack.i.h.bf16 %v10012_v63  ;;  %v10013_v1 = vunpack.i.l.bf16 %v10012_v63 }
 0x585   : > { %v9964_v48 = vunpack.i.h.bf16 %v9962_v10  ;;  %v9963_v55 = vunpack.i.l.bf16 %v9962_v10  ;;  %v9957_v59 = vpop.permute.xlu0 %9956 }
 0x586   : > { %v9959_v56 = vunpack.i.h.bf16 %v9957_v59  ;;  %v9958_v61 = vunpack.i.l.bf16 %v9957_v59 }
 0x588   : > { %v6948_v53 = vsel %vm880_vm8, %v6878_v13, %v9958_v61  ;;  %v6949_v28 = vsel %vm880_vm8, %v6879_v0, %v9959_v56 }
 0x589   : > { %v7018_v44 = vsel %vm951_vm7, %v6948_v53, %v9963_v55  ;;  %v7019_v14 = vsel %vm951_vm7, %v6949_v28, %v9964_v48  ;;  %v9999_v48 = vunpack.i.h.bf16 %v9997_v26  ;;  %v9998_v55 = vunpack.i.l.bf16 %v9997_v26 }
 0x58a   : > { %v7032_v2 = vpack.c.bf16 %v7019_v14, %v7018_v44 }
 0x58b   : > { %7492 = vmatmul.msk.bf16.gmra.mxu2 %vm1012_vm9, %v6164_v22  ;;  %v10027_v13 = vpop.permute.xlu2 %10026  ;;  %v6672_v44 = vsel %vm596_vm3, %v16851_v15, %v9998_v55  ;;  %v6673_v14 = vsel %vm596_vm3, %v16854_v52, %v9999_v48  ;;  %v6279_v55 = vld [vmem:[%s10405_s10 + $0x130] sm:$0xff] }
 0x58c   : > { %7511 = vmatmul.msk.bf16.gmra.mxu3 %vm1012_vm9, %v7032_v2  ;;  %v9977_v50 = vpop.permute.xlu1 %9976 }
 0x58d   : > { %v9972_v20 = vpop.permute.xlu0 %9971  ;;  %v9979_v22 = vunpack.i.h.bf16 %v9977_v50  ;;  %v9978_v3 = vunpack.i.l.bf16 %v9977_v50 }
 0x58e   : > { %v9974_v16 = vunpack.i.h.bf16 %v9972_v20  ;;  %v9973_v60 = vunpack.i.l.bf16 %v9972_v20 }
 0x590   : > { %v6740_v49 = vsel %vm667_vm4, %v6670_v39, %v9973_v60  ;;  %v6741_v57 = vsel %vm667_vm4, %v6671_v62, %v9974_v16 }
 0x591   : > { %v6810_v24 = vsel %vm738_vm5, %v6740_v49, %v9978_v3  ;;  %v6811_v30 = vsel %vm738_vm5, %v6741_v57, %v9979_v22 }
 0x592   : > { %v6880_v58 = vsel %vm809_vm6, %v6810_v24, %v9983_v7  ;;  %v6881_v47 = vsel %vm809_vm6, %v6811_v30, %v9984_v9  ;;  %v9839_v7 = vunpack.i.h.bf16 %v16796_v19 }
 0x593   : > { %v10042_v3 = vpop.permute.xlu2 %10041 }
 0x594   : > { %v9992_v45 = vpop.permute.xlu1 %9991 }
 0x595   : > { %v9994_v23 = vunpack.i.h.bf16 %v9992_v45  ;;  %v9993_v4 = vunpack.i.l.bf16 %v9992_v45  ;;  %v9987_v33 = vpop.permute.xlu0 %9986  ;;  %v9838_v45 = vunpack.i.l.bf16 %v16796_v19 }
 0x596   : > { %v9989_v5 = vunpack.i.h.bf16 %v9987_v33  ;;  %v9988_v51 = vunpack.i.l.bf16 %v9987_v33 }
 0x597   : > { %v6237_v21 = vpop.f32.mrf.mxu2 }
 0x598   : > { %v6950_v25 = vsel %vm880_vm8, %v6880_v58, %v9988_v51  ;;  %v6951_v38 = vsel %vm880_vm8, %v6881_v47, %v9989_v5  ;;  %v6293_v29 = vmul.f32 %v16802_v31, %v6237_v21  ;;  %v10321_v51 = vld [vmem:[#allocation2 + $0x1d7] sm:$0xff] }
 0x599   : > { %v7020_v10 = vsel %vm951_vm7, %v6950_v25, %v9993_v4  ;;  %v7021_v43 = vsel %vm951_vm7, %v6951_v38, %v9994_v23  ;;  %v10028_v23 = vunpack.i.l.bf16 %v10027_v13  ;;  %v10029_v4 = vunpack.i.h.bf16 %v10027_v13  ;;  %v10322_v25 = vld [vmem:[#allocation2 + $0x1df] sm:$0xff] }
 0x59a   : > { %v6309_v34 = vadd.f32 %v16837_v18, %v6293_v29  ;;  %v7033_v8 = vpack.c.bf16 %v7021_v43, %v7020_v10  ;;  %v6495_v58 = vsel %vm307_vm1, %v10321_v51, %v9838_v45  ;;  %v6496_v38 = vsel %vm307_vm1, %v10322_v25, %v9839_v7  ;;  %v6281_v25 = vld [vmem:[%s10405_s10 + $0x140] sm:$0xff] }
 0x59b   : > { %v6591_v29 = vsel %vm512_vm2, %v6495_v58, %v10028_v23  ;;  %v6592_v19 = vsel %vm512_vm2, %v6496_v38, %v10029_v4  ;;  %v10324_v23 = vld [vmem:[#allocation2 + $0x1e7] sm:$0xff] }
 0x59c   : > { %v6325_v59 = vadd.f32 %v6309_v34, %v6277_v35  ;;  %7512 = vmatmul.msk.bf16.gmra.mxu3 %vm1012_vm9, %v7033_v8  ;;  %v10007_v56 = vpop.permute.xlu1 %10006 }
 0x59d   : > { %v10002_v61 = vpop.permute.xlu0 %10001  ;;  %v10009_v26 = vunpack.i.h.bf16 %v10007_v56  ;;  %v10008_v2 = vunpack.i.l.bf16 %v10007_v56 }
 0x59e   : > { %v6341_v0 = vmax.f32 %v6325_v59, 0.0  ;;  %v10004_v53 = vunpack.i.h.bf16 %v10002_v61  ;;  %v10003_v28 = vunpack.i.l.bf16 %v10002_v61  ;;  %v10057_v59 = vpop.permute.xlu2 %10056 }
 0x59f   : > { %v6239_v12 = vpop.f32.mrf.mxu2 }
 0x5a0   : > { %v6357_v32 = vpack.c.bf16 %v6341_v0, %v6341_v0  ;;  %v6294_v36 = vmul.f32 %v16802_v31, %v6239_v12  ;;  %v6743_v17 = vsel %vm667_vm4, %v6673_v14, %v10004_v53  ;;  %v6742_v27 = vsel %vm667_vm4, %v6672_v44, %v10003_v28 }
 0x5a1   : > { %v6813_v15 = vsel %vm738_vm5, %v6743_v17, %v10009_v26  ;;  %v6812_v20 = vsel %vm738_vm5, %v6742_v27, %v10008_v2  ;;  %v10044_v28 = vunpack.i.h.bf16 %v10042_v3  ;;  %v10043_v44 = vunpack.i.l.bf16 %v10042_v3 }
 0x5a2   : > { %6373 = vst.msk [vmem:[%s15526_s22 + $0x80] sm:$0xf] %vm4626_vm10, %v6357_v32  ;;  %v6310_v50 = vadd.f32 %v16837_v18, %v6294_v36  ;;  %v6882_v62 = vsel %vm809_vm6, %v6812_v20, %v10013_v1  ;;  %v6883_v22 = vsel %vm809_vm6, %v6813_v15, %v10014_v40  ;;  %v10059_v17 = vunpack.i.h.bf16 %v10057_v59 }
 0x5a3   : > { %v10058_v27 = vunpack.i.l.bf16 %v10057_v59 }
 0x5a4   : > { %v6326_v52 = vadd.f32 %v6310_v50, %v6278_v6  ;;  %v10022_v41 = vpop.permute.xlu1 %10021 }
 0x5a5   : > { %v10024_v42 = vunpack.i.h.bf16 %v10022_v41  ;;  %v10023_v16 = vunpack.i.l.bf16 %v10022_v41  ;;  %v10017_v60 = vpop.permute.xlu0 %10016 }
 0x5a6   : > { %v6342_v46 = vmax.f32 %v6326_v52, 0.0  ;;  %v10019_v54 = vunpack.i.h.bf16 %v10017_v60  ;;  %v10018_v39 = vunpack.i.l.bf16 %v10017_v60  ;;  %v10072_v3 = vpop.permute.xlu2 %10071 }
 0x5a8   : > { %v6358_v49 = vpack.c.bf16 %v6342_v46, %v6342_v46  ;;  %v6952_v57 = vsel %vm880_vm8, %v6882_v62, %v10018_v39  ;;  %v6953_v24 = vsel %vm880_vm8, %v6883_v22, %v10019_v54  ;;  %v9844_v39 = vunpack.i.h.bf16 %v16792_v37 }
 0x5a9   : > { %v7022_v30 = vsel %vm951_vm7, %v6952_v57, %v10023_v16  ;;  %v7023_v63 = vsel %vm951_vm7, %v6953_v24, %v10024_v42  ;;  %v6280_v16 = vld [vmem:[%s10405_s10 + $0x138] sm:$0xff]  ;;  %v9843_v62 = vunpack.i.l.bf16 %v16792_v37 }
 0x5aa   : > { %6374 = vst.msk [vmem:[%s15526_s22 + $0x84] sm:$0xf] %vm4626_vm10, %v6358_v49  ;;  %v7034_v9 = vpack.c.bf16 %v7023_v63, %v7022_v30 }
 0x5ab   : > { %v6497_v4 = vsel %vm307_vm1, %v10324_v23, %v9843_v62 }
 0x5ac   : > { %7513 = vmatmul.msk.bf16.gmra.mxu3 %vm1012_vm9, %v7034_v9  ;;  %v10037_v33 = vpop.permute.xlu1 %10036  ;;  %v10323_v9 = vld [vmem:[#allocation2 + $0x1ef] sm:$0xff] }
 0x5ad   : > { %v10032_v5 = vpop.permute.xlu0 %10031  ;;  %v10039_v10 = vunpack.i.h.bf16 %v10037_v33  ;;  %v10038_v43 = vunpack.i.l.bf16 %v10037_v33  ;;  %v6498_v7 = vsel %vm307_vm1, %v10323_v9, %v9844_v39  ;;  %v10326_v9 = vld [vmem:[#allocation2 + $0x1f7] sm:$0xff] }
 0x5ae   : > { %v10034_v47 = vunpack.i.h.bf16 %v10032_v5  ;;  %v10033_v21 = vunpack.i.l.bf16 %v10032_v5  ;;  %v6242_v35 = vpop.f32.mrf.mxu2 }
 0x5af   : > { %v6295_v34 = vmul.f32 %v16802_v31, %v6242_v35 }
 0x5b0   : > { %v6674_v8 = vsel %vm596_vm3, %v6591_v29, %v10033_v21  ;;  %v6675_v48 = vsel %vm596_vm3, %v6592_v19, %v10034_v47 }
 0x5b1   : > { %v6311_v56 = vadd.f32 %v16837_v18, %v6295_v34  ;;  %v6744_v61 = vsel %vm667_vm4, %v6674_v8, %v10038_v43  ;;  %v6745_v13 = vsel %vm667_vm4, %v6675_v48, %v10039_v10  ;;  %v10074_v43 = vunpack.i.h.bf16 %v10072_v3  ;;  %v10087_v48 = vpop.permute.xlu2 %10086 }
 0x5b2   : > { %v6814_v6 = vsel %vm738_vm5, %v6744_v61, %v10043_v44  ;;  %v6815_v50 = vsel %vm738_vm5, %v6745_v13, %v10044_v28  ;;  %v10073_v34 = vunpack.i.l.bf16 %v10072_v3 }
 0x5b3   : > { %v6327_v0 = vadd.f32 %v6311_v56, %v6279_v55 }
 0x5b4   : > { %v10052_v53 = vpop.permute.xlu1 %10051 }
 0x5b5   : > { %v10054_v14 = vunpack.i.h.bf16 %v10052_v53  ;;  %v10053_v12 = vunpack.i.l.bf16 %v10052_v53  ;;  %v10047_v32 = vpop.permute.xlu0 %10046  ;;  %v6343_v26 = vmax.f32 %v6327_v0, 0.0 }
 0x5b6   : > { %v10049_v2 = vunpack.i.h.bf16 %v10047_v32  ;;  %v10048_v36 = vunpack.i.l.bf16 %v10047_v32  ;;  %v6244_v15 = vpop.f32.mrf.mxu2 }
 0x5b7   : > { %v6359_v20 = vpack.c.bf16 %v6343_v26, %v6343_v26  ;;  %v6296_v40 = vmul.f32 %v16802_v31, %v6244_v15  ;;  %v6282_v26 = vld [vmem:[%s10405_s10 + $0x148] sm:$0xff]  ;;  %v10089_v15 = vunpack.i.h.bf16 %v10087_v48 }
 0x5b8   : > { %v6884_v52 = vsel %vm809_vm6, %v6814_v6, %v10048_v36  ;;  %v6885_v41 = vsel %vm809_vm6, %v6815_v50, %v10049_v2  ;;  %v9849_v50 = vunpack.i.h.bf16 %v16691_v11 }
 0x5b9   : > { %v6954_v1 = vsel %vm880_vm8, %v6884_v52, %v10053_v12  ;;  %v6955_v42 = vsel %vm880_vm8, %v6885_v41, %v10054_v14  ;;  %6375 = vst.msk [vmem:[%s15526_s22 + $0x88] sm:$0xf] %vm4626_vm10, %v6359_v20  ;;  %v6312_v60 = vadd.f32 %v16837_v18, %v6296_v40  ;;  %v10088_v20 = vunpack.i.l.bf16 %v10087_v48  ;;  %v10102_v62 = vpop.permute.xlu2 %10101 }
 0x5ba   : > { %v7024_v46 = vsel %vm951_vm7, %v6954_v1, %v10058_v27  ;;  %v7025_v54 = vsel %vm951_vm7, %v6955_v42, %v10059_v17  ;;  %v9848_v41 = vunpack.i.l.bf16 %v16691_v11 }
 0x5bb   : > { %v7035_v22 = vpack.c.bf16 %v7025_v54, %v7024_v46  ;;  %v6328_v49 = vadd.f32 %v6312_v60, %v6280_v16 }
 0x5bc   : > { %v10067_v57 = vpop.permute.xlu1 %10066 }
 0x5bd   : > { %v10062_v24 = vpop.permute.xlu0 %10061  ;;  %7514 = vmatmul.msk.bf16.gmra.mxu3 %vm1012_vm9, %v7035_v22  ;;  %v6344_v30 = vmax.f32 %v6328_v49, 0.0  ;;  %v10069_v5 = vunpack.i.h.bf16 %v10067_v57  ;;  %v10068_v51 = vunpack.i.l.bf16 %v10067_v57 }
 0x5be   : > { %v10064_v63 = vunpack.i.h.bf16 %v10062_v24  ;;  %v10063_v45 = vunpack.i.l.bf16 %v10062_v24  ;;  %v6247_v33 = vpop.f32.mrf.mxu2  ;;  %v6283_v24 = vld [vmem:[%s10405_s10 + $0x150] sm:$0xff] }
 0x5bf   : > { %v6360_v37 = vpack.c.bf16 %v6344_v30, %v6344_v30  ;;  %v6297_v58 = vmul.f32 %v16802_v31, %v6247_v33 }
 0x5c0   : > { %v6594_v47 = vsel %vm512_vm2, %v6498_v7, %v10064_v63  ;;  %v6593_v21 = vsel %vm512_vm2, %v6497_v4, %v10063_v45  ;;  %v10325_v63 = vld [vmem:[#allocation2 + $0x1ff] sm:$0xff]  ;;  %v6499_v7 = vsel %vm307_vm1, %v10326_v9, %v9848_v41  ;;  %v6287_v9 = vld [vmem:[%s10405_s10 + $0x170] sm:$0xff] }
 0x5c1   : > { %6376 = vst.msk [vmem:[%s15526_s22 + $0x8c] sm:$0xf] %vm4626_vm10, %v6360_v37  ;;  %v6313_v38 = vadd.f32 %v16837_v18, %v6297_v58  ;;  %v6677_v29 = vsel %vm596_vm3, %v6594_v47, %v10069_v5  ;;  %v6676_v35 = vsel %vm596_vm3, %v6593_v21, %v10068_v51  ;;  %v6500_v45 = vsel %vm307_vm1, %v10325_v63, %v9849_v50 }
 0x5c2   : > { %v6746_v61 = vsel %vm667_vm4, %v6676_v35, %v10073_v34  ;;  %v6747_v13 = vsel %vm667_vm4, %v6677_v29, %v10074_v43  ;;  %v10104_v5 = vunpack.i.h.bf16 %v10102_v62  ;;  %v10103_v51 = vunpack.i.l.bf16 %v10102_v62 }
 0x5c3   : > { %v6329_v19 = vadd.f32 %v6313_v38, %v6281_v25 }
 0x5c4   : > { %v10082_v10 = vpop.permute.xlu1 %10081 }
 0x5c5   : > { %v10077_v8 = vpop.permute.xlu0 %10076  ;;  %v6345_v55 = vmax.f32 %v6329_v19, 0.0  ;;  %v10084_v28 = vunpack.i.h.bf16 %v10082_v10  ;;  %v10083_v44 = vunpack.i.l.bf16 %v10082_v10 }
 0x5c6   : > { %v10079_v59 = vunpack.i.h.bf16 %v10077_v8  ;;  %v10078_v56 = vunpack.i.l.bf16 %v10077_v8  ;;  %v6249_v0 = vpop.f32.mrf.mxu2  ;;  %v10117_v8 = vpop.permute.xlu2 %10116 }
 0x5c7   : > { %v6361_v53 = vpack.c.bf16 %v6345_v55, %v6345_v55  ;;  %v6298_v14 = vmul.f32 %v16802_v31, %v6249_v0 }
 0x5c8   : > { %v6816_v12 = vsel %vm738_vm5, %v6746_v61, %v10078_v56  ;;  %v6817_v32 = vsel %vm738_vm5, %v6747_v13, %v10079_v59  ;;  %v6284_v59 = vld [vmem:[%s10405_s10 + $0x158] sm:$0xff]  ;;  %v10119_v61 = vunpack.i.h.bf16 %v10117_v8  ;;  %v10118_v13 = vunpack.i.l.bf16 %v10117_v8 }
 0x5c9   : > { %6377 = vst.msk [vmem:[%s15526_s22 + $0x90] sm:$0xf] %vm4626_vm10, %v6361_v53  ;;  %v6314_v2 = vadd.f32 %v16837_v18, %v6298_v14  ;;  %v6886_v36 = vsel %vm809_vm6, %v6816_v12, %v10083_v44  ;;  %v6887_v17 = vsel %vm809_vm6, %v6817_v32, %v10084_v28 }
 0x5ca   : > { %v6956_v46 = vsel %vm880_vm8, %v6886_v36, %v10088_v20  ;;  %v6957_v54 = vsel %vm880_vm8, %v6887_v17, %v10089_v15 }
 0x5cb   : > { %v6330_v27 = vadd.f32 %v6314_v2, %v6282_v26 }
 0x5cc   : > { %v10097_v6 = vpop.permute.xlu1 %10096 }
 0x5cd   : > { %v10092_v52 = vpop.permute.xlu0 %10091  ;;  %v6346_v40 = vmax.f32 %v6330_v27, 0.0  ;;  %v10099_v16 = vunpack.i.h.bf16 %v10097_v6  ;;  %v10098_v60 = vunpack.i.l.bf16 %v10097_v6 }
 0x5ce   : > { %v10094_v1 = vunpack.i.h.bf16 %v10092_v52  ;;  %v10093_v42 = vunpack.i.l.bf16 %v10092_v52  ;;  %v6252_v39 = vpop.f32.mrf.mxu2 }
 0x5cf   : > { %v6362_v22 = vpack.c.bf16 %v6346_v40, %v6346_v40  ;;  %v6299_v57 = vmul.f32 %v16802_v31, %v6252_v39  ;;  %v6595_v23 = vsel %vm512_vm2, %v6499_v7, %v10098_v60  ;;  %v6596_v4 = vsel %vm512_vm2, %v6500_v45, %v10099_v16  ;;  %v7150_v7 = vld [vmem:[%s10405_s10 + $0x1a0] sm:$0xff] }
 0x5d0   : > { %v7026_v3 = vsel %vm951_vm7, %v6956_v46, %v10093_v42  ;;  %v7027_v49 = vsel %vm951_vm7, %v6957_v54, %v10094_v1  ;;  %v6678_v38 = vsel %vm596_vm3, %v6595_v23, %v10103_v51  ;;  %v6679_v29 = vsel %vm596_vm3, %v6596_v4, %v10104_v5  ;;  %v6285_v1 = vld [vmem:[%s10405_s10 + $0x160] sm:$0xff] }
 0x5d1   : > { %v7036_v11 = vpack.c.bf16 %v7027_v49, %v7026_v3  ;;  %6378 = vst.msk [vmem:[%s15526_s22 + $0x94] sm:$0xf] %vm4626_vm10, %v6362_v22  ;;  %v6315_v30 = vadd.f32 %v16837_v18, %v6299_v57  ;;  %v6286_v22 = vld [vmem:[%s10405_s10 + $0x168] sm:$0xff] }
 0x5d3   : > { %7515 = vmatmul.msk.bf16.gmra.mxu3 %vm1012_vm9, %v7036_v11  ;;  %v6331_v33 = vadd.f32 %v6315_v30, %v6283_v24 }
 0x5d4   : > { %v10112_v37 = vpop.permute.xlu1 %10111 }
 0x5d5   : > { %v10107_v58 = vpop.permute.xlu0 %10106  ;;  %v6347_v47 = vmax.f32 %v6331_v33, 0.0  ;;  %v10114_v10 = vunpack.i.h.bf16 %v10112_v37  ;;  %v10113_v43 = vunpack.i.l.bf16 %v10112_v37 }
 0x5d6   : > { %v10109_v21 = vunpack.i.h.bf16 %v10107_v58  ;;  %v10108_v25 = vunpack.i.l.bf16 %v10107_v58  ;;  %v6254_v35 = vpop.f32.mrf.mxu2 }
 0x5d7   : > { %v6363_v19 = vpack.c.bf16 %v6347_v47, %v6347_v47  ;;  %v6300_v34 = vmul.f32 %v16802_v31, %v6254_v35  ;;  %v6288_v35 = vld [vmem:[%s10405_s10 + $0x178] sm:$0xff] }
 0x5d8   : > { %v6749_v48 = vsel %vm667_vm4, %v6679_v29, %v10109_v21  ;;  %v6748_v55 = vsel %vm667_vm4, %v6678_v38, %v10108_v25  ;;  %v17139_v25 = vld [vmem:[%s17258_s5] ss:$0 sm:$0xff] }
 0x5d9   : > { %6379 = vst.msk [vmem:[%s15526_s22 + $0x98] sm:$0xf] %vm4626_vm10, %v6363_v19  ;;  %v6316_v56 = vadd.f32 %v16837_v18, %v6300_v34  ;;  %v6818_v53 = vsel %vm738_vm5, %v6748_v55, %v10113_v43  ;;  %v6819_v28 = vsel %vm738_vm5, %v6749_v48, %v10114_v10  ;;  %v7151_v19 = vld [vmem:[%s10405_s10 + $0x1a8] sm:$0xff] }
 0x5da   : > { %v6888_v17 = vsel %vm809_vm6, %v6818_v53, %v10118_v13  ;;  %v6889_v27 = vsel %vm809_vm6, %v6819_v28, %v10119_v61  ;;  %v6289_v28 = vld [vmem:[%s10405_s10 + $0x180] sm:$0xff] }
 0x5db   : > { %v6332_v0 = vadd.f32 %v6316_v56, %v6284_v59 }
 0x5dc   : > { %v10127_v44 = vpop.permute.xlu1 %10126 }
 0x5dd   : > { %v10122_v14 = vpop.permute.xlu0 %10121  ;;  %v10129_v12 = vunpack.i.h.bf16 %v10127_v44  ;;  %v10128_v32 = vunpack.i.l.bf16 %v10127_v44  ;;  %v6348_v26 = vmax.f32 %v6332_v0, 0.0  ;;  %v7152_v44 = vld [vmem:[%s10405_s10 + $0x1b0] sm:$0xff] }
 0x5de   : > { %v10124_v2 = vunpack.i.h.bf16 %v10122_v14  ;;  %v10123_v36 = vunpack.i.l.bf16 %v10122_v14  ;;  %v6257_v6 = vpop.f32.mrf.mxu2 }
 0x5df   : > { %v6364_v50 = vpack.c.bf16 %v6348_v26, %v6348_v26  ;;  %v6301_v52 = vmul.f32 %v16802_v31, %v6257_v6 }
 0x5e0   : > { %v6958_v15 = vsel %vm880_vm8, %v6888_v17, %v10123_v36  ;;  %v6959_v20 = vsel %vm880_vm8, %v6889_v27, %v10124_v2 }
 0x5e1   : > { %v7028_v41 = vsel %vm951_vm7, %v6958_v15, %v10128_v32  ;;  %v7029_v40 = vsel %vm951_vm7, %v6959_v20, %v10129_v12  ;;  %6380 = vst.msk [vmem:[%s15526_s22 + $0x9c] sm:$0xf] %vm4626_vm10, %v6364_v50  ;;  %v6317_v16 = vadd.f32 %v16837_v18, %v6301_v52  ;;  %v6290_v52 = vld [vmem:[%s10405_s10 + $0x188] sm:$0xff] }
 0x5e2   : > { %v7037_v42 = vpack.c.bf16 %v7029_v40, %v7028_v41  ;;  %v7153_v41 = vld [vmem:[%s10405_s10 + $0x1b8] sm:$0xff] }
 0x5e3   : > { %v6333_v60 = vadd.f32 %v6317_v16, %v6285_v1 }
 0x5e4   : > { %7516 = vmatmul.msk.bf16.gmra.mxu3 %vm1012_vm9, %v7037_v42 }
 0x5e5   : > { %v6349_v46 = vmax.f32 %v6333_v60, 0.0 }
 0x5e6   : > { %v6259_v54 = vpop.f32.mrf.mxu2 }
 0x5e7   : > { %v6365_v39 = vpack.c.bf16 %v6349_v46, %v6349_v46  ;;  %v6302_v62 = vmul.f32 %v16802_v31, %v6259_v54 }
 0x5e9   : > { %6381 = vst.msk [vmem:[%s15526_s22 + $0xa0] sm:$0xf] %vm4626_vm10, %v6365_v39  ;;  %v6318_v3 = vadd.f32 %v16837_v18, %v6302_v62 }
 0x5eb   : > { %v6334_v49 = vadd.f32 %v6318_v3, %v6286_v22 }
 0x5ed   : > { %v6350_v57 = vmax.f32 %v6334_v49, 0.0 }
 0x5ee   : > { %v6262_v11 = vpop.f32.mrf.mxu2 }
 0x5ef   : > { %v7110_v24 = vpop.f32.mrf.mxu3  ;;  %v6366_v30 = vpack.c.bf16 %v6350_v57, %v6350_v57  ;;  %v6303_v63 = vmul.f32 %v16802_v31, %v6262_v11  ;;  %v6291_v57 = vld [vmem:[%s10405_s10 + $0x190] sm:$0xff]  ;;  %v7154_v11 = vld [vmem:[%s10405_s10 + $0x1c0] sm:$0xff] }
 0x5f0   : > { %v7166_v45 = vmul.f32 %v16802_v31, %v7110_v24 }
 0x5f1   : > { %6382 = vst.msk [vmem:[%s15526_s22 + $0xa4] sm:$0xf] %vm4626_vm10, %v6366_v30  ;;  %v6319_v23 = vadd.f32 %v16837_v18, %v6303_v63 }
 0x5f2   : > { %v7182_v4 = vadd.f32 %v16837_v18, %v7166_v45 }
 0x5f3   : > { %v6335_v33 = vadd.f32 %v6319_v23, %v6287_v9 }
 0x5f4   : > { %v7198_v37 = vadd.f32 %v7182_v4, %v7150_v7 }
 0x5f5   : > { %v6351_v5 = vmax.f32 %v6335_v33, 0.0 }
 0x5f6   : > { %v7214_v51 = vmax.f32 %v7198_v37, 0.0  ;;  %v6264_v58 = vpop.f32.mrf.mxu2 }
 0x5f7   : > { %v7112_v47 = vpop.f32.mrf.mxu3  ;;  %v6367_v21 = vpack.c.bf16 %v6351_v5, %v6351_v5  ;;  %v6304_v38 = vmul.f32 %v17139_v25, %v6264_v58  ;;  %v6292_v58 = vld [vmem:[%s10405_s10 + $0x198] sm:$0xff] }
 0x5f8   : > { %v7230_v31 = vpack.c.bf16 %v7214_v51, %v7214_v51  ;;  %v7167_v29 = vmul.f32 %v17139_v25, %v7112_v47  ;;  %v7155_v47 = vld [vmem:[%s10405_s10 + $0x1c8] sm:$0xff] }
 0x5f9   : > { %6383 = vst.msk [vmem:[%s15526_s22 + $0xa8] sm:$0xf] %vm4626_vm10, %v6367_v21  ;;  %v6320_v10 = vadd.f32 %v16837_v18, %v6304_v38 }
 0x5fa   : > { %v7183_v43 = vadd.f32 %v16837_v18, %v7167_v29  ;;  %7246 = vst.msk [vmem:[%s15526_s22 + $0xc0] sm:$0xf] %vm4626_vm10, %v7230_v31 }
 0x5fb   : > { %v6336_v34 = vadd.f32 %v6320_v10, %v6288_v35 }
 0x5fc   : > { %v7199_v8 = vadd.f32 %v7183_v43, %v7151_v19 }
 0x5fd   : > { %v6352_v48 = vmax.f32 %v6336_v34, 0.0 }
 0x5fe   : > { %v7215_v55 = vmax.f32 %v7199_v8, 0.0  ;;  %v6267_v59 = vpop.f32.mrf.mxu2 }
 0x5ff   : > { %v7115_v56 = vpop.f32.mrf.mxu3  ;;  %v6368_v61 = vpack.c.bf16 %v6352_v48, %v6352_v48  ;;  %v6305_v0 = vmul.f32 %v17139_v25, %v6267_v59  ;;  %v7156_v48 = vld [vmem:[%s10405_s10 + $0x1d0] sm:$0xff] }
 0x600   : > { %v7231_v13 = vpack.c.bf16 %v7215_v55, %v7215_v55  ;;  %v7168_v53 = vmul.f32 %v17139_v25, %v7115_v56 }
 0x601   : > { %6384 = vst.msk [vmem:[%s15526_s22 + $0xac] sm:$0xf] %vm4626_vm10, %v6368_v61  ;;  %v6321_v14 = vadd.f32 %v16837_v18, %v6305_v0 }
 0x602   : > { %v7184_v12 = vadd.f32 %v16837_v18, %v7168_v53  ;;  %7247 = vst.msk [vmem:[%s15526_s22 + $0xc4] sm:$0xf] %vm4626_vm10, %v7231_v13  ;;  %v17170_v18 = vld [vmem:[%s17259_s6] ss:$0 sm:$0xff]  ;;  %v7157_v53 = vld [vmem:[%s10405_s10 + $0x1d8] sm:$0xff] }
 0x603   : > { %v6337_v32 = vadd.f32 %v6321_v14, %v6289_v28 }
 0x604   : > { %v7200_v26 = vadd.f32 %v7184_v12, %v7152_v44 }
 0x605   : > { %v6353_v2 = vmax.f32 %v6337_v32, 0.0 }
 0x606   : > { %v7216_v36 = vmax.f32 %v7200_v26, 0.0  ;;  %v6269_v17 = vpop.f32.mrf.mxu2 }
 0x607   : > { %v7117_v27 = vpop.f32.mrf.mxu3  ;;  %v6369_v6 = vpack.c.bf16 %v6353_v2, %v6353_v2  ;;  %v6306_v15 = vmul.f32 %v17139_v25, %v6269_v17  ;;  %v7158_v2 = vld [vmem:[%s10405_s10 + $0x1e0] sm:$0xff] }
 0x608   : > { %v7232_v50 = vpack.c.bf16 %v7216_v36, %v7216_v36  ;;  %v7169_v20 = vmul.f32 %v17139_v25, %v7117_v27 }
 0x609   : > { %6385 = vst.msk [vmem:[%s15526_s22 + $0xb0] sm:$0xf] %vm4626_vm10, %v6369_v6  ;;  %v6322_v40 = vadd.f32 %v17170_v18, %v6306_v15 }
 0x60a   : > { %v7185_v1 = vadd.f32 %v17170_v18, %v7169_v20  ;;  %7248 = vst.msk [vmem:[%s15526_s22 + $0xc8] sm:$0xf] %vm4626_vm10, %v7232_v50  ;;  %v7159_v20 = vld [vmem:[%s10405_s10 + $0x1e8] sm:$0xff] }
 0x60b   : > { %v6338_v42 = vadd.f32 %v6322_v40, %v6290_v52 }
 0x60c   : > { %v7201_v16 = vadd.f32 %v7185_v1, %v7153_v41 }
 0x60d   : > { %v6354_v60 = vmax.f32 %v6338_v42, 0.0 }
 0x60e   : > { %v7217_v46 = vmax.f32 %v7201_v16, 0.0  ;;  %v6272_v54 = vpop.f32.mrf.mxu2 }
 0x60f   : > { %v7120_v39 = vpop.f32.mrf.mxu3  ;;  %v6370_v62 = vpack.c.bf16 %v6354_v60, %v6354_v60  ;;  %v6307_v3 = vmul.f32 %v17139_v25, %v6272_v54  ;;  %v7160_v60 = vld [vmem:[%s10405_s10 + $0x1f0] sm:$0xff] }
 0x610   : > { %v7233_v22 = vpack.c.bf16 %v7217_v46, %v7217_v46  ;;  %v7170_v49 = vmul.f32 %v17139_v25, %v7120_v39 }
 0x611   : > { %6386 = vst.msk [vmem:[%s15526_s22 + $0xb4] sm:$0xf] %vm4626_vm10, %v6370_v62  ;;  %v6323_v24 = vadd.f32 %v17170_v18, %v6307_v3 }
 0x612   : > { %v7186_v30 = vadd.f32 %v17170_v18, %v7170_v49  ;;  %7249 = vst.msk [vmem:[%s15526_s22 + $0xcc] sm:$0xf] %vm4626_vm10, %v7233_v22  ;;  %v7161_v49 = vld [vmem:[%s10405_s10 + $0x1f8] sm:$0xff] }
 0x613   : > { %v6339_v63 = vadd.f32 %v6323_v24, %v6291_v57 }
 0x614   : > { %v7202_v45 = vadd.f32 %v7186_v30, %v7154_v11 }
 0x615   : > { %v6355_v9 = vmax.f32 %v6339_v63, 0.0 }
 0x616   : > { %v7218_v7 = vmax.f32 %v7202_v45, 0.0  ;;  %v6274_v23 = vpop.f32.mrf.mxu2 }
 0x617   : > { %v7122_v4 = vpop.f32.mrf.mxu3  ;;  %v6371_v33 = vpack.c.bf16 %v6355_v9, %v6355_v9  ;;  %v6308_v5 = vmul.f32 %v17139_v25, %v6274_v23  ;;  %v7162_v9 = vld [vmem:[%s10405_s10 + $0x200] sm:$0xff] }
 0x618   : > { %v7234_v37 = vpack.c.bf16 %v7218_v7, %v7218_v7  ;;  %v7171_v51 = vmul.f32 %v17139_v25, %v7122_v4 }
 0x619   : > { %6387 = vst.msk [vmem:[%s15526_s22 + $0xb8] sm:$0xf] %vm4626_vm10, %v6371_v33  ;;  %v6324_v21 = vadd.f32 %v17170_v18, %v6308_v5 }
 0x61a   : > { %v7187_v31 = vadd.f32 %v17170_v18, %v7171_v51  ;;  %7250 = vst.msk [vmem:[%s15526_s22 + $0xd0] sm:$0xf] %vm4626_vm10, %v7234_v37  ;;  %v7163_v51 = vld [vmem:[%s10405_s10 + $0x208] sm:$0xff] }
 0x61b   : > { %v6340_v38 = vadd.f32 %v6324_v21, %v6292_v58 }
 0x61c   : > { %v7203_v29 = vadd.f32 %v7187_v31, %v7155_v47 }
 0x61d   : > { %v6356_v35 = vmax.f32 %v6340_v38, 0.0 }
 0x61e   : > { %v7219_v19 = vmax.f32 %v7203_v29, 0.0 }
 0x61f   : > { %v7125_v10 = vpop.f32.mrf.mxu3  ;;  %v6372_v43 = vpack.c.bf16 %v6356_v35, %v6356_v35  ;;  %v7164_v35 = vld [vmem:[%s10405_s10 + $0x210] sm:$0xff] }
 0x620   : > { %v7235_v34 = vpack.c.bf16 %v7219_v19, %v7219_v19  ;;  %v7172_v8 = vmul.f32 %v17139_v25, %v7125_v10 }
 0x621   : > { %6388 = vst.msk [vmem:[%s15526_s22 + $0xbc] sm:$0xf] %vm4626_vm10, %v6372_v43 }
 0x622   : > { %v7188_v55 = vadd.f32 %v17170_v18, %v7172_v8  ;;  %7251 = vst.msk [vmem:[%s15526_s22 + $0xd4] sm:$0xf] %vm4626_vm10, %v7235_v34 }
 0x624   : > { %v7204_v59 = vadd.f32 %v7188_v55, %v7156_v48  ;;  %v7165_v55 = vld [vmem:[%s10405_s10 + $0x218] sm:$0xff] }
 0x626   : > { %v7220_v56 = vmax.f32 %v7204_v59, 0.0 }
 0x627   : > { %v7127_v61 = vpop.f32.mrf.mxu3 }
 0x628   : > { %v7236_v13 = vpack.c.bf16 %v7220_v56, %v7220_v56  ;;  %v7173_v0 = vmul.f32 %v17139_v25, %v7127_v61 }
 0x62a   : > { %7252 = vst.msk [vmem:[%s15526_s22 + $0xd8] sm:$0xf] %vm4626_vm10, %v7236_v13  ;;  %v7189_v28 = vadd.f32 %v17170_v18, %v7173_v0 }
 0x62c   : > { %v7205_v44 = vadd.f32 %v7189_v28, %v7157_v53 }
 0x62e   : > { %v7221_v14 = vmax.f32 %v7205_v44, 0.0 }
 0x62f   : > { %v7130_v12 = vpop.f32.mrf.mxu3 }
 0x630   : > { %v7237_v32 = vpack.c.bf16 %v7221_v14, %v7221_v14  ;;  %v7174_v26 = vmul.f32 %v17139_v25, %v7130_v12 }
 0x632   : > { %7253 = vst.msk [vmem:[%s15526_s22 + $0xdc] sm:$0xf] %vm4626_vm10, %v7237_v32  ;;  %v7190_v36 = vadd.f32 %v17170_v18, %v7174_v26 }
 0x634   : > { %v7206_v17 = vadd.f32 %v7190_v36, %v7158_v2 }
 0x636   : > { %v7222_v27 = vmax.f32 %v7206_v17, 0.0 }
 0x637   : > { %v7132_v6 = vpop.f32.mrf.mxu3 }
 0x638   : > { %v7238_v50 = vpack.c.bf16 %v7222_v27, %v7222_v27  ;;  %v7175_v15 = vmul.f32 %v17139_v25, %v7132_v6 }
 0x63a   : > { %7254 = vst.msk [vmem:[%s15526_s22 + $0xe0] sm:$0xf] %vm4626_vm10, %v7238_v50  ;;  %v7191_v52 = vadd.f32 %v17170_v18, %v7175_v15 }
 0x63c   : > { %v7207_v41 = vadd.f32 %v7191_v52, %v7159_v20 }
 0x63e   : > { %v7223_v40 = vmax.f32 %v7207_v41, 0.0 }
 0x640   : > { %v7239_v1 = vpack.c.bf16 %v7223_v40, %v7223_v40  ;;  %v7135_v42 = vpop.f32.mrf.mxu3 }
 0x641   : > { %v7176_v16 = vmul.f32 %v17139_v25, %v7135_v42 }
 0x642   : > { %7255 = vst.msk [vmem:[%s15526_s22 + $0xe4] sm:$0xf] %vm4626_vm10, %v7239_v1 }
 0x643   : > { %v7192_v46 = vadd.f32 %v17170_v18, %v7176_v16 }
 0x645   : > { %v7208_v54 = vadd.f32 %v7192_v46, %v7160_v60 }
 0x647   : > { %v7224_v39 = vmax.f32 %v7208_v54, 0.0 }
 0x648   : > { %v7137_v62 = vpop.f32.mrf.mxu3 }
 0x649   : > { %v7240_v22 = vpack.c.bf16 %v7224_v39, %v7224_v39  ;;  %v7177_v3 = vmul.f32 %v17139_v25, %v7137_v62 }
 0x64b   : > { %7256 = vst.msk [vmem:[%s15526_s22 + $0xe8] sm:$0xf] %vm4626_vm10, %v7240_v22  ;;  %v7193_v57 = vadd.f32 %v17170_v18, %v7177_v3 }
 0x64d   : > { %v7209_v11 = vadd.f32 %v7193_v57, %v7161_v49 }
 0x64f   : > { %v7225_v24 = vmax.f32 %v7209_v11, 0.0 }
 0x651   : > { %v7241_v30 = vpack.c.bf16 %v7225_v24, %v7225_v24 }
 0x653   : > { %7257 = vst.msk [vmem:[%s15526_s22 + $0xec] sm:$0xf] %vm4626_vm10, %v7241_v30 }
 0x656   : > { %v7140_v63 = vpop.f32.mrf.mxu3 }
 0x657   : > { %v7178_v45 = vmul.f32 %v17139_v25, %v7140_v63 }
 0x659   : > { %v7194_v7 = vadd.f32 %v17170_v18, %v7178_v45 }
 0x65b   : > { %v7210_v23 = vadd.f32 %v7194_v7, %v7162_v9 }
 0x65d   : > { %v7226_v4 = vmax.f32 %v7210_v23, 0.0 }
 0x65e   : > { %v7142_v33 = vpop.f32.mrf.mxu3 }
 0x65f   : > { %v7242_v37 = vpack.c.bf16 %v7226_v4, %v7226_v4  ;;  %v7179_v5 = vmul.f32 %v17139_v25, %v7142_v33 }
 0x661   : > { %7258 = vst.msk [vmem:[%s15526_s22 + $0xf0] sm:$0xf] %vm4626_vm10, %v7242_v37  ;;  %v7195_v58 = vadd.f32 %v17170_v18, %v7179_v5 }
 0x663   : > { %v7211_v47 = vadd.f32 %v7195_v58, %v7163_v51 }
 0x665   : > { %v7227_v21 = vmax.f32 %v7211_v47, 0.0 }
 0x667   : > { %v7243_v31 = vpack.c.bf16 %v7227_v21, %v7227_v21  ;;  %v7145_v38 = vpop.f32.mrf.mxu3 }
 0x668   : > { %v7180_v29 = vmul.f32 %v17139_v25, %v7145_v38 }
 0x669   : > { %7259 = vst.msk [vmem:[%s15526_s22 + $0xf4] sm:$0xf] %vm4626_vm10, %v7243_v31 }
 0x66a   : > { %v7196_v19 = vadd.f32 %v17170_v18, %v7180_v29 }
 0x66c   : > { %v7212_v10 = vadd.f32 %v7196_v19, %v7164_v35 }
 0x66e   : > { %v7228_v43 = vmax.f32 %v7212_v10, 0.0 }
 0x66f   : > { %v7147_v34 = vpop.f32.mrf.mxu3 }
 0x670   : > { %v7244_v8 = vpack.c.bf16 %v7228_v43, %v7228_v43  ;;  %v7181_v48 = vmul.f32 %v17139_v25, %v7147_v34 }
 0x672   : > { %7260 = vst.msk [vmem:[%s15526_s22 + $0xf8] sm:$0xf] %vm4626_vm10, %v7244_v8  ;;  %v7197_v59 = vadd.f32 %v17170_v18, %v7181_v48 }
 0x674   : > { %v7213_v56 = vadd.f32 %v7197_v59, %v7165_v55 }
 0x676   : > { %v7229_v61 = vmax.f32 %v7213_v56, 0.0 }
 0x678   : > { %v7245_v13 = vpack.c.bf16 %v7229_v61, %v7229_v61 }
 0x67a   : > { %7261 = vst.msk [vmem:[%s15526_s22 + $0xfc] sm:$0xf] %vm4626_vm10, %v7245_v13 }
 0x67b PF: > { %s18_s27 = sadd.s32 1, %s10335_s27  }
 0x67c   : > { %p15_p4 = scmp.ge.s32.totalorder %s18_s27, 4  }
 0x67e   :  { %17 = sbr.rel (!%p15_p4) target bundleno = 1 (0x1), region = 82 }

</bundles_post_ra>
